<compile_context>
chip_gen: v5e
topology: v5e:2x2
jax: 0.10.0
libtpu: 0.0.40
codegen_flags: <defaults>
</compile_context>

<pallas_src>
import jax
import jax.numpy as jnp
from jax.experimental import pallas as pl
from jax.experimental.pallas import tpu as pltpu


# ----------------------------------------------------------------------------
# Pallas kernels
# ----------------------------------------------------------------------------
def conv_pool_kernel(cols_ref, w_ref, p_ref, o_ref):
    """Fused conv block tile: Conv('same') + bias + LeakyReLU(0.05) + BN(eval) + MaxPool2x2.

    cols_ref: (4, tm, K) bf16 -- im2col rows of the 4 conv-output pixels feeding each
              pooled pixel, packed along the leading dim (single DMA stream).
    w_ref:    (K, Cout) bf16.
    p_ref:    (3, Cout) f32 = [bias; bn_scale; bn_shift].
    o_ref:    (tm, Cout) bf16 pooled output.

    One (4*tm, K) x (K, Cout) MXU matmul, then a max/min + sign(bn_scale) epilogue:
    LeakyReLU and x -> x*s+t are monotone (direction flips when s < 0), so the pooled
    value is g(max_z) when s >= 0 and g(min_z) when s < 0 -- correct for negative gamma.
    """
    tm = o_ref.shape[0]
    cols = cols_ref[...]                                            # (4, tm, K)
    z = jnp.dot(cols.reshape(4 * tm, cols.shape[-1]), w_ref[...],
                preferred_element_type=jnp.float32)                 # (4*tm, Cout) f32
    z0, z1 = z[0 * tm:1 * tm], z[1 * tm:2 * tm]
    z2, z3 = z[2 * tm:3 * tm], z[3 * tm:4 * tm]

    params = p_ref[...]
    bias, scale, shift = params[0:1, :], params[1:2, :], params[2:3, :]

    zmax = jnp.maximum(jnp.maximum(z0, z1), jnp.maximum(z2, z3)) + bias
    zmin = jnp.minimum(jnp.minimum(z0, z1), jnp.minimum(z2, z3)) + bias
    gmax = jnp.maximum(zmax, 0.05 * zmax)                           # LeakyReLU(0.05)
    gmin = jnp.maximum(zmin, 0.05 * zmin)
    pooled = jnp.where(scale >= 0.0, gmax, gmin) * scale + shift    # BN eval + 2x2 max
    o_ref[...] = pooled.astype(o_ref.dtype)


def fc_kernel(x_ref, w1_ref, b1_ref, w2_ref, b2_ref, o_ref):
    """Fused FC head: Linear(1152,256) -> ReLU -> [BatchNorm1d folded into] Linear(256,7)."""
    h = jnp.dot(x_ref[...], w1_ref[...], preferred_element_type=jnp.float32) + b1_ref[...]
    h = jnp.maximum(h, 0.0)
    o_ref[...] = (jnp.dot(h.astype(jnp.bfloat16), w2_ref[...],
                          preferred_element_type=jnp.float32) + b2_ref[...])


# ----------------------------------------------------------------------------
# JAX glue
# ----------------------------------------------------------------------------
def _round_up(x, m):
    return ((x + m - 1) // m) * m


def _bn_fold(gamma, beta, mean, var, eps=1e-5):
    scale = gamma / jnp.sqrt(var + eps)
    shift = beta - mean * scale
    return scale, shift


def _plan_rows(mp, bytes_per_row, *, max_tile=4096, min_tile=256,
               block_budget=4 << 20, split_threshold=1024):
    """Pick a row tile (multiple of 8), K-aware.

    Targets ~`block_budget` bytes of streamed col data per grid step (amortizes the
    ~0.35us/step pipeline overhead without blowing VMEM: double-buffered blocks stay
    well inside v7x's 32 MiB scoped budget).  Forces a 2-way split (so both of a v7x
    chip's TensorCores get work) only when there are enough rows to make it worthwhile.
    """
    m8 = _round_up(max(mp, 8), 8)
    cap = min(max_tile, max(min_tile, (block_budget // max(bytes_per_row, 1)) // 8 * 8))
    steps = -(-m8 // cap)
    if steps == 1 and m8 >= split_threshold:
        steps = 2
    tm = _round_up(-(-m8 // steps), 8)
    m_pad = _round_up(m8, tm)
    return m_pad, tm


def _pooled_im2col(x_nhwc, ksize):
    """'same'-padded stride-1 im2col, pre-split by 2x2 pool offset, packed as one array.

    Returns a (4, N*Ho*Wo, ksize*ksize*Cin) bf16 array; row r=(n,io,jo) of slab d=(di,dj)
    holds the patch of conv-output pixel (2*io+di, 2*jo+dj).
    """
    N, H, W, C = x_nhwc.shape
    pad = ksize // 2
    Ho, Wo = H // 2, W // 2
    xp = jnp.pad(x_nhwc, ((0, 0), (pad, pad), (pad, pad), (0, 0)))
    slabs = []
    for di in range(2):
        for dj in range(2):
            patches = []
            for kh in range(ksize):
                for kw in range(ksize):
                    patches.append(
                        xp[:, di + kh: di + kh + H: 2, dj + kw: dj + kw + W: 2, :])
            cols = jnp.stack(patches, axis=3)                  # (N, Ho, Wo, k*k, C)
            slabs.append(cols.reshape(N * Ho * Wo, ksize * ksize * C))
    return jnp.stack(slabs, axis=0).astype(jnp.bfloat16), (Ho, Wo)


def conv_block(x_nhwc, p, ksize):
    """Conv2d('same') + LeakyReLU(0.05) + BatchNorm2d(eval) + MaxPool2d(2), fully fused."""
    N, H, W, Cin = x_nhwc.shape
    Cout = p["w"].shape[-1]
    K = ksize * ksize * Cin
    Kp = _round_up(K, 8)                     # pad ragged K (conv1: 25 -> 32)

    cols, (Ho, Wo) = _pooled_im2col(x_nhwc, ksize)            # (4, Mp, K) bf16
    Mp = N * Ho * Wo
    m_pad, tm = _plan_rows(Mp, bytes_per_row=4 * Kp * 2)
    cols = jnp.pad(cols, ((0, 0), (0, m_pad - Mp), (0, Kp - K)))

    wm = p["w"].reshape(K, Cout)
    if Kp != K:
        wm = jnp.pad(wm, ((0, Kp - K), (0, 0)))
    wm = wm.astype(jnp.bfloat16)
    scale, shift = _bn_fold(p["gamma"], p["beta"], p["mean"], p["var"])
    packed = jnp.stack([p["b"], scale, shift], axis=0).astype(jnp.float32)   # (3, Cout)

    out = pl.pallas_call(
        conv_pool_kernel,
        out_shape=jax.ShapeDtypeStruct((m_pad, Cout), jnp.bfloat16),
        grid=(m_pad // tm,),
        in_specs=[pl.BlockSpec((4, tm, Kp), lambda i: (0, i, 0)),
                  pl.BlockSpec((Kp, Cout), lambda i: (0, 0)),
                  pl.BlockSpec((3, Cout), lambda i: (0, 0))],
        out_specs=pl.BlockSpec((tm, Cout), lambda i: (i, 0)),
        compiler_params=pltpu.CompilerParams(
            dimension_semantics=("parallel",),
            vmem_limit_bytes=32 * 1024 * 1024),
    )(cols, wm, packed)

    return out[:Mp].reshape(N, Ho, Wo, Cout)


def fc_head(x2d, p):
    N, Din = x2d.shape
    Dh = p["w1"].shape[-1]
    Dout = p["w2"].shape[-1]
    n_pad, tb = _plan_rows(N, bytes_per_row=Din * 2)
    xb = jnp.pad(x2d.astype(jnp.bfloat16), ((0, n_pad - N), (0, 0)))

    # Fold eval-mode BatchNorm1d into the second Linear:
    #   (relu(x@w1+b1)*s + t) @ w2 + b2 == relu(x@w1+b1) @ (s[:,None]*w2) + (t@w2 + b2)
    scale, shift = _bn_fold(p["gamma"], p["beta"], p["mean"], p["var"])
    w2f = (scale[:, None] * p["w2"]).astype(jnp.bfloat16)
    b2f = (shift @ p["w2"] + p["b2"]).astype(jnp.float32).reshape(1, -1)

    out = pl.pallas_call(
        fc_kernel,
        out_shape=jax.ShapeDtypeStruct((n_pad, Dout), jnp.float32),
        grid=(n_pad // tb,),
        in_specs=[pl.BlockSpec((tb, Din), lambda i: (i, 0)),
                  pl.BlockSpec((Din, Dh), lambda i: (0, 0)),
                  pl.BlockSpec((1, Dh), lambda i: (0, 0)),
                  pl.BlockSpec((Dh, Dout), lambda i: (0, 0)),
                  pl.BlockSpec((1, Dout), lambda i: (0, 0))],
        out_specs=pl.BlockSpec((tb, Dout), lambda i: (i, 0)),
        compiler_params=pltpu.CompilerParams(
            dimension_semantics=("parallel",),
            vmem_limit_bytes=32 * 1024 * 1024),
    )(xb, p["w1"].astype(jnp.bfloat16),
      p["b1"].reshape(1, -1).astype(jnp.float32), w2f, b2f)
    return out[:N]


@jax.jit
def net_forward(x_nchw, params):
    # PyTorch input is NCHW; convert to NHWC (channels on the lane axis) once at entry.
    x = jnp.transpose(x_nchw, (0, 2, 3, 1))                       # (N, 48, 48, 1)
    x = conv_block(x, params["conv1"], ksize=5)                   # (N, 24, 24, 32)
    x = conv_block(x, params["conv2"], ksize=3)                   # (N, 12, 12, 64)
    x = conv_block(x, params["conv3"], ksize=3)                   # (N, 6, 6, 128)
    x = conv_block(x, params["conv4"], ksize=3)                   # (N, 3, 3, 128)
    N = x.shape[0]
    # torch's `x.view(-1, 3*3*128)` flattens NCHW as (c, h, w); that permutation is folded
    # into fc.w1 at parameter-build time, so a plain NHWC flatten is correct here.
    x = x.reshape(N, 3 * 3 * 128)
    return fc_head(x, params["fc"])                               # (N, 7), f32


# ----------------------------------------------------------------------------
# Deterministic parameter construction (synthetic init, no checkpoint)
# ----------------------------------------------------------------------------
def _fold_flatten_into_w1(w1_chw_rows):
    """Permute w1's 1152 input rows from torch's (c,h,w) flatten order to NHWC (h,w,c)."""
    w = w1_chw_rows.reshape(128, 3, 3, 256)       # rows ordered (c, h, w)
    w = jnp.transpose(w, (1, 2, 0, 3))            # -> (h, w, c, out)
    return w.reshape(3 * 3 * 128, 256)


def _init_conv(key, ksize, cin, cout):
    k = jax.random.split(key, 6)
    fan_in = ksize * ksize * cin
    return {
        "w": jax.random.normal(k[0], (ksize, ksize, cin, cout), jnp.float32) / jnp.sqrt(fan_in),
        "b": jax.random.normal(k[1], (cout,), jnp.float32) * 0.1,
        "gamma": jax.random.uniform(k[2], (cout,), jnp.float32, 0.5, 1.5),
        "beta": jax.random.normal(k[3], (cout,), jnp.float32) * 0.1,
        "mean": jax.random.normal(k[4], (cout,), jnp.float32) * 0.1,
        "var": jax.random.uniform(k[5], (cout,), jnp.float32, 0.5, 1.5),
    }


def _init_fc(key):
    k = jax.random.split(key, 8)
    d_in, d_h, d_out = 3 * 3 * 128, 256, 7
    # w1 is generated in torch-flatten (c,h,w) input-row order (as a checkpoint would be,
    # after transposing to (in,out)), then permuted once to NHWC row order.
    w1_torch = jax.random.normal(k[0], (d_in, d_h), jnp.float32) / jnp.sqrt(d_in)
    return {
        "w1": _fold_flatten_into_w1(w1_torch),
        "b1": jax.random.normal(k[1], (d_h,), jnp.float32) * 0.1,
        "gamma": jax.random.uniform(k[2], (d_h,), jnp.float32, 0.5, 1.5),
        "beta": jax.random.normal(k[3], (d_h,), jnp.float32) * 0.1,
        "mean": jax.random.normal(k[4], (d_h,), jnp.float32) * 0.1,
        "var": jax.random.uniform(k[5], (d_h,), jnp.float32, 0.5, 1.5),
        "w2": jax.random.normal(k[6], (d_h, d_out), jnp.float32) / jnp.sqrt(d_h),
        "b2": jax.random.normal(k[7], (d_out,), jnp.float32) * 0.1,
    }


def init_params(key):
    k1, k2, k3, k4, k5 = jax.random.split(key, 5)
    return {
        "conv1": _init_conv(k1, 5, 1, 32),
        "conv2": _init_conv(k2, 3, 32, 64),
        "conv3": _init_conv(k3, 3, 64, 128),
        "conv4": _init_conv(k4, 3, 128, 128),
        "fc": _init_fc(k5),
    }


if __name__ == "__main__":
    key = jax.random.PRNGKey(0)
    k_params, k_x = jax.random.split(key)
    params = init_params(k_params)
    # The module implies 48x48 grayscale input (4x MaxPool2d(2) -> 3x3x128 before the FC).
    x = jax.random.normal(k_x, (2, 1, 48, 48), jnp.float32)       # NCHW, like PyTorch

    logits = net_forward(x, params)
    jax.block_until_ready(logits)
    assert logits.shape == (2, 7) and logits.dtype == jnp.float32
    print("KERNEL_OK")
</pallas_src>

<mosaic_0001>
module attributes {stable_mosaic.version = 11 : i64} {
  func.func @conv_pool_kernel(%arg0: i32, %arg1: memref<4x576x32xbf16, #tpu.memory_space<vmem>>, %arg2: memref<32x32xbf16, #tpu.memory_space<vmem>>, %arg3: memref<3x32xf32, #tpu.memory_space<vmem>>, %arg4: memref<576x32xbf16, #tpu.memory_space<vmem>>) attributes {dimension_semantics = [#tpu.dimension_semantics<parallel>], iteration_bounds = array<i64: 2>, scalar_prefetch = 0 : i64, scratch_operands = 0 : i64, tpu.core_type = #tpu.core_type<tc>, window_params = [{transform_indices = @transform_0, window_bounds = array<i64: 4, 576, 32>}, {pipeline_mode = #tpu.pipeline_mode<synchronous>, transform_indices = @transform_1, window_bounds = array<i64: 32, 32>}, {pipeline_mode = #tpu.pipeline_mode<synchronous>, transform_indices = @transform_2, window_bounds = array<i64: 3, 32>}, {transform_indices = @transform_3, window_bounds = array<i64: 576, 32>}]} {
    %c0 = arith.constant 0 : index
    %c0_0 = arith.constant 0 : index
    %c0_1 = arith.constant 0 : index
    %0 = vector.load %arg1[%c0, %c0_0, %c0_1] : memref<4x576x32xbf16, #tpu.memory_space<vmem>>, vector<4x576x32xbf16>
    %1 = vector.shape_cast %0 : vector<4x576x32xbf16> to vector<2304x32xbf16>
    %c0_2 = arith.constant 0 : index
    %c0_3 = arith.constant 0 : index
    %2 = vector.load %arg2[%c0_2, %c0_3] : memref<32x32xbf16, #tpu.memory_space<vmem>>, vector<32x32xbf16>
    %cst = arith.constant dense<0.000000e+00> : vector<2304x32xf32>
    %3 = tpu.matmul %1, %2, %cst {dimension_numbers = #tpu.dot_dimension_numbers<[1], [0], [0], [1], [0, 0, 1, 1], [], []>} : vector<2304x32xbf16>, vector<32x32xbf16>, vector<2304x32xf32> -> vector<2304x32xf32>
    %4 = vector.extract_strided_slice %3 {offsets = [0, 0], sizes = [576, 32], strides = [1, 1]} : vector<2304x32xf32> to vector<576x32xf32>
    %5 = vector.extract_strided_slice %3 {offsets = [576, 0], sizes = [576, 32], strides = [1, 1]} : vector<2304x32xf32> to vector<576x32xf32>
    %6 = vector.extract_strided_slice %3 {offsets = [1152, 0], sizes = [576, 32], strides = [1, 1]} : vector<2304x32xf32> to vector<576x32xf32>
    %7 = vector.extract_strided_slice %3 {offsets = [1728, 0], sizes = [576, 32], strides = [1, 1]} : vector<2304x32xf32> to vector<576x32xf32>
    %c0_4 = arith.constant 0 : index
    %c0_5 = arith.constant 0 : index
    %8 = vector.load %arg3[%c0_4, %c0_5] : memref<3x32xf32, #tpu.memory_space<vmem>>, vector<3x32xf32>
    %9 = vector.extract_strided_slice %8 {offsets = [0, 0], sizes = [1, 32], strides = [1, 1]} : vector<3x32xf32> to vector<1x32xf32>
    %10 = vector.extract_strided_slice %8 {offsets = [1, 0], sizes = [1, 32], strides = [1, 1]} : vector<3x32xf32> to vector<1x32xf32>
    %11 = vector.extract_strided_slice %8 {offsets = [2, 0], sizes = [1, 32], strides = [1, 1]} : vector<3x32xf32> to vector<1x32xf32>
    %12 = arith.maximumf %4, %5 : vector<576x32xf32>
    %13 = arith.maximumf %6, %7 : vector<576x32xf32>
    %14 = arith.maximumf %12, %13 : vector<576x32xf32>
    %15 = vector.broadcast %9 : vector<1x32xf32> to vector<576x32xf32>
    %16 = arith.addf %14, %15 : vector<576x32xf32>
    %17 = arith.minimumf %4, %5 : vector<576x32xf32>
    %18 = arith.minimumf %6, %7 : vector<576x32xf32>
    %19 = arith.minimumf %17, %18 : vector<576x32xf32>
    %20 = vector.broadcast %9 : vector<1x32xf32> to vector<576x32xf32>
    %21 = arith.addf %19, %20 : vector<576x32xf32>
    %cst_6 = arith.constant 5.000000e-02 : f32
    %22 = vector.broadcast %cst_6 : f32 to vector<576x32xf32>
    %23 = arith.mulf %22, %16 : vector<576x32xf32>
    %24 = arith.maximumf %16, %23 : vector<576x32xf32>
    %cst_7 = arith.constant 5.000000e-02 : f32
    %25 = vector.broadcast %cst_7 : f32 to vector<576x32xf32>
    %26 = arith.mulf %25, %21 : vector<576x32xf32>
    %27 = arith.maximumf %21, %26 : vector<576x32xf32>
    %cst_8 = arith.constant 0.000000e+00 : f32
    %28 = vector.broadcast %cst_8 : f32 to vector<1x32xf32>
    %29 = arith.cmpf oge, %10, %28 : vector<1x32xf32>
    %30 = vector.shape_cast %29 : vector<1x32xi1> to vector<1x32xi1>
    %31 = vector.broadcast %30 : vector<1x32xi1> to vector<576x32xi1>
    %32 = arith.select %31, %24, %27 : vector<576x32xi1>, vector<576x32xf32>
    %33 = vector.broadcast %10 : vector<1x32xf32> to vector<576x32xf32>
    %34 = arith.mulf %32, %33 : vector<576x32xf32>
    %35 = vector.broadcast %11 : vector<1x32xf32> to vector<576x32xf32>
    %36 = arith.addf %34, %35 : vector<576x32xf32>
    %37 = arith.truncf %36 : vector<576x32xf32> to vector<576x32xbf16>
    %c0_9 = arith.constant 0 : index
    %c0_10 = arith.constant 0 : index
    %38 = vector.load %arg4[%c0_9, %c0_10] : memref<576x32xbf16, #tpu.memory_space<vmem>>, vector<576x32xbf16>
    tpu.vector_store %arg4[%c0_9, %c0_10], %37 {strides = array<i32>} : memref<576x32xbf16, #tpu.memory_space<vmem>>, vector<576x32xbf16>,
    return
  }
  func.func @transform_0(%arg0: i32) -> (i32, i32, i32) {
    %c0_i32 = arith.constant 0 : i32
    %c0_i32_0 = arith.constant 0 : i32
    %c0_i32_1 = arith.constant 0 : i32
    return %c0_i32, %arg0, %c0_i32_0 : i32, i32, i32
  }
  func.func @transform_1(%arg0: i32) -> (i32, i32) {
    %c0_i32 = arith.constant 0 : i32
    %c0_i32_0 = arith.constant 0 : i32
    %c0_i32_1 = arith.constant 0 : i32
    return %c0_i32, %c0_i32_0 : i32, i32
  }
  func.func @transform_2(%arg0: i32) -> (i32, i32) {
    %c0_i32 = arith.constant 0 : i32
    %c0_i32_0 = arith.constant 0 : i32
    %c0_i32_1 = arith.constant 0 : i32
    return %c0_i32, %c0_i32_0 : i32, i32
  }
  func.func @transform_3(%arg0: i32) -> (i32, i32) {
    %c0_i32 = arith.constant 0 : i32
    %c0_i32_0 = arith.constant 0 : i32
    return %arg0, %c0_i32 : i32, i32
  }
}

module attributes {stable_mosaic.version = 11 : i64} {
  func.func @conv_pool_kernel(%arg0: i32, %arg1: memref<4x288x288xbf16, #tpu.memory_space<vmem>>, %arg2: memref<288x64xbf16, #tpu.memory_space<vmem>>, %arg3: memref<3x64xf32, #tpu.memory_space<vmem>>, %arg4: memref<288x64xbf16, #tpu.memory_space<vmem>>) attributes {dimension_semantics = [#tpu.dimension_semantics<parallel>], iteration_bounds = array<i64: 1>, scalar_prefetch = 0 : i64, scratch_operands = 0 : i64, tpu.core_type = #tpu.core_type<tc>, window_params = [{transform_indices = @transform_0, window_bounds = array<i64: 4, 288, 288>}, {pipeline_mode = #tpu.pipeline_mode<synchronous>, transform_indices = @transform_1, window_bounds = array<i64: 288, 64>}, {pipeline_mode = #tpu.pipeline_mode<synchronous>, transform_indices = @transform_2, window_bounds = array<i64: 3, 64>}, {transform_indices = @transform_3, window_bounds = array<i64: 288, 64>}]} {
    %c0 = arith.constant 0 : index
    %c0_0 = arith.constant 0 : index
    %c0_1 = arith.constant 0 : index
    %0 = vector.load %arg1[%c0, %c0_0, %c0_1] : memref<4x288x288xbf16, #tpu.memory_space<vmem>>, vector<4x288x288xbf16>
    %1 = vector.shape_cast %0 : vector<4x288x288xbf16> to vector<1152x288xbf16>
    %c0_2 = arith.constant 0 : index
    %c0_3 = arith.constant 0 : index
    %2 = vector.load %arg2[%c0_2, %c0_3] : memref<288x64xbf16, #tpu.memory_space<vmem>>, vector<288x64xbf16>
    %cst = arith.constant dense<0.000000e+00> : vector<1152x64xf32>
    %3 = tpu.matmul %1, %2, %cst {dimension_numbers = #tpu.dot_dimension_numbers<[1], [0], [0], [1], [0, 0, 1, 1], [], []>} : vector<1152x288xbf16>, vector<288x64xbf16>, vector<1152x64xf32> -> vector<1152x64xf32>
    %4 = vector.extract_strided_slice %3 {offsets = [0, 0], sizes = [288, 64], strides = [1, 1]} : vector<1152x64xf32> to vector<288x64xf32>
    %5 = vector.extract_strided_slice %3 {offsets = [288, 0], sizes = [288, 64], strides = [1, 1]} : vector<1152x64xf32> to vector<288x64xf32>
    %6 = vector.extract_strided_slice %3 {offsets = [576, 0], sizes = [288, 64], strides = [1, 1]} : vector<1152x64xf32> to vector<288x64xf32>
    %7 = vector.extract_strided_slice %3 {offsets = [864, 0], sizes = [288, 64], strides = [1, 1]} : vector<1152x64xf32> to vector<288x64xf32>
    %c0_4 = arith.constant 0 : index
    %c0_5 = arith.constant 0 : index
    %8 = vector.load %arg3[%c0_4, %c0_5] : memref<3x64xf32, #tpu.memory_space<vmem>>, vector<3x64xf32>
    %9 = vector.extract_strided_slice %8 {offsets = [0, 0], sizes = [1, 64], strides = [1, 1]} : vector<3x64xf32> to vector<1x64xf32>
    %10 = vector.extract_strided_slice %8 {offsets = [1, 0], sizes = [1, 64], strides = [1, 1]} : vector<3x64xf32> to vector<1x64xf32>
    %11 = vector.extract_strided_slice %8 {offsets = [2, 0], sizes = [1, 64], strides = [1, 1]} : vector<3x64xf32> to vector<1x64xf32>
    %12 = arith.maximumf %4, %5 : vector<288x64xf32>
    %13 = arith.maximumf %6, %7 : vector<288x64xf32>
    %14 = arith.maximumf %12, %13 : vector<288x64xf32>
    %15 = vector.broadcast %9 : vector<1x64xf32> to vector<288x64xf32>
    %16 = arith.addf %14, %15 : vector<288x64xf32>
    %17 = arith.minimumf %4, %5 : vector<288x64xf32>
    %18 = arith.minimumf %6, %7 : vector<288x64xf32>
    %19 = arith.minimumf %17, %18 : vector<288x64xf32>
    %20 = vector.broadcast %9 : vector<1x64xf32> to vector<288x64xf32>
    %21 = arith.addf %19, %20 : vector<288x64xf32>
    %cst_6 = arith.constant 5.000000e-02 : f32
    %22 = vector.broadcast %cst_6 : f32 to vector<288x64xf32>
    %23 = arith.mulf %22, %16 : vector<288x64xf32>
    %24 = arith.maximumf %16, %23 : vector<288x64xf32>
    %cst_7 = arith.constant 5.000000e-02 : f32
    %25 = vector.broadcast %cst_7 : f32 to vector<288x64xf32>
    %26 = arith.mulf %25, %21 : vector<288x64xf32>
    %27 = arith.maximumf %21, %26 : vector<288x64xf32>
    %cst_8 = arith.constant 0.000000e+00 : f32
    %28 = vector.broadcast %cst_8 : f32 to vector<1x64xf32>
    %29 = arith.cmpf oge, %10, %28 : vector<1x64xf32>
    %30 = vector.shape_cast %29 : vector<1x64xi1> to vector<1x64xi1>
    %31 = vector.broadcast %30 : vector<1x64xi1> to vector<288x64xi1>
    %32 = arith.select %31, %24, %27 : vector<288x64xi1>, vector<288x64xf32>
    %33 = vector.broadcast %10 : vector<1x64xf32> to vector<288x64xf32>
    %34 = arith.mulf %32, %33 : vector<288x64xf32>
    %35 = vector.broadcast %11 : vector<1x64xf32> to vector<288x64xf32>
    %36 = arith.addf %34, %35 : vector<288x64xf32>
    %37 = arith.truncf %36 : vector<288x64xf32> to vector<288x64xbf16>
    %c0_9 = arith.constant 0 : index
    %c0_10 = arith.constant 0 : index
    %38 = vector.load %arg4[%c0_9, %c0_10] : memref<288x64xbf16, #tpu.memory_space<vmem>>, vector<288x64xbf16>
    tpu.vector_store %arg4[%c0_9, %c0_10], %37 {strides = array<i32>} : memref<288x64xbf16, #tpu.memory_space<vmem>>, vector<288x64xbf16>,
    return
  }
  func.func @transform_0(%arg0: i32) -> (i32, i32, i32) {
    %c0_i32 = arith.constant 0 : i32
    %c0_i32_0 = arith.constant 0 : i32
    %c0_i32_1 = arith.constant 0 : i32
    return %c0_i32, %arg0, %c0_i32_0 : i32, i32, i32
  }
  func.func @transform_1(%arg0: i32) -> (i32, i32) {
    %c0_i32 = arith.constant 0 : i32
    %c0_i32_0 = arith.constant 0 : i32
    %c0_i32_1 = arith.constant 0 : i32
    return %c0_i32, %c0_i32_0 : i32, i32
  }
  func.func @transform_2(%arg0: i32) -> (i32, i32) {
    %c0_i32 = arith.constant 0 : i32
    %c0_i32_0 = arith.constant 0 : i32
    %c0_i32_1 = arith.constant 0 : i32
    return %c0_i32, %c0_i32_0 : i32, i32
  }
  func.func @transform_3(%arg0: i32) -> (i32, i32) {
    %c0_i32 = arith.constant 0 : i32
    %c0_i32_0 = arith.constant 0 : i32
    return %arg0, %c0_i32 : i32, i32
  }
}

module attributes {stable_mosaic.version = 11 : i64} {
  func.func @conv_pool_kernel(%arg0: i32, %arg1: memref<4x72x576xbf16, #tpu.memory_space<vmem>>, %arg2: memref<576x128xbf16, #tpu.memory_space<vmem>>, %arg3: memref<3x128xf32, #tpu.memory_space<vmem>>, %arg4: memref<72x128xbf16, #tpu.memory_space<vmem>>) attributes {dimension_semantics = [#tpu.dimension_semantics<parallel>], iteration_bounds = array<i64: 1>, scalar_prefetch = 0 : i64, scratch_operands = 0 : i64, tpu.core_type = #tpu.core_type<tc>, window_params = [{transform_indices = @transform_0, window_bounds = array<i64: 4, 72, 576>}, {pipeline_mode = #tpu.pipeline_mode<synchronous>, transform_indices = @transform_1, window_bounds = array<i64: 576, 128>}, {pipeline_mode = #tpu.pipeline_mode<synchronous>, transform_indices = @transform_2, window_bounds = array<i64: 3, 128>}, {transform_indices = @transform_3, window_bounds = array<i64: 72, 128>}]} {
    %c0 = arith.constant 0 : index
    %c0_0 = arith.constant 0 : index
    %c0_1 = arith.constant 0 : index
    %0 = vector.load %arg1[%c0, %c0_0, %c0_1] : memref<4x72x576xbf16, #tpu.memory_space<vmem>>, vector<4x72x576xbf16>
    %1 = vector.shape_cast %0 : vector<4x72x576xbf16> to vector<288x576xbf16>
    %c0_2 = arith.constant 0 : index
    %c0_3 = arith.constant 0 : index
    %2 = vector.load %arg2[%c0_2, %c0_3] : memref<576x128xbf16, #tpu.memory_space<vmem>>, vector<576x128xbf16>
    %cst = arith.constant dense<0.000000e+00> : vector<288x128xf32>
    %3 = tpu.matmul %1, %2, %cst {dimension_numbers = #tpu.dot_dimension_numbers<[1], [0], [0], [1], [0, 0, 1, 1], [], []>} : vector<288x576xbf16>, vector<576x128xbf16>, vector<288x128xf32> -> vector<288x128xf32>
    %4 = vector.extract_strided_slice %3 {offsets = [0, 0], sizes = [72, 128], strides = [1, 1]} : vector<288x128xf32> to vector<72x128xf32>
    %5 = vector.extract_strided_slice %3 {offsets = [72, 0], sizes = [72, 128], strides = [1, 1]} : vector<288x128xf32> to vector<72x128xf32>
    %6 = vector.extract_strided_slice %3 {offsets = [144, 0], sizes = [72, 128], strides = [1, 1]} : vector<288x128xf32> to vector<72x128xf32>
    %7 = vector.extract_strided_slice %3 {offsets = [216, 0], sizes = [72, 128], strides = [1, 1]} : vector<288x128xf32> to vector<72x128xf32>
    %c0_4 = arith.constant 0 : index
    %c0_5 = arith.constant 0 : index
    %8 = vector.load %arg3[%c0_4, %c0_5] : memref<3x128xf32, #tpu.memory_space<vmem>>, vector<3x128xf32>
    %9 = vector.extract_strided_slice %8 {offsets = [0, 0], sizes = [1, 128], strides = [1, 1]} : vector<3x128xf32> to vector<1x128xf32>
    %10 = vector.extract_strided_slice %8 {offsets = [1, 0], sizes = [1, 128], strides = [1, 1]} : vector<3x128xf32> to vector<1x128xf32>
    %11 = vector.extract_strided_slice %8 {offsets = [2, 0], sizes = [1, 128], strides = [1, 1]} : vector<3x128xf32> to vector<1x128xf32>
    %12 = arith.maximumf %4, %5 : vector<72x128xf32>
    %13 = arith.maximumf %6, %7 : vector<72x128xf32>
    %14 = arith.maximumf %12, %13 : vector<72x128xf32>
    %15 = vector.broadcast %9 : vector<1x128xf32> to vector<72x128xf32>
    %16 = arith.addf %14, %15 : vector<72x128xf32>
    %17 = arith.minimumf %4, %5 : vector<72x128xf32>
    %18 = arith.minimumf %6, %7 : vector<72x128xf32>
    %19 = arith.minimumf %17, %18 : vector<72x128xf32>
    %20 = vector.broadcast %9 : vector<1x128xf32> to vector<72x128xf32>
    %21 = arith.addf %19, %20 : vector<72x128xf32>
    %cst_6 = arith.constant 5.000000e-02 : f32
    %22 = vector.broadcast %cst_6 : f32 to vector<72x128xf32>
    %23 = arith.mulf %22, %16 : vector<72x128xf32>
    %24 = arith.maximumf %16, %23 : vector<72x128xf32>
    %cst_7 = arith.constant 5.000000e-02 : f32
    %25 = vector.broadcast %cst_7 : f32 to vector<72x128xf32>
    %26 = arith.mulf %25, %21 : vector<72x128xf32>
    %27 = arith.maximumf %21, %26 : vector<72x128xf32>
    %cst_8 = arith.constant 0.000000e+00 : f32
    %28 = vector.broadcast %cst_8 : f32 to vector<1x128xf32>
    %29 = arith.cmpf oge, %10, %28 : vector<1x128xf32>
    %30 = vector.shape_cast %29 : vector<1x128xi1> to vector<1x128xi1>
    %31 = vector.broadcast %30 : vector<1x128xi1> to vector<72x128xi1>
    %32 = arith.select %31, %24, %27 : vector<72x128xi1>, vector<72x128xf32>
    %33 = vector.broadcast %10 : vector<1x128xf32> to vector<72x128xf32>
    %34 = arith.mulf %32, %33 : vector<72x128xf32>
    %35 = vector.broadcast %11 : vector<1x128xf32> to vector<72x128xf32>
    %36 = arith.addf %34, %35 : vector<72x128xf32>
    %37 = arith.truncf %36 : vector<72x128xf32> to vector<72x128xbf16>
    %c0_9 = arith.constant 0 : index
    %c0_10 = arith.constant 0 : index
    %38 = vector.load %arg4[%c0_9, %c0_10] : memref<72x128xbf16, #tpu.memory_space<vmem>>, vector<72x128xbf16>
    tpu.vector_store %arg4[%c0_9, %c0_10], %37 {strides = array<i32>} : memref<72x128xbf16, #tpu.memory_space<vmem>>, vector<72x128xbf16>,
    return
  }
  func.func @transform_0(%arg0: i32) -> (i32, i32, i32) {
    %c0_i32 = arith.constant 0 : i32
    %c0_i32_0 = arith.constant 0 : i32
    %c0_i32_1 = arith.constant 0 : i32
    return %c0_i32, %arg0, %c0_i32_0 : i32, i32, i32
  }
  func.func @transform_1(%arg0: i32) -> (i32, i32) {
    %c0_i32 = arith.constant 0 : i32
    %c0_i32_0 = arith.constant 0 : i32
    %c0_i32_1 = arith.constant 0 : i32
    return %c0_i32, %c0_i32_0 : i32, i32
  }
  func.func @transform_2(%arg0: i32) -> (i32, i32) {
    %c0_i32 = arith.constant 0 : i32
    %c0_i32_0 = arith.constant 0 : i32
    %c0_i32_1 = arith.constant 0 : i32
    return %c0_i32, %c0_i32_0 : i32, i32
  }
  func.func @transform_3(%arg0: i32) -> (i32, i32) {
    %c0_i32 = arith.constant 0 : i32
    %c0_i32_0 = arith.constant 0 : i32
    return %arg0, %c0_i32 : i32, i32
  }
}

module attributes {stable_mosaic.version = 11 : i64} {
  func.func @fc_kernel(%arg0: i32, %arg1: memref<8x1152xbf16, #tpu.memory_space<vmem>>, %arg2: memref<1152x256xbf16, #tpu.memory_space<vmem>>, %arg3: memref<1x256xf32, #tpu.memory_space<vmem>>, %arg4: memref<256x7xbf16, #tpu.memory_space<vmem>>, %arg5: memref<1x7xf32, #tpu.memory_space<vmem>>, %arg6: memref<8x7xf32, #tpu.memory_space<vmem>>) attributes {dimension_semantics = [#tpu.dimension_semantics<parallel>], iteration_bounds = array<i64: 1>, scalar_prefetch = 0 : i64, scratch_operands = 0 : i64, tpu.core_type = #tpu.core_type<tc>, window_params = [{transform_indices = @transform_0, window_bounds = array<i64: 8, 1152>}, {pipeline_mode = #tpu.pipeline_mode<synchronous>, transform_indices = @transform_1, window_bounds = array<i64: 1152, 256>}, {pipeline_mode = #tpu.pipeline_mode<synchronous>, transform_indices = @transform_2, window_bounds = array<i64: 1, 256>}, {pipeline_mode = #tpu.pipeline_mode<synchronous>, transform_indices = @transform_3, window_bounds = array<i64: 256, 7>}, {pipeline_mode = #tpu.pipeline_mode<synchronous>, transform_indices = @transform_4, window_bounds = array<i64: 1, 7>}, {transform_indices = @transform_5, window_bounds = array<i64: 8, 7>}]} {
    %c0 = arith.constant 0 : index
    %c0_0 = arith.constant 0 : index
    %0 = vector.load %arg1[%c0, %c0_0] : memref<8x1152xbf16, #tpu.memory_space<vmem>>, vector<8x1152xbf16>
    %c0_1 = arith.constant 0 : index
    %c0_2 = arith.constant 0 : index
    %1 = vector.load %arg2[%c0_1, %c0_2] : memref<1152x256xbf16, #tpu.memory_space<vmem>>, vector<1152x256xbf16>
    %cst = arith.constant dense<0.000000e+00> : vector<8x256xf32>
    %2 = tpu.matmul %0, %1, %cst {dimension_numbers = #tpu.dot_dimension_numbers<[1], [0], [0], [1], [0, 0, 1, 1], [], []>} : vector<8x1152xbf16>, vector<1152x256xbf16>, vector<8x256xf32> -> vector<8x256xf32>
    %c0_3 = arith.constant 0 : index
    %c0_4 = arith.constant 0 : index
    %3 = vector.load %arg3[%c0_3, %c0_4] : memref<1x256xf32, #tpu.memory_space<vmem>>, vector<1x256xf32>
    %4 = vector.broadcast %3 : vector<1x256xf32> to vector<8x256xf32>
    %5 = arith.addf %2, %4 : vector<8x256xf32>
    %cst_5 = arith.constant 0.000000e+00 : f32
    %6 = vector.broadcast %cst_5 : f32 to vector<8x256xf32>
    %7 = arith.maximumf %5, %6 : vector<8x256xf32>
    %8 = arith.truncf %7 : vector<8x256xf32> to vector<8x256xbf16>
    %c0_6 = arith.constant 0 : index
    %c0_7 = arith.constant 0 : index
    %9 = vector.load %arg4[%c0_6, %c0_7] : memref<256x7xbf16, #tpu.memory_space<vmem>>, vector<256x7xbf16>
    %cst_8 = arith.constant dense<0.000000e+00> : vector<8x7xf32>
    %10 = tpu.matmul %8, %9, %cst_8 {dimension_numbers = #tpu.dot_dimension_numbers<[1], [0], [0], [1], [0, 0, 1, 1], [], []>} : vector<8x256xbf16>, vector<256x7xbf16>, vector<8x7xf32> -> vector<8x7xf32>
    %c0_9 = arith.constant 0 : index
    %c0_10 = arith.constant 0 : index
    %11 = vector.load %arg5[%c0_9, %c0_10] : memref<1x7xf32, #tpu.memory_space<vmem>>, vector<1x7xf32>
    %12 = vector.broadcast %11 : vector<1x7xf32> to vector<8x7xf32>
    %13 = arith.addf %10, %12 : vector<8x7xf32>
    %c0_11 = arith.constant 0 : index
    %c0_12 = arith.constant 0 : index
    %14 = vector.load %arg6[%c0_11, %c0_12] : memref<8x7xf32, #tpu.memory_space<vmem>>, vector<8x7xf32>
    tpu.vector_store %arg6[%c0_11, %c0_12], %13 {strides = array<i32>} : memref<8x7xf32, #tpu.memory_space<vmem>>, vector<8x7xf32>,
    return
  }
  func.func @transform_0(%arg0: i32) -> (i32, i32) {
    %c0_i32 = arith.constant 0 : i32
    %c0_i32_0 = arith.constant 0 : i32
    return %arg0, %c0_i32 : i32, i32
  }
  func.func @transform_1(%arg0: i32) -> (i32, i32) {
    %c0_i32 = arith.constant 0 : i32
    %c0_i32_0 = arith.constant 0 : i32
    %c0_i32_1 = arith.constant 0 : i32
    return %c0_i32, %c0_i32_0 : i32, i32
  }
  func.func @transform_2(%arg0: i32) -> (i32, i32) {
    %c0_i32 = arith.constant 0 : i32
    %c0_i32_0 = arith.constant 0 : i32
    %c0_i32_1 = arith.constant 0 : i32
    return %c0_i32, %c0_i32_0 : i32, i32
  }
  func.func @transform_3(%arg0: i32) -> (i32, i32) {
    %c0_i32 = arith.constant 0 : i32
    %c0_i32_0 = arith.constant 0 : i32
    %c0_i32_1 = arith.constant 0 : i32
    return %c0_i32, %c0_i32_0 : i32, i32
  }
  func.func @transform_4(%arg0: i32) -> (i32, i32) {
    %c0_i32 = arith.constant 0 : i32
    %c0_i32_0 = arith.constant 0 : i32
    %c0_i32_1 = arith.constant 0 : i32
    return %c0_i32, %c0_i32_0 : i32, i32
  }
  func.func @transform_5(%arg0: i32) -> (i32, i32) {
    %c0_i32 = arith.constant 0 : i32
    %c0_i32_0 = arith.constant 0 : i32
    return %arg0, %c0_i32 : i32, i32
  }
}

module attributes {stable_mosaic.version = 11 : i64} {
  func.func @conv_pool_kernel(%arg0: i32, %arg1: memref<4x24x1152xbf16, #tpu.memory_space<vmem>>, %arg2: memref<1152x128xbf16, #tpu.memory_space<vmem>>, %arg3: memref<3x128xf32, #tpu.memory_space<vmem>>, %arg4: memref<24x128xbf16, #tpu.memory_space<vmem>>) attributes {dimension_semantics = [#tpu.dimension_semantics<parallel>], iteration_bounds = array<i64: 1>, scalar_prefetch = 0 : i64, scratch_operands = 0 : i64, tpu.core_type = #tpu.core_type<tc>, window_params = [{transform_indices = @transform_0, window_bounds = array<i64: 4, 24, 1152>}, {pipeline_mode = #tpu.pipeline_mode<synchronous>, transform_indices = @transform_1, window_bounds = array<i64: 1152, 128>}, {pipeline_mode = #tpu.pipeline_mode<synchronous>, transform_indices = @transform_2, window_bounds = array<i64: 3, 128>}, {transform_indices = @transform_3, window_bounds = array<i64: 24, 128>}]} {
    %c0 = arith.constant 0 : index
    %c0_0 = arith.constant 0 : index
    %c0_1 = arith.constant 0 : index
    %0 = vector.load %arg1[%c0, %c0_0, %c0_1] : memref<4x24x1152xbf16, #tpu.memory_space<vmem>>, vector<4x24x1152xbf16>
    %1 = vector.shape_cast %0 : vector<4x24x1152xbf16> to vector<96x1152xbf16>
    %c0_2 = arith.constant 0 : index
    %c0_3 = arith.constant 0 : index
    %2 = vector.load %arg2[%c0_2, %c0_3] : memref<1152x128xbf16, #tpu.memory_space<vmem>>, vector<1152x128xbf16>
    %cst = arith.constant dense<0.000000e+00> : vector<96x128xf32>
    %3 = tpu.matmul %1, %2, %cst {dimension_numbers = #tpu.dot_dimension_numbers<[1], [0], [0], [1], [0, 0, 1, 1], [], []>} : vector<96x1152xbf16>, vector<1152x128xbf16>, vector<96x128xf32> -> vector<96x128xf32>
    %4 = vector.extract_strided_slice %3 {offsets = [0, 0], sizes = [24, 128], strides = [1, 1]} : vector<96x128xf32> to vector<24x128xf32>
    %5 = vector.extract_strided_slice %3 {offsets = [24, 0], sizes = [24, 128], strides = [1, 1]} : vector<96x128xf32> to vector<24x128xf32>
    %6 = vector.extract_strided_slice %3 {offsets = [48, 0], sizes = [24, 128], strides = [1, 1]} : vector<96x128xf32> to vector<24x128xf32>
    %7 = vector.extract_strided_slice %3 {offsets = [72, 0], sizes = [24, 128], strides = [1, 1]} : vector<96x128xf32> to vector<24x128xf32>
    %c0_4 = arith.constant 0 : index
    %c0_5 = arith.constant 0 : index
    %8 = vector.load %arg3[%c0_4, %c0_5] : memref<3x128xf32, #tpu.memory_space<vmem>>, vector<3x128xf32>
    %9 = vector.extract_strided_slice %8 {offsets = [0, 0], sizes = [1, 128], strides = [1, 1]} : vector<3x128xf32> to vector<1x128xf32>
    %10 = vector.extract_strided_slice %8 {offsets = [1, 0], sizes = [1, 128], strides = [1, 1]} : vector<3x128xf32> to vector<1x128xf32>
    %11 = vector.extract_strided_slice %8 {offsets = [2, 0], sizes = [1, 128], strides = [1, 1]} : vector<3x128xf32> to vector<1x128xf32>
    %12 = arith.maximumf %4, %5 : vector<24x128xf32>
    %13 = arith.maximumf %6, %7 : vector<24x128xf32>
    %14 = arith.maximumf %12, %13 : vector<24x128xf32>
    %15 = vector.broadcast %9 : vector<1x128xf32> to vector<24x128xf32>
    %16 = arith.addf %14, %15 : vector<24x128xf32>
    %17 = arith.minimumf %4, %5 : vector<24x128xf32>
    %18 = arith.minimumf %6, %7 : vector<24x128xf32>
    %19 = arith.minimumf %17, %18 : vector<24x128xf32>
    %20 = vector.broadcast %9 : vector<1x128xf32> to vector<24x128xf32>
    %21 = arith.addf %19, %20 : vector<24x128xf32>
    %cst_6 = arith.constant 5.000000e-02 : f32
    %22 = vector.broadcast %cst_6 : f32 to vector<24x128xf32>
    %23 = arith.mulf %22, %16 : vector<24x128xf32>
    %24 = arith.maximumf %16, %23 : vector<24x128xf32>
    %cst_7 = arith.constant 5.000000e-02 : f32
    %25 = vector.broadcast %cst_7 : f32 to vector<24x128xf32>
    %26 = arith.mulf %25, %21 : vector<24x128xf32>
    %27 = arith.maximumf %21, %26 : vector<24x128xf32>
    %cst_8 = arith.constant 0.000000e+00 : f32
    %28 = vector.broadcast %cst_8 : f32 to vector<1x128xf32>
    %29 = arith.cmpf oge, %10, %28 : vector<1x128xf32>
    %30 = vector.shape_cast %29 : vector<1x128xi1> to vector<1x128xi1>
    %31 = vector.broadcast %30 : vector<1x128xi1> to vector<24x128xi1>
    %32 = arith.select %31, %24, %27 : vector<24x128xi1>, vector<24x128xf32>
    %33 = vector.broadcast %10 : vector<1x128xf32> to vector<24x128xf32>
    %34 = arith.mulf %32, %33 : vector<24x128xf32>
    %35 = vector.broadcast %11 : vector<1x128xf32> to vector<24x128xf32>
    %36 = arith.addf %34, %35 : vector<24x128xf32>
    %37 = arith.truncf %36 : vector<24x128xf32> to vector<24x128xbf16>
    %c0_9 = arith.constant 0 : index
    %c0_10 = arith.constant 0 : index
    %38 = vector.load %arg4[%c0_9, %c0_10] : memref<24x128xbf16, #tpu.memory_space<vmem>>, vector<24x128xbf16>
    tpu.vector_store %arg4[%c0_9, %c0_10], %37 {strides = array<i32>} : memref<24x128xbf16, #tpu.memory_space<vmem>>, vector<24x128xbf16>,
    return
  }
  func.func @transform_0(%arg0: i32) -> (i32, i32, i32) {
    %c0_i32 = arith.constant 0 : i32
    %c0_i32_0 = arith.constant 0 : i32
    %c0_i32_1 = arith.constant 0 : i32
    return %c0_i32, %arg0, %c0_i32_0 : i32, i32, i32
  }
  func.func @transform_1(%arg0: i32) -> (i32, i32) {
    %c0_i32 = arith.constant 0 : i32
    %c0_i32_0 = arith.constant 0 : i32
    %c0_i32_1 = arith.constant 0 : i32
    return %c0_i32, %c0_i32_0 : i32, i32
  }
  func.func @transform_2(%arg0: i32) -> (i32, i32) {
    %c0_i32 = arith.constant 0 : i32
    %c0_i32_0 = arith.constant 0 : i32
    %c0_i32_1 = arith.constant 0 : i32
    return %c0_i32, %c0_i32_0 : i32, i32
  }
  func.func @transform_3(%arg0: i32) -> (i32, i32) {
    %c0_i32 = arith.constant 0 : i32
    %c0_i32_0 = arith.constant 0 : i32
    return %arg0, %c0_i32 : i32, i32
  }
}

</mosaic_0001>

<bundles_post_ra>
// kernel: net_forward.5
= control target key start
LH: loop header
LB: loop body
LE: loop exit
PB: predicated region body
PF: predicated region fallthrough
CT: control target
= control target key end

     0   :  { %s6995_s12 = smov 0   ;;  %s6997_s13 = smov 0   ;;  %s8229_s0 = inlined_call_operand.vmem [shape: bf16[4,1152,32], index: 0, kind: input, shape index: {}]   ;;  %s8230_s1 = inlined_call_operand.vmem [shape: bf16[32,32], index: 1, kind: input, shape index: {}]   ;;  %s8231_s2 = inlined_call_operand.vmem [shape: f32[3,32], index: 2, kind: input, shape index: {}]   ;;  %s8232_s3 = inlined_call_operand.vmem [shape: bf16[1152,32], index: 3, kind: output, shape index: {}]  }
   0x1   :  { %s6999_s14 = smov 0  }
   0x2 LB: > { %s6033_s15 = sadd.s32 4294967295, %s6972_s14   ;;  %s7012_s16 = sadd.s32 1, %s6972_s14   ;;  %s6972_s14 = sphi %s6999_s14, %s8237_s14   ;;  %s6968_s13 = sphi %s6997_s13, %s8236_s13   ;;  %s6964_s12 = sphi %s6995_s12, %s8235_s12  }
   0x3   : > { %s17_s17 = ssub.s32 %s6972_s14, %s7012_s16  ;;  %s20_s18 = sadd.s32 1, %s6968_s13 }
   0x4   : > { %p18_p0 = scmp.eq.s32.totalorder %s17_s17, 0  ;;  %p27_p1 = scmp.ne.s32.totalorder %s6968_s13, %s6964_s12 }
   0x5   : > { %p28_p2 = scmp.eq.s32.totalorder %s6972_s14, 0  ;;  %p6036_p4 = scmp.ge.s32.totalorder %s6972_s14, 2 }
   0x6   : > { %s7021_s19 = scalar_select %p18_p0, %s6968_s13, %s20_s18  }
   0x7   : > { %p29_p3 = por %p28_p2, %p27_p1  ;;  %127 = sbr.rel (%p6036_p4) target bundleno = 161 (0xa1), region = 24 }
   0xc   : > { %130 = sbr.rel (!%p29_p3) target bundleno = 161 (0xa1), region = 28  ;;  %s132_s20 = sand.u32 (%p29_p3), 1, %s6968_s13  }
   0xd   : > { %s6770_s21 = smul.u32 (%p29_p3), 288, %s6972_s14 }
   0xe   : > { %s6923_s22 = smul.u32 (%p29_p3), 1152, %s132_s20 }
   0xf   : > { %s7029_s25 = scalar_lea.vmem (%p29_p3), %s8229_s0, %s6770_s21 }
  0x10   : > { %v154_v0 = vld [vmem:[%s7029_s25] sm:$0xff] (%p29_p3)   ;;  %v158_v1 = vld [vmem:[%s7029_s25 + $0x8] sm:$0xff] (%p29_p3)   ;;  %v162_v2 = vld [vmem:[%s7029_s25 + $0x10] sm:$0xff] (%p29_p3)   ;;  %s7034_s26 = scalar_lea.vmem (%p29_p3), [#allocation2], %s6923_s22 }
  0x11   : > { %155 = vst [vmem:[%s7034_s26] sm:$0xff] %v154_v0   ;;  %v166_v3 = vld [vmem:[%s7029_s25 + $0x18] sm:$0xff]   ;;  %v170_v4 = vld [vmem:[%s7029_s25 + $0x20] sm:$0xff]   ;;  %v174_v5 = vld [vmem:[%s7029_s25 + $0x28] sm:$0xff]  }
  0x12   : > { %159 = vst [vmem:[%s7034_s26 + $0x8] sm:$0xff] %v158_v1   ;;  %v178_v6 = vld [vmem:[%s7029_s25 + $0x30] sm:$0xff]   ;;  %v182_v7 = vld [vmem:[%s7029_s25 + $0x38] sm:$0xff]   ;;  %v186_v8 = vld [vmem:[%s7029_s25 + $0x40] sm:$0xff]  }
  0x13   : > { %163 = vst [vmem:[%s7034_s26 + $0x10] sm:$0xff] %v162_v2   ;;  %v190_v9 = vld [vmem:[%s7029_s25 + $0x48] sm:$0xff]   ;;  %v194_v10 = vld [vmem:[%s7029_s25 + $0x50] sm:$0xff]   ;;  %v198_v11 = vld [vmem:[%s7029_s25 + $0x58] sm:$0xff]  }
  0x14   : > { %167 = vst [vmem:[%s7034_s26 + $0x18] sm:$0xff] %v166_v3   ;;  %v202_v12 = vld [vmem:[%s7029_s25 + $0x60] sm:$0xff]   ;;  %v206_v13 = vld [vmem:[%s7029_s25 + $0x68] sm:$0xff]   ;;  %v210_v14 = vld [vmem:[%s7029_s25 + $0x70] sm:$0xff]  }
  0x15   : > { %171 = vst [vmem:[%s7034_s26 + $0x20] sm:$0xff] %v170_v4   ;;  %v214_v15 = vld [vmem:[%s7029_s25 + $0x78] sm:$0xff]   ;;  %v218_v16 = vld [vmem:[%s7029_s25 + $0x80] sm:$0xff]   ;;  %v222_v17 = vld [vmem:[%s7029_s25 + $0x88] sm:$0xff]  }
  0x16   : > { %175 = vst [vmem:[%s7034_s26 + $0x28] sm:$0xff] %v174_v5   ;;  %v226_v18 = vld [vmem:[%s7029_s25 + $0x90] sm:$0xff]   ;;  %v230_v19 = vld [vmem:[%s7029_s25 + $0x98] sm:$0xff]   ;;  %v234_v20 = vld [vmem:[%s7029_s25 + $0xa0] sm:$0xff]  }
  0x17   : > { %179 = vst [vmem:[%s7034_s26 + $0x30] sm:$0xff] %v178_v6   ;;  %v238_v21 = vld [vmem:[%s7029_s25 + $0xa8] sm:$0xff]   ;;  %v242_v22 = vld [vmem:[%s7029_s25 + $0xb0] sm:$0xff]   ;;  %v246_v23 = vld [vmem:[%s7029_s25 + $0xb8] sm:$0xff]  }
  0x18   : > { %183 = vst [vmem:[%s7034_s26 + $0x38] sm:$0xff] %v182_v7   ;;  %v250_v24 = vld [vmem:[%s7029_s25 + $0xc0] sm:$0xff]   ;;  %v254_v25 = vld [vmem:[%s7029_s25 + $0xc8] sm:$0xff]   ;;  %v258_v26 = vld [vmem:[%s7029_s25 + $0xd0] sm:$0xff]  }
  0x19   : > { %187 = vst [vmem:[%s7034_s26 + $0x40] sm:$0xff] %v186_v8   ;;  %v262_v27 = vld [vmem:[%s7029_s25 + $0xd8] sm:$0xff]   ;;  %v266_v28 = vld [vmem:[%s7029_s25 + $0xe0] sm:$0xff]   ;;  %v270_v29 = vld [vmem:[%s7029_s25 + $0xe8] sm:$0xff]  }
  0x1a   : > { %191 = vst [vmem:[%s7034_s26 + $0x48] sm:$0xff] %v190_v9   ;;  %v274_v30 = vld [vmem:[%s7029_s25 + $0xf0] sm:$0xff]   ;;  %v278_v31 = vld [vmem:[%s7029_s25 + $0xf8] sm:$0xff]   ;;  %v282_v32 = vld [vmem:[%s7029_s25 + $0x100] sm:$0xff]  }
  0x1b   : > { %195 = vst [vmem:[%s7034_s26 + $0x50] sm:$0xff] %v194_v10   ;;  %v286_v33 = vld [vmem:[%s7029_s25 + $0x108] sm:$0xff]   ;;  %v290_v34 = vld [vmem:[%s7029_s25 + $0x110] sm:$0xff]   ;;  %v294_v35 = vld [vmem:[%s7029_s25 + $0x118] sm:$0xff]  }
  0x1c   : > { %199 = vst [vmem:[%s7034_s26 + $0x58] sm:$0xff] %v198_v11   ;;  %v298_v36 = vld [vmem:[%s7029_s25 + $0x240] sm:$0xff]   ;;  %v302_v37 = vld [vmem:[%s7029_s25 + $0x248] sm:$0xff]   ;;  %v306_v38 = vld [vmem:[%s7029_s25 + $0x250] sm:$0xff]  }
  0x1d   : > { %203 = vst [vmem:[%s7034_s26 + $0x60] sm:$0xff] %v202_v12   ;;  %v310_v39 = vld [vmem:[%s7029_s25 + $0x258] sm:$0xff]   ;;  %v314_v40 = vld [vmem:[%s7029_s25 + $0x260] sm:$0xff]   ;;  %v318_v41 = vld [vmem:[%s7029_s25 + $0x268] sm:$0xff]  }
  0x1e   : > { %207 = vst [vmem:[%s7034_s26 + $0x68] sm:$0xff] %v206_v13   ;;  %v322_v42 = vld [vmem:[%s7029_s25 + $0x270] sm:$0xff]   ;;  %v326_v43 = vld [vmem:[%s7029_s25 + $0x278] sm:$0xff]   ;;  %v330_v44 = vld [vmem:[%s7029_s25 + $0x280] sm:$0xff]  }
  0x1f   : > { %211 = vst [vmem:[%s7034_s26 + $0x70] sm:$0xff] %v210_v14   ;;  %v334_v45 = vld [vmem:[%s7029_s25 + $0x288] sm:$0xff]   ;;  %v338_v46 = vld [vmem:[%s7029_s25 + $0x290] sm:$0xff]   ;;  %v342_v47 = vld [vmem:[%s7029_s25 + $0x298] sm:$0xff]  }
  0x20   : > { %215 = vst [vmem:[%s7034_s26 + $0x78] sm:$0xff] %v214_v15   ;;  %v346_v48 = vld [vmem:[%s7029_s25 + $0x2a0] sm:$0xff]   ;;  %v350_v49 = vld [vmem:[%s7029_s25 + $0x2a8] sm:$0xff]   ;;  %v354_v50 = vld [vmem:[%s7029_s25 + $0x2b0] sm:$0xff]  }
  0x21   : > { %219 = vst [vmem:[%s7034_s26 + $0x80] sm:$0xff] %v218_v16   ;;  %v358_v51 = vld [vmem:[%s7029_s25 + $0x2b8] sm:$0xff]   ;;  %v362_v52 = vld [vmem:[%s7029_s25 + $0x2c0] sm:$0xff]   ;;  %v366_v53 = vld [vmem:[%s7029_s25 + $0x2c8] sm:$0xff]  }
  0x22   : > { %223 = vst [vmem:[%s7034_s26 + $0x88] sm:$0xff] %v222_v17   ;;  %v370_v54 = vld [vmem:[%s7029_s25 + $0x2d0] sm:$0xff]   ;;  %v374_v55 = vld [vmem:[%s7029_s25 + $0x2d8] sm:$0xff]   ;;  %v378_v56 = vld [vmem:[%s7029_s25 + $0x2e0] sm:$0xff]  }
  0x23   : > { %227 = vst [vmem:[%s7034_s26 + $0x90] sm:$0xff] %v226_v18   ;;  %v382_v57 = vld [vmem:[%s7029_s25 + $0x2e8] sm:$0xff]   ;;  %v386_v58 = vld [vmem:[%s7029_s25 + $0x2f0] sm:$0xff]   ;;  %v390_v59 = vld [vmem:[%s7029_s25 + $0x2f8] sm:$0xff]  }
  0x24   : > { %231 = vst [vmem:[%s7034_s26 + $0x98] sm:$0xff] %v230_v19   ;;  %v394_v60 = vld [vmem:[%s7029_s25 + $0x300] sm:$0xff]   ;;  %v398_v61 = vld [vmem:[%s7029_s25 + $0x308] sm:$0xff]   ;;  %v402_v62 = vld [vmem:[%s7029_s25 + $0x310] sm:$0xff]  }
  0x25   : > { %235 = vst [vmem:[%s7034_s26 + $0xa0] sm:$0xff] %v234_v20   ;;  %v406_v63 = vld [vmem:[%s7029_s25 + $0x318] sm:$0xff]   ;;  %v410_v0 = vld [vmem:[%s7029_s25 + $0x320] sm:$0xff]   ;;  %v414_v1 = vld [vmem:[%s7029_s25 + $0x328] sm:$0xff]  }
  0x26   : > { %239 = vst [vmem:[%s7034_s26 + $0xa8] sm:$0xff] %v238_v21   ;;  %v418_v2 = vld [vmem:[%s7029_s25 + $0x330] sm:$0xff]   ;;  %v422_v3 = vld [vmem:[%s7029_s25 + $0x338] sm:$0xff]   ;;  %v426_v4 = vld [vmem:[%s7029_s25 + $0x340] sm:$0xff]  }
  0x27   : > { %243 = vst [vmem:[%s7034_s26 + $0xb0] sm:$0xff] %v242_v22   ;;  %v430_v5 = vld [vmem:[%s7029_s25 + $0x348] sm:$0xff]   ;;  %v434_v6 = vld [vmem:[%s7029_s25 + $0x350] sm:$0xff]   ;;  %v438_v7 = vld [vmem:[%s7029_s25 + $0x358] sm:$0xff]  }
  0x28   : > { %247 = vst [vmem:[%s7034_s26 + $0xb8] sm:$0xff] %v246_v23   ;;  %v442_v8 = vld [vmem:[%s7029_s25 + $0x480] sm:$0xff]   ;;  %v446_v9 = vld [vmem:[%s7029_s25 + $0x488] sm:$0xff]   ;;  %v450_v10 = vld [vmem:[%s7029_s25 + $0x490] sm:$0xff]  }
  0x29   : > { %251 = vst [vmem:[%s7034_s26 + $0xc0] sm:$0xff] %v250_v24   ;;  %v454_v11 = vld [vmem:[%s7029_s25 + $0x498] sm:$0xff]   ;;  %v458_v12 = vld [vmem:[%s7029_s25 + $0x4a0] sm:$0xff]   ;;  %v462_v13 = vld [vmem:[%s7029_s25 + $0x4a8] sm:$0xff]  }
  0x2a   : > { %255 = vst [vmem:[%s7034_s26 + $0xc8] sm:$0xff] %v254_v25   ;;  %v466_v14 = vld [vmem:[%s7029_s25 + $0x4b0] sm:$0xff]   ;;  %v470_v15 = vld [vmem:[%s7029_s25 + $0x4b8] sm:$0xff]   ;;  %v474_v16 = vld [vmem:[%s7029_s25 + $0x4c0] sm:$0xff]  }
  0x2b   : > { %259 = vst [vmem:[%s7034_s26 + $0xd0] sm:$0xff] %v258_v26   ;;  %v478_v17 = vld [vmem:[%s7029_s25 + $0x4c8] sm:$0xff]   ;;  %v482_v18 = vld [vmem:[%s7029_s25 + $0x4d0] sm:$0xff]   ;;  %v486_v19 = vld [vmem:[%s7029_s25 + $0x4d8] sm:$0xff]  }
  0x2c   : > { %263 = vst [vmem:[%s7034_s26 + $0xd8] sm:$0xff] %v262_v27   ;;  %v490_v20 = vld [vmem:[%s7029_s25 + $0x4e0] sm:$0xff]   ;;  %v494_v21 = vld [vmem:[%s7029_s25 + $0x4e8] sm:$0xff]   ;;  %v498_v22 = vld [vmem:[%s7029_s25 + $0x4f0] sm:$0xff]  }
  0x2d   : > { %267 = vst [vmem:[%s7034_s26 + $0xe0] sm:$0xff] %v266_v28   ;;  %v502_v23 = vld [vmem:[%s7029_s25 + $0x4f8] sm:$0xff]   ;;  %v506_v24 = vld [vmem:[%s7029_s25 + $0x500] sm:$0xff]   ;;  %v510_v25 = vld [vmem:[%s7029_s25 + $0x508] sm:$0xff]  }
  0x2e   : > { %271 = vst [vmem:[%s7034_s26 + $0xe8] sm:$0xff] %v270_v29   ;;  %v514_v26 = vld [vmem:[%s7029_s25 + $0x510] sm:$0xff]   ;;  %v518_v27 = vld [vmem:[%s7029_s25 + $0x518] sm:$0xff]   ;;  %v522_v28 = vld [vmem:[%s7029_s25 + $0x520] sm:$0xff]  }
  0x2f   : > { %275 = vst [vmem:[%s7034_s26 + $0xf0] sm:$0xff] %v274_v30   ;;  %v526_v29 = vld [vmem:[%s7029_s25 + $0x528] sm:$0xff]   ;;  %v530_v30 = vld [vmem:[%s7029_s25 + $0x530] sm:$0xff]  }
  0x30   : > { %279 = vst [vmem:[%s7034_s26 + $0xf8] sm:$0xff] %v278_v31   ;;  %v534_v31 = vld [vmem:[%s7029_s25 + $0x538] sm:$0xff]  }
  0x31   : > { %283 = vst [vmem:[%s7034_s26 + $0x100] sm:$0xff] %v282_v32   ;;  %v538_v32 = vld [vmem:[%s7029_s25 + $0x540] sm:$0xff]  }
  0x32   : > { %287 = vst [vmem:[%s7034_s26 + $0x108] sm:$0xff] %v286_v33   ;;  %v542_v33 = vld [vmem:[%s7029_s25 + $0x548] sm:$0xff]  }
  0x33   : > { %291 = vst [vmem:[%s7034_s26 + $0x110] sm:$0xff] %v290_v34   ;;  %v546_v34 = vld [vmem:[%s7029_s25 + $0x550] sm:$0xff]  }
  0x34   : > { %295 = vst [vmem:[%s7034_s26 + $0x118] sm:$0xff] %v294_v35   ;;  %v550_v35 = vld [vmem:[%s7029_s25 + $0x558] sm:$0xff]  }
  0x35   : > { %299 = vst [vmem:[%s7034_s26 + $0x120] sm:$0xff] %v298_v36   ;;  %v554_v36 = vld [vmem:[%s7029_s25 + $0x560] sm:$0xff]  }
  0x36   : > { %303 = vst [vmem:[%s7034_s26 + $0x128] sm:$0xff] %v302_v37   ;;  %v558_v37 = vld [vmem:[%s7029_s25 + $0x568] sm:$0xff]  }
  0x37   : > { %307 = vst [vmem:[%s7034_s26 + $0x130] sm:$0xff] %v306_v38   ;;  %v562_v38 = vld [vmem:[%s7029_s25 + $0x570] sm:$0xff]  }
  0x38   : > { %311 = vst [vmem:[%s7034_s26 + $0x138] sm:$0xff] %v310_v39   ;;  %v566_v39 = vld [vmem:[%s7029_s25 + $0x578] sm:$0xff]  }
  0x39   : > { %315 = vst [vmem:[%s7034_s26 + $0x140] sm:$0xff] %v314_v40   ;;  %v570_v40 = vld [vmem:[%s7029_s25 + $0x580] sm:$0xff]  }
  0x3a   : > { %319 = vst [vmem:[%s7034_s26 + $0x148] sm:$0xff] %v318_v41   ;;  %v574_v41 = vld [vmem:[%s7029_s25 + $0x588] sm:$0xff]  }
  0x3b   : > { %323 = vst [vmem:[%s7034_s26 + $0x150] sm:$0xff] %v322_v42   ;;  %v578_v42 = vld [vmem:[%s7029_s25 + $0x590] sm:$0xff]  }
  0x3c   : > { %327 = vst [vmem:[%s7034_s26 + $0x158] sm:$0xff] %v326_v43   ;;  %v582_v43 = vld [vmem:[%s7029_s25 + $0x598] sm:$0xff]  }
  0x3d   : > { %331 = vst [vmem:[%s7034_s26 + $0x160] sm:$0xff] %v330_v44   ;;  %v586_v44 = vld [vmem:[%s7029_s25 + $0x6c0] sm:$0xff]  }
  0x3e   : > { %335 = vst [vmem:[%s7034_s26 + $0x168] sm:$0xff] %v334_v45   ;;  %v590_v45 = vld [vmem:[%s7029_s25 + $0x6c8] sm:$0xff]  }
  0x3f   : > { %339 = vst [vmem:[%s7034_s26 + $0x170] sm:$0xff] %v338_v46   ;;  %v594_v46 = vld [vmem:[%s7029_s25 + $0x6d0] sm:$0xff]  }
  0x40   : > { %343 = vst [vmem:[%s7034_s26 + $0x178] sm:$0xff] %v342_v47   ;;  %v598_v47 = vld [vmem:[%s7029_s25 + $0x6d8] sm:$0xff]  }
  0x41   : > { %347 = vst [vmem:[%s7034_s26 + $0x180] sm:$0xff] %v346_v48   ;;  %v602_v48 = vld [vmem:[%s7029_s25 + $0x6e0] sm:$0xff]  }
  0x42   : > { %351 = vst [vmem:[%s7034_s26 + $0x188] sm:$0xff] %v350_v49   ;;  %v606_v49 = vld [vmem:[%s7029_s25 + $0x6e8] sm:$0xff]  }
  0x43   : > { %355 = vst [vmem:[%s7034_s26 + $0x190] sm:$0xff] %v354_v50   ;;  %v610_v50 = vld [vmem:[%s7029_s25 + $0x6f0] sm:$0xff]  }
  0x44   : > { %359 = vst [vmem:[%s7034_s26 + $0x198] sm:$0xff] %v358_v51   ;;  %v614_v51 = vld [vmem:[%s7029_s25 + $0x6f8] sm:$0xff]  }
  0x45   : > { %363 = vst [vmem:[%s7034_s26 + $0x1a0] sm:$0xff] %v362_v52   ;;  %v618_v52 = vld [vmem:[%s7029_s25 + $0x700] sm:$0xff]  }
  0x46   : > { %367 = vst [vmem:[%s7034_s26 + $0x1a8] sm:$0xff] %v366_v53   ;;  %v622_v53 = vld [vmem:[%s7029_s25 + $0x708] sm:$0xff]  }
  0x47   : > { %371 = vst [vmem:[%s7034_s26 + $0x1b0] sm:$0xff] %v370_v54   ;;  %v626_v54 = vld [vmem:[%s7029_s25 + $0x710] sm:$0xff]  }
  0x48   : > { %375 = vst [vmem:[%s7034_s26 + $0x1b8] sm:$0xff] %v374_v55   ;;  %v630_v55 = vld [vmem:[%s7029_s25 + $0x718] sm:$0xff]  }
  0x49   : > { %379 = vst [vmem:[%s7034_s26 + $0x1c0] sm:$0xff] %v378_v56   ;;  %v634_v56 = vld [vmem:[%s7029_s25 + $0x720] sm:$0xff]  }
  0x4a   : > { %383 = vst [vmem:[%s7034_s26 + $0x1c8] sm:$0xff] %v382_v57   ;;  %v638_v57 = vld [vmem:[%s7029_s25 + $0x728] sm:$0xff]  }
  0x4b   : > { %387 = vst [vmem:[%s7034_s26 + $0x1d0] sm:$0xff] %v386_v58   ;;  %v642_v58 = vld [vmem:[%s7029_s25 + $0x730] sm:$0xff]  }
  0x4c   : > { %391 = vst [vmem:[%s7034_s26 + $0x1d8] sm:$0xff] %v390_v59   ;;  %v646_v59 = vld [vmem:[%s7029_s25 + $0x738] sm:$0xff]  }
  0x4d   : > { %395 = vst [vmem:[%s7034_s26 + $0x1e0] sm:$0xff] %v394_v60   ;;  %v650_v60 = vld [vmem:[%s7029_s25 + $0x740] sm:$0xff]  }
  0x4e   : > { %399 = vst [vmem:[%s7034_s26 + $0x1e8] sm:$0xff] %v398_v61   ;;  %v654_v61 = vld [vmem:[%s7029_s25 + $0x748] sm:$0xff]  }
  0x4f   : > { %403 = vst [vmem:[%s7034_s26 + $0x1f0] sm:$0xff] %v402_v62   ;;  %v658_v62 = vld [vmem:[%s7029_s25 + $0x750] sm:$0xff]  }
  0x50   : > { %407 = vst [vmem:[%s7034_s26 + $0x1f8] sm:$0xff] %v406_v63   ;;  %v662_v63 = vld [vmem:[%s7029_s25 + $0x758] sm:$0xff]  }
  0x51   : > { %411 = vst [vmem:[%s7034_s26 + $0x200] sm:$0xff] %v410_v0   ;;  %v666_v0 = vld [vmem:[%s7029_s25 + $0x760] sm:$0xff]  }
  0x52   : > { %415 = vst [vmem:[%s7034_s26 + $0x208] sm:$0xff] %v414_v1   ;;  %v670_v1 = vld [vmem:[%s7029_s25 + $0x768] sm:$0xff]  }
  0x53   : > { %419 = vst [vmem:[%s7034_s26 + $0x210] sm:$0xff] %v418_v2   ;;  %v674_v2 = vld [vmem:[%s7029_s25 + $0x770] sm:$0xff]  }
  0x54   : > { %423 = vst [vmem:[%s7034_s26 + $0x218] sm:$0xff] %v422_v3   ;;  %v678_v3 = vld [vmem:[%s7029_s25 + $0x778] sm:$0xff]  }
  0x55   : > { %427 = vst [vmem:[%s7034_s26 + $0x220] sm:$0xff] %v426_v4   ;;  %v682_v4 = vld [vmem:[%s7029_s25 + $0x780] sm:$0xff]  }
  0x56   : > { %431 = vst [vmem:[%s7034_s26 + $0x228] sm:$0xff] %v430_v5   ;;  %v686_v5 = vld [vmem:[%s7029_s25 + $0x788] sm:$0xff]  }
  0x57   : > { %435 = vst [vmem:[%s7034_s26 + $0x230] sm:$0xff] %v434_v6   ;;  %v690_v6 = vld [vmem:[%s7029_s25 + $0x790] sm:$0xff]  }
  0x58   : > { %439 = vst [vmem:[%s7034_s26 + $0x238] sm:$0xff] %v438_v7   ;;  %v694_v7 = vld [vmem:[%s7029_s25 + $0x798] sm:$0xff]  }
  0x59   : > { %443 = vst [vmem:[%s7034_s26 + $0x240] sm:$0xff] %v442_v8   ;;  %v698_v8 = vld [vmem:[%s7029_s25 + $0x7a0] sm:$0xff]  }
  0x5a   : > { %447 = vst [vmem:[%s7034_s26 + $0x248] sm:$0xff] %v446_v9   ;;  %v702_v9 = vld [vmem:[%s7029_s25 + $0x7a8] sm:$0xff]  }
  0x5b   : > { %451 = vst [vmem:[%s7034_s26 + $0x250] sm:$0xff] %v450_v10   ;;  %v706_v10 = vld [vmem:[%s7029_s25 + $0x7b0] sm:$0xff]  }
  0x5c   : > { %455 = vst [vmem:[%s7034_s26 + $0x258] sm:$0xff] %v454_v11   ;;  %v710_v11 = vld [vmem:[%s7029_s25 + $0x7b8] sm:$0xff]  }
  0x5d   : > { %459 = vst [vmem:[%s7034_s26 + $0x260] sm:$0xff] %v458_v12   ;;  %v714_v12 = vld [vmem:[%s7029_s25 + $0x7c0] sm:$0xff]  }
  0x5e   : > { %463 = vst [vmem:[%s7034_s26 + $0x268] sm:$0xff] %v462_v13   ;;  %v718_v13 = vld [vmem:[%s7029_s25 + $0x7c8] sm:$0xff]  }
  0x5f   : > { %467 = vst [vmem:[%s7034_s26 + $0x270] sm:$0xff] %v466_v14   ;;  %v722_v14 = vld [vmem:[%s7029_s25 + $0x7d0] sm:$0xff]  }
  0x60   : > { %471 = vst [vmem:[%s7034_s26 + $0x278] sm:$0xff] %v470_v15   ;;  %v726_v15 = vld [vmem:[%s7029_s25 + $0x7d8] sm:$0xff]  }
  0x61   : > { %475 = vst [vmem:[%s7034_s26 + $0x280] sm:$0xff] %v474_v16  }
  0x62   : > { %479 = vst [vmem:[%s7034_s26 + $0x288] sm:$0xff] %v478_v17  }
  0x63   : > { %483 = vst [vmem:[%s7034_s26 + $0x290] sm:$0xff] %v482_v18  }
  0x64   : > { %487 = vst [vmem:[%s7034_s26 + $0x298] sm:$0xff] %v486_v19  }
  0x65   : > { %491 = vst [vmem:[%s7034_s26 + $0x2a0] sm:$0xff] %v490_v20  }
  0x66   : > { %495 = vst [vmem:[%s7034_s26 + $0x2a8] sm:$0xff] %v494_v21  }
  0x67   : > { %499 = vst [vmem:[%s7034_s26 + $0x2b0] sm:$0xff] %v498_v22  }
  0x68   : > { %503 = vst [vmem:[%s7034_s26 + $0x2b8] sm:$0xff] %v502_v23  }
  0x69   : > { %507 = vst [vmem:[%s7034_s26 + $0x2c0] sm:$0xff] %v506_v24  }
  0x6a   : > { %511 = vst [vmem:[%s7034_s26 + $0x2c8] sm:$0xff] %v510_v25  }
  0x6b   : > { %515 = vst [vmem:[%s7034_s26 + $0x2d0] sm:$0xff] %v514_v26  }
  0x6c   : > { %519 = vst [vmem:[%s7034_s26 + $0x2d8] sm:$0xff] %v518_v27  }
  0x6d   : > { %523 = vst [vmem:[%s7034_s26 + $0x2e0] sm:$0xff] %v522_v28  }
  0x6e   : > { %527 = vst [vmem:[%s7034_s26 + $0x2e8] sm:$0xff] %v526_v29  }
  0x6f   : > { %531 = vst [vmem:[%s7034_s26 + $0x2f0] sm:$0xff] %v530_v30  }
  0x70   : > { %535 = vst [vmem:[%s7034_s26 + $0x2f8] sm:$0xff] %v534_v31  }
  0x71   : > { %539 = vst [vmem:[%s7034_s26 + $0x300] sm:$0xff] %v538_v32  }
  0x72   : > { %543 = vst [vmem:[%s7034_s26 + $0x308] sm:$0xff] %v542_v33  }
  0x73   : > { %547 = vst [vmem:[%s7034_s26 + $0x310] sm:$0xff] %v546_v34  }
  0x74   : > { %551 = vst [vmem:[%s7034_s26 + $0x318] sm:$0xff] %v550_v35  }
  0x75   : > { %555 = vst [vmem:[%s7034_s26 + $0x320] sm:$0xff] %v554_v36  }
  0x76   : > { %559 = vst [vmem:[%s7034_s26 + $0x328] sm:$0xff] %v558_v37  }
  0x77   : > { %563 = vst [vmem:[%s7034_s26 + $0x330] sm:$0xff] %v562_v38  }
  0x78   : > { %567 = vst [vmem:[%s7034_s26 + $0x338] sm:$0xff] %v566_v39  }
  0x79   : > { %571 = vst [vmem:[%s7034_s26 + $0x340] sm:$0xff] %v570_v40  }
  0x7a   : > { %575 = vst [vmem:[%s7034_s26 + $0x348] sm:$0xff] %v574_v41  }
  0x7b   : > { %579 = vst [vmem:[%s7034_s26 + $0x350] sm:$0xff] %v578_v42  }
  0x7c   : > { %583 = vst [vmem:[%s7034_s26 + $0x358] sm:$0xff] %v582_v43  }
  0x7d   : > { %587 = vst [vmem:[%s7034_s26 + $0x360] sm:$0xff] %v586_v44  }
  0x7e   : > { %591 = vst [vmem:[%s7034_s26 + $0x368] sm:$0xff] %v590_v45  }
  0x7f   : > { %595 = vst [vmem:[%s7034_s26 + $0x370] sm:$0xff] %v594_v46  }
  0x80   : > { %599 = vst [vmem:[%s7034_s26 + $0x378] sm:$0xff] %v598_v47  }
  0x81   : > { %603 = vst [vmem:[%s7034_s26 + $0x380] sm:$0xff] %v602_v48  }
  0x82   : > { %607 = vst [vmem:[%s7034_s26 + $0x388] sm:$0xff] %v606_v49  }
  0x83   : > { %611 = vst [vmem:[%s7034_s26 + $0x390] sm:$0xff] %v610_v50  }
  0x84   : > { %615 = vst [vmem:[%s7034_s26 + $0x398] sm:$0xff] %v614_v51  }
  0x85   : > { %619 = vst [vmem:[%s7034_s26 + $0x3a0] sm:$0xff] %v618_v52  }
  0x86   : > { %623 = vst [vmem:[%s7034_s26 + $0x3a8] sm:$0xff] %v622_v53  }
  0x87   : > { %627 = vst [vmem:[%s7034_s26 + $0x3b0] sm:$0xff] %v626_v54  }
  0x88   : > { %631 = vst [vmem:[%s7034_s26 + $0x3b8] sm:$0xff] %v630_v55  }
  0x89   : > { %635 = vst [vmem:[%s7034_s26 + $0x3c0] sm:$0xff] %v634_v56  }
  0x8a   : > { %639 = vst [vmem:[%s7034_s26 + $0x3c8] sm:$0xff] %v638_v57  }
  0x8b   : > { %643 = vst [vmem:[%s7034_s26 + $0x3d0] sm:$0xff] %v642_v58  }
  0x8c   : > { %647 = vst [vmem:[%s7034_s26 + $0x3d8] sm:$0xff] %v646_v59  }
  0x8d   : > { %651 = vst [vmem:[%s7034_s26 + $0x3e0] sm:$0xff] %v650_v60  }
  0x8e   : > { %655 = vst [vmem:[%s7034_s26 + $0x3e8] sm:$0xff] %v654_v61  }
  0x8f   : > { %659 = vst [vmem:[%s7034_s26 + $0x3f0] sm:$0xff] %v658_v62  }
  0x90   : > { %663 = vst [vmem:[%s7034_s26 + $0x3f8] sm:$0xff] %v662_v63  }
  0x91   : > { %667 = vst [vmem:[%s7034_s26 + $0x400] sm:$0xff] %v666_v0  }
  0x92   : > { %671 = vst [vmem:[%s7034_s26 + $0x408] sm:$0xff] %v670_v1  }
  0x93   : > { %675 = vst [vmem:[%s7034_s26 + $0x410] sm:$0xff] %v674_v2  }
  0x94   : > { %679 = vst [vmem:[%s7034_s26 + $0x418] sm:$0xff] %v678_v3  }
  0x95   : > { %683 = vst [vmem:[%s7034_s26 + $0x420] sm:$0xff] %v682_v4  }
  0x96   : > { %687 = vst [vmem:[%s7034_s26 + $0x428] sm:$0xff] %v686_v5  }
  0x97   : > { %691 = vst [vmem:[%s7034_s26 + $0x430] sm:$0xff] %v690_v6  }
  0x98   : > { %695 = vst [vmem:[%s7034_s26 + $0x438] sm:$0xff] %v694_v7  }
  0x99   : > { %699 = vst [vmem:[%s7034_s26 + $0x440] sm:$0xff] %v698_v8  }
  0x9a   : > { %703 = vst [vmem:[%s7034_s26 + $0x448] sm:$0xff] %v702_v9  }
  0x9b   : > { %707 = vst [vmem:[%s7034_s26 + $0x450] sm:$0xff] %v706_v10  }
  0x9c   : > { %711 = vst [vmem:[%s7034_s26 + $0x458] sm:$0xff] %v710_v11  }
  0x9d   : > { %715 = vst [vmem:[%s7034_s26 + $0x460] sm:$0xff] %v714_v12  }
  0x9e   : > { %719 = vst [vmem:[%s7034_s26 + $0x468] sm:$0xff] %v718_v13  }
  0x9f   : > { %723 = vst [vmem:[%s7034_s26 + $0x470] sm:$0xff] %v722_v14  }
  0xa0   : > { %727 = vst [vmem:[%s7034_s26 + $0x478] sm:$0xff] %v726_v15  }
  0xa1 PF: > { %p6038_p5 = scmp.ge.s32.totalorder %s6972_s14, 1  ;;  %p2506_p6 = scmp.lt.s32.totalorder %s6972_s14, 3 }
  0xa3   : > { %p2507_p7 = pnand %p6038_p5, %p2506_p6 }
  0xa4   : > { %s2513_s29 = sand.u32 (!%p2507_p7), 1, %s6964_s12   ;;  %s2537_s9 = smul.u32 (!%p2507_p7), 72, %s6033_s15 }
  0xa5   : > { %2510 = sbr.rel (%p2507_p7) target bundleno = 897 (0x381), region = 80 }
  0xa6   : > { %s6924_s30 = smul.u32 (!%p2507_p7), 1152, %s2513_s29  ;;  %p2538_p8 = scmp.lt.s32.totalorder (!%p2507_p7), %s2537_s9, 143 }
  0xa8   : > { %s7330_s6 = scalar_lea.vmem (!%p2507_p7), [#allocation2], %s6924_s30 }
  0xaa   : > { %v6916_v16 = vld [vmem:[%s8230_s1 + $0x8] sm:$0xff]  ;;  %v6915_v17 = vld [vmem:[%s8230_s1] sm:$0xff]  ;;  %vm3568_vm0 = vcmask 261120   ;;  %v6773_v26 = vld [vmem:[%s7330_s6 + $0x10] sm:$0xff]  ;;  %v6974_v0 = vmov 0   ;;  %s8239_s9 = smov (!%p2538_p8, %s2537_s9), 143 }
  0xab   : > { %4007 = vmatpush.bf16.msra.mxu0 %v6916_v16  ;;  %6917 = vmatpush.bf16.msra.mxu1 %v6916_v16  ;;  %v6771_v18 = vld [vmem:[%s7330_s6] sm:$0xff]  ;;  %v6772_v22 = vld [vmem:[%s7330_s6 + $0x8] sm:$0xff]  ;;  %v6809_v27 = vld [vmem:[%s7330_s6 + $0x130] sm:$0xff]  ;;  %s6039_s10 = sshll.u32 %s8239_s9, 2  ;;  %vm5890_vm3 = vcmask 257024  }
  0xac   : > { %6918 = vmatpush.bf16.msra.mxu2 %v6916_v16  ;;  %6919 = vmatpush.bf16.msra.mxu3 %v6916_v16  ;;  %v6807_v19 = vld [vmem:[%s7330_s6 + $0x120] sm:$0xff]  ;;  %v6808_v23 = vld [vmem:[%s7330_s6 + $0x128] sm:$0xff]  ;;  %v6845_v28 = vld [vmem:[%s7330_s6 + $0x250] sm:$0xff]  ;;  %s7441_s14 = scalar_lea.vmem %s8232_s3, %s6039_s10 }
  0xad   : > { %v6843_v20 = vld [vmem:[%s7330_s6 + $0x240] sm:$0xff]  ;;  %v6844_v24 = vld [vmem:[%s7330_s6 + $0x248] sm:$0xff]  ;;  %v6881_v29 = vld [vmem:[%s7330_s6 + $0x370] sm:$0xff] }
  0xae   : > { %v6879_v21 = vld [vmem:[%s7330_s6 + $0x360] sm:$0xff]  ;;  %v6880_v25 = vld [vmem:[%s7330_s6 + $0x368] sm:$0xff]  ;;  %v6774_v30 = vld [vmem:[%s7330_s6 + $0x18] sm:$0xff] }
  0xaf   : > { %4008 = vmatpush.bf16.msra.mxu0 %v6915_v17  ;;  %6920 = vmatpush.bf16.msra.mxu1 %v6915_v17  ;;  %v6810_v31 = vld [vmem:[%s7330_s6 + $0x138] sm:$0xff]  ;;  %v6775_v34 = vld [vmem:[%s7330_s6 + $0x20] sm:$0xff]  ;;  %v6776_v38 = vld [vmem:[%s7330_s6 + $0x28] sm:$0xff] }
  0xb0   : > { %6921 = vmatpush.bf16.msra.mxu2 %v6915_v17  ;;  %6922 = vmatpush.bf16.msra.mxu3 %v6915_v17  ;;  %v6846_v32 = vld [vmem:[%s7330_s6 + $0x258] sm:$0xff]  ;;  %v6811_v35 = vld [vmem:[%s7330_s6 + $0x140] sm:$0xff]  ;;  %v6812_v39 = vld [vmem:[%s7330_s6 + $0x148] sm:$0xff] }
  0xb1   : > { %v6882_v33 = vld [vmem:[%s7330_s6 + $0x378] sm:$0xff]  ;;  %v6847_v36 = vld [vmem:[%s7330_s6 + $0x260] sm:$0xff]  ;;  %v6848_v40 = vld [vmem:[%s7330_s6 + $0x268] sm:$0xff] }
  0xb2   : > { %6624 = vmatmul.msk.bf16.vlgmr.msra.gmra.mxu0 %vm3568_vm0, %v6771_v18  ;;  %6660 = vmatmul.msk.bf16.vlgmr.msra.gmra.mxu1 %vm3568_vm0, %v6807_v19  ;;  %v6883_v37 = vld [vmem:[%s7330_s6 + $0x380] sm:$0xff]  ;;  %v6884_v41 = vld [vmem:[%s7330_s6 + $0x388] sm:$0xff]  ;;  %v6777_v42 = vld [vmem:[%s7330_s6 + $0x30] sm:$0xff] }
  0xb3   : > { %6696 = vmatmul.msk.bf16.vlgmr.msra.gmra.mxu2 %vm3568_vm0, %v6843_v20  ;;  %6732 = vmatmul.msk.bf16.vlgmr.msra.gmra.mxu3 %vm3568_vm0, %v6879_v21  ;;  %v6813_v43 = vld [vmem:[%s7330_s6 + $0x150] sm:$0xff]  ;;  %v6778_v46 = vld [vmem:[%s7330_s6 + $0x38] sm:$0xff]  ;;  %v6779_v50 = vld [vmem:[%s7330_s6 + $0x40] sm:$0xff] }
  0xb4   : > { %v6849_v44 = vld [vmem:[%s7330_s6 + $0x270] sm:$0xff]  ;;  %v6814_v47 = vld [vmem:[%s7330_s6 + $0x158] sm:$0xff]  ;;  %v6815_v51 = vld [vmem:[%s7330_s6 + $0x160] sm:$0xff] }
  0xb5   : > { %v6885_v45 = vld [vmem:[%s7330_s6 + $0x390] sm:$0xff]  ;;  %v6850_v48 = vld [vmem:[%s7330_s6 + $0x278] sm:$0xff]  ;;  %v6851_v54 = vld [vmem:[%s7330_s6 + $0x280] sm:$0xff] }
  0xb6   : > { %v6886_v49 = vld [vmem:[%s7330_s6 + $0x398] sm:$0xff]  ;;  %v6887_v55 = vld [vmem:[%s7330_s6 + $0x3a0] sm:$0xff]  ;;  %v6780_v17 = vld [vmem:[%s7330_s6 + $0x48] sm:$0xff] }
  0xb7   : > { %v4730_v56 = vld [vmem:[%s8231_s2] sm:$0x7]  ;;  %v6816_v18 = vld [vmem:[%s7330_s6 + $0x168] sm:$0xff] }
  0xb8   : > { %vm5596_vm1 = vcmp.ge.f32.partialorder %v4730_v56, 0.0  ;;  %v7409_v62 = vperm.slane %v4730_v56, 0  ;;  %v7419_v12 = vperm.slane %v4730_v56, 1 }
  0xb9   : > { %v5597_v1 = vsel %vm5596_vm1, 1, %v6974_v0  ;;  %v6817_v0 = vld [vmem:[%s7330_s6 + $0x170] sm:$0xff] }
  0xba   : > { %v5598_v6 = vperm.slane %v5597_v1, 1 }
  0xbc   : > { %vm7415_vm2 = vcmp.eq.s32.totalorder %v5598_v6, 1 }
  0xc2   : > { %6625 = vmatmul.msk.bf16.gmra.mxu0 %vm3568_vm0, %v6772_v22  ;;  %6661 = vmatmul.msk.bf16.gmra.mxu1 %vm3568_vm0, %v6808_v23 }
  0xc3   : > { %6697 = vmatmul.msk.bf16.gmra.mxu2 %vm3568_vm0, %v6844_v24  ;;  %6733 = vmatmul.msk.bf16.gmra.mxu3 %vm3568_vm0, %v6880_v25  ;;  %v6852_v25 = vld [vmem:[%s7330_s6 + $0x288] sm:$0xff] }
  0xd2   : > { %6626 = vmatmul.msk.bf16.gmra.mxu0 %vm3568_vm0, %v6773_v26  ;;  %6662 = vmatmul.msk.bf16.gmra.mxu1 %vm3568_vm0, %v6809_v27  ;;  %v6888_v26 = vld [vmem:[%s7330_s6 + $0x3a8] sm:$0xff]  ;;  %v7425_v27 = vperm.slane %v4730_v56, 2 }
  0xd3   : > { %6698 = vmatmul.msk.bf16.gmra.mxu2 %vm3568_vm0, %v6845_v28  ;;  %6734 = vmatmul.msk.bf16.gmra.mxu3 %vm3568_vm0, %v6881_v29 }
  0xe2   : > { %6627 = vmatmul.msk.bf16.gmra.mxu0 %vm3568_vm0, %v6774_v30  ;;  %6663 = vmatmul.msk.bf16.gmra.mxu1 %vm3568_vm0, %v6810_v31 }
  0xe3   : > { %6699 = vmatmul.msk.bf16.gmra.mxu2 %vm3568_vm0, %v6846_v32  ;;  %6735 = vmatmul.msk.bf16.gmra.mxu3 %vm3568_vm0, %v6882_v33 }
  0xf2   : > { %6628 = vmatmul.msk.bf16.gmra.mxu0 %vm3568_vm0, %v6775_v34  ;;  %6664 = vmatmul.msk.bf16.gmra.mxu1 %vm3568_vm0, %v6811_v35 }
  0xf3   : > { %6700 = vmatmul.msk.bf16.gmra.mxu2 %vm3568_vm0, %v6847_v36  ;;  %6736 = vmatmul.msk.bf16.gmra.mxu3 %vm3568_vm0, %v6883_v37 }
 0x102   : > { %6629 = vmatmul.msk.bf16.gmra.mxu0 %vm3568_vm0, %v6776_v38  ;;  %6665 = vmatmul.msk.bf16.gmra.mxu1 %vm3568_vm0, %v6812_v39 }
 0x103   : > { %6701 = vmatmul.msk.bf16.gmra.mxu2 %vm3568_vm0, %v6848_v40  ;;  %6737 = vmatmul.msk.bf16.gmra.mxu3 %vm3568_vm0, %v6884_v41 }
 0x112   : > { %6630 = vmatmul.msk.bf16.gmra.mxu0 %vm3568_vm0, %v6777_v42  ;;  %6666 = vmatmul.msk.bf16.gmra.mxu1 %vm3568_vm0, %v6813_v43 }
 0x113   : > { %6702 = vmatmul.msk.bf16.gmra.mxu2 %vm3568_vm0, %v6849_v44  ;;  %6738 = vmatmul.msk.bf16.gmra.mxu3 %vm3568_vm0, %v6885_v45 }
 0x122   : > { %6631 = vmatmul.msk.bf16.gmra.mxu0 %vm3568_vm0, %v6778_v46  ;;  %6667 = vmatmul.msk.bf16.gmra.mxu1 %vm3568_vm0, %v6814_v47 }
 0x123   : > { %6703 = vmatmul.msk.bf16.gmra.mxu2 %vm3568_vm0, %v6850_v48  ;;  %6739 = vmatmul.msk.bf16.gmra.mxu3 %vm3568_vm0, %v6886_v49 }
 0x12f   : > { %v4010_v52 = vpop.f32.mrf.mxu0  ;;  %v4190_v53 = vpop.f32.mrf.mxu1 }
 0x130   : > { %v4731_v57 = vmax.f32 %v4010_v52, %v4190_v53  ;;  %v5020_v58 = vmin.f32 %v4010_v52, %v4190_v53 }
 0x132   : > { %6632 = vmatmul.msk.bf16.gmra.mxu0 %vm3568_vm0, %v6779_v50  ;;  %6668 = vmatmul.msk.bf16.gmra.mxu1 %vm3568_vm0, %v6815_v51 }
 0x133   : > { %6704 = vmatmul.msk.bf16.gmra.mxu2 %vm3568_vm0, %v6851_v54  ;;  %6740 = vmatmul.msk.bf16.gmra.mxu3 %vm3568_vm0, %v6887_v55 }
 0x136   : > { %v4370_v59 = vpop.f32.mrf.mxu2  ;;  %v4550_v60 = vpop.f32.mrf.mxu3 }
 0x137   : > { %v4803_v61 = vmax.f32 %v4370_v59, %v4550_v60  ;;  %v5092_v63 = vmin.f32 %v4370_v59, %v4550_v60  ;;  %v4012_v2 = vpop.f32.mrf.mxu0  ;;  %v4192_v3 = vpop.f32.mrf.mxu1 }
 0x138   : > { %v4732_v13 = vmax.f32 %v4012_v2, %v4192_v3  ;;  %v5021_v14 = vmin.f32 %v4012_v2, %v4192_v3 }
 0x139   : > { %v4875_v4 = vmax.f32 %v4731_v57, %v4803_v61  ;;  %v5164_v5 = vmin.f32 %v5020_v58, %v5092_v63  ;;  %v6781_v63 = vld [vmem:[%s7330_s6 + $0x50] sm:$0xff] }
 0x13b   : > { %v4948_v7 = vadd.f32 %v7409_v62, %v4875_v4  ;;  %v5236_v8 = vadd.f32 %v5164_v5, %v7409_v62 }
 0x13d   : > { %v5308_v9 = vmul.f32 0.05, %v4948_v7  ;;  %v5452_v10 = vmul.f32 0.05, %v5236_v8 }
 0x13e   : > { %v4372_v15 = vpop.f32.mrf.mxu2  ;;  %v4552_v16 = vpop.f32.mrf.mxu3 }
 0x13f   : > { %v5380_v19 = vmax.f32 %v4948_v7, %v5308_v9  ;;  %v5524_v20 = vmax.f32 %v5236_v8, %v5452_v10  ;;  %v4804_v21 = vmax.f32 %v4372_v15, %v4552_v16  ;;  %v5093_v22 = vmin.f32 %v4372_v15, %v4552_v16  ;;  %v4015_v23 = vpop.f32.mrf.mxu0  ;;  %v4195_v24 = vpop.f32.mrf.mxu1  ;;  %v6853_v7 = vld [vmem:[%s7330_s6 + $0x290] sm:$0xff] }
 0x140   : > { %v4733_v37 = vmax.f32 %v4015_v23, %v4195_v24  ;;  %v5022_v38 = vmin.f32 %v4015_v23, %v4195_v24  ;;  %v6889_v8 = vld [vmem:[%s7330_s6 + $0x3b0] sm:$0xff] }
 0x141   : > { %v5600_v28 = vsel %vm7415_vm2, %v5380_v19, %v5524_v20  ;;  %v4876_v29 = vmax.f32 %v4732_v13, %v4804_v21  ;;  %v5165_v30 = vmin.f32 %v5021_v14, %v5093_v22 }
 0x142   : > { %v5673_v31 = vmul.f32 %v7419_v12, %v5600_v28  ;;  %6633 = vmatmul.msk.bf16.gmra.mxu0 %vm3568_vm0, %v6780_v17  ;;  %6669 = vmatmul.msk.bf16.gmra.mxu1 %vm3568_vm0, %v6816_v18 }
 0x143   : > { %v4949_v32 = vadd.f32 %v7409_v62, %v4876_v29  ;;  %v5237_v33 = vadd.f32 %v5165_v30, %v7409_v62  ;;  %6705 = vmatmul.msk.bf16.gmra.mxu2 %vm3568_vm0, %v6852_v25  ;;  %6741 = vmatmul.msk.bf16.gmra.mxu3 %vm3568_vm0, %v6888_v26 }
 0x144   : > { %v5746_v34 = vadd.f32 %v7425_v27, %v5673_v31 }
 0x145   : > { %v5309_v35 = vmul.f32 0.05, %v4949_v32  ;;  %v5453_v36 = vmul.f32 0.05, %v5237_v33 }
 0x146   : > { %v5818_v39 = vpack.c.bf16 %v5746_v34, %v5746_v34  ;;  %v4375_v40 = vpop.f32.mrf.mxu2  ;;  %v4555_v41 = vpop.f32.mrf.mxu3 }
 0x147   : > { %v5381_v42 = vmax.f32 %v4949_v32, %v5309_v35  ;;  %v5525_v43 = vmax.f32 %v5237_v33, %v5453_v36  ;;  %v4805_v44 = vmax.f32 %v4375_v40, %v4555_v41  ;;  %v5094_v45 = vmin.f32 %v4375_v40, %v4555_v41  ;;  %v4017_v46 = vpop.f32.mrf.mxu0  ;;  %v4197_v47 = vpop.f32.mrf.mxu1 }
 0x148   : > { %5891 = vst.msk [vmem:[%s7441_s14] sm:$0xf] %vm5890_vm3, %v5818_v39  ;;  %v4734_v58 = vmax.f32 %v4017_v46, %v4197_v47  ;;  %v5023_v59 = vmin.f32 %v4017_v46, %v4197_v47  ;;  %v6782_v46 = vld [vmem:[%s7330_s6 + $0x58] sm:$0xff] }
 0x149   : > { %v5601_v48 = vsel %vm7415_vm2, %v5381_v42, %v5525_v43  ;;  %v4877_v49 = vmax.f32 %v4733_v37, %v4805_v44  ;;  %v5166_v50 = vmin.f32 %v5022_v38, %v5094_v45  ;;  %v6818_v47 = vld [vmem:[%s7330_s6 + $0x178] sm:$0xff] }
 0x14a   : > { %v5674_v51 = vmul.f32 %v7419_v12, %v5601_v48 }
 0x14b   : > { %v4950_v52 = vadd.f32 %v7409_v62, %v4877_v49  ;;  %v5238_v53 = vadd.f32 %v5166_v50, %v7409_v62 }
 0x14c   : > { %v5747_v54 = vadd.f32 %v7425_v27, %v5674_v51 }
 0x14d   : > { %v5310_v55 = vmul.f32 0.05, %v4950_v52  ;;  %v5454_v56 = vmul.f32 0.05, %v5238_v53 }
 0x14e   : > { %v5819_v57 = vpack.c.bf16 %v5747_v54, %v5747_v54  ;;  %v4377_v60 = vpop.f32.mrf.mxu2  ;;  %v4557_v61 = vpop.f32.mrf.mxu3  ;;  %v6854_v54 = vld [vmem:[%s7330_s6 + $0x298] sm:$0xff] }
 0x14f   : > { %v5382_v1 = vmax.f32 %v4950_v52, %v5310_v55  ;;  %v5526_v2 = vmax.f32 %v5238_v53, %v5454_v56  ;;  %v4806_v3 = vmax.f32 %v4377_v60, %v4557_v61  ;;  %v5095_v4 = vmin.f32 %v4377_v60, %v4557_v61  ;;  %v4020_v5 = vpop.f32.mrf.mxu0  ;;  %v4200_v6 = vpop.f32.mrf.mxu1  ;;  %v6890_v55 = vld [vmem:[%s7330_s6 + $0x3b8] sm:$0xff] }
 0x150   : > { %5892 = vst.msk [vmem:[%s7441_s14 + $0x4] sm:$0xf] %vm5890_vm3, %v5819_v57  ;;  %v4735_v20 = vmax.f32 %v4020_v5, %v4200_v6  ;;  %v5024_v21 = vmin.f32 %v4020_v5, %v4200_v6 }
 0x151   : > { %v5602_v9 = vsel %vm7415_vm2, %v5382_v1, %v5526_v2  ;;  %v4878_v10 = vmax.f32 %v4734_v58, %v4806_v3  ;;  %v5167_v13 = vmin.f32 %v5023_v59, %v5095_v4 }
 0x152   : > { %v5675_v14 = vmul.f32 %v7419_v12, %v5602_v9  ;;  %6634 = vmatmul.msk.bf16.gmra.mxu0 %vm3568_vm0, %v6781_v63  ;;  %6670 = vmatmul.msk.bf16.gmra.mxu1 %vm3568_vm0, %v6817_v0 }
 0x153   : > { %v4951_v15 = vadd.f32 %v7409_v62, %v4878_v10  ;;  %v5239_v16 = vadd.f32 %v5167_v13, %v7409_v62  ;;  %6706 = vmatmul.msk.bf16.gmra.mxu2 %vm3568_vm0, %v6853_v7  ;;  %6742 = vmatmul.msk.bf16.gmra.mxu3 %vm3568_vm0, %v6889_v8 }
 0x154   : > { %v5748_v17 = vadd.f32 %v7425_v27, %v5675_v14 }
 0x155   : > { %v5311_v18 = vmul.f32 0.05, %v4951_v15  ;;  %v5455_v19 = vmul.f32 0.05, %v5239_v16 }
 0x156   : > { %v5820_v22 = vpack.c.bf16 %v5748_v17, %v5748_v17  ;;  %v4380_v23 = vpop.f32.mrf.mxu2  ;;  %v4560_v24 = vpop.f32.mrf.mxu3 }
 0x157   : > { %v5383_v25 = vmax.f32 %v4951_v15, %v5311_v18  ;;  %v5527_v26 = vmax.f32 %v5239_v16, %v5455_v19  ;;  %v4807_v28 = vmax.f32 %v4380_v23, %v4560_v24  ;;  %v5096_v29 = vmin.f32 %v4380_v23, %v4560_v24  ;;  %v4022_v30 = vpop.f32.mrf.mxu0  ;;  %v4202_v31 = vpop.f32.mrf.mxu1 }
 0x158   : > { %5893 = vst.msk [vmem:[%s7441_s14 + $0x8] sm:$0xf] %vm5890_vm3, %v5820_v22  ;;  %v4736_v42 = vmax.f32 %v4022_v30, %v4202_v31  ;;  %v5025_v43 = vmin.f32 %v4022_v30, %v4202_v31  ;;  %v6783_v30 = vld [vmem:[%s7330_s6 + $0x60] sm:$0xff] }
 0x159   : > { %v5603_v32 = vsel %vm7415_vm2, %v5383_v25, %v5527_v26  ;;  %v4879_v33 = vmax.f32 %v4735_v20, %v4807_v28  ;;  %v5168_v34 = vmin.f32 %v5024_v21, %v5096_v29  ;;  %v6819_v31 = vld [vmem:[%s7330_s6 + $0x180] sm:$0xff] }
 0x15a   : > { %v5676_v35 = vmul.f32 %v7419_v12, %v5603_v32 }
 0x15b   : > { %v4952_v36 = vadd.f32 %v7409_v62, %v4879_v33  ;;  %v5240_v37 = vadd.f32 %v5168_v34, %v7409_v62 }
 0x15c   : > { %v5749_v38 = vadd.f32 %v7425_v27, %v5676_v35 }
 0x15d   : > { %v5312_v39 = vmul.f32 0.05, %v4952_v36  ;;  %v5456_v40 = vmul.f32 0.05, %v5240_v37 }
 0x15e   : > { %v5821_v41 = vpack.c.bf16 %v5749_v38, %v5749_v38  ;;  %v4382_v44 = vpop.f32.mrf.mxu2  ;;  %v4562_v45 = vpop.f32.mrf.mxu3  ;;  %v6855_v38 = vld [vmem:[%s7330_s6 + $0x2a0] sm:$0xff] }
 0x15f   : > { %v5384_v48 = vmax.f32 %v4952_v36, %v5312_v39  ;;  %v5528_v49 = vmax.f32 %v5240_v37, %v5456_v40  ;;  %v4808_v50 = vmax.f32 %v4382_v44, %v4562_v45  ;;  %v5097_v51 = vmin.f32 %v4382_v44, %v4562_v45  ;;  %v4025_v52 = vpop.f32.mrf.mxu0  ;;  %v4205_v53 = vpop.f32.mrf.mxu1  ;;  %v6891_v39 = vld [vmem:[%s7330_s6 + $0x3c0] sm:$0xff] }
 0x160   : > { %5894 = vst.msk [vmem:[%s7441_s14 + $0xc] sm:$0xf] %vm5890_vm3, %v5821_v41  ;;  %v4737_v2 = vmax.f32 %v4025_v52, %v4205_v53  ;;  %v5026_v3 = vmin.f32 %v4025_v52, %v4205_v53 }
 0x161   : > { %v5604_v56 = vsel %vm7415_vm2, %v5384_v48, %v5528_v49  ;;  %v4880_v57 = vmax.f32 %v4736_v42, %v4808_v50  ;;  %v5169_v58 = vmin.f32 %v5025_v43, %v5097_v51 }
 0x162   : > { %v5677_v59 = vmul.f32 %v7419_v12, %v5604_v56  ;;  %6635 = vmatmul.msk.bf16.gmra.mxu0 %vm3568_vm0, %v6782_v46  ;;  %6671 = vmatmul.msk.bf16.gmra.mxu1 %vm3568_vm0, %v6818_v47 }
 0x163   : > { %v4953_v60 = vadd.f32 %v7409_v62, %v4880_v57  ;;  %v5241_v61 = vadd.f32 %v5169_v58, %v7409_v62  ;;  %6707 = vmatmul.msk.bf16.gmra.mxu2 %vm3568_vm0, %v6854_v54  ;;  %6743 = vmatmul.msk.bf16.gmra.mxu3 %vm3568_vm0, %v6890_v55 }
 0x164   : > { %v5750_v63 = vadd.f32 %v7425_v27, %v5677_v59 }
 0x165   : > { %v5313_v0 = vmul.f32 0.05, %v4953_v60  ;;  %v5457_v1 = vmul.f32 0.05, %v5241_v61 }
 0x166   : > { %v5822_v4 = vpack.c.bf16 %v5750_v63, %v5750_v63  ;;  %v4385_v5 = vpop.f32.mrf.mxu2  ;;  %v4565_v6 = vpop.f32.mrf.mxu3 }
 0x167   : > { %v5385_v7 = vmax.f32 %v4953_v60, %v5313_v0  ;;  %v5529_v8 = vmax.f32 %v5241_v61, %v5457_v1  ;;  %v4809_v9 = vmax.f32 %v4385_v5, %v4565_v6  ;;  %v5098_v10 = vmin.f32 %v4385_v5, %v4565_v6  ;;  %v4027_v13 = vpop.f32.mrf.mxu0  ;;  %v4207_v14 = vpop.f32.mrf.mxu1 }
 0x168   : > { %5895 = vst.msk [vmem:[%s7441_s14 + $0x10] sm:$0xf] %vm5890_vm3, %v5822_v4  ;;  %v4738_v25 = vmax.f32 %v4027_v13, %v4207_v14  ;;  %v5027_v26 = vmin.f32 %v4027_v13, %v4207_v14  ;;  %v6784_v13 = vld [vmem:[%s7330_s6 + $0x68] sm:$0xff] }
 0x169   : > { %v5605_v15 = vsel %vm7415_vm2, %v5385_v7, %v5529_v8  ;;  %v4881_v16 = vmax.f32 %v4737_v2, %v4809_v9  ;;  %v5170_v17 = vmin.f32 %v5026_v3, %v5098_v10  ;;  %v6820_v14 = vld [vmem:[%s7330_s6 + $0x188] sm:$0xff] }
 0x16a   : > { %v5678_v18 = vmul.f32 %v7419_v12, %v5605_v15 }
 0x16b   : > { %v4954_v19 = vadd.f32 %v7409_v62, %v4881_v16  ;;  %v5242_v20 = vadd.f32 %v5170_v17, %v7409_v62 }
 0x16c   : > { %v5751_v21 = vadd.f32 %v7425_v27, %v5678_v18 }
 0x16d   : > { %v5314_v22 = vmul.f32 0.05, %v4954_v19  ;;  %v5458_v23 = vmul.f32 0.05, %v5242_v20 }
 0x16e   : > { %v5823_v24 = vpack.c.bf16 %v5751_v21, %v5751_v21  ;;  %v4387_v28 = vpop.f32.mrf.mxu2  ;;  %v4567_v29 = vpop.f32.mrf.mxu3  ;;  %v6856_v21 = vld [vmem:[%s7330_s6 + $0x2a8] sm:$0xff] }
 0x16f   : > { %v5386_v32 = vmax.f32 %v4954_v19, %v5314_v22  ;;  %v5530_v33 = vmax.f32 %v5242_v20, %v5458_v23  ;;  %v4810_v34 = vmax.f32 %v4387_v28, %v4567_v29  ;;  %v5099_v35 = vmin.f32 %v4387_v28, %v4567_v29  ;;  %v4030_v36 = vpop.f32.mrf.mxu0  ;;  %v4210_v37 = vpop.f32.mrf.mxu1  ;;  %v6892_v22 = vld [vmem:[%s7330_s6 + $0x3c8] sm:$0xff] }
 0x170   : > { %5896 = vst.msk [vmem:[%s7441_s14 + $0x14] sm:$0xf] %vm5890_vm3, %v5823_v24  ;;  %v4739_v49 = vmax.f32 %v4030_v36, %v4210_v37  ;;  %v5028_v50 = vmin.f32 %v4030_v36, %v4210_v37 }
 0x171   : > { %v5606_v40 = vsel %vm7415_vm2, %v5386_v32, %v5530_v33  ;;  %v4882_v41 = vmax.f32 %v4738_v25, %v4810_v34  ;;  %v5171_v42 = vmin.f32 %v5027_v26, %v5099_v35 }
 0x172   : > { %v5679_v43 = vmul.f32 %v7419_v12, %v5606_v40  ;;  %6636 = vmatmul.msk.bf16.gmra.mxu0 %vm3568_vm0, %v6783_v30  ;;  %6672 = vmatmul.msk.bf16.gmra.mxu1 %vm3568_vm0, %v6819_v31 }
 0x173   : > { %v4955_v44 = vadd.f32 %v7409_v62, %v4882_v41  ;;  %v5243_v45 = vadd.f32 %v5171_v42, %v7409_v62  ;;  %6708 = vmatmul.msk.bf16.gmra.mxu2 %vm3568_vm0, %v6855_v38  ;;  %6744 = vmatmul.msk.bf16.gmra.mxu3 %vm3568_vm0, %v6891_v39 }
 0x174   : > { %v5752_v46 = vadd.f32 %v7425_v27, %v5679_v43 }
 0x175   : > { %v5315_v47 = vmul.f32 0.05, %v4955_v44  ;;  %v5459_v48 = vmul.f32 0.05, %v5243_v45 }
 0x176   : > { %v5824_v51 = vpack.c.bf16 %v5752_v46, %v5752_v46  ;;  %v4390_v52 = vpop.f32.mrf.mxu2  ;;  %v4570_v53 = vpop.f32.mrf.mxu3 }
 0x177   : > { %v5387_v54 = vmax.f32 %v4955_v44, %v5315_v47  ;;  %v5531_v55 = vmax.f32 %v5243_v45, %v5459_v48  ;;  %v4811_v56 = vmax.f32 %v4390_v52, %v4570_v53  ;;  %v5100_v57 = vmin.f32 %v4390_v52, %v4570_v53  ;;  %v4032_v58 = vpop.f32.mrf.mxu0  ;;  %v4212_v59 = vpop.f32.mrf.mxu1 }
 0x178   : > { %5897 = vst.msk [vmem:[%s7441_s14 + $0x18] sm:$0xf] %vm5890_vm3, %v5824_v51  ;;  %v4740_v7 = vmax.f32 %v4032_v58, %v4212_v59  ;;  %v5029_v8 = vmin.f32 %v4032_v58, %v4212_v59  ;;  %v6785_v58 = vld [vmem:[%s7330_s6 + $0x70] sm:$0xff] }
 0x179   : > { %v5607_v60 = vsel %vm7415_vm2, %v5387_v54, %v5531_v55  ;;  %v4883_v61 = vmax.f32 %v4739_v49, %v4811_v56  ;;  %v5172_v63 = vmin.f32 %v5028_v50, %v5100_v57  ;;  %v6821_v59 = vld [vmem:[%s7330_s6 + $0x190] sm:$0xff] }
 0x17a   : > { %v5680_v0 = vmul.f32 %v7419_v12, %v5607_v60 }
 0x17b   : > { %v4956_v1 = vadd.f32 %v7409_v62, %v4883_v61  ;;  %v5244_v2 = vadd.f32 %v5172_v63, %v7409_v62 }
 0x17c   : > { %v5753_v3 = vadd.f32 %v7425_v27, %v5680_v0 }
 0x17d   : > { %v5316_v4 = vmul.f32 0.05, %v4956_v1  ;;  %v5460_v5 = vmul.f32 0.05, %v5244_v2 }
 0x17e   : > { %v5825_v6 = vpack.c.bf16 %v5753_v3, %v5753_v3  ;;  %v4392_v9 = vpop.f32.mrf.mxu2  ;;  %v4572_v10 = vpop.f32.mrf.mxu3  ;;  %v6857_v3 = vld [vmem:[%s7330_s6 + $0x2b0] sm:$0xff] }
 0x17f   : > { %v5388_v15 = vmax.f32 %v4956_v1, %v5316_v4  ;;  %v5532_v16 = vmax.f32 %v5244_v2, %v5460_v5  ;;  %v4812_v17 = vmax.f32 %v4392_v9, %v4572_v10  ;;  %v5101_v18 = vmin.f32 %v4392_v9, %v4572_v10  ;;  %v4035_v19 = vpop.f32.mrf.mxu0  ;;  %v4215_v20 = vpop.f32.mrf.mxu1  ;;  %v6893_v4 = vld [vmem:[%s7330_s6 + $0x3d0] sm:$0xff] }
 0x180   : > { %5898 = vst.msk [vmem:[%s7441_s14 + $0x1c] sm:$0xf] %vm5890_vm3, %v5825_v6  ;;  %v4741_v33 = vmax.f32 %v4035_v19, %v4215_v20  ;;  %v5030_v34 = vmin.f32 %v4035_v19, %v4215_v20 }
 0x181   : > { %v5608_v23 = vsel %vm7415_vm2, %v5388_v15, %v5532_v16  ;;  %v4884_v24 = vmax.f32 %v4740_v7, %v4812_v17  ;;  %v5173_v25 = vmin.f32 %v5029_v8, %v5101_v18 }
 0x182   : > { %v5681_v26 = vmul.f32 %v7419_v12, %v5608_v23  ;;  %6637 = vmatmul.msk.bf16.gmra.mxu0 %vm3568_vm0, %v6784_v13  ;;  %6673 = vmatmul.msk.bf16.gmra.mxu1 %vm3568_vm0, %v6820_v14 }
 0x183   : > { %v4957_v28 = vadd.f32 %v7409_v62, %v4884_v24  ;;  %v5245_v29 = vadd.f32 %v5173_v25, %v7409_v62  ;;  %6709 = vmatmul.msk.bf16.gmra.mxu2 %vm3568_vm0, %v6856_v21  ;;  %6745 = vmatmul.msk.bf16.gmra.mxu3 %vm3568_vm0, %v6892_v22 }
 0x184   : > { %v5754_v30 = vadd.f32 %v7425_v27, %v5681_v26 }
 0x185   : > { %v5317_v31 = vmul.f32 0.05, %v4957_v28  ;;  %v5461_v32 = vmul.f32 0.05, %v5245_v29 }
 0x186   : > { %v5826_v35 = vpack.c.bf16 %v5754_v30, %v5754_v30  ;;  %v4395_v36 = vpop.f32.mrf.mxu2  ;;  %v4575_v37 = vpop.f32.mrf.mxu3 }
 0x187   : > { %v5389_v38 = vmax.f32 %v4957_v28, %v5317_v31  ;;  %v5533_v39 = vmax.f32 %v5245_v29, %v5461_v32  ;;  %v4813_v40 = vmax.f32 %v4395_v36, %v4575_v37  ;;  %v5102_v41 = vmin.f32 %v4395_v36, %v4575_v37  ;;  %v4037_v42 = vpop.f32.mrf.mxu0  ;;  %v4217_v43 = vpop.f32.mrf.mxu1 }
 0x188   : > { %5899 = vst.msk [vmem:[%s7441_s14 + $0x20] sm:$0xf] %vm5890_vm3, %v5826_v35  ;;  %v4742_v54 = vmax.f32 %v4037_v42, %v4217_v43  ;;  %v5031_v55 = vmin.f32 %v4037_v42, %v4217_v43  ;;  %v6786_v42 = vld [vmem:[%s7330_s6 + $0x78] sm:$0xff] }
 0x189   : > { %v5609_v44 = vsel %vm7415_vm2, %v5389_v38, %v5533_v39  ;;  %v4885_v45 = vmax.f32 %v4741_v33, %v4813_v40  ;;  %v5174_v46 = vmin.f32 %v5030_v34, %v5102_v41  ;;  %v6822_v43 = vld [vmem:[%s7330_s6 + $0x198] sm:$0xff] }
 0x18a   : > { %v5682_v47 = vmul.f32 %v7419_v12, %v5609_v44 }
 0x18b   : > { %v4958_v48 = vadd.f32 %v7409_v62, %v4885_v45  ;;  %v5246_v49 = vadd.f32 %v5174_v46, %v7409_v62 }
 0x18c   : > { %v5755_v50 = vadd.f32 %v7425_v27, %v5682_v47 }
 0x18d   : > { %v5318_v51 = vmul.f32 0.05, %v4958_v48  ;;  %v5462_v52 = vmul.f32 0.05, %v5246_v49 }
 0x18e   : > { %v5827_v53 = vpack.c.bf16 %v5755_v50, %v5755_v50  ;;  %v4397_v56 = vpop.f32.mrf.mxu2  ;;  %v4577_v57 = vpop.f32.mrf.mxu3  ;;  %v6858_v50 = vld [vmem:[%s7330_s6 + $0x2b8] sm:$0xff] }
 0x18f   : > { %v5390_v60 = vmax.f32 %v4958_v48, %v5318_v51  ;;  %v5534_v61 = vmax.f32 %v5246_v49, %v5462_v52  ;;  %v4814_v63 = vmax.f32 %v4397_v56, %v4577_v57  ;;  %v5103_v0 = vmin.f32 %v4397_v56, %v4577_v57  ;;  %v4040_v1 = vpop.f32.mrf.mxu0  ;;  %v4220_v2 = vpop.f32.mrf.mxu1  ;;  %v6894_v51 = vld [vmem:[%s7330_s6 + $0x3d8] sm:$0xff] }
 0x190   : > { %5900 = vst.msk [vmem:[%s7441_s14 + $0x24] sm:$0xf] %vm5890_vm3, %v5827_v53  ;;  %v4743_v16 = vmax.f32 %v4040_v1, %v4220_v2  ;;  %v5032_v17 = vmin.f32 %v4040_v1, %v4220_v2 }
 0x191   : > { %v5610_v5 = vsel %vm7415_vm2, %v5390_v60, %v5534_v61  ;;  %v4886_v6 = vmax.f32 %v4742_v54, %v4814_v63  ;;  %v5175_v7 = vmin.f32 %v5031_v55, %v5103_v0 }
 0x192   : > { %v5683_v8 = vmul.f32 %v7419_v12, %v5610_v5  ;;  %6638 = vmatmul.msk.bf16.gmra.mxu0 %vm3568_vm0, %v6785_v58  ;;  %6674 = vmatmul.msk.bf16.gmra.mxu1 %vm3568_vm0, %v6821_v59 }
 0x193   : > { %v4959_v9 = vadd.f32 %v7409_v62, %v4886_v6  ;;  %v5247_v10 = vadd.f32 %v5175_v7, %v7409_v62  ;;  %6710 = vmatmul.msk.bf16.gmra.mxu2 %vm3568_vm0, %v6857_v3  ;;  %6746 = vmatmul.msk.bf16.gmra.mxu3 %vm3568_vm0, %v6893_v4 }
 0x194   : > { %v5756_v13 = vadd.f32 %v7425_v27, %v5683_v8 }
 0x195   : > { %v5319_v14 = vmul.f32 0.05, %v4959_v9  ;;  %v5463_v15 = vmul.f32 0.05, %v5247_v10 }
 0x196   : > { %v5828_v18 = vpack.c.bf16 %v5756_v13, %v5756_v13  ;;  %v4400_v19 = vpop.f32.mrf.mxu2  ;;  %v4580_v20 = vpop.f32.mrf.mxu3 }
 0x197   : > { %v5391_v21 = vmax.f32 %v4959_v9, %v5319_v14  ;;  %v5535_v22 = vmax.f32 %v5247_v10, %v5463_v15  ;;  %v4815_v23 = vmax.f32 %v4400_v19, %v4580_v20  ;;  %v5104_v24 = vmin.f32 %v4400_v19, %v4580_v20  ;;  %v4042_v25 = vpop.f32.mrf.mxu0  ;;  %v4222_v26 = vpop.f32.mrf.mxu1 }
 0x198   : > { %5901 = vst.msk [vmem:[%s7441_s14 + $0x28] sm:$0xf] %vm5890_vm3, %v5828_v18  ;;  %v4744_v38 = vmax.f32 %v4042_v25, %v4222_v26  ;;  %v5033_v39 = vmin.f32 %v4042_v25, %v4222_v26  ;;  %v6787_v25 = vld [vmem:[%s7330_s6 + $0x80] sm:$0xff] }
 0x199   : > { %v5611_v28 = vsel %vm7415_vm2, %v5391_v21, %v5535_v22  ;;  %v4887_v29 = vmax.f32 %v4743_v16, %v4815_v23  ;;  %v5176_v30 = vmin.f32 %v5032_v17, %v5104_v24  ;;  %v6823_v26 = vld [vmem:[%s7330_s6 + $0x1a0] sm:$0xff] }
 0x19a   : > { %v5684_v31 = vmul.f32 %v7419_v12, %v5611_v28 }
 0x19b   : > { %v4960_v32 = vadd.f32 %v7409_v62, %v4887_v29  ;;  %v5248_v33 = vadd.f32 %v5176_v30, %v7409_v62 }
 0x19c   : > { %v5757_v34 = vadd.f32 %v7425_v27, %v5684_v31 }
 0x19d   : > { %v5320_v35 = vmul.f32 0.05, %v4960_v32  ;;  %v5464_v36 = vmul.f32 0.05, %v5248_v33 }
 0x19e   : > { %v5829_v37 = vpack.c.bf16 %v5757_v34, %v5757_v34  ;;  %v4402_v40 = vpop.f32.mrf.mxu2  ;;  %v4582_v41 = vpop.f32.mrf.mxu3  ;;  %v6859_v34 = vld [vmem:[%s7330_s6 + $0x2c0] sm:$0xff] }
 0x19f   : > { %v5392_v44 = vmax.f32 %v4960_v32, %v5320_v35  ;;  %v5536_v45 = vmax.f32 %v5248_v33, %v5464_v36  ;;  %v4816_v46 = vmax.f32 %v4402_v40, %v4582_v41  ;;  %v5105_v47 = vmin.f32 %v4402_v40, %v4582_v41  ;;  %v4045_v48 = vpop.f32.mrf.mxu0  ;;  %v4225_v49 = vpop.f32.mrf.mxu1  ;;  %v6895_v35 = vld [vmem:[%s7330_s6 + $0x3e0] sm:$0xff] }
 0x1a0   : > { %5902 = vst.msk [vmem:[%s7441_s14 + $0x2c] sm:$0xf] %vm5890_vm3, %v5829_v37  ;;  %v4745_v61 = vmax.f32 %v4045_v48, %v4225_v49  ;;  %v5034_v63 = vmin.f32 %v4045_v48, %v4225_v49 }
 0x1a1   : > { %v5612_v52 = vsel %vm7415_vm2, %v5392_v44, %v5536_v45  ;;  %v4888_v53 = vmax.f32 %v4744_v38, %v4816_v46  ;;  %v5177_v54 = vmin.f32 %v5033_v39, %v5105_v47 }
 0x1a2   : > { %v5685_v55 = vmul.f32 %v7419_v12, %v5612_v52  ;;  %6639 = vmatmul.msk.bf16.gmra.mxu0 %vm3568_vm0, %v6786_v42  ;;  %6675 = vmatmul.msk.bf16.gmra.mxu1 %vm3568_vm0, %v6822_v43 }
 0x1a3   : > { %v4961_v56 = vadd.f32 %v7409_v62, %v4888_v53  ;;  %v5249_v57 = vadd.f32 %v5177_v54, %v7409_v62  ;;  %6711 = vmatmul.msk.bf16.gmra.mxu2 %vm3568_vm0, %v6858_v50  ;;  %6747 = vmatmul.msk.bf16.gmra.mxu3 %vm3568_vm0, %v6894_v51 }
 0x1a4   : > { %v5758_v58 = vadd.f32 %v7425_v27, %v5685_v55 }
 0x1a5   : > { %v5321_v59 = vmul.f32 0.05, %v4961_v56  ;;  %v5465_v60 = vmul.f32 0.05, %v5249_v57 }
 0x1a6   : > { %v5830_v0 = vpack.c.bf16 %v5758_v58, %v5758_v58  ;;  %v4405_v1 = vpop.f32.mrf.mxu2  ;;  %v4585_v2 = vpop.f32.mrf.mxu3 }
 0x1a7   : > { %v5393_v3 = vmax.f32 %v4961_v56, %v5321_v59  ;;  %v5537_v4 = vmax.f32 %v5249_v57, %v5465_v60  ;;  %v4817_v5 = vmax.f32 %v4405_v1, %v4585_v2  ;;  %v5106_v6 = vmin.f32 %v4405_v1, %v4585_v2  ;;  %v4047_v7 = vpop.f32.mrf.mxu0  ;;  %v4227_v8 = vpop.f32.mrf.mxu1 }
 0x1a8   : > { %5903 = vst.msk [vmem:[%s7441_s14 + $0x30] sm:$0xf] %vm5890_vm3, %v5830_v0  ;;  %v4746_v21 = vmax.f32 %v4047_v7, %v4227_v8  ;;  %v5035_v22 = vmin.f32 %v4047_v7, %v4227_v8  ;;  %v6788_v7 = vld [vmem:[%s7330_s6 + $0x88] sm:$0xff] }
 0x1a9   : > { %v5613_v9 = vsel %vm7415_vm2, %v5393_v3, %v5537_v4  ;;  %v4889_v10 = vmax.f32 %v4745_v61, %v4817_v5  ;;  %v5178_v13 = vmin.f32 %v5034_v63, %v5106_v6  ;;  %v6824_v8 = vld [vmem:[%s7330_s6 + $0x1a8] sm:$0xff] }
 0x1aa   : > { %v5686_v14 = vmul.f32 %v7419_v12, %v5613_v9 }
 0x1ab   : > { %v4962_v15 = vadd.f32 %v7409_v62, %v4889_v10  ;;  %v5250_v16 = vadd.f32 %v5178_v13, %v7409_v62 }
 0x1ac   : > { %v5759_v17 = vadd.f32 %v7425_v27, %v5686_v14 }
 0x1ad   : > { %v5322_v18 = vmul.f32 0.05, %v4962_v15  ;;  %v5466_v19 = vmul.f32 0.05, %v5250_v16 }
 0x1ae   : > { %v5831_v20 = vpack.c.bf16 %v5759_v17, %v5759_v17  ;;  %v4407_v23 = vpop.f32.mrf.mxu2  ;;  %v4587_v24 = vpop.f32.mrf.mxu3  ;;  %v6860_v17 = vld [vmem:[%s7330_s6 + $0x2c8] sm:$0xff] }
 0x1af   : > { %v5394_v28 = vmax.f32 %v4962_v15, %v5322_v18  ;;  %v5538_v29 = vmax.f32 %v5250_v16, %v5466_v19  ;;  %v4818_v30 = vmax.f32 %v4407_v23, %v4587_v24  ;;  %v5107_v31 = vmin.f32 %v4407_v23, %v4587_v24  ;;  %v4050_v32 = vpop.f32.mrf.mxu0  ;;  %v4230_v33 = vpop.f32.mrf.mxu1  ;;  %v6896_v18 = vld [vmem:[%s7330_s6 + $0x3e8] sm:$0xff] }
 0x1b0   : > { %5904 = vst.msk [vmem:[%s7441_s14 + $0x34] sm:$0xf] %vm5890_vm3, %v5831_v20  ;;  %v4747_v45 = vmax.f32 %v4050_v32, %v4230_v33  ;;  %v5036_v46 = vmin.f32 %v4050_v32, %v4230_v33 }
 0x1b1   : > { %v5614_v36 = vsel %vm7415_vm2, %v5394_v28, %v5538_v29  ;;  %v4890_v37 = vmax.f32 %v4746_v21, %v4818_v30  ;;  %v5179_v38 = vmin.f32 %v5035_v22, %v5107_v31 }
 0x1b2   : > { %v5687_v39 = vmul.f32 %v7419_v12, %v5614_v36  ;;  %6640 = vmatmul.msk.bf16.gmra.mxu0 %vm3568_vm0, %v6787_v25  ;;  %6676 = vmatmul.msk.bf16.gmra.mxu1 %vm3568_vm0, %v6823_v26 }
 0x1b3   : > { %v4963_v40 = vadd.f32 %v7409_v62, %v4890_v37  ;;  %v5251_v41 = vadd.f32 %v5179_v38, %v7409_v62  ;;  %6712 = vmatmul.msk.bf16.gmra.mxu2 %vm3568_vm0, %v6859_v34  ;;  %6748 = vmatmul.msk.bf16.gmra.mxu3 %vm3568_vm0, %v6895_v35 }
 0x1b4   : > { %v5760_v42 = vadd.f32 %v7425_v27, %v5687_v39 }
 0x1b5   : > { %v5323_v43 = vmul.f32 0.05, %v4963_v40  ;;  %v5467_v44 = vmul.f32 0.05, %v5251_v41 }
 0x1b6   : > { %v5832_v47 = vpack.c.bf16 %v5760_v42, %v5760_v42  ;;  %v4410_v48 = vpop.f32.mrf.mxu2  ;;  %v4590_v49 = vpop.f32.mrf.mxu3 }
 0x1b7   : > { %v5395_v50 = vmax.f32 %v4963_v40, %v5323_v43  ;;  %v5539_v51 = vmax.f32 %v5251_v41, %v5467_v44  ;;  %v4819_v52 = vmax.f32 %v4410_v48, %v4590_v49  ;;  %v5108_v53 = vmin.f32 %v4410_v48, %v4590_v49  ;;  %v4052_v54 = vpop.f32.mrf.mxu0  ;;  %v4232_v55 = vpop.f32.mrf.mxu1 }
 0x1b8   : > { %5905 = vst.msk [vmem:[%s7441_s14 + $0x38] sm:$0xf] %vm5890_vm3, %v5832_v47  ;;  %v4748_v3 = vmax.f32 %v4052_v54, %v4232_v55  ;;  %v5037_v4 = vmin.f32 %v4052_v54, %v4232_v55  ;;  %v6789_v54 = vld [vmem:[%s7330_s6 + $0x90] sm:$0xff] }
 0x1b9   : > { %v5615_v56 = vsel %vm7415_vm2, %v5395_v50, %v5539_v51  ;;  %v4891_v57 = vmax.f32 %v4747_v45, %v4819_v52  ;;  %v5180_v58 = vmin.f32 %v5036_v46, %v5108_v53  ;;  %v6825_v55 = vld [vmem:[%s7330_s6 + $0x1b0] sm:$0xff] }
 0x1ba   : > { %v5688_v59 = vmul.f32 %v7419_v12, %v5615_v56 }
 0x1bb   : > { %v4964_v60 = vadd.f32 %v7409_v62, %v4891_v57  ;;  %v5252_v61 = vadd.f32 %v5180_v58, %v7409_v62 }
 0x1bc   : > { %v5761_v63 = vadd.f32 %v7425_v27, %v5688_v59 }
 0x1bd   : > { %v5324_v0 = vmul.f32 0.05, %v4964_v60  ;;  %v5468_v1 = vmul.f32 0.05, %v5252_v61 }
 0x1be   : > { %v5833_v2 = vpack.c.bf16 %v5761_v63, %v5761_v63  ;;  %v4412_v5 = vpop.f32.mrf.mxu2  ;;  %v4592_v6 = vpop.f32.mrf.mxu3  ;;  %v6861_v63 = vld [vmem:[%s7330_s6 + $0x2d0] sm:$0xff] }
 0x1bf   : > { %v5396_v9 = vmax.f32 %v4964_v60, %v5324_v0  ;;  %v5540_v10 = vmax.f32 %v5252_v61, %v5468_v1  ;;  %v4820_v13 = vmax.f32 %v4412_v5, %v4592_v6  ;;  %v5109_v14 = vmin.f32 %v4412_v5, %v4592_v6  ;;  %v4055_v15 = vpop.f32.mrf.mxu0  ;;  %v4235_v16 = vpop.f32.mrf.mxu1  ;;  %v6897_v0 = vld [vmem:[%s7330_s6 + $0x3f0] sm:$0xff] }
 0x1c0   : > { %5906 = vst.msk [vmem:[%s7441_s14 + $0x3c] sm:$0xf] %vm5890_vm3, %v5833_v2  ;;  %v4749_v29 = vmax.f32 %v4055_v15, %v4235_v16  ;;  %v5038_v30 = vmin.f32 %v4055_v15, %v4235_v16 }
 0x1c1   : > { %v5616_v19 = vsel %vm7415_vm2, %v5396_v9, %v5540_v10  ;;  %v4892_v20 = vmax.f32 %v4748_v3, %v4820_v13  ;;  %v5181_v21 = vmin.f32 %v5037_v4, %v5109_v14 }
 0x1c2   : > { %v5689_v22 = vmul.f32 %v7419_v12, %v5616_v19  ;;  %6641 = vmatmul.msk.bf16.gmra.mxu0 %vm3568_vm0, %v6788_v7  ;;  %6677 = vmatmul.msk.bf16.gmra.mxu1 %vm3568_vm0, %v6824_v8 }
 0x1c3   : > { %v4965_v23 = vadd.f32 %v7409_v62, %v4892_v20  ;;  %v5253_v24 = vadd.f32 %v5181_v21, %v7409_v62  ;;  %6713 = vmatmul.msk.bf16.gmra.mxu2 %vm3568_vm0, %v6860_v17  ;;  %6749 = vmatmul.msk.bf16.gmra.mxu3 %vm3568_vm0, %v6896_v18 }
 0x1c4   : > { %v5762_v25 = vadd.f32 %v7425_v27, %v5689_v22 }
 0x1c5   : > { %v5325_v26 = vmul.f32 0.05, %v4965_v23  ;;  %v5469_v28 = vmul.f32 0.05, %v5253_v24 }
 0x1c6   : > { %v5834_v31 = vpack.c.bf16 %v5762_v25, %v5762_v25  ;;  %v4415_v32 = vpop.f32.mrf.mxu2  ;;  %v4595_v33 = vpop.f32.mrf.mxu3 }
 0x1c7   : > { %v5397_v34 = vmax.f32 %v4965_v23, %v5325_v26  ;;  %v5541_v35 = vmax.f32 %v5253_v24, %v5469_v28  ;;  %v4821_v36 = vmax.f32 %v4415_v32, %v4595_v33  ;;  %v5110_v37 = vmin.f32 %v4415_v32, %v4595_v33  ;;  %v4057_v38 = vpop.f32.mrf.mxu0  ;;  %v4237_v39 = vpop.f32.mrf.mxu1 }
 0x1c8   : > { %5907 = vst.msk [vmem:[%s7441_s14 + $0x40] sm:$0xf] %vm5890_vm3, %v5834_v31  ;;  %v4750_v50 = vmax.f32 %v4057_v38, %v4237_v39  ;;  %v5039_v51 = vmin.f32 %v4057_v38, %v4237_v39  ;;  %v6790_v38 = vld [vmem:[%s7330_s6 + $0x98] sm:$0xff] }
 0x1c9   : > { %v5617_v40 = vsel %vm7415_vm2, %v5397_v34, %v5541_v35  ;;  %v4893_v41 = vmax.f32 %v4749_v29, %v4821_v36  ;;  %v5182_v42 = vmin.f32 %v5038_v30, %v5110_v37  ;;  %v6826_v39 = vld [vmem:[%s7330_s6 + $0x1b8] sm:$0xff] }
 0x1ca   : > { %v5690_v43 = vmul.f32 %v7419_v12, %v5617_v40 }
 0x1cb   : > { %v4966_v44 = vadd.f32 %v7409_v62, %v4893_v41  ;;  %v5254_v45 = vadd.f32 %v5182_v42, %v7409_v62 }
 0x1cc   : > { %v5763_v46 = vadd.f32 %v7425_v27, %v5690_v43 }
 0x1cd   : > { %v5326_v47 = vmul.f32 0.05, %v4966_v44  ;;  %v5470_v48 = vmul.f32 0.05, %v5254_v45 }
 0x1ce   : > { %v5835_v49 = vpack.c.bf16 %v5763_v46, %v5763_v46  ;;  %v4417_v52 = vpop.f32.mrf.mxu2  ;;  %v4597_v53 = vpop.f32.mrf.mxu3  ;;  %v6862_v46 = vld [vmem:[%s7330_s6 + $0x2d8] sm:$0xff] }
 0x1cf   : > { %v5398_v56 = vmax.f32 %v4966_v44, %v5326_v47  ;;  %v5542_v57 = vmax.f32 %v5254_v45, %v5470_v48  ;;  %v4822_v58 = vmax.f32 %v4417_v52, %v4597_v53  ;;  %v5111_v59 = vmin.f32 %v4417_v52, %v4597_v53  ;;  %v4060_v60 = vpop.f32.mrf.mxu0  ;;  %v4240_v61 = vpop.f32.mrf.mxu1  ;;  %v6898_v47 = vld [vmem:[%s7330_s6 + $0x3f8] sm:$0xff] }
 0x1d0   : > { %5908 = vst.msk [vmem:[%s7441_s14 + $0x44] sm:$0xf] %vm5890_vm3, %v5835_v49  ;;  %v4751_v10 = vmax.f32 %v4060_v60, %v4240_v61  ;;  %v5040_v13 = vmin.f32 %v4060_v60, %v4240_v61 }
 0x1d1   : > { %v5618_v1 = vsel %vm7415_vm2, %v5398_v56, %v5542_v57  ;;  %v4894_v2 = vmax.f32 %v4750_v50, %v4822_v58  ;;  %v5183_v3 = vmin.f32 %v5039_v51, %v5111_v59 }
 0x1d2   : > { %v5691_v4 = vmul.f32 %v7419_v12, %v5618_v1  ;;  %6642 = vmatmul.msk.bf16.gmra.mxu0 %vm3568_vm0, %v6789_v54  ;;  %6678 = vmatmul.msk.bf16.gmra.mxu1 %vm3568_vm0, %v6825_v55 }
 0x1d3   : > { %v4967_v5 = vadd.f32 %v7409_v62, %v4894_v2  ;;  %v5255_v6 = vadd.f32 %v5183_v3, %v7409_v62  ;;  %6714 = vmatmul.msk.bf16.gmra.mxu2 %vm3568_vm0, %v6861_v63  ;;  %6750 = vmatmul.msk.bf16.gmra.mxu3 %vm3568_vm0, %v6897_v0 }
 0x1d4   : > { %v5764_v7 = vadd.f32 %v7425_v27, %v5691_v4 }
 0x1d5   : > { %v5327_v8 = vmul.f32 0.05, %v4967_v5  ;;  %v5471_v9 = vmul.f32 0.05, %v5255_v6 }
 0x1d6   : > { %v5836_v14 = vpack.c.bf16 %v5764_v7, %v5764_v7  ;;  %v4420_v15 = vpop.f32.mrf.mxu2  ;;  %v4600_v16 = vpop.f32.mrf.mxu3 }
 0x1d7   : > { %v5399_v17 = vmax.f32 %v4967_v5, %v5327_v8  ;;  %v5543_v18 = vmax.f32 %v5255_v6, %v5471_v9  ;;  %v4823_v19 = vmax.f32 %v4420_v15, %v4600_v16  ;;  %v5112_v20 = vmin.f32 %v4420_v15, %v4600_v16  ;;  %v4062_v21 = vpop.f32.mrf.mxu0  ;;  %v4242_v22 = vpop.f32.mrf.mxu1 }
 0x1d8   : > { %5909 = vst.msk [vmem:[%s7441_s14 + $0x48] sm:$0xf] %vm5890_vm3, %v5836_v14  ;;  %v4752_v34 = vmax.f32 %v4062_v21, %v4242_v22  ;;  %v5041_v35 = vmin.f32 %v4062_v21, %v4242_v22  ;;  %v6791_v21 = vld [vmem:[%s7330_s6 + $0xa0] sm:$0xff] }
 0x1d9   : > { %v5619_v23 = vsel %vm7415_vm2, %v5399_v17, %v5543_v18  ;;  %v4895_v24 = vmax.f32 %v4751_v10, %v4823_v19  ;;  %v5184_v25 = vmin.f32 %v5040_v13, %v5112_v20  ;;  %v6827_v22 = vld [vmem:[%s7330_s6 + $0x1c0] sm:$0xff] }
 0x1da   : > { %v5692_v26 = vmul.f32 %v7419_v12, %v5619_v23 }
 0x1db   : > { %v4968_v28 = vadd.f32 %v7409_v62, %v4895_v24  ;;  %v5256_v29 = vadd.f32 %v5184_v25, %v7409_v62 }
 0x1dc   : > { %v5765_v30 = vadd.f32 %v7425_v27, %v5692_v26 }
 0x1dd   : > { %v5328_v31 = vmul.f32 0.05, %v4968_v28  ;;  %v5472_v32 = vmul.f32 0.05, %v5256_v29 }
 0x1de   : > { %v5837_v33 = vpack.c.bf16 %v5765_v30, %v5765_v30  ;;  %v4422_v36 = vpop.f32.mrf.mxu2  ;;  %v4602_v37 = vpop.f32.mrf.mxu3  ;;  %v6863_v30 = vld [vmem:[%s7330_s6 + $0x2e0] sm:$0xff] }
 0x1df   : > { %v5400_v40 = vmax.f32 %v4968_v28, %v5328_v31  ;;  %v5544_v41 = vmax.f32 %v5256_v29, %v5472_v32  ;;  %v4824_v42 = vmax.f32 %v4422_v36, %v4602_v37  ;;  %v5113_v43 = vmin.f32 %v4422_v36, %v4602_v37  ;;  %v4065_v44 = vpop.f32.mrf.mxu0  ;;  %v4245_v45 = vpop.f32.mrf.mxu1  ;;  %v6899_v31 = vld [vmem:[%s7330_s6 + $0x400] sm:$0xff] }
 0x1e0   : > { %5910 = vst.msk [vmem:[%s7441_s14 + $0x4c] sm:$0xf] %vm5890_vm3, %v5837_v33  ;;  %v4753_v57 = vmax.f32 %v4065_v44, %v4245_v45  ;;  %v5042_v58 = vmin.f32 %v4065_v44, %v4245_v45 }
 0x1e1   : > { %v5620_v48 = vsel %vm7415_vm2, %v5400_v40, %v5544_v41  ;;  %v4896_v49 = vmax.f32 %v4752_v34, %v4824_v42  ;;  %v5185_v50 = vmin.f32 %v5041_v35, %v5113_v43 }
 0x1e2   : > { %v5693_v51 = vmul.f32 %v7419_v12, %v5620_v48  ;;  %6643 = vmatmul.msk.bf16.gmra.mxu0 %vm3568_vm0, %v6790_v38  ;;  %6679 = vmatmul.msk.bf16.gmra.mxu1 %vm3568_vm0, %v6826_v39 }
 0x1e3   : > { %v4969_v52 = vadd.f32 %v7409_v62, %v4896_v49  ;;  %v5257_v53 = vadd.f32 %v5185_v50, %v7409_v62  ;;  %6715 = vmatmul.msk.bf16.gmra.mxu2 %vm3568_vm0, %v6862_v46  ;;  %6751 = vmatmul.msk.bf16.gmra.mxu3 %vm3568_vm0, %v6898_v47 }
 0x1e4   : > { %v5766_v54 = vadd.f32 %v7425_v27, %v5693_v51 }
 0x1e5   : > { %v5329_v55 = vmul.f32 0.05, %v4969_v52  ;;  %v5473_v56 = vmul.f32 0.05, %v5257_v53 }
 0x1e6   : > { %v5838_v59 = vpack.c.bf16 %v5766_v54, %v5766_v54  ;;  %v4425_v60 = vpop.f32.mrf.mxu2  ;;  %v4605_v61 = vpop.f32.mrf.mxu3 }
 0x1e7   : > { %v5401_v63 = vmax.f32 %v4969_v52, %v5329_v55  ;;  %v5545_v0 = vmax.f32 %v5257_v53, %v5473_v56  ;;  %v4825_v1 = vmax.f32 %v4425_v60, %v4605_v61  ;;  %v5114_v2 = vmin.f32 %v4425_v60, %v4605_v61  ;;  %v4067_v3 = vpop.f32.mrf.mxu0  ;;  %v4247_v4 = vpop.f32.mrf.mxu1 }
 0x1e8   : > { %5911 = vst.msk [vmem:[%s7441_s14 + $0x50] sm:$0xf] %vm5890_vm3, %v5838_v59  ;;  %v4754_v17 = vmax.f32 %v4067_v3, %v4247_v4  ;;  %v5043_v18 = vmin.f32 %v4067_v3, %v4247_v4  ;;  %v6792_v3 = vld [vmem:[%s7330_s6 + $0xa8] sm:$0xff] }
 0x1e9   : > { %v5621_v5 = vsel %vm7415_vm2, %v5401_v63, %v5545_v0  ;;  %v4897_v6 = vmax.f32 %v4753_v57, %v4825_v1  ;;  %v5186_v7 = vmin.f32 %v5042_v58, %v5114_v2  ;;  %v6828_v4 = vld [vmem:[%s7330_s6 + $0x1c8] sm:$0xff] }
 0x1ea   : > { %v5694_v8 = vmul.f32 %v7419_v12, %v5621_v5 }
 0x1eb   : > { %v4970_v9 = vadd.f32 %v7409_v62, %v4897_v6  ;;  %v5258_v10 = vadd.f32 %v5186_v7, %v7409_v62 }
 0x1ec   : > { %v5767_v13 = vadd.f32 %v7425_v27, %v5694_v8 }
 0x1ed   : > { %v5330_v14 = vmul.f32 0.05, %v4970_v9  ;;  %v5474_v15 = vmul.f32 0.05, %v5258_v10 }
 0x1ee   : > { %v5839_v16 = vpack.c.bf16 %v5767_v13, %v5767_v13  ;;  %v4427_v19 = vpop.f32.mrf.mxu2  ;;  %v4607_v20 = vpop.f32.mrf.mxu3  ;;  %v6864_v13 = vld [vmem:[%s7330_s6 + $0x2e8] sm:$0xff] }
 0x1ef   : > { %v5402_v23 = vmax.f32 %v4970_v9, %v5330_v14  ;;  %v5546_v24 = vmax.f32 %v5258_v10, %v5474_v15  ;;  %v4826_v25 = vmax.f32 %v4427_v19, %v4607_v20  ;;  %v5115_v26 = vmin.f32 %v4427_v19, %v4607_v20  ;;  %v4070_v28 = vpop.f32.mrf.mxu0  ;;  %v4250_v29 = vpop.f32.mrf.mxu1  ;;  %v6900_v14 = vld [vmem:[%s7330_s6 + $0x408] sm:$0xff] }
 0x1f0   : > { %5912 = vst.msk [vmem:[%s7441_s14 + $0x54] sm:$0xf] %vm5890_vm3, %v5839_v16  ;;  %v4755_v41 = vmax.f32 %v4070_v28, %v4250_v29  ;;  %v5044_v42 = vmin.f32 %v4070_v28, %v4250_v29 }
 0x1f1   : > { %v5622_v32 = vsel %vm7415_vm2, %v5402_v23, %v5546_v24  ;;  %v4898_v33 = vmax.f32 %v4754_v17, %v4826_v25  ;;  %v5187_v34 = vmin.f32 %v5043_v18, %v5115_v26 }
 0x1f2   : > { %v5695_v35 = vmul.f32 %v7419_v12, %v5622_v32  ;;  %6644 = vmatmul.msk.bf16.gmra.mxu0 %vm3568_vm0, %v6791_v21  ;;  %6680 = vmatmul.msk.bf16.gmra.mxu1 %vm3568_vm0, %v6827_v22 }
 0x1f3   : > { %v4971_v36 = vadd.f32 %v7409_v62, %v4898_v33  ;;  %v5259_v37 = vadd.f32 %v5187_v34, %v7409_v62  ;;  %6716 = vmatmul.msk.bf16.gmra.mxu2 %vm3568_vm0, %v6863_v30  ;;  %6752 = vmatmul.msk.bf16.gmra.mxu3 %vm3568_vm0, %v6899_v31 }
 0x1f4   : > { %v5768_v38 = vadd.f32 %v7425_v27, %v5695_v35 }
 0x1f5   : > { %v5331_v39 = vmul.f32 0.05, %v4971_v36  ;;  %v5475_v40 = vmul.f32 0.05, %v5259_v37 }
 0x1f6   : > { %v5840_v43 = vpack.c.bf16 %v5768_v38, %v5768_v38  ;;  %v4430_v44 = vpop.f32.mrf.mxu2  ;;  %v4610_v45 = vpop.f32.mrf.mxu3 }
 0x1f7   : > { %v5403_v46 = vmax.f32 %v4971_v36, %v5331_v39  ;;  %v5547_v47 = vmax.f32 %v5259_v37, %v5475_v40  ;;  %v4827_v48 = vmax.f32 %v4430_v44, %v4610_v45  ;;  %v5116_v49 = vmin.f32 %v4430_v44, %v4610_v45  ;;  %v4072_v50 = vpop.f32.mrf.mxu0  ;;  %v4252_v51 = vpop.f32.mrf.mxu1 }
 0x1f8   : > { %5913 = vst.msk [vmem:[%s7441_s14 + $0x58] sm:$0xf] %vm5890_vm3, %v5840_v43  ;;  %v4756_v63 = vmax.f32 %v4072_v50, %v4252_v51  ;;  %v5045_v0 = vmin.f32 %v4072_v50, %v4252_v51  ;;  %v6793_v50 = vld [vmem:[%s7330_s6 + $0xb0] sm:$0xff] }
 0x1f9   : > { %v5623_v52 = vsel %vm7415_vm2, %v5403_v46, %v5547_v47  ;;  %v4899_v53 = vmax.f32 %v4755_v41, %v4827_v48  ;;  %v5188_v54 = vmin.f32 %v5044_v42, %v5116_v49  ;;  %v6829_v51 = vld [vmem:[%s7330_s6 + $0x1d0] sm:$0xff] }
 0x1fa   : > { %v5696_v55 = vmul.f32 %v7419_v12, %v5623_v52 }
 0x1fb   : > { %v4972_v56 = vadd.f32 %v7409_v62, %v4899_v53  ;;  %v5260_v57 = vadd.f32 %v5188_v54, %v7409_v62 }
 0x1fc   : > { %v5769_v58 = vadd.f32 %v7425_v27, %v5696_v55 }
 0x1fd   : > { %v5332_v59 = vmul.f32 0.05, %v4972_v56  ;;  %v5476_v60 = vmul.f32 0.05, %v5260_v57 }
 0x1fe   : > { %v5841_v61 = vpack.c.bf16 %v5769_v58, %v5769_v58  ;;  %v4432_v1 = vpop.f32.mrf.mxu2  ;;  %v4612_v2 = vpop.f32.mrf.mxu3  ;;  %v6865_v58 = vld [vmem:[%s7330_s6 + $0x2f0] sm:$0xff] }
 0x1ff   : > { %v5404_v5 = vmax.f32 %v4972_v56, %v5332_v59  ;;  %v5548_v6 = vmax.f32 %v5260_v57, %v5476_v60  ;;  %v4828_v7 = vmax.f32 %v4432_v1, %v4612_v2  ;;  %v5117_v8 = vmin.f32 %v4432_v1, %v4612_v2  ;;  %v4075_v9 = vpop.f32.mrf.mxu0  ;;  %v4255_v10 = vpop.f32.mrf.mxu1  ;;  %v6901_v59 = vld [vmem:[%s7330_s6 + $0x410] sm:$0xff] }
 0x200   : > { %5914 = vst.msk [vmem:[%s7441_s14 + $0x5c] sm:$0xf] %vm5890_vm3, %v5841_v61  ;;  %v4757_v24 = vmax.f32 %v4075_v9, %v4255_v10  ;;  %v5046_v25 = vmin.f32 %v4075_v9, %v4255_v10 }
 0x201   : > { %v5624_v15 = vsel %vm7415_vm2, %v5404_v5, %v5548_v6  ;;  %v4900_v16 = vmax.f32 %v4756_v63, %v4828_v7  ;;  %v5189_v17 = vmin.f32 %v5045_v0, %v5117_v8 }
 0x202   : > { %v5697_v18 = vmul.f32 %v7419_v12, %v5624_v15  ;;  %6645 = vmatmul.msk.bf16.gmra.mxu0 %vm3568_vm0, %v6792_v3  ;;  %6681 = vmatmul.msk.bf16.gmra.mxu1 %vm3568_vm0, %v6828_v4 }
 0x203   : > { %v4973_v19 = vadd.f32 %v7409_v62, %v4900_v16  ;;  %v5261_v20 = vadd.f32 %v5189_v17, %v7409_v62  ;;  %6717 = vmatmul.msk.bf16.gmra.mxu2 %vm3568_vm0, %v6864_v13  ;;  %6753 = vmatmul.msk.bf16.gmra.mxu3 %vm3568_vm0, %v6900_v14 }
 0x204   : > { %v5770_v21 = vadd.f32 %v7425_v27, %v5697_v18 }
 0x205   : > { %v5333_v22 = vmul.f32 0.05, %v4973_v19  ;;  %v5477_v23 = vmul.f32 0.05, %v5261_v20 }
 0x206   : > { %v5842_v26 = vpack.c.bf16 %v5770_v21, %v5770_v21  ;;  %v4435_v28 = vpop.f32.mrf.mxu2  ;;  %v4615_v29 = vpop.f32.mrf.mxu3 }
 0x207   : > { %v5405_v30 = vmax.f32 %v4973_v19, %v5333_v22  ;;  %v5549_v31 = vmax.f32 %v5261_v20, %v5477_v23  ;;  %v4829_v32 = vmax.f32 %v4435_v28, %v4615_v29  ;;  %v5118_v33 = vmin.f32 %v4435_v28, %v4615_v29  ;;  %v4077_v34 = vpop.f32.mrf.mxu0  ;;  %v4257_v35 = vpop.f32.mrf.mxu1 }
 0x208   : > { %5915 = vst.msk [vmem:[%s7441_s14 + $0x60] sm:$0xf] %vm5890_vm3, %v5842_v26  ;;  %v4758_v46 = vmax.f32 %v4077_v34, %v4257_v35  ;;  %v5047_v47 = vmin.f32 %v4077_v34, %v4257_v35  ;;  %v6794_v34 = vld [vmem:[%s7330_s6 + $0xb8] sm:$0xff] }
 0x209   : > { %v5625_v36 = vsel %vm7415_vm2, %v5405_v30, %v5549_v31  ;;  %v4901_v37 = vmax.f32 %v4757_v24, %v4829_v32  ;;  %v5190_v38 = vmin.f32 %v5046_v25, %v5118_v33  ;;  %v6830_v35 = vld [vmem:[%s7330_s6 + $0x1d8] sm:$0xff] }
 0x20a   : > { %v5698_v39 = vmul.f32 %v7419_v12, %v5625_v36 }
 0x20b   : > { %v4974_v40 = vadd.f32 %v7409_v62, %v4901_v37  ;;  %v5262_v41 = vadd.f32 %v5190_v38, %v7409_v62 }
 0x20c   : > { %v5771_v42 = vadd.f32 %v7425_v27, %v5698_v39 }
 0x20d   : > { %v5334_v43 = vmul.f32 0.05, %v4974_v40  ;;  %v5478_v44 = vmul.f32 0.05, %v5262_v41 }
 0x20e   : > { %v5843_v45 = vpack.c.bf16 %v5771_v42, %v5771_v42  ;;  %v4437_v48 = vpop.f32.mrf.mxu2  ;;  %v4617_v49 = vpop.f32.mrf.mxu3  ;;  %v6866_v42 = vld [vmem:[%s7330_s6 + $0x2f8] sm:$0xff] }
 0x20f   : > { %v5406_v52 = vmax.f32 %v4974_v40, %v5334_v43  ;;  %v5550_v53 = vmax.f32 %v5262_v41, %v5478_v44  ;;  %v4830_v54 = vmax.f32 %v4437_v48, %v4617_v49  ;;  %v5119_v55 = vmin.f32 %v4437_v48, %v4617_v49  ;;  %v4080_v56 = vpop.f32.mrf.mxu0  ;;  %v4260_v57 = vpop.f32.mrf.mxu1  ;;  %v6902_v43 = vld [vmem:[%s7330_s6 + $0x418] sm:$0xff] }
 0x210   : > { %5916 = vst.msk [vmem:[%s7441_s14 + $0x64] sm:$0xf] %vm5890_vm3, %v5843_v45  ;;  %v4759_v6 = vmax.f32 %v4080_v56, %v4260_v57  ;;  %v5048_v7 = vmin.f32 %v4080_v56, %v4260_v57 }
 0x211   : > { %v5626_v60 = vsel %vm7415_vm2, %v5406_v52, %v5550_v53  ;;  %v4902_v61 = vmax.f32 %v4758_v46, %v4830_v54  ;;  %v5191_v63 = vmin.f32 %v5047_v47, %v5119_v55 }
 0x212   : > { %v5699_v0 = vmul.f32 %v7419_v12, %v5626_v60  ;;  %6646 = vmatmul.msk.bf16.gmra.mxu0 %vm3568_vm0, %v6793_v50  ;;  %6682 = vmatmul.msk.bf16.gmra.mxu1 %vm3568_vm0, %v6829_v51 }
 0x213   : > { %v4975_v1 = vadd.f32 %v7409_v62, %v4902_v61  ;;  %v5263_v2 = vadd.f32 %v5191_v63, %v7409_v62  ;;  %6718 = vmatmul.msk.bf16.gmra.mxu2 %vm3568_vm0, %v6865_v58  ;;  %6754 = vmatmul.msk.bf16.gmra.mxu3 %vm3568_vm0, %v6901_v59 }
 0x214   : > { %v5772_v3 = vadd.f32 %v7425_v27, %v5699_v0 }
 0x215   : > { %v5335_v4 = vmul.f32 0.05, %v4975_v1  ;;  %v5479_v5 = vmul.f32 0.05, %v5263_v2 }
 0x216   : > { %v5844_v8 = vpack.c.bf16 %v5772_v3, %v5772_v3  ;;  %v4440_v9 = vpop.f32.mrf.mxu2  ;;  %v4620_v10 = vpop.f32.mrf.mxu3 }
 0x217   : > { %v5407_v13 = vmax.f32 %v4975_v1, %v5335_v4  ;;  %v5551_v14 = vmax.f32 %v5263_v2, %v5479_v5  ;;  %v4831_v15 = vmax.f32 %v4440_v9, %v4620_v10  ;;  %v5120_v16 = vmin.f32 %v4440_v9, %v4620_v10  ;;  %v4082_v17 = vpop.f32.mrf.mxu0  ;;  %v4262_v18 = vpop.f32.mrf.mxu1 }
 0x218   : > { %5917 = vst.msk [vmem:[%s7441_s14 + $0x68] sm:$0xf] %vm5890_vm3, %v5844_v8  ;;  %v4760_v30 = vmax.f32 %v4082_v17, %v4262_v18  ;;  %v5049_v31 = vmin.f32 %v4082_v17, %v4262_v18  ;;  %v6795_v17 = vld [vmem:[%s7330_s6 + $0xc0] sm:$0xff] }
 0x219   : > { %v5627_v19 = vsel %vm7415_vm2, %v5407_v13, %v5551_v14  ;;  %v4903_v20 = vmax.f32 %v4759_v6, %v4831_v15  ;;  %v5192_v21 = vmin.f32 %v5048_v7, %v5120_v16  ;;  %v6831_v18 = vld [vmem:[%s7330_s6 + $0x1e0] sm:$0xff] }
 0x21a   : > { %v5700_v22 = vmul.f32 %v7419_v12, %v5627_v19 }
 0x21b   : > { %v4976_v23 = vadd.f32 %v7409_v62, %v4903_v20  ;;  %v5264_v24 = vadd.f32 %v5192_v21, %v7409_v62 }
 0x21c   : > { %v5773_v25 = vadd.f32 %v7425_v27, %v5700_v22 }
 0x21d   : > { %v5336_v26 = vmul.f32 0.05, %v4976_v23  ;;  %v5480_v28 = vmul.f32 0.05, %v5264_v24 }
 0x21e   : > { %v5845_v29 = vpack.c.bf16 %v5773_v25, %v5773_v25  ;;  %v4442_v32 = vpop.f32.mrf.mxu2  ;;  %v4622_v33 = vpop.f32.mrf.mxu3  ;;  %v6867_v25 = vld [vmem:[%s7330_s6 + $0x300] sm:$0xff] }
 0x21f   : > { %v5408_v36 = vmax.f32 %v4976_v23, %v5336_v26  ;;  %v5552_v37 = vmax.f32 %v5264_v24, %v5480_v28  ;;  %v4832_v38 = vmax.f32 %v4442_v32, %v4622_v33  ;;  %v5121_v39 = vmin.f32 %v4442_v32, %v4622_v33  ;;  %v4085_v40 = vpop.f32.mrf.mxu0  ;;  %v4265_v41 = vpop.f32.mrf.mxu1  ;;  %v6903_v26 = vld [vmem:[%s7330_s6 + $0x420] sm:$0xff] }
 0x220   : > { %5918 = vst.msk [vmem:[%s7441_s14 + $0x6c] sm:$0xf] %vm5890_vm3, %v5845_v29  ;;  %v4761_v53 = vmax.f32 %v4085_v40, %v4265_v41  ;;  %v5050_v54 = vmin.f32 %v4085_v40, %v4265_v41 }
 0x221   : > { %v5628_v44 = vsel %vm7415_vm2, %v5408_v36, %v5552_v37  ;;  %v4904_v45 = vmax.f32 %v4760_v30, %v4832_v38  ;;  %v5193_v46 = vmin.f32 %v5049_v31, %v5121_v39 }
 0x222   : > { %v5701_v47 = vmul.f32 %v7419_v12, %v5628_v44  ;;  %6647 = vmatmul.msk.bf16.gmra.mxu0 %vm3568_vm0, %v6794_v34  ;;  %6683 = vmatmul.msk.bf16.gmra.mxu1 %vm3568_vm0, %v6830_v35 }
 0x223   : > { %v4977_v48 = vadd.f32 %v7409_v62, %v4904_v45  ;;  %v5265_v49 = vadd.f32 %v5193_v46, %v7409_v62  ;;  %6719 = vmatmul.msk.bf16.gmra.mxu2 %vm3568_vm0, %v6866_v42  ;;  %6755 = vmatmul.msk.bf16.gmra.mxu3 %vm3568_vm0, %v6902_v43 }
 0x224   : > { %v5774_v50 = vadd.f32 %v7425_v27, %v5701_v47 }
 0x225   : > { %v5337_v51 = vmul.f32 0.05, %v4977_v48  ;;  %v5481_v52 = vmul.f32 0.05, %v5265_v49 }
 0x226   : > { %v5846_v55 = vpack.c.bf16 %v5774_v50, %v5774_v50  ;;  %v4445_v56 = vpop.f32.mrf.mxu2  ;;  %v4625_v57 = vpop.f32.mrf.mxu3 }
 0x227   : > { %v5409_v58 = vmax.f32 %v4977_v48, %v5337_v51  ;;  %v5553_v59 = vmax.f32 %v5265_v49, %v5481_v52  ;;  %v4833_v60 = vmax.f32 %v4445_v56, %v4625_v57  ;;  %v5122_v61 = vmin.f32 %v4445_v56, %v4625_v57  ;;  %v4087_v63 = vpop.f32.mrf.mxu0  ;;  %v4267_v0 = vpop.f32.mrf.mxu1 }
 0x228   : > { %5919 = vst.msk [vmem:[%s7441_s14 + $0x70] sm:$0xf] %vm5890_vm3, %v5846_v55  ;;  %v4762_v13 = vmax.f32 %v4087_v63, %v4267_v0  ;;  %v5051_v14 = vmin.f32 %v4087_v63, %v4267_v0  ;;  %v6796_v63 = vld [vmem:[%s7330_s6 + $0xc8] sm:$0xff] }
 0x229   : > { %v5629_v1 = vsel %vm7415_vm2, %v5409_v58, %v5553_v59  ;;  %v4905_v2 = vmax.f32 %v4761_v53, %v4833_v60  ;;  %v5194_v3 = vmin.f32 %v5050_v54, %v5122_v61  ;;  %v6832_v0 = vld [vmem:[%s7330_s6 + $0x1e8] sm:$0xff] }
 0x22a   : > { %v5702_v4 = vmul.f32 %v7419_v12, %v5629_v1 }
 0x22b   : > { %v4978_v5 = vadd.f32 %v7409_v62, %v4905_v2  ;;  %v5266_v6 = vadd.f32 %v5194_v3, %v7409_v62 }
 0x22c   : > { %v5775_v7 = vadd.f32 %v7425_v27, %v5702_v4 }
 0x22d   : > { %v5338_v8 = vmul.f32 0.05, %v4978_v5  ;;  %v5482_v9 = vmul.f32 0.05, %v5266_v6 }
 0x22e   : > { %v5847_v10 = vpack.c.bf16 %v5775_v7, %v5775_v7  ;;  %v4447_v15 = vpop.f32.mrf.mxu2  ;;  %v4627_v16 = vpop.f32.mrf.mxu3  ;;  %v6868_v7 = vld [vmem:[%s7330_s6 + $0x308] sm:$0xff] }
 0x22f   : > { %v5410_v19 = vmax.f32 %v4978_v5, %v5338_v8  ;;  %v5554_v20 = vmax.f32 %v5266_v6, %v5482_v9  ;;  %v4834_v21 = vmax.f32 %v4447_v15, %v4627_v16  ;;  %v5123_v22 = vmin.f32 %v4447_v15, %v4627_v16  ;;  %v4090_v23 = vpop.f32.mrf.mxu0  ;;  %v4270_v24 = vpop.f32.mrf.mxu1  ;;  %v6904_v8 = vld [vmem:[%s7330_s6 + $0x428] sm:$0xff] }
 0x230   : > { %5920 = vst.msk [vmem:[%s7441_s14 + $0x74] sm:$0xf] %vm5890_vm3, %v5847_v10  ;;  %v4763_v37 = vmax.f32 %v4090_v23, %v4270_v24  ;;  %v5052_v38 = vmin.f32 %v4090_v23, %v4270_v24 }
 0x231   : > { %v5630_v28 = vsel %vm7415_vm2, %v5410_v19, %v5554_v20  ;;  %v4906_v29 = vmax.f32 %v4762_v13, %v4834_v21  ;;  %v5195_v30 = vmin.f32 %v5051_v14, %v5123_v22 }
 0x232   : > { %v5703_v31 = vmul.f32 %v7419_v12, %v5630_v28  ;;  %6648 = vmatmul.msk.bf16.gmra.mxu0 %vm3568_vm0, %v6795_v17  ;;  %6684 = vmatmul.msk.bf16.gmra.mxu1 %vm3568_vm0, %v6831_v18 }
 0x233   : > { %v4979_v32 = vadd.f32 %v7409_v62, %v4906_v29  ;;  %v5267_v33 = vadd.f32 %v5195_v30, %v7409_v62  ;;  %6720 = vmatmul.msk.bf16.gmra.mxu2 %vm3568_vm0, %v6867_v25  ;;  %6756 = vmatmul.msk.bf16.gmra.mxu3 %vm3568_vm0, %v6903_v26 }
 0x234   : > { %v5776_v34 = vadd.f32 %v7425_v27, %v5703_v31 }
 0x235   : > { %v5339_v35 = vmul.f32 0.05, %v4979_v32  ;;  %v5483_v36 = vmul.f32 0.05, %v5267_v33 }
 0x236   : > { %v5848_v39 = vpack.c.bf16 %v5776_v34, %v5776_v34  ;;  %v4450_v40 = vpop.f32.mrf.mxu2  ;;  %v4630_v41 = vpop.f32.mrf.mxu3 }
 0x237   : > { %v5411_v42 = vmax.f32 %v4979_v32, %v5339_v35  ;;  %v5555_v43 = vmax.f32 %v5267_v33, %v5483_v36  ;;  %v4835_v44 = vmax.f32 %v4450_v40, %v4630_v41  ;;  %v5124_v45 = vmin.f32 %v4450_v40, %v4630_v41  ;;  %v4092_v46 = vpop.f32.mrf.mxu0  ;;  %v4272_v47 = vpop.f32.mrf.mxu1 }
 0x238   : > { %5921 = vst.msk [vmem:[%s7441_s14 + $0x78] sm:$0xf] %vm5890_vm3, %v5848_v39  ;;  %v4764_v58 = vmax.f32 %v4092_v46, %v4272_v47  ;;  %v5053_v59 = vmin.f32 %v4092_v46, %v4272_v47  ;;  %v6797_v46 = vld [vmem:[%s7330_s6 + $0xd0] sm:$0xff] }
 0x239   : > { %v5631_v48 = vsel %vm7415_vm2, %v5411_v42, %v5555_v43  ;;  %v4907_v49 = vmax.f32 %v4763_v37, %v4835_v44  ;;  %v5196_v50 = vmin.f32 %v5052_v38, %v5124_v45  ;;  %v6833_v47 = vld [vmem:[%s7330_s6 + $0x1f0] sm:$0xff] }
 0x23a   : > { %v5704_v51 = vmul.f32 %v7419_v12, %v5631_v48 }
 0x23b   : > { %v4980_v52 = vadd.f32 %v7409_v62, %v4907_v49  ;;  %v5268_v53 = vadd.f32 %v5196_v50, %v7409_v62 }
 0x23c   : > { %v5777_v54 = vadd.f32 %v7425_v27, %v5704_v51 }
 0x23d   : > { %v5340_v55 = vmul.f32 0.05, %v4980_v52  ;;  %v5484_v56 = vmul.f32 0.05, %v5268_v53 }
 0x23e   : > { %v5849_v57 = vpack.c.bf16 %v5777_v54, %v5777_v54  ;;  %v4452_v60 = vpop.f32.mrf.mxu2  ;;  %v4632_v61 = vpop.f32.mrf.mxu3  ;;  %v6869_v54 = vld [vmem:[%s7330_s6 + $0x310] sm:$0xff] }
 0x23f   : > { %v5412_v1 = vmax.f32 %v4980_v52, %v5340_v55  ;;  %v5556_v2 = vmax.f32 %v5268_v53, %v5484_v56  ;;  %v4836_v3 = vmax.f32 %v4452_v60, %v4632_v61  ;;  %v5125_v4 = vmin.f32 %v4452_v60, %v4632_v61  ;;  %v4095_v5 = vpop.f32.mrf.mxu0  ;;  %v4275_v6 = vpop.f32.mrf.mxu1  ;;  %v6905_v55 = vld [vmem:[%s7330_s6 + $0x430] sm:$0xff] }
 0x240   : > { %5922 = vst.msk [vmem:[%s7441_s14 + $0x7c] sm:$0xf] %vm5890_vm3, %v5849_v57  ;;  %v4765_v20 = vmax.f32 %v4095_v5, %v4275_v6  ;;  %v5054_v21 = vmin.f32 %v4095_v5, %v4275_v6 }
 0x241   : > { %v5632_v9 = vsel %vm7415_vm2, %v5412_v1, %v5556_v2  ;;  %v4908_v10 = vmax.f32 %v4764_v58, %v4836_v3  ;;  %v5197_v13 = vmin.f32 %v5053_v59, %v5125_v4 }
 0x242   : > { %v5705_v14 = vmul.f32 %v7419_v12, %v5632_v9  ;;  %6649 = vmatmul.msk.bf16.gmra.mxu0 %vm3568_vm0, %v6796_v63  ;;  %6685 = vmatmul.msk.bf16.gmra.mxu1 %vm3568_vm0, %v6832_v0 }
 0x243   : > { %v4981_v15 = vadd.f32 %v7409_v62, %v4908_v10  ;;  %v5269_v16 = vadd.f32 %v5197_v13, %v7409_v62  ;;  %6721 = vmatmul.msk.bf16.gmra.mxu2 %vm3568_vm0, %v6868_v7  ;;  %6757 = vmatmul.msk.bf16.gmra.mxu3 %vm3568_vm0, %v6904_v8 }
 0x244   : > { %v5778_v17 = vadd.f32 %v7425_v27, %v5705_v14 }
 0x245   : > { %v5341_v18 = vmul.f32 0.05, %v4981_v15  ;;  %v5485_v19 = vmul.f32 0.05, %v5269_v16 }
 0x246   : > { %v5850_v22 = vpack.c.bf16 %v5778_v17, %v5778_v17  ;;  %v4455_v23 = vpop.f32.mrf.mxu2  ;;  %v4635_v24 = vpop.f32.mrf.mxu3 }
 0x247   : > { %v5413_v25 = vmax.f32 %v4981_v15, %v5341_v18  ;;  %v5557_v26 = vmax.f32 %v5269_v16, %v5485_v19  ;;  %v4837_v28 = vmax.f32 %v4455_v23, %v4635_v24  ;;  %v5126_v29 = vmin.f32 %v4455_v23, %v4635_v24  ;;  %v4097_v30 = vpop.f32.mrf.mxu0  ;;  %v4277_v31 = vpop.f32.mrf.mxu1 }
 0x248   : > { %5923 = vst.msk [vmem:[%s7441_s14 + $0x80] sm:$0xf] %vm5890_vm3, %v5850_v22  ;;  %v4766_v42 = vmax.f32 %v4097_v30, %v4277_v31  ;;  %v5055_v43 = vmin.f32 %v4097_v30, %v4277_v31  ;;  %v6798_v30 = vld [vmem:[%s7330_s6 + $0xd8] sm:$0xff] }
 0x249   : > { %v5633_v32 = vsel %vm7415_vm2, %v5413_v25, %v5557_v26  ;;  %v4909_v33 = vmax.f32 %v4765_v20, %v4837_v28  ;;  %v5198_v34 = vmin.f32 %v5054_v21, %v5126_v29  ;;  %v6834_v31 = vld [vmem:[%s7330_s6 + $0x1f8] sm:$0xff] }
 0x24a   : > { %v5706_v35 = vmul.f32 %v7419_v12, %v5633_v32 }
 0x24b   : > { %v4982_v36 = vadd.f32 %v7409_v62, %v4909_v33  ;;  %v5270_v37 = vadd.f32 %v5198_v34, %v7409_v62 }
 0x24c   : > { %v5779_v38 = vadd.f32 %v7425_v27, %v5706_v35 }
 0x24d   : > { %v5342_v39 = vmul.f32 0.05, %v4982_v36  ;;  %v5486_v40 = vmul.f32 0.05, %v5270_v37 }
 0x24e   : > { %v5851_v41 = vpack.c.bf16 %v5779_v38, %v5779_v38  ;;  %v4457_v44 = vpop.f32.mrf.mxu2  ;;  %v4637_v45 = vpop.f32.mrf.mxu3  ;;  %v6870_v38 = vld [vmem:[%s7330_s6 + $0x318] sm:$0xff] }
 0x24f   : > { %v5414_v48 = vmax.f32 %v4982_v36, %v5342_v39  ;;  %v5558_v49 = vmax.f32 %v5270_v37, %v5486_v40  ;;  %v4838_v50 = vmax.f32 %v4457_v44, %v4637_v45  ;;  %v5127_v51 = vmin.f32 %v4457_v44, %v4637_v45  ;;  %v4100_v52 = vpop.f32.mrf.mxu0  ;;  %v4280_v53 = vpop.f32.mrf.mxu1  ;;  %v6906_v39 = vld [vmem:[%s7330_s6 + $0x438] sm:$0xff] }
 0x250   : > { %5924 = vst.msk [vmem:[%s7441_s14 + $0x84] sm:$0xf] %vm5890_vm3, %v5851_v41  ;;  %v4767_v2 = vmax.f32 %v4100_v52, %v4280_v53  ;;  %v5056_v3 = vmin.f32 %v4100_v52, %v4280_v53 }
 0x251   : > { %v5634_v56 = vsel %vm7415_vm2, %v5414_v48, %v5558_v49  ;;  %v4910_v57 = vmax.f32 %v4766_v42, %v4838_v50  ;;  %v5199_v58 = vmin.f32 %v5055_v43, %v5127_v51 }
 0x252   : > { %v5707_v59 = vmul.f32 %v7419_v12, %v5634_v56  ;;  %6650 = vmatmul.msk.bf16.gmra.mxu0 %vm3568_vm0, %v6797_v46  ;;  %6686 = vmatmul.msk.bf16.gmra.mxu1 %vm3568_vm0, %v6833_v47 }
 0x253   : > { %v4983_v60 = vadd.f32 %v7409_v62, %v4910_v57  ;;  %v5271_v61 = vadd.f32 %v5199_v58, %v7409_v62  ;;  %6722 = vmatmul.msk.bf16.gmra.mxu2 %vm3568_vm0, %v6869_v54  ;;  %6758 = vmatmul.msk.bf16.gmra.mxu3 %vm3568_vm0, %v6905_v55 }
 0x254   : > { %v5780_v63 = vadd.f32 %v7425_v27, %v5707_v59 }
 0x255   : > { %v5343_v0 = vmul.f32 0.05, %v4983_v60  ;;  %v5487_v1 = vmul.f32 0.05, %v5271_v61 }
 0x256   : > { %v5852_v4 = vpack.c.bf16 %v5780_v63, %v5780_v63  ;;  %v4460_v5 = vpop.f32.mrf.mxu2  ;;  %v4640_v6 = vpop.f32.mrf.mxu3 }
 0x257   : > { %v5415_v7 = vmax.f32 %v4983_v60, %v5343_v0  ;;  %v5559_v8 = vmax.f32 %v5271_v61, %v5487_v1  ;;  %v4839_v9 = vmax.f32 %v4460_v5, %v4640_v6  ;;  %v5128_v10 = vmin.f32 %v4460_v5, %v4640_v6  ;;  %v4102_v13 = vpop.f32.mrf.mxu0  ;;  %v4282_v14 = vpop.f32.mrf.mxu1 }
 0x258   : > { %5925 = vst.msk [vmem:[%s7441_s14 + $0x88] sm:$0xf] %vm5890_vm3, %v5852_v4  ;;  %v4768_v25 = vmax.f32 %v4102_v13, %v4282_v14  ;;  %v5057_v26 = vmin.f32 %v4102_v13, %v4282_v14  ;;  %v6799_v13 = vld [vmem:[%s7330_s6 + $0xe0] sm:$0xff] }
 0x259   : > { %v5635_v15 = vsel %vm7415_vm2, %v5415_v7, %v5559_v8  ;;  %v4911_v16 = vmax.f32 %v4767_v2, %v4839_v9  ;;  %v5200_v17 = vmin.f32 %v5056_v3, %v5128_v10  ;;  %v6835_v14 = vld [vmem:[%s7330_s6 + $0x200] sm:$0xff] }
 0x25a   : > { %v5708_v18 = vmul.f32 %v7419_v12, %v5635_v15 }
 0x25b   : > { %v4984_v19 = vadd.f32 %v7409_v62, %v4911_v16  ;;  %v5272_v20 = vadd.f32 %v5200_v17, %v7409_v62 }
 0x25c   : > { %v5781_v21 = vadd.f32 %v7425_v27, %v5708_v18 }
 0x25d   : > { %v5344_v22 = vmul.f32 0.05, %v4984_v19  ;;  %v5488_v23 = vmul.f32 0.05, %v5272_v20 }
 0x25e   : > { %v5853_v24 = vpack.c.bf16 %v5781_v21, %v5781_v21  ;;  %v4462_v28 = vpop.f32.mrf.mxu2  ;;  %v4642_v29 = vpop.f32.mrf.mxu3  ;;  %v6871_v21 = vld [vmem:[%s7330_s6 + $0x320] sm:$0xff] }
 0x25f   : > { %v5416_v32 = vmax.f32 %v4984_v19, %v5344_v22  ;;  %v5560_v33 = vmax.f32 %v5272_v20, %v5488_v23  ;;  %v4840_v34 = vmax.f32 %v4462_v28, %v4642_v29  ;;  %v5129_v35 = vmin.f32 %v4462_v28, %v4642_v29  ;;  %v4105_v36 = vpop.f32.mrf.mxu0  ;;  %v4285_v37 = vpop.f32.mrf.mxu1  ;;  %v6907_v22 = vld [vmem:[%s7330_s6 + $0x440] sm:$0xff] }
 0x260   : > { %5926 = vst.msk [vmem:[%s7441_s14 + $0x8c] sm:$0xf] %vm5890_vm3, %v5853_v24  ;;  %v4769_v49 = vmax.f32 %v4105_v36, %v4285_v37  ;;  %v5058_v50 = vmin.f32 %v4105_v36, %v4285_v37 }
 0x261   : > { %v5636_v40 = vsel %vm7415_vm2, %v5416_v32, %v5560_v33  ;;  %v4912_v41 = vmax.f32 %v4768_v25, %v4840_v34  ;;  %v5201_v42 = vmin.f32 %v5057_v26, %v5129_v35 }
 0x262   : > { %v5709_v43 = vmul.f32 %v7419_v12, %v5636_v40  ;;  %6651 = vmatmul.msk.bf16.gmra.mxu0 %vm3568_vm0, %v6798_v30  ;;  %6687 = vmatmul.msk.bf16.gmra.mxu1 %vm3568_vm0, %v6834_v31 }
 0x263   : > { %v4985_v44 = vadd.f32 %v7409_v62, %v4912_v41  ;;  %v5273_v45 = vadd.f32 %v5201_v42, %v7409_v62  ;;  %6723 = vmatmul.msk.bf16.gmra.mxu2 %vm3568_vm0, %v6870_v38  ;;  %6759 = vmatmul.msk.bf16.gmra.mxu3 %vm3568_vm0, %v6906_v39 }
 0x264   : > { %v5782_v46 = vadd.f32 %v7425_v27, %v5709_v43 }
 0x265   : > { %v5345_v47 = vmul.f32 0.05, %v4985_v44  ;;  %v5489_v48 = vmul.f32 0.05, %v5273_v45 }
 0x266   : > { %v5854_v51 = vpack.c.bf16 %v5782_v46, %v5782_v46  ;;  %v4465_v52 = vpop.f32.mrf.mxu2  ;;  %v4645_v53 = vpop.f32.mrf.mxu3 }
 0x267   : > { %v5417_v54 = vmax.f32 %v4985_v44, %v5345_v47  ;;  %v5561_v55 = vmax.f32 %v5273_v45, %v5489_v48  ;;  %v4841_v56 = vmax.f32 %v4465_v52, %v4645_v53  ;;  %v5130_v57 = vmin.f32 %v4465_v52, %v4645_v53  ;;  %v4107_v58 = vpop.f32.mrf.mxu0  ;;  %v4287_v59 = vpop.f32.mrf.mxu1 }
 0x268   : > { %5927 = vst.msk [vmem:[%s7441_s14 + $0x90] sm:$0xf] %vm5890_vm3, %v5854_v51  ;;  %v4770_v7 = vmax.f32 %v4107_v58, %v4287_v59  ;;  %v5059_v8 = vmin.f32 %v4107_v58, %v4287_v59  ;;  %v6800_v58 = vld [vmem:[%s7330_s6 + $0xe8] sm:$0xff] }
 0x269   : > { %v5637_v60 = vsel %vm7415_vm2, %v5417_v54, %v5561_v55  ;;  %v4913_v61 = vmax.f32 %v4769_v49, %v4841_v56  ;;  %v5202_v63 = vmin.f32 %v5058_v50, %v5130_v57  ;;  %v6836_v59 = vld [vmem:[%s7330_s6 + $0x208] sm:$0xff] }
 0x26a   : > { %v5710_v0 = vmul.f32 %v7419_v12, %v5637_v60 }
 0x26b   : > { %v4986_v1 = vadd.f32 %v7409_v62, %v4913_v61  ;;  %v5274_v2 = vadd.f32 %v5202_v63, %v7409_v62 }
 0x26c   : > { %v5783_v3 = vadd.f32 %v7425_v27, %v5710_v0 }
 0x26d   : > { %v5346_v4 = vmul.f32 0.05, %v4986_v1  ;;  %v5490_v5 = vmul.f32 0.05, %v5274_v2 }
 0x26e   : > { %v5855_v6 = vpack.c.bf16 %v5783_v3, %v5783_v3  ;;  %v4467_v9 = vpop.f32.mrf.mxu2  ;;  %v4647_v10 = vpop.f32.mrf.mxu3  ;;  %v6872_v3 = vld [vmem:[%s7330_s6 + $0x328] sm:$0xff] }
 0x26f   : > { %v5418_v15 = vmax.f32 %v4986_v1, %v5346_v4  ;;  %v5562_v16 = vmax.f32 %v5274_v2, %v5490_v5  ;;  %v4842_v17 = vmax.f32 %v4467_v9, %v4647_v10  ;;  %v5131_v18 = vmin.f32 %v4467_v9, %v4647_v10  ;;  %v4110_v19 = vpop.f32.mrf.mxu0  ;;  %v4290_v20 = vpop.f32.mrf.mxu1  ;;  %v6908_v4 = vld [vmem:[%s7330_s6 + $0x448] sm:$0xff] }
 0x270   : > { %5928 = vst.msk [vmem:[%s7441_s14 + $0x94] sm:$0xf] %vm5890_vm3, %v5855_v6  ;;  %v4771_v33 = vmax.f32 %v4110_v19, %v4290_v20  ;;  %v5060_v34 = vmin.f32 %v4110_v19, %v4290_v20 }
 0x271   : > { %v5638_v23 = vsel %vm7415_vm2, %v5418_v15, %v5562_v16  ;;  %v4914_v24 = vmax.f32 %v4770_v7, %v4842_v17  ;;  %v5203_v25 = vmin.f32 %v5059_v8, %v5131_v18 }
 0x272   : > { %v5711_v26 = vmul.f32 %v7419_v12, %v5638_v23  ;;  %6652 = vmatmul.msk.bf16.gmra.mxu0 %vm3568_vm0, %v6799_v13  ;;  %6688 = vmatmul.msk.bf16.gmra.mxu1 %vm3568_vm0, %v6835_v14 }
 0x273   : > { %v4987_v28 = vadd.f32 %v7409_v62, %v4914_v24  ;;  %v5275_v29 = vadd.f32 %v5203_v25, %v7409_v62  ;;  %6724 = vmatmul.msk.bf16.gmra.mxu2 %vm3568_vm0, %v6871_v21  ;;  %6760 = vmatmul.msk.bf16.gmra.mxu3 %vm3568_vm0, %v6907_v22 }
 0x274   : > { %v5784_v30 = vadd.f32 %v7425_v27, %v5711_v26 }
 0x275   : > { %v5347_v31 = vmul.f32 0.05, %v4987_v28  ;;  %v5491_v32 = vmul.f32 0.05, %v5275_v29 }
 0x276   : > { %v5856_v35 = vpack.c.bf16 %v5784_v30, %v5784_v30  ;;  %v4470_v36 = vpop.f32.mrf.mxu2  ;;  %v4650_v37 = vpop.f32.mrf.mxu3 }
 0x277   : > { %v5419_v38 = vmax.f32 %v4987_v28, %v5347_v31  ;;  %v5563_v39 = vmax.f32 %v5275_v29, %v5491_v32  ;;  %v4843_v40 = vmax.f32 %v4470_v36, %v4650_v37  ;;  %v5132_v41 = vmin.f32 %v4470_v36, %v4650_v37  ;;  %v4112_v42 = vpop.f32.mrf.mxu0  ;;  %v4292_v43 = vpop.f32.mrf.mxu1 }
 0x278   : > { %5929 = vst.msk [vmem:[%s7441_s14 + $0x98] sm:$0xf] %vm5890_vm3, %v5856_v35  ;;  %v4772_v54 = vmax.f32 %v4112_v42, %v4292_v43  ;;  %v5061_v55 = vmin.f32 %v4112_v42, %v4292_v43  ;;  %v6801_v42 = vld [vmem:[%s7330_s6 + $0xf0] sm:$0xff] }
 0x279   : > { %v5639_v44 = vsel %vm7415_vm2, %v5419_v38, %v5563_v39  ;;  %v4915_v45 = vmax.f32 %v4771_v33, %v4843_v40  ;;  %v5204_v46 = vmin.f32 %v5060_v34, %v5132_v41  ;;  %v6837_v43 = vld [vmem:[%s7330_s6 + $0x210] sm:$0xff] }
 0x27a   : > { %v5712_v47 = vmul.f32 %v7419_v12, %v5639_v44 }
 0x27b   : > { %v4988_v48 = vadd.f32 %v7409_v62, %v4915_v45  ;;  %v5276_v49 = vadd.f32 %v5204_v46, %v7409_v62 }
 0x27c   : > { %v5785_v50 = vadd.f32 %v7425_v27, %v5712_v47 }
 0x27d   : > { %v5348_v51 = vmul.f32 0.05, %v4988_v48  ;;  %v5492_v52 = vmul.f32 0.05, %v5276_v49 }
 0x27e   : > { %v5857_v53 = vpack.c.bf16 %v5785_v50, %v5785_v50  ;;  %v4472_v56 = vpop.f32.mrf.mxu2  ;;  %v4652_v57 = vpop.f32.mrf.mxu3  ;;  %v6873_v50 = vld [vmem:[%s7330_s6 + $0x330] sm:$0xff] }
 0x27f   : > { %v5420_v60 = vmax.f32 %v4988_v48, %v5348_v51  ;;  %v5564_v61 = vmax.f32 %v5276_v49, %v5492_v52  ;;  %v4844_v63 = vmax.f32 %v4472_v56, %v4652_v57  ;;  %v5133_v0 = vmin.f32 %v4472_v56, %v4652_v57  ;;  %v4115_v1 = vpop.f32.mrf.mxu0  ;;  %v4295_v2 = vpop.f32.mrf.mxu1  ;;  %v6909_v51 = vld [vmem:[%s7330_s6 + $0x450] sm:$0xff] }
 0x280   : > { %5930 = vst.msk [vmem:[%s7441_s14 + $0x9c] sm:$0xf] %vm5890_vm3, %v5857_v53  ;;  %v4773_v16 = vmax.f32 %v4115_v1, %v4295_v2  ;;  %v5062_v17 = vmin.f32 %v4115_v1, %v4295_v2 }
 0x281   : > { %v5640_v5 = vsel %vm7415_vm2, %v5420_v60, %v5564_v61  ;;  %v4916_v6 = vmax.f32 %v4772_v54, %v4844_v63  ;;  %v5205_v7 = vmin.f32 %v5061_v55, %v5133_v0 }
 0x282   : > { %v5713_v8 = vmul.f32 %v7419_v12, %v5640_v5  ;;  %6653 = vmatmul.msk.bf16.gmra.mxu0 %vm3568_vm0, %v6800_v58  ;;  %6689 = vmatmul.msk.bf16.gmra.mxu1 %vm3568_vm0, %v6836_v59 }
 0x283   : > { %v4989_v9 = vadd.f32 %v7409_v62, %v4916_v6  ;;  %v5277_v10 = vadd.f32 %v5205_v7, %v7409_v62  ;;  %6725 = vmatmul.msk.bf16.gmra.mxu2 %vm3568_vm0, %v6872_v3  ;;  %6761 = vmatmul.msk.bf16.gmra.mxu3 %vm3568_vm0, %v6908_v4 }
 0x284   : > { %v5786_v13 = vadd.f32 %v7425_v27, %v5713_v8 }
 0x285   : > { %v5349_v14 = vmul.f32 0.05, %v4989_v9  ;;  %v5493_v15 = vmul.f32 0.05, %v5277_v10 }
 0x286   : > { %v5858_v18 = vpack.c.bf16 %v5786_v13, %v5786_v13  ;;  %v4475_v19 = vpop.f32.mrf.mxu2  ;;  %v4655_v20 = vpop.f32.mrf.mxu3 }
 0x287   : > { %v5421_v21 = vmax.f32 %v4989_v9, %v5349_v14  ;;  %v5565_v22 = vmax.f32 %v5277_v10, %v5493_v15  ;;  %v4845_v23 = vmax.f32 %v4475_v19, %v4655_v20  ;;  %v5134_v24 = vmin.f32 %v4475_v19, %v4655_v20  ;;  %v4117_v25 = vpop.f32.mrf.mxu0  ;;  %v4297_v26 = vpop.f32.mrf.mxu1 }
 0x288   : > { %5931 = vst.msk [vmem:[%s7441_s14 + $0xa0] sm:$0xf] %vm5890_vm3, %v5858_v18  ;;  %v4774_v38 = vmax.f32 %v4117_v25, %v4297_v26  ;;  %v5063_v39 = vmin.f32 %v4117_v25, %v4297_v26  ;;  %v6802_v25 = vld [vmem:[%s7330_s6 + $0xf8] sm:$0xff] }
 0x289   : > { %v5641_v28 = vsel %vm7415_vm2, %v5421_v21, %v5565_v22  ;;  %v4917_v29 = vmax.f32 %v4773_v16, %v4845_v23  ;;  %v5206_v30 = vmin.f32 %v5062_v17, %v5134_v24  ;;  %v6838_v26 = vld [vmem:[%s7330_s6 + $0x218] sm:$0xff] }
 0x28a   : > { %v5714_v31 = vmul.f32 %v7419_v12, %v5641_v28 }
 0x28b   : > { %v4990_v32 = vadd.f32 %v7409_v62, %v4917_v29  ;;  %v5278_v33 = vadd.f32 %v5206_v30, %v7409_v62 }
 0x28c   : > { %v5787_v34 = vadd.f32 %v7425_v27, %v5714_v31 }
 0x28d   : > { %v5350_v35 = vmul.f32 0.05, %v4990_v32  ;;  %v5494_v36 = vmul.f32 0.05, %v5278_v33 }
 0x28e   : > { %v5859_v37 = vpack.c.bf16 %v5787_v34, %v5787_v34  ;;  %v4477_v40 = vpop.f32.mrf.mxu2  ;;  %v4657_v41 = vpop.f32.mrf.mxu3  ;;  %v6874_v34 = vld [vmem:[%s7330_s6 + $0x338] sm:$0xff] }
 0x28f   : > { %v5422_v44 = vmax.f32 %v4990_v32, %v5350_v35  ;;  %v5566_v45 = vmax.f32 %v5278_v33, %v5494_v36  ;;  %v4846_v46 = vmax.f32 %v4477_v40, %v4657_v41  ;;  %v5135_v47 = vmin.f32 %v4477_v40, %v4657_v41  ;;  %v4120_v48 = vpop.f32.mrf.mxu0  ;;  %v4300_v49 = vpop.f32.mrf.mxu1  ;;  %v6910_v35 = vld [vmem:[%s7330_s6 + $0x458] sm:$0xff] }
 0x290   : > { %5932 = vst.msk [vmem:[%s7441_s14 + $0xa4] sm:$0xf] %vm5890_vm3, %v5859_v37  ;;  %v4775_v61 = vmax.f32 %v4120_v48, %v4300_v49  ;;  %v5064_v63 = vmin.f32 %v4120_v48, %v4300_v49 }
 0x291   : > { %v5642_v52 = vsel %vm7415_vm2, %v5422_v44, %v5566_v45  ;;  %v4918_v53 = vmax.f32 %v4774_v38, %v4846_v46  ;;  %v5207_v54 = vmin.f32 %v5063_v39, %v5135_v47 }
 0x292   : > { %v5715_v55 = vmul.f32 %v7419_v12, %v5642_v52  ;;  %6654 = vmatmul.msk.bf16.gmra.mxu0 %vm3568_vm0, %v6801_v42  ;;  %6690 = vmatmul.msk.bf16.gmra.mxu1 %vm3568_vm0, %v6837_v43 }
 0x293   : > { %v4991_v56 = vadd.f32 %v7409_v62, %v4918_v53  ;;  %v5279_v57 = vadd.f32 %v5207_v54, %v7409_v62  ;;  %6726 = vmatmul.msk.bf16.gmra.mxu2 %vm3568_vm0, %v6873_v50  ;;  %6762 = vmatmul.msk.bf16.gmra.mxu3 %vm3568_vm0, %v6909_v51 }
 0x294   : > { %v5788_v58 = vadd.f32 %v7425_v27, %v5715_v55 }
 0x295   : > { %v5351_v59 = vmul.f32 0.05, %v4991_v56  ;;  %v5495_v60 = vmul.f32 0.05, %v5279_v57 }
 0x296   : > { %v5860_v0 = vpack.c.bf16 %v5788_v58, %v5788_v58  ;;  %v4480_v1 = vpop.f32.mrf.mxu2  ;;  %v4660_v2 = vpop.f32.mrf.mxu3 }
 0x297   : > { %v5423_v3 = vmax.f32 %v4991_v56, %v5351_v59  ;;  %v5567_v4 = vmax.f32 %v5279_v57, %v5495_v60  ;;  %v4847_v5 = vmax.f32 %v4480_v1, %v4660_v2  ;;  %v5136_v6 = vmin.f32 %v4480_v1, %v4660_v2  ;;  %v4122_v7 = vpop.f32.mrf.mxu0  ;;  %v4302_v8 = vpop.f32.mrf.mxu1 }
 0x298   : > { %5933 = vst.msk [vmem:[%s7441_s14 + $0xa8] sm:$0xf] %vm5890_vm3, %v5860_v0  ;;  %v4776_v21 = vmax.f32 %v4122_v7, %v4302_v8  ;;  %v5065_v22 = vmin.f32 %v4122_v7, %v4302_v8  ;;  %v6803_v7 = vld [vmem:[%s7330_s6 + $0x100] sm:$0xff] }
 0x299   : > { %v5643_v9 = vsel %vm7415_vm2, %v5423_v3, %v5567_v4  ;;  %v4919_v10 = vmax.f32 %v4775_v61, %v4847_v5  ;;  %v5208_v13 = vmin.f32 %v5064_v63, %v5136_v6  ;;  %v6839_v8 = vld [vmem:[%s7330_s6 + $0x220] sm:$0xff] }
 0x29a   : > { %v5716_v14 = vmul.f32 %v7419_v12, %v5643_v9 }
 0x29b   : > { %v4992_v15 = vadd.f32 %v7409_v62, %v4919_v10  ;;  %v5280_v16 = vadd.f32 %v5208_v13, %v7409_v62 }
 0x29c   : > { %v5789_v17 = vadd.f32 %v7425_v27, %v5716_v14 }
 0x29d   : > { %v5352_v18 = vmul.f32 0.05, %v4992_v15  ;;  %v5496_v19 = vmul.f32 0.05, %v5280_v16 }
 0x29e   : > { %v5861_v20 = vpack.c.bf16 %v5789_v17, %v5789_v17  ;;  %v4482_v23 = vpop.f32.mrf.mxu2  ;;  %v4662_v24 = vpop.f32.mrf.mxu3  ;;  %v6875_v17 = vld [vmem:[%s7330_s6 + $0x340] sm:$0xff] }
 0x29f   : > { %v5424_v28 = vmax.f32 %v4992_v15, %v5352_v18  ;;  %v5568_v29 = vmax.f32 %v5280_v16, %v5496_v19  ;;  %v4848_v30 = vmax.f32 %v4482_v23, %v4662_v24  ;;  %v5137_v31 = vmin.f32 %v4482_v23, %v4662_v24  ;;  %v4125_v32 = vpop.f32.mrf.mxu0  ;;  %v4305_v33 = vpop.f32.mrf.mxu1  ;;  %v6911_v18 = vld [vmem:[%s7330_s6 + $0x460] sm:$0xff] }
 0x2a0   : > { %5934 = vst.msk [vmem:[%s7441_s14 + $0xac] sm:$0xf] %vm5890_vm3, %v5861_v20  ;;  %v4777_v45 = vmax.f32 %v4125_v32, %v4305_v33  ;;  %v5066_v46 = vmin.f32 %v4125_v32, %v4305_v33 }
 0x2a1   : > { %v5644_v36 = vsel %vm7415_vm2, %v5424_v28, %v5568_v29  ;;  %v4920_v37 = vmax.f32 %v4776_v21, %v4848_v30  ;;  %v5209_v38 = vmin.f32 %v5065_v22, %v5137_v31 }
 0x2a2   : > { %v5717_v39 = vmul.f32 %v7419_v12, %v5644_v36  ;;  %6655 = vmatmul.msk.bf16.gmra.mxu0 %vm3568_vm0, %v6802_v25  ;;  %6691 = vmatmul.msk.bf16.gmra.mxu1 %vm3568_vm0, %v6838_v26 }
 0x2a3   : > { %v4993_v40 = vadd.f32 %v7409_v62, %v4920_v37  ;;  %v5281_v41 = vadd.f32 %v5209_v38, %v7409_v62  ;;  %6727 = vmatmul.msk.bf16.gmra.mxu2 %vm3568_vm0, %v6874_v34  ;;  %6763 = vmatmul.msk.bf16.gmra.mxu3 %vm3568_vm0, %v6910_v35 }
 0x2a4   : > { %v5790_v42 = vadd.f32 %v7425_v27, %v5717_v39 }
 0x2a5   : > { %v5353_v43 = vmul.f32 0.05, %v4993_v40  ;;  %v5497_v44 = vmul.f32 0.05, %v5281_v41 }
 0x2a6   : > { %v5862_v47 = vpack.c.bf16 %v5790_v42, %v5790_v42  ;;  %v4485_v48 = vpop.f32.mrf.mxu2  ;;  %v4665_v49 = vpop.f32.mrf.mxu3 }
 0x2a7   : > { %v5425_v50 = vmax.f32 %v4993_v40, %v5353_v43  ;;  %v5569_v51 = vmax.f32 %v5281_v41, %v5497_v44  ;;  %v4849_v52 = vmax.f32 %v4485_v48, %v4665_v49  ;;  %v5138_v53 = vmin.f32 %v4485_v48, %v4665_v49  ;;  %v4127_v54 = vpop.f32.mrf.mxu0  ;;  %v4307_v55 = vpop.f32.mrf.mxu1 }
 0x2a8   : > { %5935 = vst.msk [vmem:[%s7441_s14 + $0xb0] sm:$0xf] %vm5890_vm3, %v5862_v47  ;;  %v4778_v3 = vmax.f32 %v4127_v54, %v4307_v55  ;;  %v5067_v4 = vmin.f32 %v4127_v54, %v4307_v55  ;;  %v6804_v54 = vld [vmem:[%s7330_s6 + $0x108] sm:$0xff] }
 0x2a9   : > { %v5645_v56 = vsel %vm7415_vm2, %v5425_v50, %v5569_v51  ;;  %v4921_v57 = vmax.f32 %v4777_v45, %v4849_v52  ;;  %v5210_v58 = vmin.f32 %v5066_v46, %v5138_v53  ;;  %v6840_v55 = vld [vmem:[%s7330_s6 + $0x228] sm:$0xff] }
 0x2aa   : > { %v5718_v59 = vmul.f32 %v7419_v12, %v5645_v56 }
 0x2ab   : > { %v4994_v60 = vadd.f32 %v7409_v62, %v4921_v57  ;;  %v5282_v61 = vadd.f32 %v5210_v58, %v7409_v62 }
 0x2ac   : > { %v5791_v63 = vadd.f32 %v7425_v27, %v5718_v59 }
 0x2ad   : > { %v5354_v0 = vmul.f32 0.05, %v4994_v60  ;;  %v5498_v1 = vmul.f32 0.05, %v5282_v61 }
 0x2ae   : > { %v5863_v2 = vpack.c.bf16 %v5791_v63, %v5791_v63  ;;  %v4487_v5 = vpop.f32.mrf.mxu2  ;;  %v4667_v6 = vpop.f32.mrf.mxu3  ;;  %v6876_v63 = vld [vmem:[%s7330_s6 + $0x348] sm:$0xff] }
 0x2af   : > { %v5426_v9 = vmax.f32 %v4994_v60, %v5354_v0  ;;  %v5570_v10 = vmax.f32 %v5282_v61, %v5498_v1  ;;  %v4850_v13 = vmax.f32 %v4487_v5, %v4667_v6  ;;  %v5139_v14 = vmin.f32 %v4487_v5, %v4667_v6  ;;  %v4130_v15 = vpop.f32.mrf.mxu0  ;;  %v4310_v16 = vpop.f32.mrf.mxu1  ;;  %v6912_v0 = vld [vmem:[%s7330_s6 + $0x468] sm:$0xff] }
 0x2b0   : > { %5936 = vst.msk [vmem:[%s7441_s14 + $0xb4] sm:$0xf] %vm5890_vm3, %v5863_v2  ;;  %v4779_v29 = vmax.f32 %v4130_v15, %v4310_v16  ;;  %v5068_v30 = vmin.f32 %v4130_v15, %v4310_v16 }
 0x2b1   : > { %v5646_v19 = vsel %vm7415_vm2, %v5426_v9, %v5570_v10  ;;  %v4922_v20 = vmax.f32 %v4778_v3, %v4850_v13  ;;  %v5211_v21 = vmin.f32 %v5067_v4, %v5139_v14 }
 0x2b2   : > { %v5719_v22 = vmul.f32 %v7419_v12, %v5646_v19  ;;  %6656 = vmatmul.msk.bf16.gmra.mxu0 %vm3568_vm0, %v6803_v7  ;;  %6692 = vmatmul.msk.bf16.gmra.mxu1 %vm3568_vm0, %v6839_v8 }
 0x2b3   : > { %v4995_v23 = vadd.f32 %v7409_v62, %v4922_v20  ;;  %v5283_v24 = vadd.f32 %v5211_v21, %v7409_v62  ;;  %6728 = vmatmul.msk.bf16.gmra.mxu2 %vm3568_vm0, %v6875_v17  ;;  %6764 = vmatmul.msk.bf16.gmra.mxu3 %vm3568_vm0, %v6911_v18 }
 0x2b4   : > { %v5792_v25 = vadd.f32 %v7425_v27, %v5719_v22 }
 0x2b5   : > { %v5355_v26 = vmul.f32 0.05, %v4995_v23  ;;  %v5499_v28 = vmul.f32 0.05, %v5283_v24 }
 0x2b6   : > { %v5864_v31 = vpack.c.bf16 %v5792_v25, %v5792_v25  ;;  %v4490_v32 = vpop.f32.mrf.mxu2  ;;  %v4670_v33 = vpop.f32.mrf.mxu3 }
 0x2b7   : > { %v5427_v34 = vmax.f32 %v4995_v23, %v5355_v26  ;;  %v5571_v35 = vmax.f32 %v5283_v24, %v5499_v28  ;;  %v4851_v36 = vmax.f32 %v4490_v32, %v4670_v33  ;;  %v5140_v37 = vmin.f32 %v4490_v32, %v4670_v33  ;;  %v4132_v38 = vpop.f32.mrf.mxu0  ;;  %v4312_v39 = vpop.f32.mrf.mxu1 }
 0x2b8   : > { %5937 = vst.msk [vmem:[%s7441_s14 + $0xb8] sm:$0xf] %vm5890_vm3, %v5864_v31  ;;  %v4780_v50 = vmax.f32 %v4132_v38, %v4312_v39  ;;  %v5069_v51 = vmin.f32 %v4132_v38, %v4312_v39  ;;  %v6805_v38 = vld [vmem:[%s7330_s6 + $0x110] sm:$0xff] }
 0x2b9   : > { %v5647_v40 = vsel %vm7415_vm2, %v5427_v34, %v5571_v35  ;;  %v4923_v41 = vmax.f32 %v4779_v29, %v4851_v36  ;;  %v5212_v42 = vmin.f32 %v5068_v30, %v5140_v37  ;;  %v6841_v39 = vld [vmem:[%s7330_s6 + $0x230] sm:$0xff] }
 0x2ba   : > { %v5720_v43 = vmul.f32 %v7419_v12, %v5647_v40 }
 0x2bb   : > { %v4996_v44 = vadd.f32 %v7409_v62, %v4923_v41  ;;  %v5284_v45 = vadd.f32 %v5212_v42, %v7409_v62 }
 0x2bc   : > { %v5793_v46 = vadd.f32 %v7425_v27, %v5720_v43 }
 0x2bd   : > { %v5356_v47 = vmul.f32 0.05, %v4996_v44  ;;  %v5500_v48 = vmul.f32 0.05, %v5284_v45 }
 0x2be   : > { %v5865_v49 = vpack.c.bf16 %v5793_v46, %v5793_v46  ;;  %v4492_v52 = vpop.f32.mrf.mxu2  ;;  %v4672_v53 = vpop.f32.mrf.mxu3  ;;  %v6877_v46 = vld [vmem:[%s7330_s6 + $0x350] sm:$0xff] }
 0x2bf   : > { %v5428_v56 = vmax.f32 %v4996_v44, %v5356_v47  ;;  %v5572_v57 = vmax.f32 %v5284_v45, %v5500_v48  ;;  %v4852_v58 = vmax.f32 %v4492_v52, %v4672_v53  ;;  %v5141_v59 = vmin.f32 %v4492_v52, %v4672_v53  ;;  %v4135_v60 = vpop.f32.mrf.mxu0  ;;  %v4315_v61 = vpop.f32.mrf.mxu1  ;;  %v6913_v47 = vld [vmem:[%s7330_s6 + $0x470] sm:$0xff] }
 0x2c0   : > { %5938 = vst.msk [vmem:[%s7441_s14 + $0xbc] sm:$0xf] %vm5890_vm3, %v5865_v49  ;;  %v4781_v10 = vmax.f32 %v4135_v60, %v4315_v61  ;;  %v5070_v13 = vmin.f32 %v4135_v60, %v4315_v61 }
 0x2c1   : > { %v5648_v1 = vsel %vm7415_vm2, %v5428_v56, %v5572_v57  ;;  %v4924_v2 = vmax.f32 %v4780_v50, %v4852_v58  ;;  %v5213_v3 = vmin.f32 %v5069_v51, %v5141_v59 }
 0x2c2   : > { %v5721_v4 = vmul.f32 %v7419_v12, %v5648_v1  ;;  %6657 = vmatmul.msk.bf16.gmra.mxu0 %vm3568_vm0, %v6804_v54  ;;  %6693 = vmatmul.msk.bf16.gmra.mxu1 %vm3568_vm0, %v6840_v55 }
 0x2c3   : > { %v4997_v5 = vadd.f32 %v7409_v62, %v4924_v2  ;;  %v5285_v6 = vadd.f32 %v5213_v3, %v7409_v62  ;;  %6729 = vmatmul.msk.bf16.gmra.mxu2 %vm3568_vm0, %v6876_v63  ;;  %6765 = vmatmul.msk.bf16.gmra.mxu3 %vm3568_vm0, %v6912_v0 }
 0x2c4   : > { %v5794_v7 = vadd.f32 %v7425_v27, %v5721_v4 }
 0x2c5   : > { %v5357_v8 = vmul.f32 0.05, %v4997_v5  ;;  %v5501_v9 = vmul.f32 0.05, %v5285_v6 }
 0x2c6   : > { %v5866_v14 = vpack.c.bf16 %v5794_v7, %v5794_v7  ;;  %v4495_v15 = vpop.f32.mrf.mxu2  ;;  %v4675_v16 = vpop.f32.mrf.mxu3 }
 0x2c7   : > { %v5429_v17 = vmax.f32 %v4997_v5, %v5357_v8  ;;  %v5573_v18 = vmax.f32 %v5285_v6, %v5501_v9  ;;  %v4853_v19 = vmax.f32 %v4495_v15, %v4675_v16  ;;  %v5142_v20 = vmin.f32 %v4495_v15, %v4675_v16  ;;  %v4137_v21 = vpop.f32.mrf.mxu0  ;;  %v4317_v22 = vpop.f32.mrf.mxu1 }
 0x2c8   : > { %5939 = vst.msk [vmem:[%s7441_s14 + $0xc0] sm:$0xf] %vm5890_vm3, %v5866_v14  ;;  %v4782_v34 = vmax.f32 %v4137_v21, %v4317_v22  ;;  %v5071_v35 = vmin.f32 %v4137_v21, %v4317_v22  ;;  %v6806_v21 = vld [vmem:[%s7330_s6 + $0x118] sm:$0xff] }
 0x2c9   : > { %v5649_v23 = vsel %vm7415_vm2, %v5429_v17, %v5573_v18  ;;  %v4925_v24 = vmax.f32 %v4781_v10, %v4853_v19  ;;  %v5214_v25 = vmin.f32 %v5070_v13, %v5142_v20  ;;  %v6842_v22 = vld [vmem:[%s7330_s6 + $0x238] sm:$0xff] }
 0x2ca   : > { %v5722_v26 = vmul.f32 %v7419_v12, %v5649_v23 }
 0x2cb   : > { %v4998_v28 = vadd.f32 %v7409_v62, %v4925_v24  ;;  %v5286_v29 = vadd.f32 %v5214_v25, %v7409_v62 }
 0x2cc   : > { %v5795_v30 = vadd.f32 %v7425_v27, %v5722_v26 }
 0x2cd   : > { %v5358_v31 = vmul.f32 0.05, %v4998_v28  ;;  %v5502_v32 = vmul.f32 0.05, %v5286_v29 }
 0x2ce   : > { %v5867_v33 = vpack.c.bf16 %v5795_v30, %v5795_v30  ;;  %v4497_v36 = vpop.f32.mrf.mxu2  ;;  %v4677_v37 = vpop.f32.mrf.mxu3  ;;  %v6878_v30 = vld [vmem:[%s7330_s6 + $0x358] sm:$0xff] }
 0x2cf   : > { %v5430_v40 = vmax.f32 %v4998_v28, %v5358_v31  ;;  %v5574_v41 = vmax.f32 %v5286_v29, %v5502_v32  ;;  %v4854_v42 = vmax.f32 %v4497_v36, %v4677_v37  ;;  %v5143_v43 = vmin.f32 %v4497_v36, %v4677_v37  ;;  %v4140_v44 = vpop.f32.mrf.mxu0  ;;  %v4320_v45 = vpop.f32.mrf.mxu1  ;;  %v6914_v31 = vld [vmem:[%s7330_s6 + $0x478] sm:$0xff] }
 0x2d0   : > { %5940 = vst.msk [vmem:[%s7441_s14 + $0xc4] sm:$0xf] %vm5890_vm3, %v5867_v33  ;;  %v4783_v57 = vmax.f32 %v4140_v44, %v4320_v45  ;;  %v5072_v58 = vmin.f32 %v4140_v44, %v4320_v45 }
 0x2d1   : > { %v5650_v48 = vsel %vm7415_vm2, %v5430_v40, %v5574_v41  ;;  %v4926_v49 = vmax.f32 %v4782_v34, %v4854_v42  ;;  %v5215_v50 = vmin.f32 %v5071_v35, %v5143_v43 }
 0x2d2   : > { %v5723_v51 = vmul.f32 %v7419_v12, %v5650_v48  ;;  %6658 = vmatmul.msk.bf16.gmra.mxu0 %vm3568_vm0, %v6805_v38  ;;  %6694 = vmatmul.msk.bf16.gmra.mxu1 %vm3568_vm0, %v6841_v39 }
 0x2d3   : > { %v4999_v52 = vadd.f32 %v7409_v62, %v4926_v49  ;;  %v5287_v53 = vadd.f32 %v5215_v50, %v7409_v62  ;;  %6730 = vmatmul.msk.bf16.gmra.mxu2 %vm3568_vm0, %v6877_v46  ;;  %6766 = vmatmul.msk.bf16.gmra.mxu3 %vm3568_vm0, %v6913_v47 }
 0x2d4   : > { %v5796_v54 = vadd.f32 %v7425_v27, %v5723_v51 }
 0x2d5   : > { %v5359_v55 = vmul.f32 0.05, %v4999_v52  ;;  %v5503_v56 = vmul.f32 0.05, %v5287_v53 }
 0x2d6   : > { %v5868_v59 = vpack.c.bf16 %v5796_v54, %v5796_v54  ;;  %v4500_v60 = vpop.f32.mrf.mxu2  ;;  %v4680_v61 = vpop.f32.mrf.mxu3 }
 0x2d7   : > { %v5431_v63 = vmax.f32 %v4999_v52, %v5359_v55  ;;  %v5575_v0 = vmax.f32 %v5287_v53, %v5503_v56  ;;  %v4855_v1 = vmax.f32 %v4500_v60, %v4680_v61  ;;  %v5144_v2 = vmin.f32 %v4500_v60, %v4680_v61  ;;  %v4142_v3 = vpop.f32.mrf.mxu0  ;;  %v4322_v4 = vpop.f32.mrf.mxu1 }
 0x2d8   : > { %5941 = vst.msk [vmem:[%s7441_s14 + $0xc8] sm:$0xf] %vm5890_vm3, %v5868_v59  ;;  %v4784_v17 = vmax.f32 %v4142_v3, %v4322_v4  ;;  %v5073_v18 = vmin.f32 %v4142_v3, %v4322_v4 }
 0x2d9   : > { %v5651_v5 = vsel %vm7415_vm2, %v5431_v63, %v5575_v0  ;;  %v4927_v6 = vmax.f32 %v4783_v57, %v4855_v1  ;;  %v5216_v7 = vmin.f32 %v5072_v58, %v5144_v2 }
 0x2da   : > { %v5724_v8 = vmul.f32 %v7419_v12, %v5651_v5 }
 0x2db   : > { %v5000_v9 = vadd.f32 %v7409_v62, %v4927_v6  ;;  %v5288_v10 = vadd.f32 %v5216_v7, %v7409_v62 }
 0x2dc   : > { %v5797_v13 = vadd.f32 %v7425_v27, %v5724_v8 }
 0x2dd   : > { %v5360_v14 = vmul.f32 0.05, %v5000_v9  ;;  %v5504_v15 = vmul.f32 0.05, %v5288_v10 }
 0x2de   : > { %v5869_v16 = vpack.c.bf16 %v5797_v13, %v5797_v13  ;;  %v4502_v19 = vpop.f32.mrf.mxu2  ;;  %v4682_v20 = vpop.f32.mrf.mxu3 }
 0x2df   : > { %v5432_v23 = vmax.f32 %v5000_v9, %v5360_v14  ;;  %v5576_v24 = vmax.f32 %v5288_v10, %v5504_v15  ;;  %v4856_v25 = vmax.f32 %v4502_v19, %v4682_v20  ;;  %v5145_v26 = vmin.f32 %v4502_v19, %v4682_v20  ;;  %v4145_v28 = vpop.f32.mrf.mxu0  ;;  %v4325_v29 = vpop.f32.mrf.mxu1 }
 0x2e0   : > { %5942 = vst.msk [vmem:[%s7441_s14 + $0xcc] sm:$0xf] %vm5890_vm3, %v5869_v16  ;;  %v4785_v41 = vmax.f32 %v4145_v28, %v4325_v29  ;;  %v5074_v42 = vmin.f32 %v4145_v28, %v4325_v29 }
 0x2e1   : > { %v5652_v32 = vsel %vm7415_vm2, %v5432_v23, %v5576_v24  ;;  %v4928_v33 = vmax.f32 %v4784_v17, %v4856_v25  ;;  %v5217_v34 = vmin.f32 %v5073_v18, %v5145_v26 }
 0x2e2   : > { %v5725_v35 = vmul.f32 %v7419_v12, %v5652_v32  ;;  %6659 = vmatmul.msk.bf16.gmra.mxu0 %vm3568_vm0, %v6806_v21  ;;  %6695 = vmatmul.msk.bf16.gmra.mxu1 %vm3568_vm0, %v6842_v22 }
 0x2e3   : > { %v5001_v36 = vadd.f32 %v7409_v62, %v4928_v33  ;;  %v5289_v37 = vadd.f32 %v5217_v34, %v7409_v62  ;;  %6731 = vmatmul.msk.bf16.gmra.mxu2 %vm3568_vm0, %v6878_v30  ;;  %6767 = vmatmul.msk.bf16.gmra.mxu3 %vm3568_vm0, %v6914_v31 }
 0x2e4   : > { %v5798_v38 = vadd.f32 %v7425_v27, %v5725_v35 }
 0x2e5   : > { %v5361_v39 = vmul.f32 0.05, %v5001_v36  ;;  %v5505_v40 = vmul.f32 0.05, %v5289_v37 }
 0x2e6   : > { %v5870_v43 = vpack.c.bf16 %v5798_v38, %v5798_v38  ;;  %v4505_v44 = vpop.f32.mrf.mxu2  ;;  %v4685_v45 = vpop.f32.mrf.mxu3 }
 0x2e7   : > { %v5433_v46 = vmax.f32 %v5001_v36, %v5361_v39  ;;  %v5577_v47 = vmax.f32 %v5289_v37, %v5505_v40  ;;  %v4857_v48 = vmax.f32 %v4505_v44, %v4685_v45  ;;  %v5146_v49 = vmin.f32 %v4505_v44, %v4685_v45  ;;  %v4147_v50 = vpop.f32.mrf.mxu0  ;;  %v4327_v51 = vpop.f32.mrf.mxu1 }
 0x2e8   : > { %5943 = vst.msk [vmem:[%s7441_s14 + $0xd0] sm:$0xf] %vm5890_vm3, %v5870_v43  ;;  %v4786_v63 = vmax.f32 %v4147_v50, %v4327_v51  ;;  %v5075_v0 = vmin.f32 %v4147_v50, %v4327_v51 }
 0x2e9   : > { %v5653_v52 = vsel %vm7415_vm2, %v5433_v46, %v5577_v47  ;;  %v4929_v53 = vmax.f32 %v4785_v41, %v4857_v48  ;;  %v5218_v54 = vmin.f32 %v5074_v42, %v5146_v49 }
 0x2ea   : > { %v5726_v55 = vmul.f32 %v7419_v12, %v5653_v52 }
 0x2eb   : > { %v5002_v56 = vadd.f32 %v7409_v62, %v4929_v53  ;;  %v5290_v57 = vadd.f32 %v5218_v54, %v7409_v62 }
 0x2ec   : > { %v5799_v58 = vadd.f32 %v7425_v27, %v5726_v55 }
 0x2ed   : > { %v5362_v59 = vmul.f32 0.05, %v5002_v56  ;;  %v5506_v60 = vmul.f32 0.05, %v5290_v57 }
 0x2ee   : > { %v5871_v61 = vpack.c.bf16 %v5799_v58, %v5799_v58  ;;  %v4507_v1 = vpop.f32.mrf.mxu2  ;;  %v4687_v2 = vpop.f32.mrf.mxu3 }
 0x2ef   : > { %v5434_v3 = vmax.f32 %v5002_v56, %v5362_v59  ;;  %v5578_v4 = vmax.f32 %v5290_v57, %v5506_v60  ;;  %v4858_v5 = vmax.f32 %v4507_v1, %v4687_v2  ;;  %v5147_v6 = vmin.f32 %v4507_v1, %v4687_v2  ;;  %v4150_v7 = vpop.f32.mrf.mxu0  ;;  %v4330_v8 = vpop.f32.mrf.mxu1 }
 0x2f0   : > { %5944 = vst.msk [vmem:[%s7441_s14 + $0xd4] sm:$0xf] %vm5890_vm3, %v5871_v61  ;;  %v4787_v20 = vmax.f32 %v4150_v7, %v4330_v8  ;;  %v5076_v21 = vmin.f32 %v4150_v7, %v4330_v8 }
 0x2f1   : > { %v5654_v9 = vsel %vm7415_vm2, %v5434_v3, %v5578_v4  ;;  %v4930_v10 = vmax.f32 %v4786_v63, %v4858_v5  ;;  %v5219_v13 = vmin.f32 %v5075_v0, %v5147_v6 }
 0x2f2   : > { %v5727_v14 = vmul.f32 %v7419_v12, %v5654_v9 }
 0x2f3   : > { %v5003_v15 = vadd.f32 %v7409_v62, %v4930_v10  ;;  %v5291_v16 = vadd.f32 %v5219_v13, %v7409_v62 }
 0x2f4   : > { %v5800_v17 = vadd.f32 %v7425_v27, %v5727_v14 }
 0x2f5   : > { %v5363_v18 = vmul.f32 0.05, %v5003_v15  ;;  %v5507_v19 = vmul.f32 0.05, %v5291_v16 }
 0x2f6   : > { %v5872_v22 = vpack.c.bf16 %v5800_v17, %v5800_v17  ;;  %v4510_v23 = vpop.f32.mrf.mxu2  ;;  %v4690_v24 = vpop.f32.mrf.mxu3 }
 0x2f7   : > { %v5435_v25 = vmax.f32 %v5003_v15, %v5363_v18  ;;  %v5579_v26 = vmax.f32 %v5291_v16, %v5507_v19  ;;  %v4859_v28 = vmax.f32 %v4510_v23, %v4690_v24  ;;  %v5148_v29 = vmin.f32 %v4510_v23, %v4690_v24  ;;  %v4152_v30 = vpop.f32.mrf.mxu0  ;;  %v4332_v31 = vpop.f32.mrf.mxu1 }
 0x2f8   : > { %5945 = vst.msk [vmem:[%s7441_s14 + $0xd8] sm:$0xf] %vm5890_vm3, %v5872_v22  ;;  %v4788_v42 = vmax.f32 %v4152_v30, %v4332_v31  ;;  %v5077_v43 = vmin.f32 %v4152_v30, %v4332_v31 }
 0x2f9   : > { %v5655_v32 = vsel %vm7415_vm2, %v5435_v25, %v5579_v26  ;;  %v4931_v33 = vmax.f32 %v4787_v20, %v4859_v28  ;;  %v5220_v34 = vmin.f32 %v5076_v21, %v5148_v29 }
 0x2fa   : > { %v5728_v35 = vmul.f32 %v7419_v12, %v5655_v32 }
 0x2fb   : > { %v5004_v36 = vadd.f32 %v7409_v62, %v4931_v33  ;;  %v5292_v37 = vadd.f32 %v5220_v34, %v7409_v62 }
 0x2fc   : > { %v5801_v38 = vadd.f32 %v7425_v27, %v5728_v35 }
 0x2fd   : > { %v5364_v39 = vmul.f32 0.05, %v5004_v36  ;;  %v5508_v40 = vmul.f32 0.05, %v5292_v37 }
 0x2fe   : > { %v5873_v41 = vpack.c.bf16 %v5801_v38, %v5801_v38  ;;  %v4512_v44 = vpop.f32.mrf.mxu2  ;;  %v4692_v45 = vpop.f32.mrf.mxu3 }
 0x2ff   : > { %v5436_v46 = vmax.f32 %v5004_v36, %v5364_v39  ;;  %v5580_v47 = vmax.f32 %v5292_v37, %v5508_v40  ;;  %v4860_v48 = vmax.f32 %v4512_v44, %v4692_v45  ;;  %v5149_v49 = vmin.f32 %v4512_v44, %v4692_v45  ;;  %v4155_v50 = vpop.f32.mrf.mxu0  ;;  %v4335_v51 = vpop.f32.mrf.mxu1 }
 0x300   : > { %5946 = vst.msk [vmem:[%s7441_s14 + $0xdc] sm:$0xf] %vm5890_vm3, %v5873_v41  ;;  %v4789_v61 = vmax.f32 %v4155_v50, %v4335_v51  ;;  %v5078_v63 = vmin.f32 %v4155_v50, %v4335_v51 }
 0x301   : > { %v5656_v52 = vsel %vm7415_vm2, %v5436_v46, %v5580_v47  ;;  %v4932_v53 = vmax.f32 %v4788_v42, %v4860_v48  ;;  %v5221_v54 = vmin.f32 %v5077_v43, %v5149_v49 }
 0x302   : > { %v5729_v55 = vmul.f32 %v7419_v12, %v5656_v52 }
 0x303   : > { %v5005_v56 = vadd.f32 %v7409_v62, %v4932_v53  ;;  %v5293_v57 = vadd.f32 %v5221_v54, %v7409_v62 }
 0x304   : > { %v5802_v58 = vadd.f32 %v7425_v27, %v5729_v55 }
 0x305   : > { %v5365_v59 = vmul.f32 0.05, %v5005_v56  ;;  %v5509_v60 = vmul.f32 0.05, %v5293_v57 }
 0x306   : > { %v5874_v0 = vpack.c.bf16 %v5802_v58, %v5802_v58  ;;  %v4515_v1 = vpop.f32.mrf.mxu2  ;;  %v4695_v2 = vpop.f32.mrf.mxu3 }
 0x307   : > { %v5437_v3 = vmax.f32 %v5005_v56, %v5365_v59  ;;  %v5581_v4 = vmax.f32 %v5293_v57, %v5509_v60  ;;  %v4861_v5 = vmax.f32 %v4515_v1, %v4695_v2  ;;  %v5150_v6 = vmin.f32 %v4515_v1, %v4695_v2  ;;  %v4157_v7 = vpop.f32.mrf.mxu0  ;;  %v4337_v8 = vpop.f32.mrf.mxu1 }
 0x308   : > { %5947 = vst.msk [vmem:[%s7441_s14 + $0xe0] sm:$0xf] %vm5890_vm3, %v5874_v0  ;;  %v4790_v21 = vmax.f32 %v4157_v7, %v4337_v8  ;;  %v5079_v22 = vmin.f32 %v4157_v7, %v4337_v8 }
 0x309   : > { %v5657_v9 = vsel %vm7415_vm2, %v5437_v3, %v5581_v4  ;;  %v4933_v10 = vmax.f32 %v4789_v61, %v4861_v5  ;;  %v5222_v13 = vmin.f32 %v5078_v63, %v5150_v6 }
 0x30a   : > { %v5730_v14 = vmul.f32 %v7419_v12, %v5657_v9 }
 0x30b   : > { %v5006_v15 = vadd.f32 %v7409_v62, %v4933_v10  ;;  %v5294_v16 = vadd.f32 %v5222_v13, %v7409_v62 }
 0x30c   : > { %v5803_v17 = vadd.f32 %v7425_v27, %v5730_v14 }
 0x30d   : > { %v5366_v18 = vmul.f32 0.05, %v5006_v15  ;;  %v5510_v19 = vmul.f32 0.05, %v5294_v16 }
 0x30e   : > { %v5875_v20 = vpack.c.bf16 %v5803_v17, %v5803_v17  ;;  %v4517_v23 = vpop.f32.mrf.mxu2  ;;  %v4697_v24 = vpop.f32.mrf.mxu3 }
 0x30f   : > { %v5438_v25 = vmax.f32 %v5006_v15, %v5366_v18  ;;  %v5582_v26 = vmax.f32 %v5294_v16, %v5510_v19  ;;  %v4862_v28 = vmax.f32 %v4517_v23, %v4697_v24  ;;  %v5151_v29 = vmin.f32 %v4517_v23, %v4697_v24  ;;  %v4160_v30 = vpop.f32.mrf.mxu0  ;;  %v4340_v31 = vpop.f32.mrf.mxu1 }
 0x310   : > { %5948 = vst.msk [vmem:[%s7441_s14 + $0xe4] sm:$0xf] %vm5890_vm3, %v5875_v20  ;;  %v4791_v41 = vmax.f32 %v4160_v30, %v4340_v31  ;;  %v5080_v42 = vmin.f32 %v4160_v30, %v4340_v31 }
 0x311   : > { %v5658_v32 = vsel %vm7415_vm2, %v5438_v25, %v5582_v26  ;;  %v4934_v33 = vmax.f32 %v4790_v21, %v4862_v28  ;;  %v5223_v34 = vmin.f32 %v5079_v22, %v5151_v29 }
 0x312   : > { %v5731_v35 = vmul.f32 %v7419_v12, %v5658_v32 }
 0x313   : > { %v5007_v36 = vadd.f32 %v7409_v62, %v4934_v33  ;;  %v5295_v37 = vadd.f32 %v5223_v34, %v7409_v62 }
 0x314   : > { %v5804_v38 = vadd.f32 %v7425_v27, %v5731_v35 }
 0x315   : > { %v5367_v39 = vmul.f32 0.05, %v5007_v36  ;;  %v5511_v40 = vmul.f32 0.05, %v5295_v37 }
 0x316   : > { %v5876_v43 = vpack.c.bf16 %v5804_v38, %v5804_v38  ;;  %v4520_v44 = vpop.f32.mrf.mxu2  ;;  %v4700_v45 = vpop.f32.mrf.mxu3 }
 0x317   : > { %v5439_v46 = vmax.f32 %v5007_v36, %v5367_v39  ;;  %v5583_v47 = vmax.f32 %v5295_v37, %v5511_v40  ;;  %v4863_v48 = vmax.f32 %v4520_v44, %v4700_v45  ;;  %v5152_v49 = vmin.f32 %v4520_v44, %v4700_v45  ;;  %v4162_v50 = vpop.f32.mrf.mxu0  ;;  %v4342_v51 = vpop.f32.mrf.mxu1 }
 0x318   : > { %5949 = vst.msk [vmem:[%s7441_s14 + $0xe8] sm:$0xf] %vm5890_vm3, %v5876_v43  ;;  %v4792_v63 = vmax.f32 %v4162_v50, %v4342_v51  ;;  %v5081_v0 = vmin.f32 %v4162_v50, %v4342_v51 }
 0x319   : > { %v5659_v52 = vsel %vm7415_vm2, %v5439_v46, %v5583_v47  ;;  %v4935_v53 = vmax.f32 %v4791_v41, %v4863_v48  ;;  %v5224_v54 = vmin.f32 %v5080_v42, %v5152_v49 }
 0x31a   : > { %v5732_v55 = vmul.f32 %v7419_v12, %v5659_v52 }
 0x31b   : > { %v5008_v56 = vadd.f32 %v7409_v62, %v4935_v53  ;;  %v5296_v57 = vadd.f32 %v5224_v54, %v7409_v62 }
 0x31c   : > { %v5805_v58 = vadd.f32 %v7425_v27, %v5732_v55 }
 0x31d   : > { %v5368_v59 = vmul.f32 0.05, %v5008_v56  ;;  %v5512_v60 = vmul.f32 0.05, %v5296_v57 }
 0x31e   : > { %v5877_v61 = vpack.c.bf16 %v5805_v58, %v5805_v58  ;;  %v4522_v1 = vpop.f32.mrf.mxu2  ;;  %v4702_v2 = vpop.f32.mrf.mxu3 }
 0x31f   : > { %v5440_v3 = vmax.f32 %v5008_v56, %v5368_v59  ;;  %v5584_v4 = vmax.f32 %v5296_v57, %v5512_v60  ;;  %v4864_v5 = vmax.f32 %v4522_v1, %v4702_v2  ;;  %v5153_v6 = vmin.f32 %v4522_v1, %v4702_v2  ;;  %v4165_v7 = vpop.f32.mrf.mxu0  ;;  %v4345_v8 = vpop.f32.mrf.mxu1 }
 0x320   : > { %5950 = vst.msk [vmem:[%s7441_s14 + $0xec] sm:$0xf] %vm5890_vm3, %v5877_v61  ;;  %v4793_v20 = vmax.f32 %v4165_v7, %v4345_v8  ;;  %v5082_v21 = vmin.f32 %v4165_v7, %v4345_v8 }
 0x321   : > { %v5660_v9 = vsel %vm7415_vm2, %v5440_v3, %v5584_v4  ;;  %v4936_v10 = vmax.f32 %v4792_v63, %v4864_v5  ;;  %v5225_v13 = vmin.f32 %v5081_v0, %v5153_v6 }
 0x322   : > { %v5733_v14 = vmul.f32 %v7419_v12, %v5660_v9 }
 0x323   : > { %v5009_v15 = vadd.f32 %v7409_v62, %v4936_v10  ;;  %v5297_v16 = vadd.f32 %v5225_v13, %v7409_v62 }
 0x324   : > { %v5806_v17 = vadd.f32 %v7425_v27, %v5733_v14 }
 0x325   : > { %v5369_v18 = vmul.f32 0.05, %v5009_v15  ;;  %v5513_v19 = vmul.f32 0.05, %v5297_v16 }
 0x326   : > { %v5878_v22 = vpack.c.bf16 %v5806_v17, %v5806_v17  ;;  %v4525_v23 = vpop.f32.mrf.mxu2  ;;  %v4705_v24 = vpop.f32.mrf.mxu3 }
 0x327   : > { %v5441_v25 = vmax.f32 %v5009_v15, %v5369_v18  ;;  %v5585_v26 = vmax.f32 %v5297_v16, %v5513_v19  ;;  %v4865_v28 = vmax.f32 %v4525_v23, %v4705_v24  ;;  %v5154_v29 = vmin.f32 %v4525_v23, %v4705_v24  ;;  %v4167_v30 = vpop.f32.mrf.mxu0  ;;  %v4347_v31 = vpop.f32.mrf.mxu1 }
 0x328   : > { %5951 = vst.msk [vmem:[%s7441_s14 + $0xf0] sm:$0xf] %vm5890_vm3, %v5878_v22  ;;  %v4794_v42 = vmax.f32 %v4167_v30, %v4347_v31  ;;  %v5083_v43 = vmin.f32 %v4167_v30, %v4347_v31 }
 0x329   : > { %v5661_v32 = vsel %vm7415_vm2, %v5441_v25, %v5585_v26  ;;  %v4937_v33 = vmax.f32 %v4793_v20, %v4865_v28  ;;  %v5226_v34 = vmin.f32 %v5082_v21, %v5154_v29 }
 0x32a   : > { %v5734_v35 = vmul.f32 %v7419_v12, %v5661_v32 }
 0x32b   : > { %v5010_v36 = vadd.f32 %v7409_v62, %v4937_v33  ;;  %v5298_v37 = vadd.f32 %v5226_v34, %v7409_v62 }
 0x32c   : > { %v5807_v38 = vadd.f32 %v7425_v27, %v5734_v35 }
 0x32d   : > { %v5370_v39 = vmul.f32 0.05, %v5010_v36  ;;  %v5514_v40 = vmul.f32 0.05, %v5298_v37 }
 0x32e   : > { %v5879_v41 = vpack.c.bf16 %v5807_v38, %v5807_v38  ;;  %v4527_v44 = vpop.f32.mrf.mxu2  ;;  %v4707_v45 = vpop.f32.mrf.mxu3 }
 0x32f   : > { %v5442_v46 = vmax.f32 %v5010_v36, %v5370_v39  ;;  %v5586_v47 = vmax.f32 %v5298_v37, %v5514_v40  ;;  %v4866_v48 = vmax.f32 %v4527_v44, %v4707_v45  ;;  %v5155_v49 = vmin.f32 %v4527_v44, %v4707_v45  ;;  %v4170_v50 = vpop.f32.mrf.mxu0  ;;  %v4350_v51 = vpop.f32.mrf.mxu1 }
 0x330   : > { %5952 = vst.msk [vmem:[%s7441_s14 + $0xf4] sm:$0xf] %vm5890_vm3, %v5879_v41  ;;  %v4795_v61 = vmax.f32 %v4170_v50, %v4350_v51  ;;  %v5084_v63 = vmin.f32 %v4170_v50, %v4350_v51 }
 0x331   : > { %v5662_v52 = vsel %vm7415_vm2, %v5442_v46, %v5586_v47  ;;  %v4938_v53 = vmax.f32 %v4794_v42, %v4866_v48  ;;  %v5227_v54 = vmin.f32 %v5083_v43, %v5155_v49 }
 0x332   : > { %v5735_v55 = vmul.f32 %v7419_v12, %v5662_v52 }
 0x333   : > { %v5011_v56 = vadd.f32 %v7409_v62, %v4938_v53  ;;  %v5299_v57 = vadd.f32 %v5227_v54, %v7409_v62 }
 0x334   : > { %v5808_v58 = vadd.f32 %v7425_v27, %v5735_v55 }
 0x335   : > { %v5371_v59 = vmul.f32 0.05, %v5011_v56  ;;  %v5515_v60 = vmul.f32 0.05, %v5299_v57 }
 0x336   : > { %v5880_v0 = vpack.c.bf16 %v5808_v58, %v5808_v58  ;;  %v4530_v1 = vpop.f32.mrf.mxu2  ;;  %v4710_v2 = vpop.f32.mrf.mxu3 }
 0x337   : > { %v5443_v3 = vmax.f32 %v5011_v56, %v5371_v59  ;;  %v5587_v4 = vmax.f32 %v5299_v57, %v5515_v60  ;;  %v4867_v5 = vmax.f32 %v4530_v1, %v4710_v2  ;;  %v5156_v6 = vmin.f32 %v4530_v1, %v4710_v2  ;;  %v4172_v7 = vpop.f32.mrf.mxu0  ;;  %v4352_v8 = vpop.f32.mrf.mxu1 }
 0x338   : > { %5953 = vst.msk [vmem:[%s7441_s14 + $0xf8] sm:$0xf] %vm5890_vm3, %v5880_v0  ;;  %v4796_v21 = vmax.f32 %v4172_v7, %v4352_v8  ;;  %v5085_v22 = vmin.f32 %v4172_v7, %v4352_v8 }
 0x339   : > { %v5663_v9 = vsel %vm7415_vm2, %v5443_v3, %v5587_v4  ;;  %v4939_v10 = vmax.f32 %v4795_v61, %v4867_v5  ;;  %v5228_v13 = vmin.f32 %v5084_v63, %v5156_v6 }
 0x33a   : > { %v5736_v14 = vmul.f32 %v7419_v12, %v5663_v9 }
 0x33b   : > { %v5012_v15 = vadd.f32 %v7409_v62, %v4939_v10  ;;  %v5300_v16 = vadd.f32 %v5228_v13, %v7409_v62 }
 0x33c   : > { %v5809_v17 = vadd.f32 %v7425_v27, %v5736_v14 }
 0x33d   : > { %v5372_v18 = vmul.f32 0.05, %v5012_v15  ;;  %v5516_v19 = vmul.f32 0.05, %v5300_v16 }
 0x33e   : > { %v5881_v20 = vpack.c.bf16 %v5809_v17, %v5809_v17  ;;  %v4532_v23 = vpop.f32.mrf.mxu2  ;;  %v4712_v24 = vpop.f32.mrf.mxu3 }
 0x33f   : > { %v5444_v25 = vmax.f32 %v5012_v15, %v5372_v18  ;;  %v5588_v26 = vmax.f32 %v5300_v16, %v5516_v19  ;;  %v4868_v28 = vmax.f32 %v4532_v23, %v4712_v24  ;;  %v5157_v29 = vmin.f32 %v4532_v23, %v4712_v24  ;;  %v4175_v30 = vpop.f32.mrf.mxu0  ;;  %v4355_v31 = vpop.f32.mrf.mxu1 }
 0x340   : > { %5954 = vst.msk [vmem:[%s7441_s14 + $0xfc] sm:$0xf] %vm5890_vm3, %v5881_v20  ;;  %v4797_v41 = vmax.f32 %v4175_v30, %v4355_v31  ;;  %v5086_v42 = vmin.f32 %v4175_v30, %v4355_v31 }
 0x341   : > { %v5664_v32 = vsel %vm7415_vm2, %v5444_v25, %v5588_v26  ;;  %v4940_v33 = vmax.f32 %v4796_v21, %v4868_v28  ;;  %v5229_v34 = vmin.f32 %v5085_v22, %v5157_v29 }
 0x342   : > { %v5737_v35 = vmul.f32 %v7419_v12, %v5664_v32 }
 0x343   : > { %v5013_v36 = vadd.f32 %v7409_v62, %v4940_v33  ;;  %v5301_v37 = vadd.f32 %v5229_v34, %v7409_v62 }
 0x344   : > { %v5810_v38 = vadd.f32 %v7425_v27, %v5737_v35 }
 0x345   : > { %v5373_v39 = vmul.f32 0.05, %v5013_v36  ;;  %v5517_v40 = vmul.f32 0.05, %v5301_v37 }
 0x346   : > { %v5882_v43 = vpack.c.bf16 %v5810_v38, %v5810_v38  ;;  %v4535_v44 = vpop.f32.mrf.mxu2  ;;  %v4715_v45 = vpop.f32.mrf.mxu3 }
 0x347   : > { %v5445_v46 = vmax.f32 %v5013_v36, %v5373_v39  ;;  %v5589_v47 = vmax.f32 %v5301_v37, %v5517_v40  ;;  %v4869_v48 = vmax.f32 %v4535_v44, %v4715_v45  ;;  %v5158_v49 = vmin.f32 %v4535_v44, %v4715_v45  ;;  %v4177_v50 = vpop.f32.mrf.mxu0  ;;  %v4357_v51 = vpop.f32.mrf.mxu1 }
 0x348   : > { %5955 = vst.msk [vmem:[%s7441_s14 + $0x100] sm:$0xf] %vm5890_vm3, %v5882_v43  ;;  %v4798_v63 = vmax.f32 %v4177_v50, %v4357_v51  ;;  %v5087_v0 = vmin.f32 %v4177_v50, %v4357_v51 }
 0x349   : > { %v5665_v52 = vsel %vm7415_vm2, %v5445_v46, %v5589_v47  ;;  %v4941_v53 = vmax.f32 %v4797_v41, %v4869_v48  ;;  %v5230_v54 = vmin.f32 %v5086_v42, %v5158_v49 }
 0x34a   : > { %v5738_v55 = vmul.f32 %v7419_v12, %v5665_v52 }
 0x34b   : > { %v5014_v56 = vadd.f32 %v7409_v62, %v4941_v53  ;;  %v5302_v57 = vadd.f32 %v5230_v54, %v7409_v62 }
 0x34c   : > { %v5811_v58 = vadd.f32 %v7425_v27, %v5738_v55 }
 0x34d   : > { %v5374_v59 = vmul.f32 0.05, %v5014_v56  ;;  %v5518_v60 = vmul.f32 0.05, %v5302_v57 }
 0x34e   : > { %v5883_v61 = vpack.c.bf16 %v5811_v58, %v5811_v58  ;;  %v4537_v1 = vpop.f32.mrf.mxu2  ;;  %v4717_v2 = vpop.f32.mrf.mxu3 }
 0x34f   : > { %v5446_v3 = vmax.f32 %v5014_v56, %v5374_v59  ;;  %v5590_v4 = vmax.f32 %v5302_v57, %v5518_v60  ;;  %v4870_v5 = vmax.f32 %v4537_v1, %v4717_v2  ;;  %v5159_v6 = vmin.f32 %v4537_v1, %v4717_v2  ;;  %v4180_v7 = vpop.f32.mrf.mxu0  ;;  %v4360_v8 = vpop.f32.mrf.mxu1 }
 0x350   : > { %5956 = vst.msk [vmem:[%s7441_s14 + $0x104] sm:$0xf] %vm5890_vm3, %v5883_v61  ;;  %v4799_v20 = vmax.f32 %v4180_v7, %v4360_v8  ;;  %v5088_v21 = vmin.f32 %v4180_v7, %v4360_v8 }
 0x351   : > { %v5666_v9 = vsel %vm7415_vm2, %v5446_v3, %v5590_v4  ;;  %v4942_v10 = vmax.f32 %v4798_v63, %v4870_v5  ;;  %v5231_v13 = vmin.f32 %v5087_v0, %v5159_v6 }
 0x352   : > { %v5739_v14 = vmul.f32 %v7419_v12, %v5666_v9 }
 0x353   : > { %v5015_v15 = vadd.f32 %v7409_v62, %v4942_v10  ;;  %v5303_v16 = vadd.f32 %v5231_v13, %v7409_v62 }
 0x354   : > { %v5812_v17 = vadd.f32 %v7425_v27, %v5739_v14 }
 0x355   : > { %v5375_v18 = vmul.f32 0.05, %v5015_v15  ;;  %v5519_v19 = vmul.f32 0.05, %v5303_v16 }
 0x356   : > { %v5884_v22 = vpack.c.bf16 %v5812_v17, %v5812_v17  ;;  %v4540_v23 = vpop.f32.mrf.mxu2  ;;  %v4720_v24 = vpop.f32.mrf.mxu3 }
 0x357   : > { %v5447_v25 = vmax.f32 %v5015_v15, %v5375_v18  ;;  %v5591_v26 = vmax.f32 %v5303_v16, %v5519_v19  ;;  %v4871_v28 = vmax.f32 %v4540_v23, %v4720_v24  ;;  %v5160_v29 = vmin.f32 %v4540_v23, %v4720_v24  ;;  %v4182_v30 = vpop.f32.mrf.mxu0  ;;  %v4362_v31 = vpop.f32.mrf.mxu1 }
 0x358   : > { %5957 = vst.msk [vmem:[%s7441_s14 + $0x108] sm:$0xf] %vm5890_vm3, %v5884_v22  ;;  %v4800_v42 = vmax.f32 %v4182_v30, %v4362_v31  ;;  %v5089_v43 = vmin.f32 %v4182_v30, %v4362_v31 }
 0x359   : > { %v5667_v32 = vsel %vm7415_vm2, %v5447_v25, %v5591_v26  ;;  %v4943_v33 = vmax.f32 %v4799_v20, %v4871_v28  ;;  %v5232_v34 = vmin.f32 %v5088_v21, %v5160_v29 }
 0x35a   : > { %v5740_v35 = vmul.f32 %v7419_v12, %v5667_v32 }
 0x35b   : > { %v5016_v36 = vadd.f32 %v7409_v62, %v4943_v33  ;;  %v5304_v37 = vadd.f32 %v5232_v34, %v7409_v62 }
 0x35c   : > { %v5813_v38 = vadd.f32 %v7425_v27, %v5740_v35 }
 0x35d   : > { %v5376_v39 = vmul.f32 0.05, %v5016_v36  ;;  %v5520_v40 = vmul.f32 0.05, %v5304_v37 }
 0x35e   : > { %v5885_v41 = vpack.c.bf16 %v5813_v38, %v5813_v38  ;;  %v4542_v44 = vpop.f32.mrf.mxu2  ;;  %v4722_v45 = vpop.f32.mrf.mxu3 }
 0x35f   : > { %v5448_v46 = vmax.f32 %v5016_v36, %v5376_v39  ;;  %v5592_v47 = vmax.f32 %v5304_v37, %v5520_v40  ;;  %v4872_v48 = vmax.f32 %v4542_v44, %v4722_v45  ;;  %v5161_v49 = vmin.f32 %v4542_v44, %v4722_v45  ;;  %v4185_v53 = vpop.f32.mrf.mxu0  ;;  %v4365_v54 = vpop.f32.mrf.mxu1 }
 0x360   : > { %5958 = vst.msk [vmem:[%s7441_s14 + $0x10c] sm:$0xf] %vm5890_vm3, %v5885_v41  ;;  %v4801_v61 = vmax.f32 %v4185_v53, %v4365_v54  ;;  %v5090_v63 = vmin.f32 %v4185_v53, %v4365_v54 }
 0x361   : > { %v5668_v50 = vsel %vm7415_vm2, %v5448_v46, %v5592_v47  ;;  %v4944_v51 = vmax.f32 %v4800_v42, %v4872_v48  ;;  %v5233_v52 = vmin.f32 %v5089_v43, %v5161_v49 }
 0x362   : > { %v5741_v55 = vmul.f32 %v7419_v12, %v5668_v50 }
 0x363   : > { %v5017_v56 = vadd.f32 %v7409_v62, %v4944_v51  ;;  %v5305_v57 = vadd.f32 %v5233_v52, %v7409_v62 }
 0x364   : > { %v5814_v58 = vadd.f32 %v7425_v27, %v5741_v55 }
 0x365   : > { %v5377_v59 = vmul.f32 0.05, %v5017_v56  ;;  %v5521_v60 = vmul.f32 0.05, %v5305_v57 }
 0x366   : > { %v5886_v0 = vpack.c.bf16 %v5814_v58, %v5814_v58  ;;  %v4545_v1 = vpop.f32.mrf.mxu2  ;;  %v4725_v2 = vpop.f32.mrf.mxu3 }
 0x367   : > { %v5449_v3 = vmax.f32 %v5017_v56, %v5377_v59  ;;  %v5593_v4 = vmax.f32 %v5305_v57, %v5521_v60  ;;  %v4873_v5 = vmax.f32 %v4545_v1, %v4725_v2  ;;  %v5162_v6 = vmin.f32 %v4545_v1, %v4725_v2  ;;  %v4187_v15 = vpop.f32.mrf.mxu0  ;;  %v4367_v16 = vpop.f32.mrf.mxu1 }
 0x368   : > { %5959 = vst.msk [vmem:[%s7441_s14 + $0x110] sm:$0xf] %vm5890_vm3, %v5886_v0  ;;  %v4802_v21 = vmax.f32 %v4187_v15, %v4367_v16  ;;  %v5091_v22 = vmin.f32 %v4187_v15, %v4367_v16 }
 0x369   : > { %v5669_v7 = vsel %vm7415_vm2, %v5449_v3, %v5593_v4  ;;  %v4945_v8 = vmax.f32 %v4801_v61, %v4873_v5  ;;  %v5234_v9 = vmin.f32 %v5090_v63, %v5162_v6 }
 0x36a   : > { %v5742_v10 = vmul.f32 %v7419_v12, %v5669_v7 }
 0x36b   : > { %v5018_v13 = vadd.f32 %v7409_v62, %v4945_v8  ;;  %v5306_v14 = vadd.f32 %v5234_v9, %v7409_v62 }
 0x36c   : > { %v5815_v17 = vadd.f32 %v7425_v27, %v5742_v10 }
 0x36d   : > { %v5378_v18 = vmul.f32 0.05, %v5018_v13  ;;  %v5522_v19 = vmul.f32 0.05, %v5306_v14 }
 0x36e   : > { %v5887_v20 = vpack.c.bf16 %v5815_v17, %v5815_v17  ;;  %v4547_v23 = vpop.f32.mrf.mxu2  ;;  %v4727_v24 = vpop.f32.mrf.mxu3 }
 0x36f   : > { %v5450_v25 = vmax.f32 %v5018_v13, %v5378_v18  ;;  %v5594_v26 = vmax.f32 %v5306_v14, %v5522_v19  ;;  %v4874_v28 = vmax.f32 %v4547_v23, %v4727_v24  ;;  %v5163_v29 = vmin.f32 %v4547_v23, %v4727_v24 }
 0x370   : > { %5960 = vst.msk [vmem:[%s7441_s14 + $0x114] sm:$0xf] %vm5890_vm3, %v5887_v20 }
 0x371   : > { %v5670_v30 = vsel %vm7415_vm2, %v5450_v25, %v5594_v26  ;;  %v4946_v31 = vmax.f32 %v4802_v21, %v4874_v28  ;;  %v5235_v32 = vmin.f32 %v5091_v22, %v5163_v29 }
 0x372   : > { %v5743_v33 = vmul.f32 %v7419_v12, %v5670_v30 }
 0x373   : > { %v5019_v34 = vadd.f32 %v7409_v62, %v4946_v31  ;;  %v5307_v35 = vadd.f32 %v5235_v32, %v7409_v62 }
 0x374   : > { %v5816_v36 = vadd.f32 %v7425_v27, %v5743_v33 }
 0x375   : > { %v5379_v37 = vmul.f32 0.05, %v5019_v34  ;;  %v5523_v38 = vmul.f32 0.05, %v5307_v35 }
 0x376   : > { %v5888_v39 = vpack.c.bf16 %v5816_v36, %v5816_v36 }
 0x377   : > { %v5451_v40 = vmax.f32 %v5019_v34, %v5379_v37  ;;  %v5595_v41 = vmax.f32 %v5307_v35, %v5523_v38 }
 0x378   : > { %5961 = vst.msk [vmem:[%s7441_s14 + $0x118] sm:$0xf] %vm5890_vm3, %v5888_v39 }
 0x379   : > { %v5671_v42 = vsel %vm7415_vm2, %v5451_v40, %v5595_v41 }
 0x37a   : > { %v5744_v43 = vmul.f32 %v7419_v12, %v5671_v42 }
 0x37c   : > { %v5817_v44 = vadd.f32 %v7425_v27, %v5744_v43 }
 0x37e   : > { %v5889_v45 = vpack.c.bf16 %v5817_v44, %v5817_v44 }
 0x380   : > { %5962 = vst.msk [vmem:[%s7441_s14 + $0x11c] sm:$0xf] %vm5890_vm3, %v5889_v45 }
 0x381 PF: > { %p10_p9 = scmp.ge.s32.totalorder %s7012_s16, 4   ;;  %s8235_s12 = smov %s6968_s13 }
 0x382   : > { %s8236_s13 = smov %s7021_s19  ;;  %s8237_s14 = smov %s7012_s16 }
 0x383   :  { %12 = sbr.rel (!%p10_p9) target bundleno = 2 (0x2), region = 123 }

// kernel: net_forward.6
= control target key start
LH: loop header
LB: loop body
LE: loop exit
PB: predicated region body
PF: predicated region fallthrough
CT: control target
= control target key end

     0   :  { %vm1527_vm0 = vcmask 261120   ;;  %vm3435_vm3 = vcmask 519168   ;;  %s7411_s1 = inlined_call_operand.vmem [shape: bf16[288,64], index: 1, kind: input, shape index: {}]   ;;  %s7412_s0 = inlined_call_operand.vmem [shape: bf16[4,288,288], index: 0, kind: input, shape index: {}]   ;;  %s7413_s2 = inlined_call_operand.vmem [shape: f32[3,64], index: 2, kind: input, shape index: {}]   ;;  %s7414_s3 = inlined_call_operand.vmem [shape: bf16[288,64], index: 3, kind: output, shape index: {}]  }
   0x1   :  { %v4707_v0 = vld [vmem:[%s7411_s1 + $0x38] sm:$0xff]  ;;  %v4767_v2 = vld [vmem:[%s7411_s1 + $0x88] sm:$0xff]  ;;  %v4706_v3 = vld [vmem:[%s7411_s1 + $0x30] sm:$0xff] }
   0x2   :  { %v4715_v1 = vld [vmem:[%s7411_s1 + $0x78] sm:$0xff]  ;;  %1744 = vmatpush.bf16.msra.mxu0 %v4707_v0  ;;  %4718 = vmatpush.bf16.msra.mxu3 %v4707_v0  ;;  %v4714_v4 = vld [vmem:[%s7411_s1 + $0x70] sm:$0xff]  ;;  %v4779_v5 = vld [vmem:[%s7411_s1 + $0x80] sm:$0xff] }
   0x3   :  { %2113 = vmatpush.bf16.msra.mxu1 %v4715_v1  ;;  %2488 = vmatpush.bf16.msra.mxu2 %v4767_v2  ;;  %v3486_v6 = vld [vmem:[%s7412_s0 + $0x8] sm:$0xf]  ;;  %v4486_v7 = vld [vmem:[%s7412_s0 + $0x10] sm:$0xf0]  ;;  %v4704_v11 = vld [vmem:[%s7411_s1 + $0x20] sm:$0xff] }
   0x4   :  { %v3487_v8 = vor.u32 %v4486_v7, %v3486_v6  ;;  %v4705_v9 = vld [vmem:[%s7411_s1 + $0x28] sm:$0xff]  ;;  %v4712_v12 = vld [vmem:[%s7411_s1 + $0x60] sm:$0xff]  ;;  %v4703_v13 = vld [vmem:[%s7411_s1 + $0x18] sm:$0xff] }
   0x5   :  { %v4713_v10 = vld [vmem:[%s7411_s1 + $0x68] sm:$0xff]  ;;  %v4711_v14 = vld [vmem:[%s7411_s1 + $0x58] sm:$0xff]  ;;  %v4702_v15 = vld [vmem:[%s7411_s1 + $0x10] sm:$0xff] }
   0x6   :  { %1745 = vmatpush.bf16.msra.mxu0 %v4706_v3  ;;  %4719 = vmatpush.bf16.msra.mxu3 %v4706_v3  ;;  %v4710_v16 = vld [vmem:[%s7411_s1 + $0x50] sm:$0xff]  ;;  %v3498_v17 = vld [vmem:[%s7412_s0 + $0x20] sm:$0xf]  ;;  %v4489_v18 = vld [vmem:[%s7412_s0 + $0x28] sm:$0xf0] }
   0x7   :  { %2114 = vmatpush.bf16.msra.mxu1 %v4714_v4  ;;  %2489 = vmatpush.bf16.msra.mxu2 %v4779_v5  ;;  %v3499_v19 = vor.u32 %v4489_v18, %v3498_v17  ;;  %v4701_v20 = vld [vmem:[%s7411_s1 + $0x8] sm:$0xff]  ;;  %v4700_v22 = vld [vmem:[%s7411_s1] sm:$0xff]  ;;  %v4126_v26 = vld [vmem:[%s7412_s0 + $0x510] sm:$0xf] }
   0x8   :  { %v4709_v21 = vld [vmem:[%s7411_s1 + $0x48] sm:$0xff]  ;;  %v4708_v23 = vld [vmem:[%s7411_s1 + $0x40] sm:$0xff]  ;;  %v4647_v27 = vld [vmem:[%s7412_s0 + $0x518] sm:$0xf0] }
   0x9   :  { %v3478_v24 = vld [vmem:[%s7412_s0] sm:$0xf]  ;;  %v4485_v25 = vld [vmem:[%s7412_s0 + $0x8] sm:$0xf0]  ;;  %v4484_v28 = vld [vmem:[%s7412_s0 + $0x4] sm:$0xf]  ;;  %v4127_v31 = vor.u32 %v4647_v27, %v4126_v26 }
   0xa   :  { %4412 = vmatmul.msk.bf16.vlgmr.msra.gmra.mxu2 %vm1527_vm0, %v3487_v8  ;;  %1746 = vmatpush.bf16.msra.mxu0 %v4705_v9  ;;  %v3480_v29 = vld [vmem:[%s7412_s0 + $0xc] sm:$0xf0]  ;;  %v3479_v30 = vor.u32 %v4485_v25, %v3478_v24  ;;  %v3510_v33 = vld [vmem:[%s7412_s0 + $0x38] sm:$0xf]  ;;  %v4492_v34 = vld [vmem:[%s7412_s0 + $0x40] sm:$0xf0] }
   0xb   :  { %4720 = vmatpush.bf16.msra.mxu3 %v4705_v9  ;;  %2115 = vmatpush.bf16.msra.mxu1 %v4713_v10  ;;  %v3483_v32 = vor.u32 %v4484_v28, %v3480_v29  ;;  %v3511_v35 = vor.u32 %v4492_v34, %v3510_v33  ;;  %v3490_v36 = vld [vmem:[%s7412_s0 + $0x18] sm:$0xf]  ;;  %v4488_v37 = vld [vmem:[%s7412_s0 + $0x20] sm:$0xf0]  ;;  %v4138_v38 = vld [vmem:[%s7412_s0 + $0x528] sm:$0xf] }
   0xc   :  { %v4650_v39 = vld [vmem:[%s7412_s0 + $0x530] sm:$0xf0]  ;;  %v4487_v40 = vld [vmem:[%s7412_s0 + $0x1c] sm:$0xf]  ;;  %v3492_v41 = vld [vmem:[%s7412_s0 + $0x24] sm:$0xf0]  ;;  %v3491_v42 = vor.u32 %v4488_v37, %v3490_v36 }
   0xd   :  { %v4139_v43 = vor.u32 %v4650_v39, %v4138_v38  ;;  %v3495_v44 = vor.u32 %v4487_v40, %v3492_v41  ;;  %v3522_v45 = vld [vmem:[%s7412_s0 + $0x50] sm:$0xf]  ;;  %v4495_v46 = vld [vmem:[%s7412_s0 + $0x58] sm:$0xf0]  ;;  %v4150_v50 = vld [vmem:[%s7412_s0 + $0x540] sm:$0xf] }
   0xe   :  { %1747 = vmatpush.bf16.msra.mxu0 %v4704_v11  ;;  %v3523_v47 = vor.u32 %v4495_v46, %v3522_v45  ;;  %v3502_v48 = vld [vmem:[%s7412_s0 + $0x30] sm:$0xf]  ;;  %v4491_v49 = vld [vmem:[%s7412_s0 + $0x38] sm:$0xf0]  ;;  %v4653_v51 = vld [vmem:[%s7412_s0 + $0x548] sm:$0xf0] }
   0xf   :  { %4721 = vmatpush.bf16.msra.mxu3 %v4704_v11  ;;  %2116 = vmatpush.bf16.msra.mxu1 %v4712_v12  ;;  %v4490_v52 = vld [vmem:[%s7412_s0 + $0x34] sm:$0xf]  ;;  %v3504_v53 = vld [vmem:[%s7412_s0 + $0x3c] sm:$0xf0]  ;;  %v3503_v54 = vor.u32 %v4491_v49, %v3502_v48  ;;  %v4151_v55 = vor.u32 %v4653_v51, %v4150_v50  ;;  %v3534_v57 = vld [vmem:[%s7412_s0 + $0x68] sm:$0xf] }
  0x10   :  { %v3507_v56 = vor.u32 %v4490_v52, %v3504_v53  ;;  %v4498_v58 = vld [vmem:[%s7412_s0 + $0x70] sm:$0xf0]  ;;  %v3514_v60 = vld [vmem:[%s7412_s0 + $0x48] sm:$0xf]  ;;  %v4162_v62 = vld [vmem:[%s7412_s0 + $0x558] sm:$0xf] }
  0x11   :  { %v3535_v59 = vor.u32 %v4498_v58, %v3534_v57  ;;  %v4494_v61 = vld [vmem:[%s7412_s0 + $0x50] sm:$0xf0]  ;;  %v4656_v63 = vld [vmem:[%s7412_s0 + $0x560] sm:$0xf0]  ;;  %v4493_v0 = vld [vmem:[%s7412_s0 + $0x4c] sm:$0xf] }
  0x12   :  { %1748 = vmatpush.bf16.msra.mxu0 %v4703_v13  ;;  %v4163_v3 = vor.u32 %v4656_v63, %v4162_v62  ;;  %v4501_v6 = vld [vmem:[%s7412_s0 + $0x88] sm:$0xf0]  ;;  %v3526_v8 = vld [vmem:[%s7412_s0 + $0x60] sm:$0xf]  ;;  %v4659_v11 = vld [vmem:[%s7412_s0 + $0x578] sm:$0xf0] }
  0x13   :  { %4722 = vmatpush.bf16.msra.mxu3 %v4703_v13  ;;  %2117 = vmatpush.bf16.msra.mxu1 %v4711_v14  ;;  %v4497_v9 = vld [vmem:[%s7412_s0 + $0x68] sm:$0xf0]  ;;  %v3528_v13 = vld [vmem:[%s7412_s0 + $0x6c] sm:$0xf0]  ;;  %v3558_v17 = vld [vmem:[%s7412_s0 + $0x98] sm:$0xf] }
  0x14   :  { %v4504_v18 = vld [vmem:[%s7412_s0 + $0xa0] sm:$0xf0]  ;;  %v4499_v24 = vld [vmem:[%s7412_s0 + $0x7c] sm:$0xf]  ;;  %v3540_v25 = vld [vmem:[%s7412_s0 + $0x84] sm:$0xf0] }
  0x15   :  { %v3543_v28 = vor.u32 %v4499_v24, %v3540_v25  ;;  %v3570_v29 = vld [vmem:[%s7412_s0 + $0xb0] sm:$0xf]  ;;  %v4503_v33 = vld [vmem:[%s7412_s0 + $0x98] sm:$0xf0]  ;;  %v4198_v34 = vld [vmem:[%s7412_s0 + $0x5a0] sm:$0xf] }
  0x16   :  { %1749 = vmatpush.bf16.msra.mxu0 %v4702_v15  ;;  %v4502_v36 = vld [vmem:[%s7412_s0 + $0x94] sm:$0xf]  ;;  %v3552_v37 = vld [vmem:[%s7412_s0 + $0x9c] sm:$0xf0]  ;;  %v3582_v41 = vld [vmem:[%s7412_s0 + $0xc8] sm:$0xf] }
  0x17   :  { %4723 = vmatpush.bf16.msra.mxu3 %v4702_v15  ;;  %2118 = vmatpush.bf16.msra.mxu1 %v4710_v16  ;;  %v3555_v40 = vor.u32 %v4502_v36, %v3552_v37  ;;  %v4506_v45 = vld [vmem:[%s7412_s0 + $0xb0] sm:$0xf0]  ;;  %v4210_v46 = vld [vmem:[%s7412_s0 + $0x5b8] sm:$0xf]  ;;  %v4505_v48 = vld [vmem:[%s7412_s0 + $0xac] sm:$0xf] }
  0x18   :  { %v3564_v49 = vld [vmem:[%s7412_s0 + $0xb4] sm:$0xf0]  ;;  %v3574_v58 = vld [vmem:[%s7412_s0 + $0xc0] sm:$0xf]  ;;  %v4508_v62 = vld [vmem:[%s7412_s0 + $0xc4] sm:$0xf] }
  0x19   :  { %v3567_v53 = vor.u32 %v4505_v48, %v3564_v49  ;;  %v3576_v63 = vld [vmem:[%s7412_s0 + $0xcc] sm:$0xf0] }
  0x1a   :  { %4413 = vmatmul.msk.bf16.gmra.mxu2 %vm1527_vm0, %v3499_v19  ;;  %1750 = vmatpush.bf16.msra.mxu0 %v4701_v20  ;;  %v3559_v19 = vor.u32 %v4504_v18, %v3558_v17  ;;  %v3586_v17 = vld [vmem:[%s7412_s0 + $0xd8] sm:$0xf]  ;;  %v4512_v18 = vld [vmem:[%s7412_s0 + $0xe0] sm:$0xf0] }
  0x1b   :  { %4724 = vmatpush.bf16.msra.mxu3 %v4701_v20  ;;  %2119 = vmatpush.bf16.msra.mxu1 %v4709_v21  ;;  %v3538_v20 = vld [vmem:[%s7412_s0 + $0x78] sm:$0xf]  ;;  %v3587_v25 = vor.u32 %v4512_v18, %v3586_v17 }
  0x1e   :  { %1751 = vmatpush.bf16.msra.mxu0 %v4700_v22 }
  0x1f   :  { %4725 = vmatpush.bf16.msra.mxu3 %v4700_v22  ;;  %2120 = vmatpush.bf16.msra.mxu1 %v4708_v23  ;;  %v4186_v22 = vld [vmem:[%s7412_s0 + $0x588] sm:$0xf] }
  0x21   :  { %1752 = vmatmul.bf16.vlgmr.msra.gmra.mxu0 %v3479_v30  ;;  %v4507_v30 = vld [vmem:[%s7412_s0 + $0xb8] sm:$0xf0] }
  0x22   :  { %2022 = vmatmul.bf16.vlgmr.msra.gmra.mxu3 %v4127_v31  ;;  %2121 = vmatmul.bf16.vlgmr.msra.gmra.mxu1 %v3483_v32  ;;  %v3571_v31 = vor.u32 %v4507_v30, %v3570_v29  ;;  %v3550_v32 = vld [vmem:[%s7412_s0 + $0x90] sm:$0xf] }
  0x23   :  { %4726 = vmatpush.bf16.msrb.mxu3 %v4715_v1  ;;  %v3516_v1 = vld [vmem:[%s7412_s0 + $0x54] sm:$0xf0]  ;;  %v3551_v38 = vor.u32 %v4503_v33, %v3550_v32  ;;  %v3618_v32 = vld [vmem:[%s7412_s0 + $0x110] sm:$0xf]  ;;  %v4519_v33 = vld [vmem:[%s7412_s0 + $0x118] sm:$0xf0] }
  0x24   :  { %v3619_v37 = vor.u32 %v4519_v33, %v3618_v32  ;;  %v4270_v32 = vld [vmem:[%s7412_s0 + $0x630] sm:$0xf]  ;;  %v4683_v33 = vld [vmem:[%s7412_s0 + $0x638] sm:$0xf0] }
  0x27   :  { %4727 = vmatpush.bf16.msrb.mxu3 %v4714_v4  ;;  %v3519_v4 = vor.u32 %v4493_v0, %v3516_v1 }
  0x2a   :  { %4414 = vmatmul.msk.bf16.gmra.mxu2 %vm1527_vm0, %v3511_v35  ;;  %v4665_v35 = vld [vmem:[%s7412_s0 + $0x5a8] sm:$0xf0] }
  0x2b   :  { %4728 = vmatpush.bf16.msrb.mxu3 %v4713_v10  ;;  %v4174_v10 = vld [vmem:[%s7412_s0 + $0x570] sm:$0xf]  ;;  %v4199_v39 = vor.u32 %v4665_v35, %v4198_v34 }
  0x2c   :  { %v4175_v15 = vor.u32 %v4659_v11, %v4174_v10 }
  0x2f   :  { %4729 = vmatpush.bf16.msrb.mxu3 %v4712_v12  ;;  %v4496_v12 = vld [vmem:[%s7412_s0 + $0x64] sm:$0xf] }
  0x31   :  { %1757 = vmatmul.bf16.gmra.mxu0 %v3491_v42  ;;  %v4510_v42 = vld [vmem:[%s7412_s0 + $0xd0] sm:$0xf0] }
  0x32   :  { %2027 = vmatmul.bf16.gmra.mxu3 %v4139_v43  ;;  %2126 = vmatmul.bf16.gmra.mxu1 %v3495_v44  ;;  %v3583_v43 = vor.u32 %v4510_v42, %v3582_v41  ;;  %v3562_v44 = vld [vmem:[%s7412_s0 + $0xa8] sm:$0xf]  ;;  %v3598_v41 = vld [vmem:[%s7412_s0 + $0xf0] sm:$0xf]  ;;  %v4515_v42 = vld [vmem:[%s7412_s0 + $0xf8] sm:$0xf0] }
  0x33   :  { %4730 = vmatpush.bf16.msrb.mxu3 %v4711_v14  ;;  %v3527_v14 = vor.u32 %v4497_v9, %v3526_v8  ;;  %v3563_v51 = vor.u32 %v4506_v45, %v3562_v44  ;;  %v3606_v8 = vld [vmem:[%s7412_s0 + $0xf8] sm:$0xf]  ;;  %v4516_v9 = vld [vmem:[%s7412_s0 + $0x100] sm:$0xf0]  ;;  %v4677_v44 = vld [vmem:[%s7412_s0 + $0x608] sm:$0xf0]  ;;  %v3599_v49 = vor.u32 %v4515_v42, %v3598_v41  ;;  %v4271_v42 = vor.u32 %v4683_v33, %v4270_v32 }
  0x34   :  { %v4514_v45 = vld [vmem:[%s7412_s0 + $0xf4] sm:$0xf]  ;;  %v4689_v32 = vld [vmem:[%s7412_s0 + $0x668] sm:$0xf0] }
  0x35   :  { %v4526_v33 = vld [vmem:[%s7412_s0 + $0x154] sm:$0xf] }
  0x37   :  { %4731 = vmatpush.bf16.msrb.mxu3 %v4710_v16  ;;  %v3531_v16 = vor.u32 %v4496_v12, %v3528_v13  ;;  %v3607_v13 = vor.u32 %v4516_v9, %v3606_v8 }
  0x3a   :  { %4415 = vmatmul.msk.bf16.gmra.mxu2 %vm1527_vm0, %v3523_v47  ;;  %v4668_v47 = vld [vmem:[%s7412_s0 + $0x5c0] sm:$0xf0] }
  0x3b   :  { %4732 = vmatpush.bf16.msrb.mxu3 %v4709_v21  ;;  %v4500_v21 = vld [vmem:[%s7412_s0 + $0x80] sm:$0xf0]  ;;  %v4211_v52 = vor.u32 %v4668_v47, %v4210_v46  ;;  %v3600_v46 = vld [vmem:[%s7412_s0 + $0xfc] sm:$0xf0] }
  0x3c   :  { %v3539_v26 = vor.u32 %v4500_v21, %v3538_v20  ;;  %v4674_v20 = vld [vmem:[%s7412_s0 + $0x5f0] sm:$0xf0]  ;;  %v4511_v21 = vld [vmem:[%s7412_s0 + $0xdc] sm:$0xf] }
  0x3f   :  { %4733 = vmatpush.bf16.msrb.mxu3 %v4708_v23  ;;  %v4662_v23 = vld [vmem:[%s7412_s0 + $0x590] sm:$0xf0] }
  0x40   :  { %v4187_v27 = vor.u32 %v4662_v23, %v4186_v22  ;;  %v3588_v22 = vld [vmem:[%s7412_s0 + $0xe4] sm:$0xf0] }
  0x41   :  { %1762 = vmatmul.bf16.gmra.mxu0 %v3503_v54  ;;  %v3594_v54 = vld [vmem:[%s7412_s0 + $0xe0] sm:$0xf] }
  0x42   :  { %2032 = vmatmul.bf16.gmra.mxu3 %v4151_v55  ;;  %2131 = vmatmul.bf16.gmra.mxu1 %v3507_v56  ;;  %v4513_v55 = vld [vmem:[%s7412_s0 + $0xe8] sm:$0xf0] }
  0x43   :  { %4734 = vmatpush.bf16.msra.mxu3 %v4767_v2  ;;  %v3515_v2 = vor.u32 %v4494_v61, %v3514_v60  ;;  %v3595_v57 = vor.u32 %v4513_v55, %v3594_v54  ;;  %v4222_v60 = vld [vmem:[%s7412_s0 + $0x5d0] sm:$0xf]  ;;  %v4671_v61 = vld [vmem:[%s7412_s0 + $0x5d8] sm:$0xf0] }
  0x47   :  { %4735 = vmatpush.bf16.msra.mxu3 %v4779_v5  ;;  %v3546_v5 = vld [vmem:[%s7412_s0 + $0x80] sm:$0xf] }
  0x48   :  { %v3547_v7 = vor.u32 %v4501_v6, %v3546_v5 }
  0x4a   :  { %4416 = vmatmul.msk.bf16.gmra.mxu2 %vm1527_vm0, %v3535_v59  ;;  %v4509_v59 = vld [vmem:[%s7412_s0 + $0xc8] sm:$0xf0] }
  0x4b   :  { %v3575_v1 = vor.u32 %v4509_v59, %v3574_v58 }
  0x51   :  { %1767 = vmatmul.bf16.gmra.mxu0 %v3515_v2 }
  0x52   :  { %2037 = vmatmul.bf16.gmra.mxu3 %v4163_v3  ;;  %2136 = vmatmul.bf16.gmra.mxu1 %v3519_v4  ;;  %v4223_v3 = vor.u32 %v4671_v61, %v4222_v60  ;;  %v3579_v4 = vor.u32 %v4508_v62, %v3576_v63 }
  0x5a   :  { %4417 = vmatmul.msk.bf16.gmra.mxu2 %vm1527_vm0, %v3547_v7 }
  0x61   :  { %1772 = vmatmul.bf16.gmra.mxu0 %v3527_v14 }
  0x62   :  { %2042 = vmatmul.bf16.gmra.mxu3 %v4175_v15  ;;  %2141 = vmatmul.bf16.gmra.mxu1 %v3531_v16 }
  0x6a   :  { %4418 = vmatmul.msk.bf16.gmra.mxu2 %vm1527_vm0, %v3559_v19  ;;  %v4234_v19 = vld [vmem:[%s7412_s0 + $0x5e8] sm:$0xf] }
  0x71   :  { %1777 = vmatmul.bf16.gmra.mxu0 %v3539_v26 }
  0x72   :  { %2047 = vmatmul.bf16.gmra.mxu3 %v4187_v27  ;;  %2146 = vmatmul.bf16.gmra.mxu1 %v3543_v28  ;;  %v4235_v27 = vor.u32 %v4674_v20, %v4234_v19  ;;  %v3591_v28 = vor.u32 %v4511_v21, %v3588_v22  ;;  %v3642_v19 = vld [vmem:[%s7412_s0 + $0x140] sm:$0xf]  ;;  %v4525_v20 = vld [vmem:[%s7412_s0 + $0x148] sm:$0xf0] }
  0x7a   :  { %4419 = vmatmul.msk.bf16.gmra.mxu2 %vm1527_vm0, %v3571_v31 }
  0x81   :  { %1782 = vmatmul.bf16.gmra.mxu0 %v3551_v38 }
  0x82   :  { %2052 = vmatmul.bf16.gmra.mxu3 %v4199_v39  ;;  %2151 = vmatmul.bf16.gmra.mxu1 %v3555_v40 }
  0x8a   :  { %4420 = vmatmul.msk.bf16.gmra.mxu2 %vm1527_vm0, %v3583_v43  ;;  %v4246_v43 = vld [vmem:[%s7412_s0 + $0x600] sm:$0xf] }
  0x8d   :  { %v2491_v50 = vpop.f32.mrf.mxu2 }
  0x91   :  { %1787 = vmatmul.bf16.gmra.mxu0 %v3563_v51  ;;  %v4247_v51 = vor.u32 %v4677_v44, %v4246_v43 }
  0x92   :  { %2057 = vmatmul.bf16.gmra.mxu3 %v4211_v52  ;;  %2156 = vmatmul.bf16.gmra.mxu1 %v3567_v53  ;;  %v3603_v52 = vor.u32 %v4514_v45, %v3600_v46 }
  0x95   :  { %v2493_v56 = vpop.f32.mrf.mxu2 }
  0x9a   :  { %4421 = vmatmul.msk.bf16.gmra.mxu2 %vm1527_vm0, %v3595_v57  ;;  %v4522_v57 = vld [vmem:[%s7412_s0 + $0x130] sm:$0xf0] }
  0x9d   :  { %v2496_v0 = vpop.f32.mrf.mxu2 }
  0x9e   :  { %v1753_v2 = vpop.f32.mrf.mxu0 }
  0x9f   :  { %v2122_v5 = vpop.f32.mrf.mxu1 }
  0xa0   :  { %v2123_v6 = vadd.f32 %v2122_v5, %v1753_v2  ;;  %v4518_v2 = vld [vmem:[%s7412_s0 + $0x110] sm:$0xf0]  ;;  %v4517_v5 = vld [vmem:[%s7412_s0 + $0x10c] sm:$0xf] }
  0xa1   :  { %1792 = vmatmul.bf16.gmra.mxu0 %v3575_v1  ;;  %v3610_v1 = vld [vmem:[%s7412_s0 + $0x108] sm:$0xf] }
  0xa2   :  { %v5052_v7 = vadd.f32 %v2491_v50, %v2123_v6  ;;  %2062 = vmatmul.bf16.gmra.mxu3 %v4223_v3  ;;  %2161 = vmatmul.bf16.gmra.mxu1 %v3579_v4  ;;  %v4258_v3 = vld [vmem:[%s7412_s0 + $0x618] sm:$0xf]  ;;  %v4680_v4 = vld [vmem:[%s7412_s0 + $0x620] sm:$0xf0] }
  0xa3   :  { %v3612_v6 = vld [vmem:[%s7412_s0 + $0x114] sm:$0xf0] }
  0xa4   :  { %7527 = vst [vmem:[#allocation2_spill] sm:$0xff] %v5052_v7 }
  0xa5   :  { %v5060_v10 = vpop.f32.mrf.mxu3  ;;  %v2498_v11 = vpop.f32.mrf.mxu2 }
  0xa6   :  { %7528 = vst [vmem:[#allocation3_spill] sm:$0xff] %v5060_v10  ;;  %v1755_v12 = vpop.f32.mrf.mxu0 }
  0xa7   :  { %v2124_v14 = vpop.f32.mrf.mxu1 }
  0xa8   :  { %v2125_v15 = vadd.f32 %v2124_v14, %v1755_v12  ;;  %v3615_v14 = vor.u32 %v4517_v5, %v3612_v6 }
  0xaa   :  { %v5062_v16 = vadd.f32 %v2493_v56, %v2125_v15  ;;  %4422 = vmatmul.msk.bf16.gmra.mxu2 %vm1527_vm0, %v3607_v13  ;;  %v3630_v56 = vld [vmem:[%s7412_s0 + $0x128] sm:$0xf]  ;;  %v4259_v13 = vor.u32 %v4680_v4, %v4258_v3 }
  0xab   :  { %v3631_v61 = vor.u32 %v4522_v57, %v3630_v56 }
  0xac   :  { %7529 = vst [vmem:[#allocation4_spill] sm:$0xff] %v5062_v16 }
  0xad   :  { %v5083_v23 = vpop.f32.mrf.mxu3  ;;  %v2501_v24 = vpop.f32.mrf.mxu2 }
  0xae   :  { %7530 = vst [vmem:[#allocation5_spill] sm:$0xff] %v5083_v23  ;;  %v1758_v26 = vpop.f32.mrf.mxu0 }
  0xaf   :  { %v2127_v29 = vpop.f32.mrf.mxu1 }
  0xb0   :  { %v2128_v30 = vadd.f32 %v2127_v29, %v1758_v26  ;;  %v3622_v29 = vld [vmem:[%s7412_s0 + $0x120] sm:$0xf] }
  0xb1   :  { %1797 = vmatmul.bf16.gmra.mxu0 %v3587_v25  ;;  %v3643_v25 = vor.u32 %v4525_v20, %v3642_v19 }
  0xb2   :  { %v5085_v31 = vadd.f32 %v2496_v0, %v2128_v30  ;;  %2067 = vmatmul.bf16.gmra.mxu3 %v4235_v27  ;;  %2166 = vmatmul.bf16.gmra.mxu1 %v3591_v28  ;;  %v4521_v30 = vld [vmem:[%s7412_s0 + $0x128] sm:$0xf0] }
  0xb4   :  { %7531 = vst [vmem:[#allocation6_spill] sm:$0xff] %v5085_v31 }
  0xb5   :  { %v5093_v34 = vpop.f32.mrf.mxu3  ;;  %v2503_v35 = vpop.f32.mrf.mxu2 }
  0xb6   :  { %7532 = vst [vmem:[#allocation7_spill] sm:$0xff] %v5093_v34  ;;  %v1760_v36 = vpop.f32.mrf.mxu0  ;;  %v4552_v34 = vld [vmem:[%s7412_s0 + $0x220] sm:$0xf0] }
  0xb7   :  { %v2129_v38 = vpop.f32.mrf.mxu1 }
  0xb8   :  { %v2130_v39 = vadd.f32 %v2129_v38, %v1760_v36  ;;  %v3624_v36 = vld [vmem:[%s7412_s0 + $0x12c] sm:$0xf0] }
  0xba   :  { %v5095_v40 = vadd.f32 %v2498_v11, %v2130_v39  ;;  %4423 = vmatmul.msk.bf16.gmra.mxu2 %vm1527_vm0, %v3619_v37  ;;  %v3611_v11 = vor.u32 %v4518_v2, %v3610_v1  ;;  %v3623_v39 = vor.u32 %v4521_v30, %v3622_v29  ;;  %v3636_v1 = vld [vmem:[%s7412_s0 + $0x144] sm:$0xf0]  ;;  %v4527_v29 = vld [vmem:[%s7412_s0 + $0x158] sm:$0xf0]  ;;  %v4294_v30 = vld [vmem:[%s7412_s0 + $0x660] sm:$0xf] }
  0xbc   :  { %7533 = vst [vmem:[#allocation8_spill] sm:$0xff] %v5095_v40 }
  0xbd   :  { %v5116_v47 = vpop.f32.mrf.mxu3  ;;  %v2506_v48 = vpop.f32.mrf.mxu2 }
  0xbe   :  { %7534 = vst [vmem:[#allocation9_spill] sm:$0xff] %v5116_v47  ;;  %v1763_v50 = vpop.f32.mrf.mxu0  ;;  %v3750_v47 = vld [vmem:[%s7412_s0 + $0x218] sm:$0xf] }
  0xbf   :  { %v2132_v53 = vpop.f32.mrf.mxu1 }
  0xc0   :  { %v2133_v54 = vadd.f32 %v2132_v53, %v1763_v50 }
  0xc1   :  { %1802 = vmatmul.bf16.gmra.mxu0 %v3599_v49  ;;  %v4528_v49 = vld [vmem:[%s7412_s0 + $0x160] sm:$0xf0] }
  0xc2   :  { %v5118_v55 = vadd.f32 %v2501_v24, %v2133_v54  ;;  %2072 = vmatmul.bf16.gmra.mxu3 %v4247_v51  ;;  %2171 = vmatmul.bf16.gmra.mxu1 %v3603_v52 }
  0xc5   :  { %v5126_v58 = vpop.f32.mrf.mxu3  ;;  %v2508_v59 = vpop.f32.mrf.mxu2 }
  0xc6   :  { %v1765_v60 = vpop.f32.mrf.mxu0 }
  0xc7   :  { %v2134_v62 = vpop.f32.mrf.mxu1 }
  0xc8   :  { %v2135_v63 = vadd.f32 %v2134_v62, %v1765_v60  ;;  %v4524_v60 = vld [vmem:[%s7412_s0 + $0x140] sm:$0xf0]  ;;  %v4686_v62 = vld [vmem:[%s7412_s0 + $0x650] sm:$0xf0] }
  0xca   :  { %v5128_v0 = vadd.f32 %v2503_v35, %v2135_v63  ;;  %4424 = vmatmul.msk.bf16.gmra.mxu2 %vm1527_vm0, %v3631_v61  ;;  %v4520_v35 = vld [vmem:[%s7412_s0 + $0x124] sm:$0xf]  ;;  %v4282_v61 = vld [vmem:[%s7412_s0 + $0x648] sm:$0xf]  ;;  %v4523_v63 = vld [vmem:[%s7412_s0 + $0x13c] sm:$0xf] }
  0xcb   :  { %v3627_v43 = vor.u32 %v4520_v35, %v3624_v36  ;;  %v4283_v6 = vor.u32 %v4686_v62, %v4282_v61  ;;  %v3648_v35 = vld [vmem:[%s7412_s0 + $0x15c] sm:$0xf0]  ;;  %v3658_v62 = vld [vmem:[%s7412_s0 + $0x168] sm:$0xf] }
  0xcd   :  { %v5149_v8 = vpop.f32.mrf.mxu3  ;;  %v2511_v9 = vpop.f32.mrf.mxu2 }
  0xce   :  { %v1768_v12 = vpop.f32.mrf.mxu0 }
  0xcf   :  { %v2137_v15 = vpop.f32.mrf.mxu1 }
  0xd0   :  { %v2138_v17 = vadd.f32 %v2137_v15, %v1768_v12  ;;  %v4531_v15 = vld [vmem:[%s7412_s0 + $0x178] sm:$0xf0] }
  0xd1   :  { %1807 = vmatmul.bf16.gmra.mxu0 %v3611_v11 }
  0xd2   :  { %v5151_v18 = vadd.f32 %v2506_v48, %v2138_v17  ;;  %2077 = vmatmul.bf16.gmra.mxu3 %v4259_v13  ;;  %2176 = vmatmul.bf16.gmra.mxu1 %v3615_v14  ;;  %v3654_v48 = vld [vmem:[%s7412_s0 + $0x158] sm:$0xf]  ;;  %v3666_v14 = vld [vmem:[%s7412_s0 + $0x170] sm:$0xf] }
  0xd3   :  { %v3655_v53 = vor.u32 %v4528_v49, %v3654_v48  ;;  %v3678_v49 = vld [vmem:[%s7412_s0 + $0x188] sm:$0xf] }
  0xd5   :  { %v5159_v21 = vpop.f32.mrf.mxu3  ;;  %v2513_v22 = vpop.f32.mrf.mxu2 }
  0xd6   :  { %v1770_v24 = vpop.f32.mrf.mxu0 }
  0xd7   :  { %v2139_v26 = vpop.f32.mrf.mxu1 }
  0xd8   :  { %v2140_v27 = vadd.f32 %v2139_v26, %v1770_v24 }
  0xda   :  { %v5161_v28 = vadd.f32 %v2508_v59, %v2140_v27  ;;  %4425 = vmatmul.msk.bf16.gmra.mxu2 %vm1527_vm0, %v3643_v25  ;;  %v3634_v59 = vld [vmem:[%s7412_s0 + $0x138] sm:$0xf]  ;;  %v3646_v27 = vld [vmem:[%s7412_s0 + $0x150] sm:$0xf] }
  0xdb   :  { %v3635_v4 = vor.u32 %v4524_v60, %v3634_v59 }
  0xdd   :  { %v5182_v37 = vpop.f32.mrf.mxu3  ;;  %v2516_v38 = vpop.f32.mrf.mxu2 }
  0xde   :  { %v1773_v41 = vpop.f32.mrf.mxu0 }
  0xdf   :  { %v2142_v44 = vpop.f32.mrf.mxu1 }
  0xe0   :  { %v2143_v45 = vadd.f32 %v2142_v44, %v1773_v41 }
  0xe1   :  { %1812 = vmatmul.bf16.gmra.mxu0 %v3623_v39  ;;  %v3647_v39 = vor.u32 %v4527_v29, %v3646_v27 }
  0xe2   :  { %v5184_v46 = vadd.f32 %v2511_v9, %v2143_v45  ;;  %2082 = vmatmul.bf16.gmra.mxu3 %v4271_v42  ;;  %2181 = vmatmul.bf16.gmra.mxu1 %v3627_v43  ;;  %v3639_v9 = vor.u32 %v4523_v63, %v3636_v1  ;;  %v4295_v42 = vor.u32 %v4689_v32, %v4294_v30  ;;  %v4530_v63 = vld [vmem:[%s7412_s0 + $0x170] sm:$0xf0]  ;;  %v4306_v1 = vld [vmem:[%s7412_s0 + $0x678] sm:$0xf] }
  0xe3   :  { %v3651_v43 = vor.u32 %v4526_v33, %v3648_v35 }
  0xe4   :  { %7535 = vst [vmem:[#allocation10_spill] sm:$0xff] %v5184_v46 }
  0xe5   :  { %v5192_v50 = vpop.f32.mrf.mxu3  ;;  %v2518_v51 = vpop.f32.mrf.mxu2 }
  0xe6   :  { %v1775_v52 = vpop.f32.mrf.mxu0 }
  0xe7   :  { %v2144_v54 = vpop.f32.mrf.mxu1 }
  0xe8   :  { %v2145_v56 = vadd.f32 %v2144_v54, %v1775_v52 }
  0xea   :  { %v5194_v57 = vadd.f32 %v2513_v22, %v2145_v56  ;;  %4426 = vmatmul.msk.bf16.gmra.mxu2 %vm1527_vm0, %v3655_v53  ;;  %v3667_v22 = vor.u32 %v4531_v15, %v3666_v14 }
  0xed   :  { %v5215_v2 = vpop.f32.mrf.mxu3  ;;  %v2521_v3 = vpop.f32.mrf.mxu2 }
  0xee   :  { %7536 = vst [vmem:[#allocation11_spill] sm:$0xff] %v5215_v2  ;;  %v1778_v5 = vpop.f32.mrf.mxu0 }
  0xef   :  { %v2147_v11 = vpop.f32.mrf.mxu1 }
  0xf0   :  { %v2148_v12 = vadd.f32 %v2147_v11, %v1778_v5  ;;  %v3660_v5 = vld [vmem:[%s7412_s0 + $0x174] sm:$0xf0]  ;;  %v3659_v11 = vor.u32 %v4530_v63, %v3658_v62 }
  0xf1   :  { %1817 = vmatmul.bf16.gmra.mxu0 %v3635_v4  ;;  %v4529_v4 = vld [vmem:[%s7412_s0 + $0x16c] sm:$0xf] }
  0xf2   :  { %v5217_v13 = vadd.f32 %v2516_v38, %v2148_v12  ;;  %2087 = vmatmul.bf16.gmra.mxu3 %v4283_v6  ;;  %2186 = vmatmul.bf16.gmra.mxu1 %v3639_v9  ;;  %v3663_v15 = vor.u32 %v4529_v4, %v3660_v5 }
  0xf4   :  { %7537 = vst [vmem:[#allocation12_spill] sm:$0xff] %v5217_v13 }
  0xf5   :  { %v5225_v17 = vpop.f32.mrf.mxu3  ;;  %v2523_v19 = vpop.f32.mrf.mxu2 }
  0xf6   :  { %7538 = vst [vmem:[#allocation13_spill] sm:$0xff] %v5225_v17  ;;  %v1780_v20 = vpop.f32.mrf.mxu0 }
  0xf7   :  { %v2149_v24 = vpop.f32.mrf.mxu1 }
  0xf8   :  { %v2150_v25 = vadd.f32 %v2149_v24, %v1780_v20  ;;  %v3690_v24 = vld [vmem:[%s7412_s0 + $0x1a0] sm:$0xf] }
  0xfa   :  { %v5227_v26 = vadd.f32 %v2518_v51, %v2150_v25  ;;  %4427 = vmatmul.msk.bf16.gmra.mxu2 %vm1527_vm0, %v3667_v22  ;;  %v4534_v51 = vld [vmem:[%s7412_s0 + $0x190] sm:$0xf0]  ;;  %v4537_v25 = vld [vmem:[%s7412_s0 + $0x1a8] sm:$0xf0] }
  0xfb   :  { %v3679_v56 = vor.u32 %v4534_v51, %v3678_v49  ;;  %v3691_v32 = vor.u32 %v4537_v25, %v3690_v24  ;;  %v4330_v24 = vld [vmem:[%s7412_s0 + $0x6a8] sm:$0xf]  ;;  %v4698_v25 = vld [vmem:[%s7412_s0 + $0x6b0] sm:$0xf0] }
  0xfd   :  { %v5248_v36 = vpop.f32.mrf.mxu3  ;;  %v2526_v38 = vpop.f32.mrf.mxu2 }
  0xfe   :  { %7539 = vst [vmem:[#allocation14_spill] sm:$0xff] %v5248_v36  ;;  %v1783_v41 = vpop.f32.mrf.mxu0 }
  0xff   :  { %v2152_v44 = vpop.f32.mrf.mxu1 }
 0x100   :  { %v2153_v45 = vadd.f32 %v2152_v44, %v1783_v41  ;;  %v4533_v41 = vld [vmem:[%s7412_s0 + $0x188] sm:$0xf0]  ;;  %v4532_v44 = vld [vmem:[%s7412_s0 + $0x184] sm:$0xf] }
 0x101   :  { %1822 = vmatmul.bf16.gmra.mxu0 %v3647_v39 }
 0x102   :  { %v5250_v48 = vadd.f32 %v2521_v3, %v2153_v45  ;;  %2092 = vmatmul.bf16.gmra.mxu3 %v4295_v42  ;;  %2191 = vmatmul.bf16.gmra.mxu1 %v3651_v43  ;;  %v4692_v3 = vld [vmem:[%s7412_s0 + $0x680] sm:$0xf0]  ;;  %v4318_v42 = vld [vmem:[%s7412_s0 + $0x690] sm:$0xf]  ;;  %v4695_v43 = vld [vmem:[%s7412_s0 + $0x698] sm:$0xf0] }
 0x103   :  { %v4307_v14 = vor.u32 %v4692_v3, %v4306_v1  ;;  %v3672_v45 = vld [vmem:[%s7412_s0 + $0x18c] sm:$0xf0]  ;;  %v3702_v1 = vld [vmem:[%s7412_s0 + $0x1b8] sm:$0xf]  ;;  %v4540_v3 = vld [vmem:[%s7412_s0 + $0x1c0] sm:$0xf0] }
 0x104   :  { %7540 = vst [vmem:[#allocation15_spill] sm:$0xff] %v5250_v48 }
 0x105   :  { %v5258_v52 = vpop.f32.mrf.mxu3  ;;  %v2528_v53 = vpop.f32.mrf.mxu2 }
 0x106   :  { %7541 = vst [vmem:[#allocation16_spill] sm:$0xff] %v5258_v52  ;;  %v1785_v54 = vpop.f32.mrf.mxu0 }
 0x107   :  { %v2154_v59 = vpop.f32.mrf.mxu1 }
 0x108   :  { %v2155_v60 = vadd.f32 %v2154_v59, %v1785_v54  ;;  %v3675_v59 = vor.u32 %v4532_v44, %v3672_v45 }
 0x10a   :  { %v5260_v61 = vadd.f32 %v2523_v19, %v2155_v60  ;;  %4428 = vmatmul.msk.bf16.gmra.mxu2 %vm1527_vm0, %v3679_v56  ;;  %v4319_v56 = vor.u32 %v4695_v43, %v4318_v42 }
 0x10d   :  { %v5281_v6 = vpop.f32.mrf.mxu3  ;;  %v2531_v9 = vpop.f32.mrf.mxu2 }
 0x10e   :  { %7542 = vst [vmem:[#allocation17_spill] sm:$0xff] %v5281_v6  ;;  %v1788_v12 = vpop.f32.mrf.mxu0 }
 0x10f   :  { %v2157_v19 = vpop.f32.mrf.mxu1 }
 0x110   :  { %v2158_v20 = vadd.f32 %v2157_v19, %v1788_v12  ;;  %v3703_v12 = vor.u32 %v4540_v3, %v3702_v1 }
 0x111   :  { %1827 = vmatmul.bf16.gmra.mxu0 %v3659_v11 }
 0x112   :  { %v5283_v22 = vadd.f32 %v2526_v38, %v2158_v20  ;;  %2097 = vmatmul.bf16.gmra.mxu3 %v4307_v14  ;;  %2196 = vmatmul.bf16.gmra.mxu1 %v3663_v15  ;;  %v3670_v38 = vld [vmem:[%s7412_s0 + $0x180] sm:$0xf]  ;;  %v4536_v20 = vld [vmem:[%s7412_s0 + $0x1a0] sm:$0xf0] }
 0x114   :  { %7543 = vst [vmem:[#allocation18_spill] sm:$0xff] %v5283_v22 }
 0x115   :  { %v5291_v27 = vpop.f32.mrf.mxu3  ;;  %v2533_v29 = vpop.f32.mrf.mxu2 }
 0x116   :  { %7544 = vst [vmem:[#allocation19_spill] sm:$0xff] %v5291_v27  ;;  %v1790_v30 = vpop.f32.mrf.mxu0  ;;  %v3822_v27 = vld [vmem:[%s7412_s0 + $0x2a8] sm:$0xf] }
 0x117   :  { %v2159_v33 = vpop.f32.mrf.mxu1 }
 0x118   :  { %v2160_v35 = vadd.f32 %v2159_v33, %v1790_v30  ;;  %v3684_v30 = vld [vmem:[%s7412_s0 + $0x1a4] sm:$0xf0] }
 0x11a   :  { %v5293_v39 = vadd.f32 %v2528_v53, %v2160_v35  ;;  %4429 = vmatmul.msk.bf16.gmra.mxu2 %vm1527_vm0, %v3691_v32  ;;  %v3671_v53 = vor.u32 %v4533_v41, %v3670_v38  ;;  %v4331_v41 = vor.u32 %v4698_v25, %v4330_v24 }
 0x11d   :  { %v5314_v49 = vpop.f32.mrf.mxu3  ;;  %v2536_v51 = vpop.f32.mrf.mxu2 }
 0x11e   :  { %7545 = vst [vmem:[#allocation20_spill] sm:$0xff] %v5314_v49  ;;  %v1793_v54 = vpop.f32.mrf.mxu0 }
 0x11f   :  { %v2162_v60 = vpop.f32.mrf.mxu1 }
 0x120   :  { %v2163_v62 = vadd.f32 %v2162_v60, %v1793_v54  ;;  %v4543_v54 = vld [vmem:[%s7412_s0 + $0x1d8] sm:$0xf0] }
 0x121   :  { %1832 = vmatmul.bf16.gmra.mxu0 %v3671_v53  ;;  %v3714_v53 = vld [vmem:[%s7412_s0 + $0x1d0] sm:$0xf] }
 0x122   :  { %v5316_v63 = vadd.f32 %v2531_v9, %v2163_v62  ;;  %2102 = vmatmul.bf16.gmra.mxu3 %v4319_v56  ;;  %2201 = vmatmul.bf16.gmra.mxu1 %v3675_v59  ;;  %v3682_v9 = vld [vmem:[%s7412_s0 + $0x198] sm:$0xf]  ;;  %v3715_v62 = vor.u32 %v4543_v54, %v3714_v53 }
 0x123   :  { %v3683_v35 = vor.u32 %v4536_v20, %v3682_v9  ;;  %v4128_v9 = vld [vmem:[%s7412_s0 + $0x51c] sm:$0xf0] }
 0x124   :  { %7546 = vst [vmem:[#allocation21_spill] sm:$0xff] %v5316_v63 }
 0x125   :  { %v5324_v4 = vpop.f32.mrf.mxu3  ;;  %v2538_v5 = vpop.f32.mrf.mxu2 }
 0x126   :  { %7547 = vst [vmem:[#allocation22_spill] sm:$0xff] %v5324_v4  ;;  %v1795_v11 = vpop.f32.mrf.mxu0  ;;  %v3810_v4 = vld [vmem:[%s7412_s0 + $0x290] sm:$0xf] }
 0x127   :  { %v2164_v14 = vpop.f32.mrf.mxu1 }
 0x128   :  { %v2165_v15 = vadd.f32 %v2164_v14, %v1795_v11  ;;  %v4538_v14 = vld [vmem:[%s7412_s0 + $0x1b4] sm:$0xf] }
 0x12a   :  { %v5326_v19 = vadd.f32 %v2533_v29, %v2165_v15  ;;  %4430 = vmatmul.msk.bf16.gmra.mxu2 %vm1527_vm0, %v3703_v12  ;;  %v4535_v29 = vld [vmem:[%s7412_s0 + $0x19c] sm:$0xf]  ;;  %v3696_v15 = vld [vmem:[%s7412_s0 + $0x1bc] sm:$0xf0] }
 0x12b   :  { %v3687_v42 = vor.u32 %v4535_v29, %v3684_v30  ;;  %v4539_v12 = vld [vmem:[%s7412_s0 + $0x1b8] sm:$0xf0]  ;;  %v3699_v30 = vor.u32 %v4538_v14, %v3696_v15  ;;  %v4541_v14 = vld [vmem:[%s7412_s0 + $0x1cc] sm:$0xf]  ;;  %v3708_v15 = vld [vmem:[%s7412_s0 + $0x1d4] sm:$0xf0] }
 0x12d   :  { %v5347_v32 = vpop.f32.mrf.mxu3  ;;  %v2541_v33 = vpop.f32.mrf.mxu2 }
 0x12e   :  { %7548 = vst [vmem:[#allocation23_spill] sm:$0xff] %v5347_v32  ;;  %v1798_v38 = vpop.f32.mrf.mxu0 }
 0x12f   :  { %v2167_v43 = vpop.f32.mrf.mxu1 }
 0x130   :  { %v2168_v44 = vadd.f32 %v2167_v43, %v1798_v38  ;;  %v3726_v43 = vld [vmem:[%s7412_s0 + $0x1e8] sm:$0xf] }
 0x131   :  { %1837 = vmatmul.bf16.gmra.mxu0 %v3683_v35 }
 0x132   :  { %v5349_v45 = vadd.f32 %v2536_v51, %v2168_v44  ;;  %2107 = vmatmul.bf16.gmra.mxu3 %v4331_v41  ;;  %2206 = vmatmul.bf16.gmra.mxu1 %v3687_v42  ;;  %v3694_v51 = vld [vmem:[%s7412_s0 + $0x1b0] sm:$0xf]  ;;  %v4546_v44 = vld [vmem:[%s7412_s0 + $0x1f0] sm:$0xf0] }
 0x133   :  { %v3695_v25 = vor.u32 %v4539_v12, %v3694_v51  ;;  %v4542_v12 = vld [vmem:[%s7412_s0 + $0x1d0] sm:$0xf0] }
 0x134   :  { %7549 = vst [vmem:[#allocation24_spill] sm:$0xff] %v5349_v45 }
 0x135   :  { %v5357_v56 = vpop.f32.mrf.mxu3  ;;  %v2543_v59 = vpop.f32.mrf.mxu2 }
 0x136   :  { %7550 = vst [vmem:[#allocation25_spill] sm:$0xff] %v5357_v56  ;;  %v1800_v60 = vpop.f32.mrf.mxu0  ;;  %v3798_v56 = vld [vmem:[%s7412_s0 + $0x278] sm:$0xf] }
 0x137   :  { %v2169_v1 = vpop.f32.mrf.mxu1 }
 0x138   :  { %v2170_v3 = vadd.f32 %v2169_v1, %v1800_v60 }
 0x13a   :  { %v5359_v11 = vadd.f32 %v2538_v5, %v2170_v3  ;;  %4431 = vmatmul.msk.bf16.gmra.mxu2 %vm1527_vm0, %v3715_v62  ;;  %v4646_v5 = vld [vmem:[%s7412_s0 + $0x514] sm:$0xf]  ;;  %v3727_v62 = vor.u32 %v4546_v44, %v3726_v43 }
 0x13b   :  { %v4131_v35 = vor.u32 %v4646_v5, %v4128_v9  ;;  %v4140_v5 = vld [vmem:[%s7412_s0 + $0x534] sm:$0xf0] }
 0x13d   :  { %v5380_v20 = vpop.f32.mrf.mxu3  ;;  %v2546_v24 = vpop.f32.mrf.mxu2 }
 0x13e   :  { %7551 = vst [vmem:[#allocation26_spill] sm:$0xff] %v5380_v20  ;;  %v1803_v29 = vpop.f32.mrf.mxu0 }
 0x13f   :  { %v2172_v38 = vpop.f32.mrf.mxu1 }
 0x140   :  { %v2173_v41 = vadd.f32 %v2172_v38, %v1803_v29 }
 0x141   :  { %1842 = vmatmul.bf16.gmra.mxu0 %v3695_v25 }
 0x142   :  { %v5382_v42 = vadd.f32 %v2541_v33, %v2173_v41  ;;  %2211 = vmatmul.bf16.gmra.mxu1 %v3699_v30  ;;  %2391 = vmatmul.bf16.vlgmr.msrb.gmra.mxu3 %v4131_v35  ;;  %v3706_v33 = vld [vmem:[%s7412_s0 + $0x1c8] sm:$0xf]  ;;  %v3711_v35 = vor.u32 %v4541_v14, %v3708_v15 }
 0x143   :  { %v3707_v29 = vor.u32 %v4542_v12, %v3706_v33 }
 0x144   :  { %7552 = vst [vmem:[#allocation27_spill] sm:$0xff] %v5382_v42 }
 0x145   :  { %v5390_v53 = vpop.f32.mrf.mxu3  ;;  %v2548_v54 = vpop.f32.mrf.mxu2 }
 0x146   :  { %7553 = vst [vmem:[#allocation28_spill] sm:$0xff] %v5390_v53  ;;  %v1805_v60 = vpop.f32.mrf.mxu0  ;;  %v3786_v53 = vld [vmem:[%s7412_s0 + $0x260] sm:$0xf] }
 0x147   :  { %v2174_v1 = vpop.f32.mrf.mxu1 }
 0x148   :  { %v2175_v3 = vadd.f32 %v2174_v1, %v1805_v60  ;;  %v3738_v60 = vld [vmem:[%s7412_s0 + $0x200] sm:$0xf] }
 0x14a   :  { %v5392_v51 = vadd.f32 %v2543_v59, %v2175_v3  ;;  %4432 = vmatmul.msk.bf16.gmra.mxu2 %vm1527_vm0, %v3727_v62  ;;  %v4649_v59 = vld [vmem:[%s7412_s0 + $0x52c] sm:$0xf] }
 0x14b   :  { %v4143_v38 = vor.u32 %v4649_v59, %v4140_v5  ;;  %v4549_v62 = vld [vmem:[%s7412_s0 + $0x208] sm:$0xf0] }
 0x14c   :  { %v3739_v12 = vor.u32 %v4549_v62, %v3738_v60  ;;  %v4545_v5 = vld [vmem:[%s7412_s0 + $0x1e8] sm:$0xf0] }
 0x14d   :  { %v5413_v9 = vpop.f32.mrf.mxu3  ;;  %v2551_v25 = vpop.f32.mrf.mxu2 }
 0x14e   :  { %7554 = vst [vmem:[#allocation29_spill] sm:$0xff] %v5413_v9  ;;  %v1808_v30 = vpop.f32.mrf.mxu0 }
 0x14f   :  { %v2177_v41 = vpop.f32.mrf.mxu1 }
 0x150   :  { %v2178_v43 = vadd.f32 %v2177_v41, %v1808_v30  ;;  %v3720_v30 = vld [vmem:[%s7412_s0 + $0x1ec] sm:$0xf0] }
 0x151   :  { %1847 = vmatmul.bf16.gmra.mxu0 %v3707_v29  ;;  %v4544_v29 = vld [vmem:[%s7412_s0 + $0x1e4] sm:$0xf] }
 0x152   :  { %v5415_v44 = vadd.f32 %v2546_v24, %v2178_v43  ;;  %2216 = vmatmul.bf16.gmra.mxu1 %v3711_v35  ;;  %2396 = vmatmul.bf16.gmra.mxu3 %v4143_v38  ;;  %v3718_v24 = vld [vmem:[%s7412_s0 + $0x1e0] sm:$0xf]  ;;  %v4152_v35 = vld [vmem:[%s7412_s0 + $0x54c] sm:$0xf0]  ;;  %v3723_v62 = vor.u32 %v4544_v29, %v3720_v30  ;;  %v3751_v29 = vor.u32 %v4552_v34, %v3750_v47  ;;  %v3732_v34 = vld [vmem:[%s7412_s0 + $0x204] sm:$0xf0] }
 0x153   :  { %v3719_v43 = vor.u32 %v4545_v5, %v3718_v24  ;;  %v4655_v47 = vld [vmem:[%s7412_s0 + $0x55c] sm:$0xf] }
 0x154   :  { %7555 = vst [vmem:[#allocation30_spill] sm:$0xff] %v5415_v44 }
 0x155   :  { %v5423_v1 = vpop.f32.mrf.mxu3  ;;  %v2553_v3 = vpop.f32.mrf.mxu2 }
 0x156   :  { %7556 = vst [vmem:[#allocation31_spill] sm:$0xff] %v5423_v1  ;;  %v1810_v33 = vpop.f32.mrf.mxu0  ;;  %v3774_v1 = vld [vmem:[%s7412_s0 + $0x248] sm:$0xf] }
 0x157   :  { %v2179_v14 = vpop.f32.mrf.mxu1 }
 0x158   :  { %v2180_v15 = vadd.f32 %v2179_v14, %v1810_v33 }
 0x15a   :  { %v5425_v59 = vadd.f32 %v2548_v54, %v2180_v15  ;;  %4433 = vmatmul.msk.bf16.gmra.mxu2 %vm1527_vm0, %v3739_v12  ;;  %v4652_v54 = vld [vmem:[%s7412_s0 + $0x544] sm:$0xf] }
 0x15b   :  { %v4155_v33 = vor.u32 %v4652_v54, %v4152_v35 }
 0x15d   :  { %v5446_v38 = vpop.f32.mrf.mxu3  ;;  %v2556_v41 = vpop.f32.mrf.mxu2 }
 0x15e   :  { %7557 = vst [vmem:[#allocation32_spill] sm:$0xff] %v5446_v38  ;;  %v1813_v60 = vpop.f32.mrf.mxu0 }
 0x15f   :  { %v2182_v12 = vpop.f32.mrf.mxu1 }
 0x160   :  { %v2183_v14 = vadd.f32 %v2182_v12, %v1813_v60  ;;  %v4547_v60 = vld [vmem:[%s7412_s0 + $0x1fc] sm:$0xf] }
 0x161   :  { %1852 = vmatmul.bf16.gmra.mxu0 %v3719_v43  ;;  %v4548_v43 = vld [vmem:[%s7412_s0 + $0x200] sm:$0xf0] }
 0x162   :  { %v5448_v15 = vadd.f32 %v2551_v25, %v2183_v14  ;;  %2221 = vmatmul.bf16.gmra.mxu1 %v3723_v62  ;;  %2401 = vmatmul.bf16.gmra.mxu3 %v4155_v33  ;;  %v3730_v25 = vld [vmem:[%s7412_s0 + $0x1f8] sm:$0xf] }
 0x163   :  { %v3731_v12 = vor.u32 %v4548_v43, %v3730_v25 }
 0x164   :  { %7558 = vst [vmem:[#allocation33_spill] sm:$0xff] %v5448_v15 }
 0x165   :  { %v5456_v23 = vpop.f32.mrf.mxu3  ;;  %v2558_v24 = vpop.f32.mrf.mxu2 }
 0x166   :  { %7559 = vst [vmem:[#allocation34_spill] sm:$0xff] %v5456_v23  ;;  %v1815_v5 = vpop.f32.mrf.mxu0  ;;  %v3762_v23 = vld [vmem:[%s7412_s0 + $0x230] sm:$0xf] }
 0x167   :  { %v2184_v30 = vpop.f32.mrf.mxu1 }
 0x168   :  { %v2185_v54 = vadd.f32 %v2184_v30, %v1815_v5  ;;  %v3735_v5 = vor.u32 %v4547_v60, %v3732_v34 }
 0x16a   :  { %v5458_v35 = vadd.f32 %v2553_v3, %v2185_v54  ;;  %4434 = vmatmul.msk.bf16.gmra.mxu2 %vm1527_vm0, %v3751_v29  ;;  %v4164_v3 = vld [vmem:[%s7412_s0 + $0x564] sm:$0xf0] }
 0x16b   :  { %v4167_v29 = vor.u32 %v4655_v47, %v4164_v3 }
 0x16d   :  { %v5479_v62 = vpop.f32.mrf.mxu3  ;;  %v2561_v33 = vpop.f32.mrf.mxu2 }
 0x16e   :  { %7560 = vst [vmem:[#allocation35_spill] sm:$0xff] %v5479_v62  ;;  %v1818_v14 = vpop.f32.mrf.mxu0  ;;  %v4555_v62 = vld [vmem:[%s7412_s0 + $0x238] sm:$0xf0] }
 0x16f   :  { %v2187_v30 = vpop.f32.mrf.mxu1  ;;  %v3763_v60 = vor.u32 %v4555_v62, %v3762_v23  ;;  %v3744_v23 = vld [vmem:[%s7412_s0 + $0x21c] sm:$0xf0] }
 0x170   :  { %v2188_v54 = vadd.f32 %v2187_v30, %v1818_v14  ;;  %v4550_v14 = vld [vmem:[%s7412_s0 + $0x214] sm:$0xf]  ;;  %v4176_v62 = vld [vmem:[%s7412_s0 + $0x57c] sm:$0xf0] }
 0x171   :  { %1857 = vmatmul.bf16.gmra.mxu0 %v3731_v12  ;;  %v4551_v12 = vld [vmem:[%s7412_s0 + $0x218] sm:$0xf0] }
 0x172   :  { %v5481_v10 = vadd.f32 %v2556_v41, %v2188_v54  ;;  %2226 = vmatmul.bf16.gmra.mxu1 %v3735_v5  ;;  %2406 = vmatmul.bf16.gmra.mxu3 %v4167_v29  ;;  %v3742_v41 = vld [vmem:[%s7412_s0 + $0x210] sm:$0xf] }
 0x173   :  { %v3743_v30 = vor.u32 %v4551_v12, %v3742_v41 }
 0x174   :  { %7561 = vst [vmem:[#allocation36_spill] sm:$0xff] %v5481_v10 }
 0x175   :  { %v5489_v38 = vpop.f32.mrf.mxu3  ;;  %v2563_v25 = vpop.f32.mrf.mxu2 }
 0x176   :  { %7562 = vst [vmem:[#allocation37_spill] sm:$0xff] %v5489_v38  ;;  %v1820_v43 = vpop.f32.mrf.mxu0 }
 0x177   :  { %v2189_v34 = vpop.f32.mrf.mxu1 }
 0x178   :  { %v2190_v47 = vadd.f32 %v2189_v34, %v1820_v43  ;;  %v3747_v43 = vor.u32 %v4550_v14, %v3744_v23 }
 0x17a   :  { %v5491_v3 = vadd.f32 %v2558_v24, %v2190_v47  ;;  %4435 = vmatmul.msk.bf16.gmra.mxu2 %vm1527_vm0, %v3763_v60  ;;  %v4658_v24 = vld [vmem:[%s7412_s0 + $0x574] sm:$0xf] }
 0x17b   :  { %v4179_v60 = vor.u32 %v4658_v24, %v4176_v62 }
 0x17d   :  { %v5512_v5 = vpop.f32.mrf.mxu3  ;;  %v2566_v29 = vpop.f32.mrf.mxu2 }
 0x17e   :  { %7563 = vst [vmem:[#allocation38_spill] sm:$0xff] %v5512_v5  ;;  %v1823_v54 = vpop.f32.mrf.mxu0  ;;  %v4558_v5 = vld [vmem:[%s7412_s0 + $0x250] sm:$0xf0] }
 0x17f   :  { %v2192_v34 = vpop.f32.mrf.mxu1  ;;  %v3775_v14 = vor.u32 %v4558_v5, %v3774_v1  ;;  %v3756_v1 = vld [vmem:[%s7412_s0 + $0x234] sm:$0xf0] }
 0x180   :  { %v2193_v47 = vadd.f32 %v2192_v34, %v1823_v54  ;;  %v4553_v54 = vld [vmem:[%s7412_s0 + $0x22c] sm:$0xf]  ;;  %v4188_v5 = vld [vmem:[%s7412_s0 + $0x594] sm:$0xf0] }
 0x181   :  { %1862 = vmatmul.bf16.gmra.mxu0 %v3743_v30  ;;  %v4554_v30 = vld [vmem:[%s7412_s0 + $0x230] sm:$0xf0] }
 0x182   :  { %v5514_v38 = vadd.f32 %v2561_v33, %v2193_v47  ;;  %2231 = vmatmul.bf16.gmra.mxu1 %v3747_v43  ;;  %2411 = vmatmul.bf16.gmra.mxu3 %v4179_v60  ;;  %v3754_v33 = vld [vmem:[%s7412_s0 + $0x228] sm:$0xf] }
 0x183   :  { %v3755_v34 = vor.u32 %v4554_v30, %v3754_v33 }
 0x184   :  { %7564 = vst [vmem:[#allocation39_spill] sm:$0xff] %v5514_v38 }
 0x185   :  { %v5522_v9 = vpop.f32.mrf.mxu3  ;;  %v2568_v41 = vpop.f32.mrf.mxu2 }
 0x186   :  { %7565 = vst [vmem:[#allocation40_spill] sm:$0xff] %v5522_v9  ;;  %v1825_v12 = vpop.f32.mrf.mxu0 }
 0x187   :  { %v2194_v23 = vpop.f32.mrf.mxu1 }
 0x188   :  { %v2195_v24 = vadd.f32 %v2194_v23, %v1825_v12  ;;  %v3759_v12 = vor.u32 %v4553_v54, %v3756_v1 }
 0x18a   :  { %v5524_v62 = vadd.f32 %v2563_v25, %v2195_v24  ;;  %4436 = vmatmul.msk.bf16.gmra.mxu2 %vm1527_vm0, %v3775_v14  ;;  %v4661_v25 = vld [vmem:[%s7412_s0 + $0x58c] sm:$0xf] }
 0x18b   :  { %v4191_v14 = vor.u32 %v4661_v25, %v4188_v5 }
 0x18c   :  { %7566 = vst [vmem:[#allocation41_spill] sm:$0xff] %v5524_v62 }
 0x18d   :  { %v5545_v43 = vpop.f32.mrf.mxu3  ;;  %v2571_v60 = vpop.f32.mrf.mxu2 }
 0x18e   :  { %7567 = vst [vmem:[#allocation42_spill] sm:$0xff] %v5545_v43  ;;  %v1828_v47 = vpop.f32.mrf.mxu0  ;;  %v4561_v43 = vld [vmem:[%s7412_s0 + $0x268] sm:$0xf0] }
 0x18f   :  { %v2197_v23 = vpop.f32.mrf.mxu1  ;;  %v3787_v54 = vor.u32 %v4561_v43, %v3786_v53  ;;  %v3768_v53 = vld [vmem:[%s7412_s0 + $0x24c] sm:$0xf0] }
 0x190   :  { %v2198_v24 = vadd.f32 %v2197_v23, %v1828_v47  ;;  %v4556_v47 = vld [vmem:[%s7412_s0 + $0x244] sm:$0xf]  ;;  %v4200_v43 = vld [vmem:[%s7412_s0 + $0x5ac] sm:$0xf0] }
 0x191   :  { %1867 = vmatmul.bf16.gmra.mxu0 %v3755_v34  ;;  %v4557_v34 = vld [vmem:[%s7412_s0 + $0x248] sm:$0xf0] }
 0x192   :  { %v5547_v9 = vadd.f32 %v2566_v29, %v2198_v24  ;;  %2236 = vmatmul.bf16.gmra.mxu1 %v3759_v12  ;;  %2416 = vmatmul.bf16.gmra.mxu3 %v4191_v14  ;;  %v3766_v29 = vld [vmem:[%s7412_s0 + $0x240] sm:$0xf] }
 0x193   :  { %v3767_v23 = vor.u32 %v4557_v34, %v3766_v29 }
 0x194   :  { %7568 = vst [vmem:[#allocation43_spill] sm:$0xff] %v5547_v9 }
 0x195   :  { %v5555_v20 = vpop.f32.mrf.mxu3  ;;  %v2573_v33 = vpop.f32.mrf.mxu2 }
 0x196   :  { %7569 = vst [vmem:[#allocation44_spill] sm:$0xff] %v5555_v20  ;;  %v1830_v30 = vpop.f32.mrf.mxu0 }
 0x197   :  { %v2199_v1 = vpop.f32.mrf.mxu1 }
 0x198   :  { %v2200_v25 = vadd.f32 %v2199_v1, %v1830_v30  ;;  %v3771_v30 = vor.u32 %v4556_v47, %v3768_v53 }
 0x19a   :  { %v5557_v5 = vadd.f32 %v2568_v41, %v2200_v25  ;;  %4437 = vmatmul.msk.bf16.gmra.mxu2 %vm1527_vm0, %v3787_v54  ;;  %v4664_v41 = vld [vmem:[%s7412_s0 + $0x5a4] sm:$0xf] }
 0x19b   :  { %v4203_v54 = vor.u32 %v4664_v41, %v4200_v43 }
 0x19c   :  { %7570 = vst [vmem:[#allocation45_spill] sm:$0xff] %v5557_v5 }
 0x19d   :  { %v5578_v12 = vpop.f32.mrf.mxu3  ;;  %v2576_v14 = vpop.f32.mrf.mxu2 }
 0x19e   :  { %7571 = vst [vmem:[#allocation46_spill] sm:$0xff] %v5578_v12  ;;  %v1833_v24 = vpop.f32.mrf.mxu0  ;;  %v4564_v12 = vld [vmem:[%s7412_s0 + $0x280] sm:$0xf0] }
 0x19f   :  { %v2202_v1 = vpop.f32.mrf.mxu1  ;;  %v3799_v47 = vor.u32 %v4564_v12, %v3798_v56  ;;  %v3780_v56 = vld [vmem:[%s7412_s0 + $0x264] sm:$0xf0] }
 0x1a0   :  { %v2203_v25 = vadd.f32 %v2202_v1, %v1833_v24  ;;  %v4559_v24 = vld [vmem:[%s7412_s0 + $0x25c] sm:$0xf]  ;;  %v4212_v12 = vld [vmem:[%s7412_s0 + $0x5c4] sm:$0xf0] }
 0x1a1   :  { %1872 = vmatmul.bf16.gmra.mxu0 %v3767_v23  ;;  %v4560_v23 = vld [vmem:[%s7412_s0 + $0x260] sm:$0xf0] }
 0x1a2   :  { %v5580_v20 = vadd.f32 %v2571_v60, %v2203_v25  ;;  %2241 = vmatmul.bf16.gmra.mxu1 %v3771_v30  ;;  %2421 = vmatmul.bf16.gmra.mxu3 %v4203_v54  ;;  %v3778_v60 = vld [vmem:[%s7412_s0 + $0x258] sm:$0xf] }
 0x1a3   :  { %v3779_v1 = vor.u32 %v4560_v23, %v3778_v60 }
 0x1a4   :  { %7572 = vst [vmem:[#allocation47_spill] sm:$0xff] %v5580_v20 }
 0x1a5   :  { %v5588_v32 = vpop.f32.mrf.mxu3  ;;  %v2578_v29 = vpop.f32.mrf.mxu2 }
 0x1a6   :  { %7573 = vst [vmem:[#allocation48_spill] sm:$0xff] %v5588_v32  ;;  %v1835_v34 = vpop.f32.mrf.mxu0 }
 0x1a7   :  { %v2204_v53 = vpop.f32.mrf.mxu1 }
 0x1a8   :  { %v2205_v41 = vadd.f32 %v2204_v53, %v1835_v34  ;;  %v3783_v34 = vor.u32 %v4559_v24, %v3780_v56 }
 0x1aa   :  { %v5590_v43 = vadd.f32 %v2573_v33, %v2205_v41  ;;  %4438 = vmatmul.msk.bf16.gmra.mxu2 %vm1527_vm0, %v3799_v47  ;;  %v4667_v33 = vld [vmem:[%s7412_s0 + $0x5bc] sm:$0xf] }
 0x1ab   :  { %v4215_v47 = vor.u32 %v4667_v33, %v4212_v12 }
 0x1ac   :  { %7574 = vst [vmem:[#allocation49_spill] sm:$0xff] %v5590_v43 }
 0x1ad   :  { %v5611_v30 = vpop.f32.mrf.mxu3  ;;  %v2581_v54 = vpop.f32.mrf.mxu2 }
 0x1ae   :  { %7575 = vst [vmem:[#allocation50_spill] sm:$0xff] %v5611_v30  ;;  %v1838_v25 = vpop.f32.mrf.mxu0  ;;  %v4567_v30 = vld [vmem:[%s7412_s0 + $0x298] sm:$0xf0] }
 0x1af   :  { %v2207_v53 = vpop.f32.mrf.mxu1  ;;  %v3811_v24 = vor.u32 %v4567_v30, %v3810_v4  ;;  %v3792_v4 = vld [vmem:[%s7412_s0 + $0x27c] sm:$0xf0] }
 0x1b0   :  { %v2208_v41 = vadd.f32 %v2207_v53, %v1838_v25  ;;  %v4562_v25 = vld [vmem:[%s7412_s0 + $0x274] sm:$0xf]  ;;  %v4224_v30 = vld [vmem:[%s7412_s0 + $0x5dc] sm:$0xf0] }
 0x1b1   :  { %1877 = vmatmul.bf16.gmra.mxu0 %v3779_v1  ;;  %v4563_v1 = vld [vmem:[%s7412_s0 + $0x278] sm:$0xf0] }
 0x1b2   :  { %v5613_v32 = vadd.f32 %v2576_v14, %v2208_v41  ;;  %2246 = vmatmul.bf16.gmra.mxu1 %v3783_v34  ;;  %2426 = vmatmul.bf16.gmra.mxu3 %v4215_v47  ;;  %v3790_v14 = vld [vmem:[%s7412_s0 + $0x270] sm:$0xf] }
 0x1b3   :  { %v3791_v53 = vor.u32 %v4563_v1, %v3790_v14 }
 0x1b4   :  { %7576 = vst [vmem:[#allocation51_spill] sm:$0xff] %v5613_v32 }
 0x1b5   :  { %v5621_v49 = vpop.f32.mrf.mxu3  ;;  %v2583_v60 = vpop.f32.mrf.mxu2 }
 0x1b6   :  { %7577 = vst [vmem:[#allocation52_spill] sm:$0xff] %v5621_v49  ;;  %v1840_v23 = vpop.f32.mrf.mxu0 }
 0x1b7   :  { %v2209_v56 = vpop.f32.mrf.mxu1 }
 0x1b8   :  { %v2210_v33 = vadd.f32 %v2209_v56, %v1840_v23  ;;  %v3795_v23 = vor.u32 %v4562_v25, %v3792_v4 }
 0x1ba   :  { %v5623_v12 = vadd.f32 %v2578_v29, %v2210_v33  ;;  %4439 = vmatmul.msk.bf16.gmra.mxu2 %vm1527_vm0, %v3811_v24  ;;  %v4670_v29 = vld [vmem:[%s7412_s0 + $0x5d4] sm:$0xf] }
 0x1bb   :  { %v4227_v24 = vor.u32 %v4670_v29, %v4224_v30 }
 0x1bc   :  { %7578 = vst [vmem:[#allocation53_spill] sm:$0xff] %v5623_v12 }
 0x1bd   :  { %v5644_v34 = vpop.f32.mrf.mxu3  ;;  %v2586_v47 = vpop.f32.mrf.mxu2 }
 0x1be   :  { %7579 = vst [vmem:[#allocation54_spill] sm:$0xff] %v5644_v34  ;;  %v1843_v41 = vpop.f32.mrf.mxu0  ;;  %v4570_v34 = vld [vmem:[%s7412_s0 + $0x2b0] sm:$0xf0] }
 0x1bf   :  { %v2212_v56 = vpop.f32.mrf.mxu1  ;;  %v3823_v29 = vor.u32 %v4570_v34, %v3822_v27  ;;  %v3804_v27 = vld [vmem:[%s7412_s0 + $0x294] sm:$0xf0] }
 0x1c0   :  { %v2213_v33 = vadd.f32 %v2212_v56, %v1843_v41  ;;  %v4565_v56 = vld [vmem:[%s7412_s0 + $0x28c] sm:$0xf]  ;;  %v4236_v34 = vld [vmem:[%s7412_s0 + $0x5f4] sm:$0xf0] }
 0x1c1   :  { %1882 = vmatmul.bf16.gmra.mxu0 %v3791_v53  ;;  %v3807_v14 = vor.u32 %v4565_v56, %v3804_v27  ;;  %v3814_v27 = vld [vmem:[%s7412_s0 + $0x2a0] sm:$0xf] }
 0x1c2   :  { %v5646_v49 = vadd.f32 %v2581_v54, %v2213_v33  ;;  %2251 = vmatmul.bf16.gmra.mxu1 %v3795_v23  ;;  %2431 = vmatmul.bf16.gmra.mxu3 %v4227_v24  ;;  %v3802_v23 = vld [vmem:[%s7412_s0 + $0x288] sm:$0xf]  ;;  %v4566_v24 = vld [vmem:[%s7412_s0 + $0x290] sm:$0xf0]  ;;  %v3834_v33 = vld [vmem:[%s7412_s0 + $0x2c0] sm:$0xf] }
 0x1c4   :  { %7580 = vst [vmem:[#allocation55_spill] sm:$0xff] %v5646_v49 }
 0x1c5   :  { %v5658_v25 = vpop.f32.mrf.mxu3  ;;  %v2588_v54 = vpop.f32.mrf.mxu2 }
 0x1c6   :  { %7581 = vst [vmem:[#allocation56_spill] sm:$0xff] %v5658_v25  ;;  %v1845_v4 = vpop.f32.mrf.mxu0 }
 0x1c7   :  { %v2214_v30 = vpop.f32.mrf.mxu1 }
 0x1c8   :  { %v2215_v53 = vadd.f32 %v2214_v30, %v1845_v4  ;;  %v4573_v4 = vld [vmem:[%s7412_s0 + $0x2c8] sm:$0xf0] }
 0x1ca   :  { %v5660_v41 = vadd.f32 %v2583_v60, %v2215_v53  ;;  %4440 = vmatmul.msk.bf16.gmra.mxu2 %vm1527_vm0, %v3823_v29  ;;  %v4673_v60 = vld [vmem:[%s7412_s0 + $0x5ec] sm:$0xf]  ;;  %v3803_v53 = vor.u32 %v4566_v24, %v3802_v23 }
 0x1cb   :  { %v4239_v49 = vor.u32 %v4673_v60, %v4236_v34  ;;  %v4569_v60 = vld [vmem:[%s7412_s0 + $0x2a8] sm:$0xf0]  ;;  %v4568_v34 = vld [vmem:[%s7412_s0 + $0x2a4] sm:$0xf] }
 0x1cc   :  { %7582 = vst [vmem:[#allocation57_spill] sm:$0xff] %v5660_v41 }
 0x1cd   :  { %v5685_v29 = vpop.f32.mrf.mxu3  ;;  %v2591_v30 = vpop.f32.mrf.mxu2 }
 0x1ce   :  { %7583 = vst [vmem:[#allocation58_spill] sm:$0xff] %v5685_v29  ;;  %v1848_v1 = vpop.f32.mrf.mxu0 }
 0x1cf   :  { %v2217_v7 = vpop.f32.mrf.mxu1 }
 0x1d0   :  { %v2218_v25 = vadd.f32 %v2217_v7, %v1848_v1 }
 0x1d1   :  { %1887 = vmatmul.bf16.gmra.mxu0 %v3803_v53  ;;  %v3846_v53 = vld [vmem:[%s7412_s0 + $0x2d8] sm:$0xf] }
 0x1d2   :  { %v5687_v6 = vadd.f32 %v2586_v47, %v2218_v25  ;;  %2256 = vmatmul.bf16.gmra.mxu1 %v3807_v14  ;;  %2436 = vmatmul.bf16.gmra.mxu3 %v4239_v49  ;;  %v3835_v14 = vor.u32 %v4573_v4, %v3834_v33  ;;  %v3816_v33 = vld [vmem:[%s7412_s0 + $0x2ac] sm:$0xf0] }
 0x1d3   :  { %v4248_v4 = vld [vmem:[%s7412_s0 + $0x60c] sm:$0xf0]  ;;  %v3819_v23 = vor.u32 %v4568_v34, %v3816_v33  ;;  %v3826_v33 = vld [vmem:[%s7412_s0 + $0x2b8] sm:$0xf] }
 0x1d4   :  { %7584 = vst [vmem:[#allocation59_spill] sm:$0xff] %v5687_v6 }
 0x1d5   :  { %v5699_v7 = vpop.f32.mrf.mxu3  ;;  %v2593_v47 = vpop.f32.mrf.mxu2 }
 0x1d6   :  { %7585 = vst [vmem:[#allocation60_spill] sm:$0xff] %v5699_v7  ;;  %v1850_v1 = vpop.f32.mrf.mxu0 }
 0x1d7   :  { %v2219_v49 = vpop.f32.mrf.mxu1 }
 0x1d8   :  { %v2220_v25 = vadd.f32 %v2219_v49, %v1850_v1  ;;  %v4576_v1 = vld [vmem:[%s7412_s0 + $0x2e0] sm:$0xf0] }
 0x1da   :  { %v5701_v56 = vadd.f32 %v2588_v54, %v2220_v25  ;;  %4441 = vmatmul.msk.bf16.gmra.mxu2 %vm1527_vm0, %v3835_v14  ;;  %v4676_v54 = vld [vmem:[%s7412_s0 + $0x604] sm:$0xf]  ;;  %v3815_v25 = vor.u32 %v4569_v60, %v3814_v27 }
 0x1db   :  { %v4251_v6 = vor.u32 %v4676_v54, %v4248_v4  ;;  %v4572_v54 = vld [vmem:[%s7412_s0 + $0x2c0] sm:$0xf0]  ;;  %v4571_v4 = vld [vmem:[%s7412_s0 + $0x2bc] sm:$0xf] }
 0x1dc   :  { %7586 = vst [vmem:[#allocation61_spill] sm:$0xff] %v5701_v56 }
 0x1dd   :  { %v5726_v14 = vpop.f32.mrf.mxu3  ;;  %v2596_v49 = vpop.f32.mrf.mxu2 }
 0x1de   :  { %7587 = vst [vmem:[#allocation62_spill] sm:$0xff] %v5726_v14  ;;  %v1853_v24 = vpop.f32.mrf.mxu0 }
 0x1df   :  { %v2222_v31 = vpop.f32.mrf.mxu1 }
 0x1e0   :  { %v2223_v7 = vadd.f32 %v2222_v31, %v1853_v24 }
 0x1e1   :  { %1892 = vmatmul.bf16.gmra.mxu0 %v3815_v25  ;;  %v3858_v25 = vld [vmem:[%s7412_s0 + $0x2f0] sm:$0xf] }
 0x1e2   :  { %v5728_v41 = vadd.f32 %v2591_v30, %v2223_v7  ;;  %2261 = vmatmul.bf16.gmra.mxu1 %v3819_v23  ;;  %2441 = vmatmul.bf16.gmra.mxu3 %v4251_v6  ;;  %v3847_v23 = vor.u32 %v4576_v1, %v3846_v53  ;;  %v3828_v53 = vld [vmem:[%s7412_s0 + $0x2c4] sm:$0xf0] }
 0x1e3   :  { %v4260_v1 = vld [vmem:[%s7412_s0 + $0x624] sm:$0xf0]  ;;  %v3831_v27 = vor.u32 %v4571_v4, %v3828_v53  ;;  %v3838_v53 = vld [vmem:[%s7412_s0 + $0x2d0] sm:$0xf] }
 0x1e5   :  { %v5740_v31 = vpop.f32.mrf.mxu3  ;;  %v2598_v30 = vpop.f32.mrf.mxu2 }
 0x1e6   :  { %v1855_v24 = vpop.f32.mrf.mxu0 }
 0x1e7   :  { %v2224_v6 = vpop.f32.mrf.mxu1 }
 0x1e8   :  { %v2225_v7 = vadd.f32 %v2224_v6, %v1855_v24  ;;  %v4579_v24 = vld [vmem:[%s7412_s0 + $0x2f8] sm:$0xf0] }
 0x1ea   :  { %v5742_v34 = vadd.f32 %v2593_v47, %v2225_v7  ;;  %4442 = vmatmul.msk.bf16.gmra.mxu2 %vm1527_vm0, %v3847_v23  ;;  %v4679_v47 = vld [vmem:[%s7412_s0 + $0x61c] sm:$0xf]  ;;  %v3827_v7 = vor.u32 %v4572_v54, %v3826_v33 }
 0x1eb   :  { %v4263_v56 = vor.u32 %v4679_v47, %v4260_v1  ;;  %v4575_v47 = vld [vmem:[%s7412_s0 + $0x2d8] sm:$0xf0]  ;;  %v4574_v1 = vld [vmem:[%s7412_s0 + $0x2d4] sm:$0xf] }
 0x1ec   :  { %v7642_v62 = vmax.f32 %v5128_v0, %v5742_v34 }
 0x1ed   :  { %v5767_v23 = vpop.f32.mrf.mxu3  ;;  %v2601_v6 = vpop.f32.mrf.mxu2 }
 0x1ee   :  { %v1858_v60 = vpop.f32.mrf.mxu0 }
 0x1ef   :  { %v2227_v40 = vpop.f32.mrf.mxu1 }
 0x1f0   :  { %v2228_v14 = vadd.f32 %v2227_v40, %v1858_v60 }
 0x1f1   :  { %1897 = vmatmul.bf16.gmra.mxu0 %v3827_v7  ;;  %v3870_v7 = vld [vmem:[%s7412_s0 + $0x308] sm:$0xf] }
 0x1f2   :  { %v5769_v16 = vadd.f32 %v2596_v49, %v2228_v14  ;;  %2266 = vmatmul.bf16.gmra.mxu1 %v3831_v27  ;;  %2446 = vmatmul.bf16.gmra.mxu3 %v4263_v56  ;;  %v3859_v27 = vor.u32 %v4579_v24, %v3858_v25  ;;  %v3840_v25 = vld [vmem:[%s7412_s0 + $0x2dc] sm:$0xf0] }
 0x1f3   :  { %v4272_v24 = vld [vmem:[%s7412_s0 + $0x63c] sm:$0xf0]  ;;  %v3843_v33 = vor.u32 %v4574_v1, %v3840_v25  ;;  %v3850_v25 = vld [vmem:[%s7412_s0 + $0x2e8] sm:$0xf] }
 0x1f5   :  { %v5781_v40 = vpop.f32.mrf.mxu3  ;;  %v2603_v14 = vpop.f32.mrf.mxu2 }
 0x1f6   :  { %v1860_v49 = vpop.f32.mrf.mxu0 }
 0x1f7   :  { %v2229_v56 = vpop.f32.mrf.mxu1 }
 0x1f8   :  { %v2230_v60 = vadd.f32 %v2229_v56, %v1860_v49  ;;  %v4582_v49 = vld [vmem:[%s7412_s0 + $0x310] sm:$0xf0] }
 0x1fa   :  { %v5783_v4 = vadd.f32 %v2598_v30, %v2230_v60  ;;  %4443 = vmatmul.msk.bf16.gmra.mxu2 %vm1527_vm0, %v3859_v27  ;;  %v4682_v30 = vld [vmem:[%s7412_s0 + $0x634] sm:$0xf]  ;;  %v3839_v60 = vor.u32 %v4575_v47, %v3838_v53 }
 0x1fb   :  { %v4275_v29 = vor.u32 %v4682_v30, %v4272_v24  ;;  %v4578_v30 = vld [vmem:[%s7412_s0 + $0x2f0] sm:$0xf0]  ;;  %v4577_v24 = vld [vmem:[%s7412_s0 + $0x2ec] sm:$0xf] }
 0x1fd   :  { %v5808_v27 = vpop.f32.mrf.mxu3  ;;  %v2606_v56 = vpop.f32.mrf.mxu2 }
 0x1fe   :  { %v1863_v54 = vpop.f32.mrf.mxu0 }
 0x1ff   :  { %v2232_v52 = vpop.f32.mrf.mxu1 }
 0x200   :  { %v2233_v36 = vadd.f32 %v2232_v52, %v1863_v54 }
 0x201   :  { %1902 = vmatmul.bf16.gmra.mxu0 %v3839_v60  ;;  %v3882_v60 = vld [vmem:[%s7412_s0 + $0x320] sm:$0xf] }
 0x202   :  { %v5810_v17 = vadd.f32 %v2601_v6, %v2233_v36  ;;  %2271 = vmatmul.bf16.gmra.mxu1 %v3843_v33  ;;  %2451 = vmatmul.bf16.gmra.mxu3 %v4275_v29  ;;  %v3871_v33 = vor.u32 %v4582_v49, %v3870_v7  ;;  %v3852_v7 = vld [vmem:[%s7412_s0 + $0x2f4] sm:$0xf0] }
 0x203   :  { %v4284_v49 = vld [vmem:[%s7412_s0 + $0x654] sm:$0xf0]  ;;  %v3855_v53 = vor.u32 %v4577_v24, %v3852_v7  ;;  %v3862_v7 = vld [vmem:[%s7412_s0 + $0x300] sm:$0xf] }
 0x204   :  { %7588 = vst [vmem:[#allocation63_spill] sm:$0xff] %v5810_v17 }
 0x205   :  { %v5822_v52 = vpop.f32.mrf.mxu3  ;;  %v2608_v36 = vpop.f32.mrf.mxu2 }
 0x206   :  { %7589 = vst [vmem:[#allocation64_spill] sm:$0xff] %v5822_v52  ;;  %v1865_v6 = vpop.f32.mrf.mxu0 }
 0x207   :  { %v2234_v29 = vpop.f32.mrf.mxu1 }
 0x208   :  { %v2235_v54 = vadd.f32 %v2234_v29, %v1865_v6  ;;  %v4585_v6 = vld [vmem:[%s7412_s0 + $0x328] sm:$0xf0] }
 0x20a   :  { %v5824_v1 = vadd.f32 %v2603_v14, %v2235_v54  ;;  %4444 = vmatmul.msk.bf16.gmra.mxu2 %vm1527_vm0, %v3871_v33  ;;  %v4685_v14 = vld [vmem:[%s7412_s0 + $0x64c] sm:$0xf]  ;;  %v3851_v54 = vor.u32 %v4578_v30, %v3850_v25 }
 0x20b   :  { %v4287_v2 = vor.u32 %v4685_v14, %v4284_v49  ;;  %v4581_v14 = vld [vmem:[%s7412_s0 + $0x308] sm:$0xf0]  ;;  %v4580_v49 = vld [vmem:[%s7412_s0 + $0x304] sm:$0xf] }
 0x20c   :  { %7590 = vst [vmem:[#allocation65_spill] sm:$0xff] %v5824_v1 }
 0x20d   :  { %v5849_v33 = vpop.f32.mrf.mxu3  ;;  %v2611_v29 = vpop.f32.mrf.mxu2 }
 0x20e   :  { %v1868_v47 = vpop.f32.mrf.mxu0 }
 0x20f   :  { %v2237_v17 = vpop.f32.mrf.mxu1 }
 0x210   :  { %v2238_v46 = vadd.f32 %v2237_v17, %v1868_v47 }
 0x211   :  { %1907 = vmatmul.bf16.gmra.mxu0 %v3851_v54  ;;  %v3894_v54 = vld [vmem:[%s7412_s0 + $0x338] sm:$0xf] }
 0x212   :  { %v5851_v52 = vadd.f32 %v2606_v56, %v2238_v46  ;;  %2276 = vmatmul.bf16.gmra.mxu1 %v3855_v53  ;;  %2456 = vmatmul.bf16.gmra.mxu3 %v4287_v2  ;;  %v3883_v53 = vor.u32 %v4585_v6, %v3882_v60  ;;  %v3864_v60 = vld [vmem:[%s7412_s0 + $0x30c] sm:$0xf0] }
 0x213   :  { %v4296_v6 = vld [vmem:[%s7412_s0 + $0x66c] sm:$0xf0]  ;;  %v3867_v25 = vor.u32 %v4580_v49, %v3864_v60  ;;  %v3874_v60 = vld [vmem:[%s7412_s0 + $0x318] sm:$0xf] }
 0x214   :  { %7591 = vst [vmem:[#allocation66_spill] sm:$0xff] %v5851_v52 }
 0x215   :  { %v5863_v17 = vpop.f32.mrf.mxu3  ;;  %v2613_v46 = vpop.f32.mrf.mxu2 }
 0x216   :  { %7592 = vst [vmem:[#allocation67_spill] sm:$0xff] %v5863_v17  ;;  %v1870_v56 = vpop.f32.mrf.mxu0 }
 0x217   :  { %v2239_v2 = vpop.f32.mrf.mxu1 }
 0x218   :  { %v2240_v47 = vadd.f32 %v2239_v2, %v1870_v56  ;;  %v4588_v56 = vld [vmem:[%s7412_s0 + $0x340] sm:$0xf0] }
 0x21a   :  { %v5865_v24 = vadd.f32 %v2608_v36, %v2240_v47  ;;  %4445 = vmatmul.msk.bf16.gmra.mxu2 %vm1527_vm0, %v3883_v53  ;;  %v4688_v36 = vld [vmem:[%s7412_s0 + $0x664] sm:$0xf]  ;;  %v3863_v47 = vor.u32 %v4581_v14, %v3862_v7 }
 0x21b   :  { %v4299_v52 = vor.u32 %v4688_v36, %v4296_v6  ;;  %v4584_v36 = vld [vmem:[%s7412_s0 + $0x320] sm:$0xf0]  ;;  %v4583_v6 = vld [vmem:[%s7412_s0 + $0x31c] sm:$0xf] }
 0x21c   :  { %7593 = vst [vmem:[#allocation68_spill] sm:$0xff] %v5865_v24 }
 0x21d   :  { %v5890_v53 = vpop.f32.mrf.mxu3  ;;  %v2616_v2 = vpop.f32.mrf.mxu2 }
 0x21e   :  { %v1873_v30 = vpop.f32.mrf.mxu0 }
 0x21f   :  { %v2242_v13 = vpop.f32.mrf.mxu1 }
 0x220   :  { %v2243_v17 = vadd.f32 %v2242_v13, %v1873_v30 }
 0x221   :  { %1912 = vmatmul.bf16.gmra.mxu0 %v3863_v47  ;;  %v3906_v47 = vld [vmem:[%s7412_s0 + $0x350] sm:$0xf] }
 0x222   :  { %v5892_v1 = vadd.f32 %v2611_v29, %v2243_v17  ;;  %2281 = vmatmul.bf16.gmra.mxu1 %v3867_v25  ;;  %2461 = vmatmul.bf16.gmra.mxu3 %v4299_v52  ;;  %v3895_v25 = vor.u32 %v4588_v56, %v3894_v54  ;;  %v3876_v54 = vld [vmem:[%s7412_s0 + $0x324] sm:$0xf0] }
 0x223   :  { %v4308_v56 = vld [vmem:[%s7412_s0 + $0x684] sm:$0xf0]  ;;  %v3879_v7 = vor.u32 %v4583_v6, %v3876_v54  ;;  %v3886_v54 = vld [vmem:[%s7412_s0 + $0x330] sm:$0xf] }
 0x224   :  { %7594 = vst [vmem:[#allocation69_spill] sm:$0xff] %v5892_v1 }
 0x225   :  { %v5904_v13 = vpop.f32.mrf.mxu3  ;;  %v2618_v29 = vpop.f32.mrf.mxu2 }
 0x226   :  { %7595 = vst [vmem:[#allocation70_spill] sm:$0xff] %v5904_v13  ;;  %v1875_v30 = vpop.f32.mrf.mxu0 }
 0x227   :  { %v2244_v52 = vpop.f32.mrf.mxu1 }
 0x228   :  { %v2245_v17 = vadd.f32 %v2244_v52, %v1875_v30  ;;  %v4591_v30 = vld [vmem:[%s7412_s0 + $0x358] sm:$0xf0] }
 0x22a   :  { %v5906_v49 = vadd.f32 %v2613_v46, %v2245_v17  ;;  %4446 = vmatmul.msk.bf16.gmra.mxu2 %vm1527_vm0, %v3895_v25  ;;  %v4691_v46 = vld [vmem:[%s7412_s0 + $0x67c] sm:$0xf]  ;;  %v3875_v17 = vor.u32 %v4584_v36, %v3874_v60 }
 0x22b   :  { %v4311_v1 = vor.u32 %v4691_v46, %v4308_v56  ;;  %v4587_v46 = vld [vmem:[%s7412_s0 + $0x338] sm:$0xf0]  ;;  %v4586_v56 = vld [vmem:[%s7412_s0 + $0x334] sm:$0xf] }
 0x22c   :  { %7596 = vst [vmem:[#allocation71_spill] sm:$0xff] %v5906_v49 }
 0x22d   :  { %v5931_v25 = vpop.f32.mrf.mxu3  ;;  %v2621_v52 = vpop.f32.mrf.mxu2 }
 0x22e   :  { %v1878_v14 = vpop.f32.mrf.mxu0 }
 0x22f   :  { %v2247_v48 = vpop.f32.mrf.mxu1 }
 0x230   :  { %v2248_v13 = vadd.f32 %v2247_v48, %v1878_v14 }
 0x231   :  { %1917 = vmatmul.bf16.gmra.mxu0 %v3875_v17  ;;  %v3918_v17 = vld [vmem:[%s7412_s0 + $0x368] sm:$0xf] }
 0x232   :  { %v5933_v24 = vadd.f32 %v2616_v2, %v2248_v13  ;;  %2286 = vmatmul.bf16.gmra.mxu1 %v3879_v7  ;;  %2466 = vmatmul.bf16.gmra.mxu3 %v4311_v1  ;;  %v3907_v7 = vor.u32 %v4591_v30, %v3906_v47  ;;  %v3888_v47 = vld [vmem:[%s7412_s0 + $0x33c] sm:$0xf0] }
 0x233   :  { %v4320_v30 = vld [vmem:[%s7412_s0 + $0x69c] sm:$0xf0]  ;;  %v3891_v60 = vor.u32 %v4586_v56, %v3888_v47  ;;  %v3898_v47 = vld [vmem:[%s7412_s0 + $0x348] sm:$0xf] }
 0x234   :  { %7597 = vst [vmem:[#allocation72_spill] sm:$0xff] %v5933_v24 }
 0x235   :  { %v5945_v48 = vpop.f32.mrf.mxu3  ;;  %v2623_v2 = vpop.f32.mrf.mxu2 }
 0x236   :  { %7598 = vst [vmem:[#allocation73_spill] sm:$0xff] %v5945_v48  ;;  %v1880_v14 = vpop.f32.mrf.mxu0 }
 0x237   :  { %v2249_v1 = vpop.f32.mrf.mxu1 }
 0x238   :  { %v2250_v13 = vadd.f32 %v2249_v1, %v1880_v14  ;;  %v4594_v14 = vld [vmem:[%s7412_s0 + $0x370] sm:$0xf0] }
 0x23a   :  { %v5947_v6 = vadd.f32 %v2618_v29, %v2250_v13  ;;  %4447 = vmatmul.msk.bf16.gmra.mxu2 %vm1527_vm0, %v3907_v7  ;;  %v4694_v29 = vld [vmem:[%s7412_s0 + $0x694] sm:$0xf]  ;;  %v3887_v13 = vor.u32 %v4587_v46, %v3886_v54 }
 0x23b   :  { %v4323_v24 = vor.u32 %v4694_v29, %v4320_v30  ;;  %v4590_v29 = vld [vmem:[%s7412_s0 + $0x350] sm:$0xf0]  ;;  %v4589_v30 = vld [vmem:[%s7412_s0 + $0x34c] sm:$0xf] }
 0x23c   :  { %7599 = vst [vmem:[#allocation74_spill] sm:$0xff] %v5947_v6 }
 0x23d   :  { %v5972_v7 = vpop.f32.mrf.mxu3  ;;  %v2626_v1 = vpop.f32.mrf.mxu2 }
 0x23e   :  { %v1883_v36 = vpop.f32.mrf.mxu0 }
 0x23f   :  { %v2252_v22 = vpop.f32.mrf.mxu1 }
 0x240   :  { %v2253_v48 = vadd.f32 %v2252_v22, %v1883_v36 }
 0x241   :  { %1922 = vmatmul.bf16.gmra.mxu0 %v3887_v13  ;;  %v3930_v13 = vld [vmem:[%s7412_s0 + $0x380] sm:$0xf] }
 0x242   :  { %v5974_v49 = vadd.f32 %v2621_v52, %v2253_v48  ;;  %2291 = vmatmul.bf16.gmra.mxu1 %v3891_v60  ;;  %2471 = vmatmul.bf16.gmra.mxu3 %v4323_v24  ;;  %v3919_v60 = vor.u32 %v4594_v14, %v3918_v17  ;;  %v3900_v17 = vld [vmem:[%s7412_s0 + $0x354] sm:$0xf0] }
 0x243   :  { %v4332_v14 = vld [vmem:[%s7412_s0 + $0x6b4] sm:$0xf0]  ;;  %v3903_v54 = vor.u32 %v4589_v30, %v3900_v17  ;;  %v3910_v17 = vld [vmem:[%s7412_s0 + $0x360] sm:$0xf] }
 0x244   :  { %7600 = vst [vmem:[#allocation75_spill] sm:$0xff] %v5974_v49 }
 0x245   :  { %v5986_v22 = vpop.f32.mrf.mxu3  ;;  %v2628_v52 = vpop.f32.mrf.mxu2 }
 0x246   :  { %7601 = vst [vmem:[#allocation76_spill] sm:$0xff] %v5986_v22  ;;  %v1885_v36 = vpop.f32.mrf.mxu0 }
 0x247   :  { %v2254_v24 = vpop.f32.mrf.mxu1 }
 0x248   :  { %v2255_v48 = vadd.f32 %v2254_v24, %v1885_v36  ;;  %v4597_v36 = vld [vmem:[%s7412_s0 + $0x388] sm:$0xf0] }
 0x24a   :  { %v5988_v56 = vadd.f32 %v2623_v2, %v2255_v48  ;;  %4448 = vmatmul.msk.bf16.gmra.mxu2 %vm1527_vm0, %v3919_v60  ;;  %v4697_v2 = vld [vmem:[%s7412_s0 + $0x6ac] sm:$0xf]  ;;  %v3899_v48 = vor.u32 %v4590_v29, %v3898_v47 }
 0x24b   :  { %v4335_v49 = vor.u32 %v4697_v2, %v4332_v14  ;;  %v4593_v2 = vld [vmem:[%s7412_s0 + $0x368] sm:$0xf0]  ;;  %v4592_v14 = vld [vmem:[%s7412_s0 + $0x364] sm:$0xf] }
 0x24c   :  { %7602 = vst [vmem:[#allocation77_spill] sm:$0xff] %v5988_v56 }
 0x24d   :  { %v6013_v60 = vpop.f32.mrf.mxu3  ;;  %v2631_v24 = vpop.f32.mrf.mxu2 }
 0x24e   :  { %v1888_v46 = vpop.f32.mrf.mxu0 }
 0x24f   :  { %v2257_v63 = vpop.f32.mrf.mxu1 }
 0x250   :  { %v2258_v22 = vadd.f32 %v2257_v63, %v1888_v46 }
 0x251   :  { %1927 = vmatmul.bf16.gmra.mxu0 %v3899_v48  ;;  %v3942_v48 = vld [vmem:[%s7412_s0 + $0x398] sm:$0xf] }
 0x252   :  { %v6015_v6 = vadd.f32 %v2626_v1, %v2258_v22  ;;  %2296 = vmatmul.bf16.gmra.mxu1 %v3903_v54  ;;  %2476 = vmatmul.bf16.gmra.mxu3 %v4335_v49  ;;  %v3931_v54 = vor.u32 %v4597_v36, %v3930_v13  ;;  %v3912_v13 = vld [vmem:[%s7412_s0 + $0x36c] sm:$0xf0]  ;;  %v4654_v36 = vld [vmem:[%s7412_s0 + $0x550] sm:$0xf0] }
 0x253   :  { %v3915_v47 = vor.u32 %v4592_v14, %v3912_v13  ;;  %v3922_v13 = vld [vmem:[%s7412_s0 + $0x378] sm:$0xf] }
 0x254   :  { %7603 = vst [vmem:[#allocation78_spill] sm:$0xff] %v6015_v6 }
 0x255   :  { %v6027_v63 = vpop.f32.mrf.mxu3  ;;  %v2633_v1 = vpop.f32.mrf.mxu2 }
 0x256   :  { %7604 = vst [vmem:[#allocation79_spill] sm:$0xff] %v6027_v63  ;;  %v1890_v46 = vpop.f32.mrf.mxu0 }
 0x257   :  { %v2259_v49 = vpop.f32.mrf.mxu1 }
 0x258   :  { %v2260_v22 = vadd.f32 %v2259_v49, %v1890_v46  ;;  %v4600_v46 = vld [vmem:[%s7412_s0 + $0x3a0] sm:$0xf0] }
 0x25a   :  { %v6029_v30 = vadd.f32 %v2628_v52, %v2260_v22  ;;  %4449 = vmatmul.msk.bf16.gmra.mxu2 %vm1527_vm0, %v3931_v54  ;;  %v4158_v52 = vld [vmem:[%s7412_s0 + $0x548] sm:$0xf]  ;;  %v3911_v22 = vor.u32 %v4593_v2, %v3910_v17 }
 0x25b   :  { %v4159_v6 = vor.u32 %v4654_v36, %v4158_v52  ;;  %v4596_v52 = vld [vmem:[%s7412_s0 + $0x380] sm:$0xf0]  ;;  %v4595_v36 = vld [vmem:[%s7412_s0 + $0x37c] sm:$0xf] }
 0x25c   :  { %7605 = vst [vmem:[#allocation80_spill] sm:$0xff] %v6029_v30 }
 0x25d   :  { %v6054_v54 = vpop.f32.mrf.mxu3  ;;  %v2636_v49 = vpop.f32.mrf.mxu2 }
 0x25e   :  { %v1893_v29 = vpop.f32.mrf.mxu0 }
 0x25f   :  { %v2262_v45 = vpop.f32.mrf.mxu1 }
 0x260   :  { %v2263_v63 = vadd.f32 %v2262_v45, %v1893_v29 }
 0x261   :  { %1932 = vmatmul.bf16.gmra.mxu0 %v3911_v22  ;;  %v3954_v22 = vld [vmem:[%s7412_s0 + $0x3b0] sm:$0xf] }
 0x262   :  { %v6056_v56 = vadd.f32 %v2631_v24, %v2263_v63  ;;  %2301 = vmatmul.bf16.gmra.mxu1 %v3915_v47  ;;  %4468 = vmatmul.msk.bf16.vlgmr.msra.gmra.mxu3 %vm1527_vm0, %v4159_v6  ;;  %v3943_v63 = vor.u32 %v4600_v46, %v3942_v48  ;;  %v3924_v48 = vld [vmem:[%s7412_s0 + $0x384] sm:$0xf0]  ;;  %v4657_v46 = vld [vmem:[%s7412_s0 + $0x568] sm:$0xf0] }
 0x263   :  { %v3927_v17 = vor.u32 %v4595_v36, %v3924_v48  ;;  %v3934_v48 = vld [vmem:[%s7412_s0 + $0x390] sm:$0xf] }
 0x264   :  { %7606 = vst [vmem:[#allocation81_spill] sm:$0xff] %v6056_v56 }
 0x265   :  { %v6069_v29 = vpop.f32.mrf.mxu3  ;;  %v2638_v24 = vpop.f32.mrf.mxu2 }
 0x266   :  { %7607 = vst [vmem:[#allocation82_spill] sm:$0xff] %v6069_v29  ;;  %v1895_v47 = vpop.f32.mrf.mxu0 }
 0x267   :  { %v2264_v6 = vpop.f32.mrf.mxu1 }
 0x268   :  { %v2265_v2 = vadd.f32 %v2264_v6, %v1895_v47  ;;  %v4603_v47 = vld [vmem:[%s7412_s0 + $0x3b8] sm:$0xf0] }
 0x26a   :  { %v6071_v14 = vadd.f32 %v2633_v1, %v2265_v2  ;;  %4450 = vmatmul.msk.bf16.gmra.mxu2 %vm1527_vm0, %v3943_v63  ;;  %v4170_v1 = vld [vmem:[%s7412_s0 + $0x560] sm:$0xf]  ;;  %v3923_v2 = vor.u32 %v4596_v52, %v3922_v13 }
 0x26b   :  { %v4171_v56 = vor.u32 %v4657_v46, %v4170_v1  ;;  %v4599_v1 = vld [vmem:[%s7412_s0 + $0x398] sm:$0xf0]  ;;  %v4598_v46 = vld [vmem:[%s7412_s0 + $0x394] sm:$0xf] }
 0x26c   :  { %7608 = vst [vmem:[#allocation83_spill] sm:$0xff] %v6071_v14 }
 0x26d   :  { %v6096_v63 = vpop.f32.mrf.mxu3  ;;  %v2641_v6 = vpop.f32.mrf.mxu2 }
 0x26e   :  { %v1898_v45 = vpop.f32.mrf.mxu0 }
 0x26f   :  { %v2267_v42 = vpop.f32.mrf.mxu1 }
 0x270   :  { %v2268_v29 = vadd.f32 %v2267_v42, %v1898_v45 }
 0x271   :  { %1937 = vmatmul.bf16.gmra.mxu0 %v3923_v2  ;;  %v3966_v2 = vld [vmem:[%s7412_s0 + $0x3c8] sm:$0xf] }
 0x272   :  { %v6098_v30 = vadd.f32 %v2636_v49, %v2268_v29  ;;  %2306 = vmatmul.bf16.gmra.mxu1 %v3927_v17  ;;  %4469 = vmatmul.msk.bf16.gmra.mxu3 %vm1527_vm0, %v4171_v56  ;;  %v3955_v29 = vor.u32 %v4603_v47, %v3954_v22  ;;  %v3936_v22 = vld [vmem:[%s7412_s0 + $0x39c] sm:$0xf0]  ;;  %v4660_v47 = vld [vmem:[%s7412_s0 + $0x580] sm:$0xf0] }
 0x273   :  { %v3939_v13 = vor.u32 %v4598_v46, %v3936_v22  ;;  %v3946_v22 = vld [vmem:[%s7412_s0 + $0x3a8] sm:$0xf] }
 0x274   :  { %7609 = vst [vmem:[#allocation84_spill] sm:$0xff] %v6098_v30 }
 0x275   :  { %v6111_v45 = vpop.f32.mrf.mxu3  ;;  %v2643_v49 = vpop.f32.mrf.mxu2 }
 0x276   :  { %7610 = vst [vmem:[#allocation85_spill] sm:$0xff] %v6111_v45  ;;  %v1900_v17 = vpop.f32.mrf.mxu0 }
 0x277   :  { %v2269_v56 = vpop.f32.mrf.mxu1 }
 0x278   :  { %v2270_v52 = vadd.f32 %v2269_v56, %v1900_v17  ;;  %v4606_v17 = vld [vmem:[%s7412_s0 + $0x3d0] sm:$0xf0] }
 0x27a   :  { %v6113_v36 = vadd.f32 %v2638_v24, %v2270_v52  ;;  %4451 = vmatmul.msk.bf16.gmra.mxu2 %vm1527_vm0, %v3955_v29  ;;  %v4182_v24 = vld [vmem:[%s7412_s0 + $0x578] sm:$0xf]  ;;  %v3935_v52 = vor.u32 %v4599_v1, %v3934_v48 }
 0x27b   :  { %v4183_v30 = vor.u32 %v4660_v47, %v4182_v24  ;;  %v4602_v24 = vld [vmem:[%s7412_s0 + $0x3b0] sm:$0xf0]  ;;  %v4601_v47 = vld [vmem:[%s7412_s0 + $0x3ac] sm:$0xf] }
 0x27c   :  { %7611 = vst [vmem:[#allocation86_spill] sm:$0xff] %v6113_v36 }
 0x27d   :  { %v6138_v29 = vpop.f32.mrf.mxu3  ;;  %v2646_v56 = vpop.f32.mrf.mxu2 }
 0x27e   :  { %v1903_v42 = vpop.f32.mrf.mxu0 }
 0x27f   :  { %v2272_v44 = vpop.f32.mrf.mxu1 }
 0x280   :  { %v2273_v45 = vadd.f32 %v2272_v44, %v1903_v42 }
 0x281   :  { %1942 = vmatmul.bf16.gmra.mxu0 %v3935_v52  ;;  %v3978_v52 = vld [vmem:[%s7412_s0 + $0x3e0] sm:$0xf] }
 0x282   :  { %v6140_v14 = vadd.f32 %v2641_v6, %v2273_v45  ;;  %2311 = vmatmul.bf16.gmra.mxu1 %v3939_v13  ;;  %4470 = vmatmul.msk.bf16.gmra.mxu3 %vm1527_vm0, %v4183_v30  ;;  %v3967_v45 = vor.u32 %v4606_v17, %v3966_v2  ;;  %v3948_v2 = vld [vmem:[%s7412_s0 + $0x3b4] sm:$0xf0]  ;;  %v4663_v17 = vld [vmem:[%s7412_s0 + $0x598] sm:$0xf0] }
 0x283   :  { %v3951_v48 = vor.u32 %v4601_v47, %v3948_v2  ;;  %v3958_v2 = vld [vmem:[%s7412_s0 + $0x3c0] sm:$0xf] }
 0x284   :  { %7612 = vst [vmem:[#allocation87_spill] sm:$0xff] %v6140_v14 }
 0x285   :  { %v6153_v42 = vpop.f32.mrf.mxu3  ;;  %v2648_v6 = vpop.f32.mrf.mxu2 }
 0x286   :  { %7613 = vst [vmem:[#allocation88_spill] sm:$0xff] %v6153_v42  ;;  %v1905_v13 = vpop.f32.mrf.mxu0 }
 0x287   :  { %v2274_v30 = vpop.f32.mrf.mxu1 }
 0x288   :  { %v2275_v1 = vadd.f32 %v2274_v30, %v1905_v13  ;;  %v4609_v13 = vld [vmem:[%s7412_s0 + $0x3e8] sm:$0xf0] }
 0x28a   :  { %v6155_v46 = vadd.f32 %v2643_v49, %v2275_v1  ;;  %4452 = vmatmul.msk.bf16.gmra.mxu2 %vm1527_vm0, %v3967_v45  ;;  %v4194_v49 = vld [vmem:[%s7412_s0 + $0x590] sm:$0xf]  ;;  %v3947_v1 = vor.u32 %v4602_v24, %v3946_v22 }
 0x28b   :  { %v4195_v14 = vor.u32 %v4663_v17, %v4194_v49  ;;  %v4605_v49 = vld [vmem:[%s7412_s0 + $0x3c8] sm:$0xf0]  ;;  %v4604_v17 = vld [vmem:[%s7412_s0 + $0x3c4] sm:$0xf] }
 0x28c   :  { %7614 = vst [vmem:[#allocation89_spill] sm:$0xff] %v6155_v46 }
 0x28d   :  { %v6180_v45 = vpop.f32.mrf.mxu3  ;;  %v2651_v30 = vpop.f32.mrf.mxu2 }
 0x28e   :  { %v1908_v44 = vpop.f32.mrf.mxu0 }
 0x28f   :  { %v2277_v15 = vpop.f32.mrf.mxu1 }
 0x290   :  { %v2278_v42 = vadd.f32 %v2277_v15, %v1908_v44 }
 0x291   :  { %1947 = vmatmul.bf16.gmra.mxu0 %v3947_v1  ;;  %v3990_v1 = vld [vmem:[%s7412_s0 + $0x3f8] sm:$0xf] }
 0x292   :  { %v6182_v36 = vadd.f32 %v2646_v56, %v2278_v42  ;;  %2316 = vmatmul.bf16.gmra.mxu1 %v3951_v48  ;;  %4471 = vmatmul.msk.bf16.gmra.mxu3 %vm1527_vm0, %v4195_v14  ;;  %v3979_v42 = vor.u32 %v4609_v13, %v3978_v52  ;;  %v3960_v52 = vld [vmem:[%s7412_s0 + $0x3cc] sm:$0xf0]  ;;  %v4666_v13 = vld [vmem:[%s7412_s0 + $0x5b0] sm:$0xf0] }
 0x293   :  { %v3963_v22 = vor.u32 %v4604_v17, %v3960_v52  ;;  %v3970_v52 = vld [vmem:[%s7412_s0 + $0x3d8] sm:$0xf] }
 0x294   :  { %7615 = vst [vmem:[#allocation90_spill] sm:$0xff] %v6182_v36 }
 0x295   :  { %v6195_v44 = vpop.f32.mrf.mxu3  ;;  %v2653_v56 = vpop.f32.mrf.mxu2 }
 0x296   :  { %7616 = vst [vmem:[#allocation91_spill] sm:$0xff] %v6195_v44  ;;  %v1910_v48 = vpop.f32.mrf.mxu0 }
 0x297   :  { %v2279_v14 = vpop.f32.mrf.mxu1 }
 0x298   :  { %v2280_v24 = vadd.f32 %v2279_v14, %v1910_v48  ;;  %v4612_v48 = vld [vmem:[%s7412_s0 + $0x400] sm:$0xf0] }
 0x29a   :  { %v6197_v47 = vadd.f32 %v2648_v6, %v2280_v24  ;;  %4453 = vmatmul.msk.bf16.gmra.mxu2 %vm1527_vm0, %v3979_v42  ;;  %v4206_v6 = vld [vmem:[%s7412_s0 + $0x5a8] sm:$0xf]  ;;  %v3959_v24 = vor.u32 %v4605_v49, %v3958_v2 }
 0x29b   :  { %v4207_v36 = vor.u32 %v4666_v13, %v4206_v6  ;;  %v4608_v6 = vld [vmem:[%s7412_s0 + $0x3e0] sm:$0xf0]  ;;  %v4607_v13 = vld [vmem:[%s7412_s0 + $0x3dc] sm:$0xf] }
 0x29c   :  { %7617 = vst [vmem:[#allocation92_spill] sm:$0xff] %v6197_v47 }
 0x29d   :  { %v6222_v42 = vpop.f32.mrf.mxu3  ;;  %v2656_v14 = vpop.f32.mrf.mxu2 }
 0x29e   :  { %v1913_v15 = vpop.f32.mrf.mxu0 }
 0x29f   :  { %v2282_v10 = vpop.f32.mrf.mxu1 }
 0x2a0   :  { %v2283_v44 = vadd.f32 %v2282_v10, %v1913_v15 }
 0x2a1   :  { %1952 = vmatmul.bf16.gmra.mxu0 %v3959_v24  ;;  %v4002_v24 = vld [vmem:[%s7412_s0 + $0x410] sm:$0xf] }
 0x2a2   :  { %v6224_v46 = vadd.f32 %v2651_v30, %v2283_v44  ;;  %2321 = vmatmul.bf16.gmra.mxu1 %v3963_v22  ;;  %4472 = vmatmul.msk.bf16.gmra.mxu3 %vm1527_vm0, %v4207_v36  ;;  %v3991_v44 = vor.u32 %v4612_v48, %v3990_v1  ;;  %v3972_v1 = vld [vmem:[%s7412_s0 + $0x3e4] sm:$0xf0]  ;;  %v4669_v48 = vld [vmem:[%s7412_s0 + $0x5c8] sm:$0xf0] }
 0x2a3   :  { %v3975_v2 = vor.u32 %v4607_v13, %v3972_v1  ;;  %v3982_v1 = vld [vmem:[%s7412_s0 + $0x3f0] sm:$0xf] }
 0x2a4   :  { %7618 = vst [vmem:[#allocation93_spill] sm:$0xff] %v6224_v46 }
 0x2a5   :  { %v6237_v15 = vpop.f32.mrf.mxu3  ;;  %v2658_v30 = vpop.f32.mrf.mxu2 }
 0x2a6   :  { %7619 = vst [vmem:[#allocation94_spill] sm:$0xff] %v6237_v15  ;;  %v1915_v22 = vpop.f32.mrf.mxu0 }
 0x2a7   :  { %v2284_v36 = vpop.f32.mrf.mxu1 }
 0x2a8   :  { %v2285_v49 = vadd.f32 %v2284_v36, %v1915_v22  ;;  %v4615_v22 = vld [vmem:[%s7412_s0 + $0x418] sm:$0xf0] }
 0x2aa   :  { %v6239_v17 = vadd.f32 %v2653_v56, %v2285_v49  ;;  %4454 = vmatmul.msk.bf16.gmra.mxu2 %vm1527_vm0, %v3991_v44  ;;  %v4218_v56 = vld [vmem:[%s7412_s0 + $0x5c0] sm:$0xf]  ;;  %v3971_v49 = vor.u32 %v4608_v6, %v3970_v52 }
 0x2ab   :  { %v4219_v46 = vor.u32 %v4669_v48, %v4218_v56  ;;  %v4611_v56 = vld [vmem:[%s7412_s0 + $0x3f8] sm:$0xf0]  ;;  %v4610_v48 = vld [vmem:[%s7412_s0 + $0x3f4] sm:$0xf] }
 0x2ac   :  { %7620 = vst [vmem:[#allocation95_spill] sm:$0xff] %v6239_v17 }
 0x2ad   :  { %v6264_v44 = vpop.f32.mrf.mxu3  ;;  %v2661_v36 = vpop.f32.mrf.mxu2 }
 0x2ae   :  { %7621 = vst [vmem:[#allocation96_spill] sm:$0xff] %v6264_v44  ;;  %v1918_v10 = vpop.f32.mrf.mxu0 }
 0x2af   :  { %v2287_v38 = vpop.f32.mrf.mxu1 }
 0x2b0   :  { %v2288_v15 = vadd.f32 %v2287_v38, %v1918_v10 }
 0x2b1   :  { %1957 = vmatmul.bf16.gmra.mxu0 %v3971_v49  ;;  %v4014_v49 = vld [vmem:[%s7412_s0 + $0x428] sm:$0xf] }
 0x2b2   :  { %v6266_v47 = vadd.f32 %v2656_v14, %v2288_v15  ;;  %2326 = vmatmul.bf16.gmra.mxu1 %v3975_v2  ;;  %4473 = vmatmul.msk.bf16.gmra.mxu3 %vm1527_vm0, %v4219_v46  ;;  %v4003_v15 = vor.u32 %v4615_v22, %v4002_v24  ;;  %v3984_v24 = vld [vmem:[%s7412_s0 + $0x3fc] sm:$0xf0]  ;;  %v4672_v22 = vld [vmem:[%s7412_s0 + $0x5e0] sm:$0xf0] }
 0x2b3   :  { %v3987_v52 = vor.u32 %v4610_v48, %v3984_v24  ;;  %v3994_v24 = vld [vmem:[%s7412_s0 + $0x408] sm:$0xf] }
 0x2b4   :  { %7622 = vst [vmem:[#allocation97_spill] sm:$0xff] %v6266_v47 }
 0x2b5   :  { %v6279_v10 = vpop.f32.mrf.mxu3  ;;  %v2663_v14 = vpop.f32.mrf.mxu2 }
 0x2b6   :  { %7623 = vst [vmem:[#allocation98_spill] sm:$0xff] %v6279_v10  ;;  %v1920_v2 = vpop.f32.mrf.mxu0 }
 0x2b7   :  { %v2289_v46 = vpop.f32.mrf.mxu1 }
 0x2b8   :  { %v2290_v6 = vadd.f32 %v2289_v46, %v1920_v2  ;;  %v4618_v2 = vld [vmem:[%s7412_s0 + $0x430] sm:$0xf0] }
 0x2ba   :  { %v6281_v13 = vadd.f32 %v2658_v30, %v2290_v6  ;;  %4455 = vmatmul.msk.bf16.gmra.mxu2 %vm1527_vm0, %v4003_v15  ;;  %v4230_v30 = vld [vmem:[%s7412_s0 + $0x5d8] sm:$0xf]  ;;  %v3983_v6 = vor.u32 %v4611_v56, %v3982_v1 }
 0x2bb   :  { %v4231_v47 = vor.u32 %v4672_v22, %v4230_v30  ;;  %v4614_v30 = vld [vmem:[%s7412_s0 + $0x410] sm:$0xf0]  ;;  %v4613_v22 = vld [vmem:[%s7412_s0 + $0x40c] sm:$0xf] }
 0x2bc   :  { %7624 = vst [vmem:[#allocation99_spill] sm:$0xff] %v6281_v13 }
 0x2bd   :  { %v6306_v15 = vpop.f32.mrf.mxu3  ;;  %v2666_v46 = vpop.f32.mrf.mxu2 }
 0x2be   :  { %7625 = vst [vmem:[#allocation100_spill] sm:$0xff] %v6306_v15  ;;  %v1923_v38 = vpop.f32.mrf.mxu0 }
 0x2bf   :  { %v2292_v9 = vpop.f32.mrf.mxu1 }
 0x2c0   :  { %v2293_v10 = vadd.f32 %v2292_v9, %v1923_v38 }
 0x2c1   :  { %1962 = vmatmul.bf16.gmra.mxu0 %v3983_v6  ;;  %v4026_v6 = vld [vmem:[%s7412_s0 + $0x440] sm:$0xf] }
 0x2c2   :  { %v6308_v17 = vadd.f32 %v2661_v36, %v2293_v10  ;;  %2331 = vmatmul.bf16.gmra.mxu1 %v3987_v52  ;;  %4474 = vmatmul.msk.bf16.gmra.mxu3 %vm1527_vm0, %v4231_v47  ;;  %v4015_v10 = vor.u32 %v4618_v2, %v4014_v49  ;;  %v3996_v49 = vld [vmem:[%s7412_s0 + $0x414] sm:$0xf0]  ;;  %v4675_v2 = vld [vmem:[%s7412_s0 + $0x5f8] sm:$0xf0] }
 0x2c3   :  { %v3999_v1 = vor.u32 %v4613_v22, %v3996_v49  ;;  %v4006_v49 = vld [vmem:[%s7412_s0 + $0x420] sm:$0xf] }
 0x2c4   :  { %7626 = vst [vmem:[#allocation101_spill] sm:$0xff] %v6308_v17 }
 0x2c5   :  { %v6321_v38 = vpop.f32.mrf.mxu3  ;;  %v2668_v36 = vpop.f32.mrf.mxu2 }
 0x2c6   :  { %7627 = vst [vmem:[#allocation102_spill] sm:$0xff] %v6321_v38  ;;  %v1925_v52 = vpop.f32.mrf.mxu0 }
 0x2c7   :  { %v2294_v47 = vpop.f32.mrf.mxu1 }
 0x2c8   :  { %v2295_v56 = vadd.f32 %v2294_v47, %v1925_v52  ;;  %v4621_v52 = vld [vmem:[%s7412_s0 + $0x448] sm:$0xf0] }
 0x2ca   :  { %v6323_v48 = vadd.f32 %v2663_v14, %v2295_v56  ;;  %4456 = vmatmul.msk.bf16.gmra.mxu2 %vm1527_vm0, %v4015_v10  ;;  %v4242_v14 = vld [vmem:[%s7412_s0 + $0x5f0] sm:$0xf]  ;;  %v3995_v56 = vor.u32 %v4614_v30, %v3994_v24 }
 0x2cb   :  { %v4243_v17 = vor.u32 %v4675_v2, %v4242_v14  ;;  %v4617_v14 = vld [vmem:[%s7412_s0 + $0x428] sm:$0xf0]  ;;  %v4616_v2 = vld [vmem:[%s7412_s0 + $0x424] sm:$0xf] }
 0x2cc   :  { %7628 = vst [vmem:[#allocation103_spill] sm:$0xff] %v6323_v48 }
 0x2cd   :  { %v6348_v10 = vpop.f32.mrf.mxu3  ;;  %v2671_v47 = vpop.f32.mrf.mxu2 }
 0x2ce   :  { %7629 = vst [vmem:[#allocation104_spill] sm:$0xff] %v6348_v10  ;;  %v1928_v9 = vpop.f32.mrf.mxu0 }
 0x2cf   :  { %v2297_v20 = vpop.f32.mrf.mxu1 }
 0x2d0   :  { %v2298_v38 = vadd.f32 %v2297_v20, %v1928_v9 }
 0x2d1   :  { %1967 = vmatmul.bf16.gmra.mxu0 %v3995_v56  ;;  %v4038_v56 = vld [vmem:[%s7412_s0 + $0x458] sm:$0xf] }
 0x2d2   :  { %v6350_v13 = vadd.f32 %v2666_v46, %v2298_v38  ;;  %2336 = vmatmul.bf16.gmra.mxu1 %v3999_v1  ;;  %4475 = vmatmul.msk.bf16.gmra.mxu3 %vm1527_vm0, %v4243_v17  ;;  %v4027_v38 = vor.u32 %v4621_v52, %v4026_v6  ;;  %v4008_v6 = vld [vmem:[%s7412_s0 + $0x42c] sm:$0xf0]  ;;  %v4678_v52 = vld [vmem:[%s7412_s0 + $0x610] sm:$0xf0] }
 0x2d3   :  { %v4011_v24 = vor.u32 %v4616_v2, %v4008_v6 }
 0x2d4   :  { %7630 = vst [vmem:[#allocation105_spill] sm:$0xff] %v6350_v13 }
 0x2d5   :  { %v6363_v9 = vpop.f32.mrf.mxu3  ;;  %v2673_v46 = vpop.f32.mrf.mxu2 }
 0x2d6   :  { %7631 = vst [vmem:[#allocation106_spill] sm:$0xff] %v6363_v9  ;;  %v1930_v1 = vpop.f32.mrf.mxu0 }
 0x2d7   :  { %v2299_v17 = vpop.f32.mrf.mxu1 }
 0x2d8   :  { %v2300_v30 = vadd.f32 %v2299_v17, %v1930_v1  ;;  %v4624_v1 = vld [vmem:[%s7412_s0 + $0x460] sm:$0xf0] }
 0x2d9   :  { %v4039_v6 = vor.u32 %v4624_v1, %v4038_v56 }
 0x2da   :  { %v6365_v22 = vadd.f32 %v2668_v36, %v2300_v30  ;;  %4457 = vmatmul.msk.bf16.gmra.mxu2 %vm1527_vm0, %v4027_v38  ;;  %v4254_v36 = vld [vmem:[%s7412_s0 + $0x608] sm:$0xf]  ;;  %v4007_v30 = vor.u32 %v4617_v14, %v4006_v49 }
 0x2db   :  { %v4255_v13 = vor.u32 %v4678_v52, %v4254_v36  ;;  %v4681_v52 = vld [vmem:[%s7412_s0 + $0x628] sm:$0xf0] }
 0x2dc   :  { %7632 = vst [vmem:[#allocation107_spill] sm:$0xff] %v6365_v22 }
 0x2dd   :  { %v6390_v38 = vpop.f32.mrf.mxu3  ;;  %v2676_v17 = vpop.f32.mrf.mxu2 }
 0x2de   :  { %7633 = vst [vmem:[#allocation108_spill] sm:$0xff] %v6390_v38  ;;  %v1933_v20 = vpop.f32.mrf.mxu0  ;;  %v4050_v38 = vld [vmem:[%s7412_s0 + $0x470] sm:$0xf] }
 0x2df   :  { %v2302_v32 = vpop.f32.mrf.mxu1 }
 0x2e0   :  { %v2303_v9 = vadd.f32 %v2302_v32, %v1933_v20 }
 0x2e1   :  { %1972 = vmatmul.bf16.gmra.mxu0 %v4007_v30 }
 0x2e2   :  { %v6392_v48 = vadd.f32 %v2671_v47, %v2303_v9  ;;  %2341 = vmatmul.bf16.gmra.mxu1 %v4011_v24  ;;  %4476 = vmatmul.msk.bf16.gmra.mxu3 %vm1527_vm0, %v4255_v13  ;;  %v4018_v13 = vld [vmem:[%s7412_s0 + $0x438] sm:$0xf]  ;;  %v4620_v47 = vld [vmem:[%s7412_s0 + $0x440] sm:$0xf0]  ;;  %v4619_v24 = vld [vmem:[%s7412_s0 + $0x43c] sm:$0xf] }
 0x2e3   :  { %v4020_v9 = vld [vmem:[%s7412_s0 + $0x444] sm:$0xf0]  ;;  %v4019_v30 = vor.u32 %v4620_v47, %v4018_v13 }
 0x2e4   :  { %7634 = vst [vmem:[#allocation109_spill] sm:$0xff] %v6392_v48  ;;  %v2851_v48 = vld [vmem:[%s7413_s2] sm:$0x7] }
 0x2e5   :  { %v2678_v49 = vpop.f32.mrf.mxu2  ;;  %v2771_v14 = vpop.f32.mrf.mxu3  ;;  %vm3285_vm1 = vcmp.ge.f32.partialorder %v2851_v48, 0.0 }
 0x2e6   :  { %v1935_v2 = vpop.f32.mrf.mxu0 }
 0x2e7   :  { %v2304_v36 = vpop.f32.mrf.mxu1 }
 0x2e8   :  { %v2305_v32 = vadd.f32 %v2304_v36, %v1935_v2 }
 0x2ea   :  { %v6401_v20 = vadd.f32 %v2673_v46, %v2305_v32  ;;  %4458 = vmatmul.msk.bf16.gmra.mxu2 %vm1527_vm0, %v4039_v6  ;;  %v4266_v46 = vld [vmem:[%s7412_s0 + $0x620] sm:$0xf]  ;;  %v4023_v6 = vor.u32 %v4619_v24, %v4020_v9 }
 0x2eb   :  { %v4267_v36 = vor.u32 %v4681_v52, %v4266_v46 }
 0x2ec   :  { %7635 = vst [vmem:[#allocation110_spill] sm:$0xff] %v6401_v20  ;;  %v4627_v20 = vld [vmem:[%s7412_s0 + $0x478] sm:$0xf0] }
 0x2ed   :  { %v2681_v56 = vpop.f32.mrf.mxu2  ;;  %v6422_v1 = vpop.f32.mrf.mxu3  ;;  %v4051_v9 = vor.u32 %v4627_v20, %v4050_v38  ;;  %v4032_v38 = vld [vmem:[%s7412_s0 + $0x45c] sm:$0xf0]  ;;  %v4684_v20 = vld [vmem:[%s7412_s0 + $0x640] sm:$0xf0] }
 0x2ee   :  { %v1938_v2 = vpop.f32.mrf.mxu0 }
 0x2ef   :  { %v2307_v32 = vpop.f32.mrf.mxu1 }
 0x2f0   :  { %v2308_v22 = vadd.f32 %v2307_v32, %v1938_v2  ;;  %v4622_v2 = vld [vmem:[%s7412_s0 + $0x454] sm:$0xf] }
 0x2f1   :  { %1977 = vmatmul.bf16.gmra.mxu0 %v4019_v30  ;;  %v4623_v30 = vld [vmem:[%s7412_s0 + $0x458] sm:$0xf0] }
 0x2f2   :  { %v6424_v12 = vadd.f32 %v2676_v17, %v2308_v22  ;;  %2346 = vmatmul.bf16.gmra.mxu1 %v4023_v6  ;;  %4477 = vmatmul.msk.bf16.gmra.mxu3 %vm1527_vm0, %v4267_v36  ;;  %v4030_v17 = vld [vmem:[%s7412_s0 + $0x450] sm:$0xf] }
 0x2f3   :  { %v4031_v32 = vor.u32 %v4623_v30, %v4030_v17  ;;  %v4062_v17 = vld [vmem:[%s7412_s0 + $0x488] sm:$0xf]  ;;  %v6472_v30 = vperm.slane %v2851_v48, 0 }
 0x2f4   :  { %7636 = vst [vmem:[#allocation111_spill] sm:$0xff] %v6424_v12 }
 0x2f5   :  { %v2683_v13 = vpop.f32.mrf.mxu2  ;;  %v6433_v47 = vpop.f32.mrf.mxu3 }
 0x2f6   :  { %v1940_v24 = vpop.f32.mrf.mxu0 }
 0x2f7   :  { %v2309_v46 = vpop.f32.mrf.mxu1 }
 0x2f8   :  { %v2310_v52 = vadd.f32 %v2309_v46, %v1940_v24 }
 0x2fa   :  { %v6435_v22 = vadd.f32 %v2678_v49, %v2310_v52  ;;  %4459 = vmatmul.msk.bf16.gmra.mxu2 %vm1527_vm0, %v4051_v9  ;;  %v4278_v49 = vld [vmem:[%s7412_s0 + $0x638] sm:$0xf]  ;;  %v4035_v9 = vor.u32 %v4622_v2, %v4032_v38  ;;  %v4737_v38 = vmov 0  }
 0x2fb   :  { %v4279_v46 = vor.u32 %v4684_v20, %v4278_v49  ;;  %v3286_v49 = vsel %vm3285_vm1, 1, %v4737_v38 }
 0x2fc   :  { %7637 = vst [vmem:[#allocation112_spill] sm:$0xff] %v6435_v22  ;;  %v2403_v22 = vadd.f32 %v5740_v31, %v5126_v58  ;;  %v4630_v58 = vld [vmem:[%s7412_s0 + $0x490] sm:$0xf0] }
 0x2fd   :  { %v6456_v6 = vpop.f32.mrf.mxu2  ;;  %v6458_v36 = vpop.f32.mrf.mxu3 }
 0x2fe   :  { %v1943_v24 = vpop.f32.mrf.mxu0  ;;  %v2772_v43 = vadd.f32 %v2771_v14, %v2403_v22  ;;  %v7638_v14 = vmax.f32 %v5118_v55, %v5728_v41  ;;  %v7639_v22 = vmin.f32 %v5118_v55, %v5728_v41  ;;  %v4626_v55 = vld [vmem:[%s7412_s0 + $0x470] sm:$0xf0]  ;;  %v4625_v41 = vld [vmem:[%s7412_s0 + $0x46c] sm:$0xf] }
 0x2ff   :  { %v2312_v52 = vpop.f32.mrf.mxu1 }
 0x300   :  { %v2313_v12 = vadd.f32 %v2312_v52, %v1943_v24 }
 0x301   :  { %1982 = vmatmul.bf16.gmra.mxu0 %v4031_v32 }
 0x302   :  { %v2682_v10 = vadd.f32 %v2681_v56, %v2313_v12  ;;  %2351 = vmatmul.bf16.gmra.mxu1 %v4035_v9  ;;  %4478 = vmatmul.msk.bf16.gmra.mxu3 %vm1527_vm0, %v4279_v46  ;;  %v4063_v9 = vor.u32 %v4630_v58, %v4062_v17  ;;  %v3287_v46 = vperm.slane %v3286_v49, 1 }
 0x304   :  { %v2892_v31 = vmax.f32 %v2682_v10, %v2772_v43  ;;  %v3037_v2 = vmin.f32 %v2682_v10, %v2772_v43  ;;  %v2405_v43 = vadd.f32 %v5767_v23, %v5149_v8  ;;  %vm6502_vm2 = vcmp.eq.s32.totalorder %v3287_v46, 1 }
 0x305   :  { %v6474_v20 = vpop.f32.mrf.mxu2  ;;  %v6476_v12 = vpop.f32.mrf.mxu3 }
 0x306   :  { %v2928_v56 = vmax.f32 %v7638_v14, %v2892_v31  ;;  %v3073_v32 = vmin.f32 %v7639_v22, %v3037_v2  ;;  %v1945_v24 = vpop.f32.mrf.mxu0  ;;  %v4042_v31 = vld [vmem:[%s7412_s0 + $0x468] sm:$0xf]  ;;  %v2774_v17 = vadd.f32 %v6422_v1, %v2405_v43  ;;  %v4044_v2 = vld [vmem:[%s7412_s0 + $0x474] sm:$0xf0]  ;;  %v6506_v14 = vperm.slane %v2851_v48, 1 }
 0x307   :  { %v2314_v52 = vpop.f32.mrf.mxu1  ;;  %v4047_v43 = vor.u32 %v4625_v41, %v4044_v2 }
 0x308   :  { %v2965_v10 = vadd.f32 %v6472_v30, %v2928_v56  ;;  %v3109_v38 = vadd.f32 %v3073_v32, %v6472_v30  ;;  %v2315_v5 = vadd.f32 %v2314_v52, %v1945_v24  ;;  %v4290_v56 = vld [vmem:[%s7412_s0 + $0x650] sm:$0xf]  ;;  %v6514_v24 = vperm.slane %v2851_v48, 2 }
 0x309   :  { %v4043_v52 = vor.u32 %v4626_v55, %v4042_v31  ;;  %v2408_v31 = vadd.f32 %v5781_v40, %v5159_v21  ;;  %v4074_v21 = vld [vmem:[%s7412_s0 + $0x4a0] sm:$0xf]  ;;  %v4633_v40 = vld [vmem:[%s7412_s0 + $0x4a8] sm:$0xf0] }
 0x30a   :  { %v3145_v8 = vmul.f32 0.05, %v2965_v10  ;;  %v3217_v23 = vmul.f32 0.05, %v3109_v38  ;;  %v2684_v58 = vadd.f32 %v2683_v13, %v2315_v5  ;;  %4460 = vmatmul.msk.bf16.gmra.mxu2 %vm1527_vm0, %v4063_v9  ;;  %v4687_v5 = vld [vmem:[%s7412_s0 + $0x658] sm:$0xf0] }
 0x30b   :  { %v4291_v48 = vor.u32 %v4687_v5, %v4290_v56 }
 0x30c   :  { %v3181_v1 = vmax.f32 %v2965_v10, %v3145_v8  ;;  %v3253_v13 = vmax.f32 %v3109_v38, %v3217_v23  ;;  %v2893_v22 = vmax.f32 %v2684_v58, %v2774_v17  ;;  %v3038_v32 = vmin.f32 %v2684_v58, %v2774_v17 }
 0x30d   :  { %v6516_v9 = vpop.f32.mrf.mxu2  ;;  %v6518_v46 = vpop.f32.mrf.mxu3  ;;  %v7643_v10 = vmin.f32 %v5128_v0, %v5742_v34  ;;  %v2777_v0 = vadd.f32 %v6433_v47, %v2408_v31 }
 0x30e   :  { %v3293_v15 = vsel %vm6502_vm2, %v3181_v1, %v3253_v13  ;;  %v2929_v44 = vmax.f32 %v7642_v62, %v2893_v22  ;;  %v1948_v17 = vpop.f32.mrf.mxu0 }
 0x30f   :  { %v3074_v38 = vmin.f32 %v7643_v10, %v3038_v32  ;;  %v3330_v8 = vmul.f32 %v6506_v14, %v3293_v15  ;;  %v2317_v23 = vpop.f32.mrf.mxu1  ;;  %v7644_v32 = vmax.f32 %v5151_v18, %v5769_v16 }
 0x310   :  { %v2966_v55 = vadd.f32 %v6472_v30, %v2929_v44  ;;  %v2318_v58 = vadd.f32 %v2317_v23, %v1948_v17  ;;  %v4075_v17 = vor.u32 %v4633_v40, %v4074_v21  ;;  %v2410_v23 = vadd.f32 %v5808_v27, %v5182_v37  ;;  %v4690_v21 = vld [vmem:[%s7412_s0 + $0x670] sm:$0xf0] }
 0x311   :  { %v3110_v41 = vadd.f32 %v3074_v38, %v6472_v30  ;;  %v3367_v2 = vadd.f32 %v6514_v24, %v3330_v8  ;;  %1987 = vmatmul.bf16.gmra.mxu0 %v4043_v52 }
 0x312   :  { %v3146_v62 = vmul.f32 0.05, %v2966_v55  ;;  %v2687_v56 = vadd.f32 %v6456_v6, %v2318_v58  ;;  %2356 = vmatmul.bf16.gmra.mxu1 %v4047_v43  ;;  %4479 = vmatmul.msk.bf16.gmra.mxu3 %vm1527_vm0, %v4291_v48  ;;  %v7645_v43 = vmin.f32 %v5151_v18, %v5769_v16  ;;  %v4054_v16 = vld [vmem:[%s7412_s0 + $0x480] sm:$0xf]  ;;  %v4629_v18 = vld [vmem:[%s7412_s0 + $0x488] sm:$0xf0]  ;;  %v2779_v37 = vadd.f32 %v6458_v36, %v2410_v23 }
 0x313   :  { %v3218_v34 = vmul.f32 0.05, %v3110_v41  ;;  %v3403_v15 = vpack.c.bf16 %v3367_v2, %v3367_v2  ;;  %v4628_v2 = vld [vmem:[%s7412_s0 + $0x484] sm:$0xf] }
 0x314   :  { %v3182_v44 = vmax.f32 %v2966_v55, %v3146_v62  ;;  %v2894_v1 = vmax.f32 %v2687_v56, %v2777_v0  ;;  %v3039_v47 = vmin.f32 %v2687_v56, %v2777_v0 }
 0x315   :  { %v3254_v5 = vmax.f32 %v3110_v41, %v3218_v34  ;;  %3440 = vst.msk [vmem:[%s7414_s3 + $0x10] sm:$0xf] %vm3435_vm3, %v3403_v15  ;;  %v6547_v6 = vpop.f32.mrf.mxu2  ;;  %v6549_v13 = vpop.f32.mrf.mxu3  ;;  %v4056_v34 = vld [vmem:[%s7412_s0 + $0x48c] sm:$0xf0]  ;;  %v4302_v15 = vld [vmem:[%s7412_s0 + $0x668] sm:$0xf] }
 0x316   :  { %v2930_v52 = vmax.f32 %v7644_v32, %v2894_v1  ;;  %v3075_v10 = vmin.f32 %v7645_v43, %v3039_v47  ;;  %v1950_v38 = vpop.f32.mrf.mxu0  ;;  %v4055_v47 = vor.u32 %v4629_v18, %v4054_v16 }
 0x317   :  { %v3294_v22 = vsel %vm6502_vm2, %v3182_v44, %v3254_v5  ;;  %v2319_v8 = vpop.f32.mrf.mxu1 }
 0x318   :  { %v3331_v48 = vmul.f32 %v6506_v14, %v3294_v22  ;;  %v2967_v31 = vadd.f32 %v6472_v30, %v2930_v52  ;;  %v3111_v55 = vadd.f32 %v3075_v10, %v6472_v30  ;;  %v2320_v41 = vadd.f32 %v2319_v8, %v1950_v38 }
 0x319   :  { %v4059_v22 = vor.u32 %v4628_v2, %v4056_v34  ;;  %v7646_v52 = vmax.f32 %v5161_v28, %v5783_v4  ;;  %v7647_v10 = vmin.f32 %v5161_v28, %v5783_v4 }
 0x31a   :  { %v3368_v58 = vadd.f32 %v6514_v24, %v3331_v48  ;;  %v3147_v27 = vmul.f32 0.05, %v2967_v31  ;;  %v3219_v0 = vmul.f32 0.05, %v3111_v55  ;;  %v2689_v62 = vadd.f32 %v6474_v20, %v2320_v41  ;;  %4461 = vmatmul.msk.bf16.gmra.mxu2 %vm1527_vm0, %v4075_v17 }
 0x31b   :  { %v4303_v48 = vor.u32 %v4690_v21, %v4302_v15 }
 0x31c   :  { %v3404_v56 = vpack.c.bf16 %v3368_v58, %v3368_v58  ;;  %v3183_v36 = vmax.f32 %v2967_v31, %v3147_v27  ;;  %v3255_v40 = vmax.f32 %v3111_v55, %v3219_v0  ;;  %v2895_v44 = vmax.f32 %v2689_v62, %v2779_v37  ;;  %v7648_v31 = vld [vmem:[#allocation64_spill] sm:$0xff]  ;;  %v4636_v0 = vld [vmem:[%s7412_s0 + $0x4c0] sm:$0xf0] }
 0x31d   :  { %v3040_v5 = vmin.f32 %v2689_v62, %v2779_v37  ;;  %v6590_v20 = vpop.f32.mrf.mxu2  ;;  %v6592_v1 = vpop.f32.mrf.mxu3  ;;  %v2413_v55 = vadd.f32 %v7648_v31, %v5192_v50  ;;  %v4086_v50 = vld [vmem:[%s7412_s0 + $0x4b8] sm:$0xf] }
 0x31e   :  { %3441 = vst.msk [vmem:[%s7414_s3 + $0x14] sm:$0xf] %vm3435_vm3, %v3404_v56  ;;  %v3295_v32 = vsel %vm6502_vm2, %v3183_v36, %v3255_v40  ;;  %v2931_v43 = vmax.f32 %v7646_v52, %v2895_v44  ;;  %v1953_v17 = vpop.f32.mrf.mxu0  ;;  %v7649_v36 = vld [vmem:[#allocation10_spill] sm:$0xff]  ;;  %v7650_v40 = vld [vmem:[#allocation63_spill] sm:$0xff]  ;;  %v4087_v52 = vor.u32 %v4636_v0, %v4086_v50 }
 0x31f   :  { %v3076_v38 = vmin.f32 %v7647_v10, %v3040_v5  ;;  %v3332_v8 = vmul.f32 %v6506_v14, %v3295_v32  ;;  %v2322_v23 = vpop.f32.mrf.mxu1  ;;  %v2782_v2 = vadd.f32 %v6476_v12, %v2413_v55  ;;  %v7651_v44 = vmax.f32 %v7649_v36, %v7650_v40  ;;  %v4066_v55 = vld [vmem:[%s7412_s0 + $0x498] sm:$0xf] }
 0x320   :  { %v2968_v41 = vadd.f32 %v6472_v30, %v2931_v43  ;;  %v2323_v16 = vadd.f32 %v2322_v23, %v1953_v17 }
 0x321   :  { %v3112_v58 = vadd.f32 %v3076_v38, %v6472_v30  ;;  %v3369_v18 = vadd.f32 %v6514_v24, %v3332_v8  ;;  %1992 = vmatmul.bf16.gmra.mxu0 %v4055_v47  ;;  %v7652_v47 = vmin.f32 %v7649_v36, %v7650_v40  ;;  %v7653_v38 = vld [vmem:[#allocation11_spill] sm:$0xff]  ;;  %v7654_v36 = vld [vmem:[#allocation65_spill] sm:$0xff] }
 0x322   :  { %v3148_v28 = vmul.f32 0.05, %v2968_v41  ;;  %v2692_v37 = vadd.f32 %v6516_v9, %v2323_v16  ;;  %2361 = vmatmul.bf16.gmra.mxu1 %v4059_v22  ;;  %4480 = vmatmul.msk.bf16.gmra.mxu3 %vm1527_vm0, %v4303_v48  ;;  %v2415_v17 = vadd.f32 %v5849_v33, %v7653_v38  ;;  %v7655_v40 = vmax.f32 %v5194_v57, %v7654_v36  ;;  %v7658_v38 = vld [vmem:[#allocation67_spill] sm:$0xff] }
 0x323   :  { %v3220_v4 = vmul.f32 0.05, %v3112_v58  ;;  %v3405_v27 = vpack.c.bf16 %v3369_v18, %v3369_v18 }
 0x324   :  { %v3184_v62 = vmax.f32 %v2968_v41, %v3148_v28  ;;  %v2896_v56 = vmax.f32 %v2692_v37, %v2782_v2  ;;  %v3041_v12 = vmin.f32 %v2692_v37, %v2782_v2  ;;  %v4632_v41 = vld [vmem:[%s7412_s0 + $0x4a0] sm:$0xf0]  ;;  %v2784_v33 = vadd.f32 %v6518_v46, %v2415_v17  ;;  %v4068_v28 = vld [vmem:[%s7412_s0 + $0x4a4] sm:$0xf0]  ;;  %v4314_v37 = vld [vmem:[%s7412_s0 + $0x680] sm:$0xf] }
 0x325   :  { %v3256_v34 = vmax.f32 %v3112_v58, %v3220_v4  ;;  %3442 = vst.msk [vmem:[%s7414_s3 + $0x18] sm:$0xf] %vm3435_vm3, %v3405_v27  ;;  %v6621_v9 = vpop.f32.mrf.mxu2  ;;  %v6623_v15 = vpop.f32.mrf.mxu3  ;;  %v4631_v58 = vld [vmem:[%s7412_s0 + $0x49c] sm:$0xf]  ;;  %v4693_v27 = vld [vmem:[%s7412_s0 + $0x688] sm:$0xf0] }
 0x326   :  { %v2932_v5 = vmax.f32 %v7651_v44, %v2896_v56  ;;  %v3077_v22 = vmin.f32 %v7652_v47, %v3041_v12  ;;  %v1955_v32 = vpop.f32.mrf.mxu0  ;;  %v4067_v56 = vor.u32 %v4632_v41, %v4066_v55  ;;  %v4071_v12 = vor.u32 %v4631_v58, %v4068_v28 }
 0x327   :  { %v3296_v21 = vsel %vm6502_vm2, %v3184_v62, %v3256_v34  ;;  %v2324_v10 = vpop.f32.mrf.mxu1 }
 0x328   :  { %v3333_v43 = vmul.f32 %v6506_v14, %v3296_v21  ;;  %v2969_v48 = vadd.f32 %v6472_v30, %v2932_v5  ;;  %v3113_v8 = vadd.f32 %v3077_v22, %v6472_v30  ;;  %v2325_v23 = vadd.f32 %v2324_v10, %v1955_v32  ;;  %v7657_v10 = vld [vmem:[#allocation13_spill] sm:$0xff] }
 0x329   :  { %v7656_v5 = vmin.f32 %v5194_v57, %v7654_v36  ;;  %v4315_v32 = vor.u32 %v4693_v27, %v4314_v37  ;;  %v2418_v17 = vadd.f32 %v7658_v38, %v7657_v10  ;;  %v4078_v10 = vld [vmem:[%s7412_s0 + $0x4b0] sm:$0xf]  ;;  %v4635_v38 = vld [vmem:[%s7412_s0 + $0x4b8] sm:$0xf0] }
 0x32a   :  { %v3370_v31 = vadd.f32 %v6514_v24, %v3333_v43  ;;  %v3149_v16 = vmul.f32 0.05, %v2969_v48  ;;  %v3221_v18 = vmul.f32 0.05, %v3113_v8  ;;  %v2694_v2 = vadd.f32 %v6547_v6, %v2325_v23  ;;  %4462 = vmatmul.msk.bf16.gmra.mxu2 %vm1527_vm0, %v4087_v52 }
 0x32b   :  { %v2787_v55 = vadd.f32 %v6549_v13, %v2418_v17  ;;  %v4634_v17 = vld [vmem:[%s7412_s0 + $0x4b4] sm:$0xf] }
 0x32c   :  { %v3406_v4 = vpack.c.bf16 %v3370_v31, %v3370_v31  ;;  %v3185_v46 = vmax.f32 %v2969_v48, %v3149_v16  ;;  %v3257_v50 = vmax.f32 %v3113_v8, %v3221_v18  ;;  %v2897_v0 = vmax.f32 %v2694_v2, %v2784_v33  ;;  %v4098_v16 = vld [vmem:[%s7412_s0 + $0x4d0] sm:$0xf]  ;;  %v4639_v18 = vld [vmem:[%s7412_s0 + $0x4d8] sm:$0xf0] }
 0x32d   :  { %v3042_v62 = vmin.f32 %v2694_v2, %v2784_v33  ;;  %v6664_v6 = vpop.f32.mrf.mxu2  ;;  %v6666_v34 = vpop.f32.mrf.mxu3  ;;  %v4099_v36 = vor.u32 %v4639_v18, %v4098_v16 }
 0x32e   :  { %3443 = vst.msk [vmem:[%s7414_s3 + $0x1c] sm:$0xf] %vm3435_vm3, %v3406_v4  ;;  %v3297_v21 = vsel %vm6502_vm2, %v3185_v46, %v3257_v50  ;;  %v2933_v44 = vmax.f32 %v7655_v40, %v2897_v0  ;;  %v1958_v22 = vpop.f32.mrf.mxu0  ;;  %v7659_v46 = vld [vmem:[#allocation12_spill] sm:$0xff]  ;;  %v7660_v50 = vld [vmem:[#allocation66_spill] sm:$0xff] }
 0x32f   :  { %v3078_v47 = vmin.f32 %v7656_v5, %v3042_v62  ;;  %v3334_v52 = vmul.f32 %v6506_v14, %v3297_v21  ;;  %v2327_v43 = vpop.f32.mrf.mxu1  ;;  %v7661_v0 = vmax.f32 %v7659_v46, %v7660_v50  ;;  %v7663_v5 = vld [vmem:[#allocation14_spill] sm:$0xff] }
 0x330   :  { %v2970_v48 = vadd.f32 %v6472_v30, %v2933_v44  ;;  %v2328_v23 = vadd.f32 %v2327_v43, %v1958_v22 }
 0x331   :  { %v3114_v8 = vadd.f32 %v3078_v47, %v6472_v30  ;;  %v3371_v31 = vadd.f32 %v6514_v24, %v3334_v52  ;;  %1997 = vmatmul.bf16.gmra.mxu0 %v4067_v56  ;;  %v7662_v56 = vmin.f32 %v7659_v46, %v7660_v50  ;;  %v2420_v47 = vadd.f32 %v5890_v53, %v7663_v5 }
 0x332   :  { %v3150_v57 = vmul.f32 0.05, %v2970_v48  ;;  %v2697_v58 = vadd.f32 %v6590_v20, %v2328_v23  ;;  %2366 = vmatmul.bf16.gmra.mxu1 %v4071_v12  ;;  %4481 = vmatmul.msk.bf16.gmra.mxu3 %vm1527_vm0, %v4315_v32 }
 0x333   :  { %v3222_v41 = vmul.f32 0.05, %v3114_v8  ;;  %v3407_v33 = vpack.c.bf16 %v3371_v31, %v3371_v31  ;;  %v2789_v53 = vadd.f32 %v6592_v1, %v2420_v47  ;;  %v4080_v31 = vld [vmem:[%s7412_s0 + $0x4bc] sm:$0xf0] }
 0x334   :  { %v3186_v2 = vmax.f32 %v2970_v48, %v3150_v57  ;;  %v2898_v4 = vmax.f32 %v2697_v58, %v2787_v55  ;;  %v3043_v13 = vmin.f32 %v2697_v58, %v2787_v55  ;;  %v4326_v57 = vld [vmem:[%s7412_s0 + $0x698] sm:$0xf] }
 0x335   :  { %v3258_v28 = vmax.f32 %v3114_v8, %v3222_v41  ;;  %3444 = vst.msk [vmem:[%s7414_s3 + $0x20] sm:$0xf] %vm3435_vm3, %v3407_v33  ;;  %v6695_v20 = vpop.f32.mrf.mxu2  ;;  %v6697_v37 = vpop.f32.mrf.mxu3  ;;  %v4696_v41 = vld [vmem:[%s7412_s0 + $0x6a0] sm:$0xf0] }
 0x336   :  { %v2934_v62 = vmax.f32 %v7661_v0, %v2898_v4  ;;  %v3079_v12 = vmin.f32 %v7662_v56, %v3043_v13  ;;  %v1960_v21 = vpop.f32.mrf.mxu0  ;;  %v7664_v13 = vld [vmem:[#allocation68_spill] sm:$0xff]  ;;  %v4327_v56 = vor.u32 %v4696_v41, %v4326_v57  ;;  %v7669_v57 = vld [vmem:[#allocation15_spill] sm:$0xff]  ;;  %v7670_v41 = vld [vmem:[#allocation69_spill] sm:$0xff] }
 0x337   :  { %v3298_v27 = vsel %vm6502_vm2, %v3186_v2, %v3258_v28  ;;  %v2329_v44 = vpop.f32.mrf.mxu1  ;;  %v4079_v2 = vor.u32 %v4635_v38, %v4078_v10  ;;  %v4083_v28 = vor.u32 %v4634_v17, %v4080_v31  ;;  %v7666_v50 = vmin.f32 %v5227_v26, %v7664_v13  ;;  %v4110_v17 = vld [vmem:[%s7412_s0 + $0x4e8] sm:$0xf] }
 0x338   :  { %v3335_v40 = vmul.f32 %v6506_v14, %v3298_v27  ;;  %v2971_v22 = vadd.f32 %v6472_v30, %v2934_v62  ;;  %v3115_v32 = vadd.f32 %v3079_v12, %v6472_v30  ;;  %v2330_v52 = vadd.f32 %v2329_v44, %v1960_v21 }
 0x339   :  { %v7665_v27 = vmax.f32 %v5227_v26, %v7664_v13 }
 0x33a   :  { %v3372_v43 = vadd.f32 %v6514_v24, %v3335_v40  ;;  %v3151_v48 = vmul.f32 0.05, %v2971_v22  ;;  %v3223_v8 = vmul.f32 0.05, %v3115_v32  ;;  %v2699_v23 = vadd.f32 %v6621_v9, %v2330_v52  ;;  %4463 = vmatmul.msk.bf16.gmra.mxu2 %vm1527_vm0, %v4099_v36  ;;  %v7667_v36 = vld [vmem:[#allocation16_spill] sm:$0xff]  ;;  %v7668_v40 = vld [vmem:[#allocation70_spill] sm:$0xff] }
 0x33b   :  { %v2423_v44 = vadd.f32 %v7668_v40, %v7667_v36  ;;  %v4637_v36 = vld [vmem:[%s7412_s0 + $0x4cc] sm:$0xf] }
 0x33c   :  { %v3408_v55 = vpack.c.bf16 %v3372_v43, %v3372_v43  ;;  %v3187_v1 = vmax.f32 %v2971_v22, %v3151_v48  ;;  %v3259_v58 = vmax.f32 %v3115_v32, %v3223_v8  ;;  %v2899_v33 = vmax.f32 %v2699_v23, %v2789_v53 }
 0x33d   :  { %v3044_v16 = vmin.f32 %v2699_v23, %v2789_v53  ;;  %v6738_v9 = vpop.f32.mrf.mxu2  ;;  %v6740_v18 = vpop.f32.mrf.mxu3  ;;  %v2792_v52 = vadd.f32 %v6623_v15, %v2423_v44  ;;  %v4642_v53 = vld [vmem:[%s7412_s0 + $0x4f0] sm:$0xf0] }
 0x33e   :  { %3445 = vst.msk [vmem:[%s7414_s3 + $0x24] sm:$0xf] %vm3435_vm3, %v3408_v55  ;;  %v3299_v4 = vsel %vm6502_vm2, %v3187_v1, %v3259_v58  ;;  %v2935_v46 = vmax.f32 %v7665_v27, %v2899_v33  ;;  %v1963_v62 = vpop.f32.mrf.mxu0  ;;  %v7671_v1 = vmax.f32 %v7669_v57, %v7670_v41  ;;  %v7672_v33 = vmin.f32 %v7669_v57, %v7670_v41  ;;  %v7673_v27 = vld [vmem:[#allocation17_spill] sm:$0xff] }
 0x33f   :  { %v3080_v0 = vmin.f32 %v7666_v50, %v3044_v16  ;;  %v3336_v12 = vmul.f32 %v6506_v14, %v3299_v4  ;;  %v2332_v21 = vpop.f32.mrf.mxu1 }
 0x340   :  { %v2972_v5 = vadd.f32 %v6472_v30, %v2935_v46  ;;  %v2333_v22 = vadd.f32 %v2332_v21, %v1963_v62  ;;  %v2425_v46 = vadd.f32 %v5931_v25, %v7673_v27  ;;  %v4638_v21 = vld [vmem:[%s7412_s0 + $0x4d0] sm:$0xf0] }
 0x341   :  { %v3116_v47 = vadd.f32 %v3080_v0, %v6472_v30  ;;  %v3373_v32 = vadd.f32 %v6514_v24, %v3336_v12  ;;  %2002 = vmatmul.bf16.gmra.mxu0 %v4079_v2  ;;  %v4090_v12 = vld [vmem:[%s7412_s0 + $0x4c8] sm:$0xf] }
 0x342   :  { %v3152_v26 = vmul.f32 0.05, %v2972_v5  ;;  %v2702_v10 = vadd.f32 %v6664_v6, %v2333_v22  ;;  %2371 = vmatmul.bf16.gmra.mxu1 %v4083_v28  ;;  %4482 = vmatmul.msk.bf16.gmra.mxu3 %vm1527_vm0, %v4327_v56  ;;  %v4111_v28 = vor.u32 %v4642_v53, %v4110_v17  ;;  %v2794_v25 = vadd.f32 %v6666_v34, %v2425_v46 }
 0x343   :  { %v3224_v43 = vmul.f32 0.05, %v3116_v47  ;;  %v3409_v38 = vpack.c.bf16 %v3373_v32, %v3373_v32  ;;  %v4338_v32 = vld [vmem:[%s7412_s0 + $0x6b0] sm:$0xf]  ;;  %v4091_v17 = vor.u32 %v4638_v21, %v4090_v12  ;;  %v4122_v12 = vld [vmem:[%s7412_s0 + $0x500] sm:$0xf] }
 0x344   :  { %v3188_v48 = vmax.f32 %v2972_v5, %v3152_v26  ;;  %v2900_v23 = vmax.f32 %v2702_v10, %v2792_v52  ;;  %v3045_v15 = vmin.f32 %v2702_v10, %v2792_v52  ;;  %v4699_v52 = vld [vmem:[%s7412_s0 + $0x6b8] sm:$0xf0]  ;;  %v4645_v21 = vld [vmem:[%s7412_s0 + $0x508] sm:$0xf0] }
 0x345   :  { %v3260_v8 = vmax.f32 %v3116_v47, %v3224_v43  ;;  %3446 = vst.msk [vmem:[%s7414_s3 + $0x28] sm:$0xf] %vm3435_vm3, %v3409_v38  ;;  %v6769_v6 = vpop.f32.mrf.mxu2  ;;  %v6771_v31 = vpop.f32.mrf.mxu3  ;;  %v4092_v47 = vld [vmem:[%s7412_s0 + $0x4d4] sm:$0xf0] }
 0x346   :  { %v2936_v58 = vmax.f32 %v7671_v1, %v2900_v23  ;;  %v3081_v16 = vmin.f32 %v7672_v33, %v3045_v15  ;;  %v1965_v2 = vpop.f32.mrf.mxu0  ;;  %v4095_v53 = vor.u32 %v4637_v36, %v4092_v47  ;;  %v4339_v1 = vor.u32 %v4699_v52, %v4338_v32  ;;  %v7679_v47 = vld [vmem:[#allocation18_spill] sm:$0xff] }
 0x347   :  { %v3300_v55 = vsel %vm6502_vm2, %v3188_v48, %v3260_v8  ;;  %v2334_v13 = vpop.f32.mrf.mxu1  ;;  %v7674_v8 = vld [vmem:[#allocation71_spill] sm:$0xff] }
 0x348   :  { %v3337_v4 = vmul.f32 %v6506_v14, %v3300_v55  ;;  %v2973_v50 = vadd.f32 %v6472_v30, %v2936_v58  ;;  %v3117_v0 = vadd.f32 %v3081_v16, %v6472_v30  ;;  %v2335_v62 = vadd.f32 %v2334_v13, %v1965_v2  ;;  %v7677_v16 = vld [vmem:[#allocation19_spill] sm:$0xff]  ;;  %v7678_v2 = vld [vmem:[#allocation73_spill] sm:$0xff] }
 0x349   :  { %v7675_v23 = vmax.f32 %v5260_v61, %v7674_v8  ;;  %v7676_v55 = vmin.f32 %v5260_v61, %v7674_v8 }
 0x34a   :  { %v3374_v56 = vadd.f32 %v6514_v24, %v3337_v4  ;;  %v3153_v40 = vmul.f32 0.05, %v2973_v50  ;;  %v3225_v44 = vmul.f32 0.05, %v3117_v0  ;;  %v2704_v5 = vadd.f32 %v6695_v20, %v2335_v62  ;;  %4464 = vmatmul.msk.bf16.gmra.mxu2 %vm1527_vm0, %v4111_v28 }
 0x34b   :  { %v2428_v28 = vadd.f32 %v7678_v2, %v7677_v16 }
 0x34c   :  { %v3410_v22 = vpack.c.bf16 %v3374_v56, %v3374_v56  ;;  %v3189_v34 = vmax.f32 %v2973_v50, %v3153_v40  ;;  %v3261_v26 = vmax.f32 %v3117_v0, %v3225_v44  ;;  %v2901_v43 = vmax.f32 %v2704_v5, %v2794_v25 }
 0x34d   :  { %v3046_v10 = vmin.f32 %v2704_v5, %v2794_v25  ;;  %v6812_v20 = vpop.f32.mrf.mxu2  ;;  %v6814_v38 = vpop.f32.mrf.mxu3  ;;  %v2797_v50 = vadd.f32 %v6697_v37, %v2428_v28  ;;  %v4640_v28 = vld [vmem:[%s7412_s0 + $0x4e4] sm:$0xf] }
 0x34e   :  { %3447 = vst.msk [vmem:[%s7414_s3 + $0x2c] sm:$0xf] %vm3435_vm3, %v3410_v22  ;;  %v3301_v48 = vsel %vm6502_vm2, %v3189_v34, %v3261_v26  ;;  %v2937_v15 = vmax.f32 %v7675_v23, %v2901_v43  ;;  %v1968_v41 = vpop.f32.mrf.mxu0  ;;  %v7680_v22 = vld [vmem:[#allocation72_spill] sm:$0xff] }
 0x34f   :  { %v3082_v57 = vmin.f32 %v7676_v55, %v3046_v10  ;;  %v3338_v58 = vmul.f32 %v6506_v14, %v3301_v48  ;;  %v2337_v33 = vpop.f32.mrf.mxu1  ;;  %v7681_v32 = vmax.f32 %v7679_v47, %v7680_v22  ;;  %v7682_v34 = vmin.f32 %v7679_v47, %v7680_v22  ;;  %v7683_v48 = vld [vmem:[#allocation20_spill] sm:$0xff]  ;;  %v7687_v47 = vld [vmem:[#allocation22_spill] sm:$0xff] }
 0x350   :  { %v2974_v4 = vadd.f32 %v6472_v30, %v2937_v15  ;;  %v2338_v27 = vadd.f32 %v2337_v33, %v1968_v41  ;;  %v4123_v10 = vor.u32 %v4645_v21, %v4122_v12  ;;  %v2430_v8 = vadd.f32 %v5972_v7, %v7683_v48  ;;  %v4102_v41 = vld [vmem:[%s7412_s0 + $0x4e0] sm:$0xf]  ;;  %v4641_v7 = vld [vmem:[%s7412_s0 + $0x4e8] sm:$0xf0]  ;;  %v7688_v22 = vld [vmem:[#allocation76_spill] sm:$0xff] }
 0x351   :  { %v3118_v13 = vadd.f32 %v3082_v57, %v6472_v30  ;;  %v3375_v46 = vadd.f32 %v6514_v24, %v3338_v58  ;;  %2007 = vmatmul.bf16.gmra.mxu0 %v4091_v17 }
 0x352   :  { %v3154_v61 = vmul.f32 0.05, %v2974_v4  ;;  %v2707_v62 = vadd.f32 %v6738_v9, %v2338_v27  ;;  %2376 = vmatmul.bf16.gmra.mxu1 %v4095_v53  ;;  %4483 = vmatmul.msk.bf16.gmra.mxu3 %vm1527_vm0, %v4339_v1  ;;  %v2799_v1 = vadd.f32 %v6740_v18, %v2430_v8  ;;  %v4134_v8 = vld [vmem:[%s7412_s0 + $0x518] sm:$0xf] }
 0x353   :  { %v3226_v0 = vmul.f32 0.05, %v3118_v13  ;;  %v3411_v56 = vpack.c.bf16 %v3375_v46, %v3375_v46 }
 0x354   :  { %v3190_v36 = vmax.f32 %v2974_v4, %v3154_v61  ;;  %v2902_v40 = vmax.f32 %v2707_v62, %v2797_v50  ;;  %v3047_v37 = vmin.f32 %v2707_v62, %v2797_v50  ;;  %v4104_v4 = vld [vmem:[%s7412_s0 + $0x4ec] sm:$0xf0]  ;;  %v4103_v61 = vor.u32 %v4641_v7, %v4102_v41  ;;  %v7684_v62 = vld [vmem:[#allocation74_spill] sm:$0xff] }
 0x355   :  { %v3262_v25 = vmax.f32 %v3118_v13, %v3226_v0  ;;  %3448 = vst.msk [vmem:[%s7414_s3 + $0x30] sm:$0xf] %vm3435_vm3, %v3411_v56  ;;  %v6843_v9 = vpop.f32.mrf.mxu2  ;;  %v6845_v44 = vpop.f32.mrf.mxu3  ;;  %v7685_v56 = vmax.f32 %v5293_v39, %v7684_v62  ;;  %v7686_v21 = vmin.f32 %v5293_v39, %v7684_v62 }
 0x356   :  { %v2938_v52 = vmax.f32 %v7681_v32, %v2902_v40  ;;  %v3083_v26 = vmin.f32 %v7682_v34, %v3047_v37  ;;  %v1970_v43 = vpop.f32.mrf.mxu0  ;;  %v4107_v40 = vor.u32 %v4640_v28, %v4104_v4  ;;  %v2433_v32 = vadd.f32 %v7688_v22, %v7687_v47  ;;  %v4643_v47 = vld [vmem:[%s7412_s0 + $0x4fc] sm:$0xf]  ;;  %v4116_v22 = vld [vmem:[%s7412_s0 + $0x504] sm:$0xf0] }
 0x357   :  { %v3302_v5 = vsel %vm6502_vm2, %v3190_v36, %v3262_v25  ;;  %v2339_v53 = vpop.f32.mrf.mxu1 }
 0x358   :  { %v3339_v17 = vmul.f32 %v6506_v14, %v3302_v5  ;;  %v2975_v23 = vadd.f32 %v6472_v30, %v2938_v52  ;;  %v3119_v15 = vadd.f32 %v3083_v26, %v6472_v30  ;;  %v2340_v55 = vadd.f32 %v2339_v53, %v1970_v43 }
 0x35a   :  { %v3376_v57 = vadd.f32 %v6514_v24, %v3339_v17  ;;  %v3155_v58 = vmul.f32 0.05, %v2975_v23  ;;  %v3227_v33 = vmul.f32 0.05, %v3119_v15  ;;  %v2709_v16 = vadd.f32 %v6769_v6, %v2340_v55  ;;  %4465 = vmatmul.msk.bf16.gmra.mxu2 %vm1527_vm0, %v4123_v10 }
 0x35b   :  { %v2802_v10 = vadd.f32 %v6771_v31, %v2433_v32 }
 0x35c   :  { %v3412_v2 = vpack.c.bf16 %v3376_v57, %v3376_v57  ;;  %v3191_v18 = vmax.f32 %v2975_v23, %v3155_v58  ;;  %v3263_v13 = vmax.f32 %v3119_v15, %v3227_v33  ;;  %v2903_v27 = vmax.f32 %v2709_v16, %v2799_v1  ;;  %v4648_v23 = vld [vmem:[%s7412_s0 + $0x520] sm:$0xf0]  ;;  %v7689_v58 = vld [vmem:[#allocation21_spill] sm:$0xff]  ;;  %v7690_v33 = vld [vmem:[#allocation75_spill] sm:$0xff] }
 0x35d   :  { %v3048_v46 = vmin.f32 %v2709_v16, %v2799_v1  ;;  %v6880_v6 = vpop.f32.mrf.mxu2  ;;  %v6882_v50 = vpop.f32.mrf.mxu3  ;;  %v7691_v16 = vmax.f32 %v7689_v58, %v7690_v33 }
 0x35e   :  { %3449 = vst.msk [vmem:[%s7414_s3 + $0x34] sm:$0xf] %vm3435_vm3, %v3412_v2  ;;  %v3303_v0 = vsel %vm6502_vm2, %v3191_v18, %v3263_v13  ;;  %v2939_v12 = vmax.f32 %v7685_v56, %v2903_v27  ;;  %v1973_v25 = vpop.f32.mrf.mxu0  ;;  %v7692_v2 = vmin.f32 %v7689_v58, %v7690_v33  ;;  %v4135_v18 = vor.u32 %v4648_v23, %v4134_v8 }
 0x35f   :  { %v3084_v36 = vmin.f32 %v7686_v21, %v3048_v46  ;;  %v3340_v37 = vmul.f32 %v6506_v14, %v3303_v0  ;;  %v2342_v5 = vpop.f32.mrf.mxu1  ;;  %v7693_v46 = vld [vmem:[#allocation23_spill] sm:$0xff]  ;;  %v4114_v21 = vld [vmem:[%s7412_s0 + $0x4f8] sm:$0xf] }
 0x360   :  { %v2976_v52 = vadd.f32 %v6472_v30, %v2939_v12  ;;  %v2343_v26 = vadd.f32 %v2342_v5, %v1973_v25 }
 0x361   :  { %v3120_v34 = vadd.f32 %v3084_v36, %v6472_v30  ;;  %v3377_v43 = vadd.f32 %v6514_v24, %v3340_v37  ;;  %2012 = vmatmul.bf16.gmra.mxu0 %v4103_v61  ;;  %v2435_v61 = vadd.f32 %v6013_v60, %v7693_v46  ;;  %v4644_v60 = vld [vmem:[%s7412_s0 + $0x500] sm:$0xf0]  ;;  %v4651_v46 = vld [vmem:[%s7412_s0 + $0x538] sm:$0xf0] }
 0x362   :  { %v3156_v39 = vmul.f32 0.05, %v2976_v52  ;;  %v2712_v53 = vadd.f32 %v6812_v20, %v2343_v26  ;;  %2381 = vmatmul.bf16.gmra.mxu1 %v4107_v40 }
 0x363   :  { %v3228_v17 = vmul.f32 0.05, %v3120_v34  ;;  %v3413_v48 = vpack.c.bf16 %v3377_v43, %v3377_v43  ;;  %v2804_v36 = vadd.f32 %v6814_v38, %v2435_v61  ;;  %v4115_v43 = vor.u32 %v4644_v60, %v4114_v21  ;;  %v7700_v21 = vld [vmem:[#allocation78_spill] sm:$0xff] }
 0x364   :  { %v3192_v15 = vmax.f32 %v2976_v52, %v3156_v39  ;;  %v2904_v57 = vmax.f32 %v2712_v53, %v2802_v10  ;;  %v3049_v41 = vmin.f32 %v2712_v53, %v2802_v10  ;;  %v7694_v39 = vld [vmem:[#allocation77_spill] sm:$0xff] }
 0x365   :  { %v3264_v55 = vmax.f32 %v3120_v34, %v3228_v17  ;;  %3450 = vst.msk [vmem:[%s7414_s3 + $0x38] sm:$0xf] %vm3435_vm3, %v3413_v48  ;;  %v6910_v31 = vpop.f32.mrf.mxu2  ;;  %v6912_v20 = vpop.f32.mrf.mxu3  ;;  %v7695_v17 = vmax.f32 %v5326_v19, %v7694_v39  ;;  %v7696_v48 = vmin.f32 %v5326_v19, %v7694_v39 }
 0x366   :  { %v2940_v7 = vmax.f32 %v7691_v16, %v2904_v57  ;;  %v3085_v28 = vmin.f32 %v7692_v2, %v3049_v41  ;;  %v1975_v4 = vpop.f32.mrf.mxu0  ;;  %v7697_v41 = vld [vmem:[#allocation25_spill] sm:$0xff] }
 0x367   :  { %v3304_v1 = vsel %vm6502_vm2, %v3192_v15, %v3264_v55  ;;  %v2344_v27 = vpop.f32.mrf.mxu1  ;;  %v4119_v15 = vor.u32 %v4643_v47, %v4116_v22 }
 0x368   :  { %v3341_v13 = vmul.f32 %v6506_v14, %v3304_v1  ;;  %v2977_v0 = vadd.f32 %v6472_v30, %v2940_v7  ;;  %v3121_v62 = vadd.f32 %v3085_v28, %v6472_v30  ;;  %v2345_v56 = vadd.f32 %v2344_v27, %v1975_v4  ;;  %v7698_v1 = vld [vmem:[#allocation79_spill] sm:$0xff]  ;;  %v4146_v27 = vld [vmem:[%s7412_s0 + $0x530] sm:$0xf] }
 0x369   :  { %v2438_v58 = vadd.f32 %v7698_v1, %v7697_v41  ;;  %v7704_v1 = vld [vmem:[#allocation80_spill] sm:$0xff] }
 0x36a   :  { %v3378_v12 = vadd.f32 %v6514_v24, %v3341_v13  ;;  %v3157_v25 = vmul.f32 0.05, %v2977_v0  ;;  %v3229_v40 = vmul.f32 0.05, %v3121_v62  ;;  %v2714_v37 = vadd.f32 %v6843_v9, %v2345_v56  ;;  %4466 = vmatmul.msk.bf16.gmra.mxu2 %vm1527_vm0, %v4135_v18 }
 0x36b   :  { %v2807_v28 = vadd.f32 %v6845_v44, %v2438_v58  ;;  %v7705_v58 = vmax.f32 %v5359_v11, %v7704_v1 }
 0x36c   :  { %v3414_v5 = vpack.c.bf16 %v3378_v12, %v3378_v12  ;;  %v3193_v38 = vmax.f32 %v2977_v0, %v3157_v25  ;;  %v3265_v32 = vmax.f32 %v3121_v62, %v3229_v40  ;;  %v2905_v52 = vmax.f32 %v2714_v37, %v2804_v36  ;;  %v7699_v12 = vld [vmem:[#allocation24_spill] sm:$0xff] }
 0x36d   :  { %v3050_v34 = vmin.f32 %v2714_v37, %v2804_v36  ;;  %v6947_v9 = vpop.f32.mrf.mxu2  ;;  %v6949_v26 = vpop.f32.mrf.mxu3  ;;  %v7701_v36 = vmax.f32 %v7699_v12, %v7700_v21  ;;  %v7702_v40 = vmin.f32 %v7699_v12, %v7700_v21 }
 0x36e   :  { %3451 = vst.msk [vmem:[%s7414_s3 + $0x3c] sm:$0xf] %vm3435_vm3, %v3414_v5  ;;  %v3305_v10 = vsel %vm6502_vm2, %v3193_v38, %v3265_v32  ;;  %v2941_v53 = vmax.f32 %v7695_v17, %v2905_v52  ;;  %v1978_v23 = vpop.f32.mrf.mxu0  ;;  %v4147_v5 = vor.u32 %v4651_v46, %v4146_v27  ;;  %v7703_v32 = vld [vmem:[#allocation26_spill] sm:$0xff] }
 0x36f   :  { %v3086_v8 = vmin.f32 %v7696_v48, %v3050_v34  ;;  %v3342_v55 = vmul.f32 %v6506_v14, %v3305_v10  ;;  %v2347_v57 = vpop.f32.mrf.mxu1  ;;  %v2440_v52 = vadd.f32 %v6054_v54, %v7703_v32 }
 0x370   :  { %v2978_v33 = vadd.f32 %v6472_v30, %v2941_v53  ;;  %v2348_v7 = vadd.f32 %v2347_v57, %v1978_v23 }
 0x371   :  { %v3122_v16 = vadd.f32 %v3086_v8, %v6472_v30  ;;  %v3379_v2 = vadd.f32 %v6514_v24, %v3342_v55  ;;  %2017 = vmatmul.bf16.gmra.mxu0 %v4115_v43  ;;  %v2809_v17 = vadd.f32 %v6882_v50, %v2440_v52 }
 0x372   :  { %v3158_v19 = vmul.f32 0.05, %v2978_v33  ;;  %v2717_v18 = vadd.f32 %v6880_v6, %v2348_v7  ;;  %2386 = vmatmul.bf16.gmra.mxu1 %v4119_v15 }
 0x373   :  { %v3230_v4 = vmul.f32 0.05, %v3122_v16  ;;  %v3415_v13 = vpack.c.bf16 %v3379_v2, %v3379_v2 }
 0x374   :  { %v3194_v61 = vmax.f32 %v2978_v33, %v3158_v19  ;;  %v2906_v62 = vmax.f32 %v2717_v18, %v2807_v28  ;;  %v3051_v56 = vmin.f32 %v2717_v18, %v2807_v28  ;;  %v7706_v33 = vmin.f32 %v5359_v11, %v7704_v1  ;;  %v7707_v19 = vld [vmem:[#allocation28_spill] sm:$0xff] }
 0x375   :  { %v3266_v0 = vmax.f32 %v3122_v16, %v3230_v4  ;;  %3452 = vst.msk [vmem:[%s7414_s3 + $0x40] sm:$0xf] %vm3435_vm3, %v3415_v13  ;;  %v6977_v44 = vpop.f32.mrf.mxu2  ;;  %v6988_v22 = vpop.f32.mrf.mxu3  ;;  %v7708_v4 = vld [vmem:[#allocation82_spill] sm:$0xff] }
 0x376   :  { %v2942_v25 = vmax.f32 %v7701_v36, %v2906_v62  ;;  %v3087_v37 = vmin.f32 %v7702_v40, %v3051_v56  ;;  %v1980_v60 = vpop.f32.mrf.mxu0  ;;  %v2443_v18 = vadd.f32 %v7708_v4, %v7707_v19 }
 0x377   :  { %v3306_v6 = vsel %vm6502_vm2, %v3194_v61, %v3266_v0  ;;  %v2349_v38 = vpop.f32.mrf.mxu1 }
 0x378   :  { %v3343_v47 = vmul.f32 %v6506_v14, %v3306_v6  ;;  %v2979_v34 = vadd.f32 %v6472_v30, %v2942_v25  ;;  %v3123_v43 = vadd.f32 %v3087_v37, %v6472_v30  ;;  %v2350_v10 = vadd.f32 %v2349_v38, %v1980_v60 }
 0x379   :  { %v2812_v62 = vadd.f32 %v6912_v20, %v2443_v18  ;;  %v7710_v20 = vld [vmem:[#allocation81_spill] sm:$0xff] }
 0x37a   :  { %v3380_v39 = vadd.f32 %v6514_v24, %v3343_v47  ;;  %v3159_v53 = vmul.f32 0.05, %v2979_v34  ;;  %v3231_v48 = vmul.f32 0.05, %v3123_v43  ;;  %v2719_v8 = vadd.f32 %v6910_v31, %v2350_v10  ;;  %4467 = vmatmul.msk.bf16.gmra.mxu2 %vm1527_vm0, %v4147_v5  ;;  %v7709_v5 = vld [vmem:[#allocation27_spill] sm:$0xff]  ;;  %v7713_v10 = vld [vmem:[#allocation29_spill] sm:$0xff] }
 0x37b   :  { %v7711_v47 = vmax.f32 %v7709_v5, %v7710_v20 }
 0x37c   :  { %v3416_v23 = vpack.c.bf16 %v3380_v39, %v3380_v39  ;;  %v3195_v15 = vmax.f32 %v2979_v34, %v3159_v53  ;;  %v3267_v55 = vmax.f32 %v3123_v43, %v3231_v48  ;;  %v2907_v57 = vmax.f32 %v2719_v8, %v2809_v17 }
 0x37d   :  { %v3052_v54 = vmin.f32 %v2719_v8, %v2809_v17  ;;  %v2726_v41 = vpop.f32.mrf.mxu2  ;;  %v7016_v0 = vpop.f32.mrf.mxu3  ;;  %v2445_v39 = vadd.f32 %v6096_v63, %v7713_v10 }
 0x37e   :  { %3453 = vst.msk [vmem:[%s7414_s3 + $0x44] sm:$0xf] %vm3435_vm3, %v3416_v23  ;;  %v3307_v50 = vsel %vm6502_vm2, %v3195_v15, %v3267_v55  ;;  %v2943_v31 = vmax.f32 %v7705_v58, %v2907_v57  ;;  %v1983_v7 = vpop.f32.mrf.mxu0 }
 0x37f   :  { %v3088_v16 = vmin.f32 %v7706_v33, %v3052_v54  ;;  %v3344_v2 = vmul.f32 %v6506_v14, %v3307_v50  ;;  %v2352_v28 = vpop.f32.mrf.mxu1  ;;  %v2814_v23 = vadd.f32 %v6949_v26, %v2445_v39 }
 0x380   :  { %v2980_v13 = vadd.f32 %v6472_v30, %v2943_v31  ;;  %v2353_v46 = vadd.f32 %v2352_v28, %v1983_v7 }
 0x381   :  { %v3124_v27 = vadd.f32 %v3088_v16, %v6472_v30  ;;  %v3381_v61 = vadd.f32 %v6514_v24, %v3344_v2  ;;  %v7714_v16 = vld [vmem:[#allocation83_spill] sm:$0xff] }
 0x382   :  { %v3160_v11 = vmul.f32 0.05, %v2980_v13  ;;  %v2722_v6 = vadd.f32 %v6947_v9, %v2353_v46  ;;  %v7712_v9 = vmin.f32 %v7709_v5, %v7710_v20  ;;  %v7715_v7 = vmax.f32 %v5392_v51, %v7714_v16 }
 0x383   :  { %v3232_v56 = vmul.f32 0.05, %v3124_v27  ;;  %v3417_v12 = vpack.c.bf16 %v3381_v61, %v3381_v61  ;;  %v7716_v2 = vmin.f32 %v5392_v51, %v7714_v16 }
 0x384   :  { %v3196_v21 = vmax.f32 %v2980_v13, %v3160_v11  ;;  %v2908_v25 = vmax.f32 %v2722_v6, %v2812_v62  ;;  %v3053_v40 = vmin.f32 %v2722_v6, %v2812_v62  ;;  %v7717_v13 = vld [vmem:[#allocation31_spill] sm:$0xff] }
 0x385   :  { %v3268_v36 = vmax.f32 %v3124_v27, %v3232_v56  ;;  %3454 = vst.msk [vmem:[%s7414_s3 + $0x48] sm:$0xf] %vm3435_vm3, %v3417_v12  ;;  %v2728_v37 = vpop.f32.mrf.mxu2  ;;  %v7040_v50 = vpop.f32.mrf.mxu3  ;;  %v7718_v27 = vld [vmem:[#allocation85_spill] sm:$0xff] }
 0x386   :  { %v2944_v38 = vmax.f32 %v7711_v47, %v2908_v25  ;;  %v3089_v32 = vmin.f32 %v7712_v9, %v3053_v40  ;;  %v1985_v52 = vpop.f32.mrf.mxu0  ;;  %v2448_v46 = vadd.f32 %v7718_v27, %v7717_v13  ;;  %v7719_v9 = vld [vmem:[#allocation30_spill] sm:$0xff] }
 0x387   :  { %v3308_v60 = vsel %vm6502_vm2, %v3196_v21, %v3268_v36  ;;  %v2354_v43 = vpop.f32.mrf.mxu1  ;;  %v7727_v27 = vld [vmem:[#allocation34_spill] sm:$0xff] }
 0x388   :  { %v3345_v34 = vmul.f32 %v6506_v14, %v3308_v60  ;;  %v2981_v17 = vadd.f32 %v6472_v30, %v2944_v38  ;;  %v3125_v53 = vadd.f32 %v3089_v32, %v6472_v30  ;;  %v2355_v48 = vadd.f32 %v2354_v43, %v1985_v52 }
 0x389   :  { %v2817_v6 = vadd.f32 %v6988_v22, %v2448_v46  ;;  %v7720_v22 = vld [vmem:[#allocation84_spill] sm:$0xff] }
 0x38a   :  { %v3382_v8 = vadd.f32 %v6514_v24, %v3345_v34  ;;  %v3161_v15 = vmul.f32 0.05, %v2981_v17  ;;  %v3233_v55 = vmul.f32 0.05, %v3125_v53  ;;  %v2724_v57 = vadd.f32 %v6977_v44, %v2355_v48  ;;  %v7728_v46 = vld [vmem:[#allocation88_spill] sm:$0xff] }
 0x38b   :  { %v7721_v32 = vmax.f32 %v7719_v9, %v7720_v22 }
 0x38c   :  { %v3418_v54 = vpack.c.bf16 %v3382_v8, %v3382_v8  ;;  %v3197_v1 = vmax.f32 %v2981_v17, %v3161_v15  ;;  %v3269_v58 = vmax.f32 %v3125_v53, %v3233_v55  ;;  %v2909_v31 = vmax.f32 %v2724_v57, %v2814_v23  ;;  %v7723_v17 = vld [vmem:[#allocation32_spill] sm:$0xff] }
 0x38d   :  { %v3054_v63 = vmin.f32 %v2724_v57, %v2814_v23  ;;  %v2731_v33 = vpop.f32.mrf.mxu2  ;;  %v2823_v20 = vpop.f32.mrf.mxu3  ;;  %v2450_v53 = vadd.f32 %v6138_v29, %v7723_v17 }
 0x38e   :  { %3455 = vst.msk [vmem:[%s7414_s3 + $0x4c] sm:$0xf] %vm3435_vm3, %v3418_v54  ;;  %v3309_v26 = vsel %vm6502_vm2, %v3197_v1, %v3269_v58  ;;  %v2945_v44 = vmax.f32 %v7715_v7, %v2909_v31  ;;  %v1988_v19 = vpop.f32.mrf.mxu0 }
 0x38f   :  { %v3090_v28 = vmin.f32 %v7716_v2, %v3054_v63  ;;  %v3346_v4 = vmul.f32 %v6506_v14, %v3309_v26  ;;  %v2357_v18 = vpop.f32.mrf.mxu1  ;;  %v2819_v55 = vadd.f32 %v7016_v0, %v2450_v53 }
 0x390   :  { %v2982_v61 = vadd.f32 %v6472_v30, %v2945_v44  ;;  %v2358_v11 = vadd.f32 %v2357_v18, %v1988_v19  ;;  %v7724_v44 = vld [vmem:[#allocation86_spill] sm:$0xff] }
 0x391   :  { %v3126_v62 = vadd.f32 %v3090_v28, %v6472_v30  ;;  %v3383_v56 = vadd.f32 %v6514_v24, %v3346_v4  ;;  %v7725_v0 = vmax.f32 %v5425_v59, %v7724_v44 }
 0x392   :  { %v3162_v12 = vmul.f32 0.05, %v2982_v61  ;;  %v2727_v51 = vadd.f32 %v2726_v41, %v2358_v11  ;;  %v7722_v41 = vmin.f32 %v7719_v9, %v7720_v22  ;;  %v7729_v22 = vld [vmem:[#allocation33_spill] sm:$0xff] }
 0x393   :  { %v3234_v21 = vmul.f32 0.05, %v3126_v62  ;;  %v3419_v36 = vpack.c.bf16 %v3383_v56, %v3383_v56 }
 0x394   :  { %v3198_v25 = vmax.f32 %v2982_v61, %v3162_v12  ;;  %v2910_v60 = vmax.f32 %v2727_v51, %v2817_v6  ;;  %v3055_v5 = vmin.f32 %v2727_v51, %v2817_v6  ;;  %v2453_v61 = vadd.f32 %v7728_v46, %v7727_v27 }
 0x395   :  { %v3270_v40 = vmax.f32 %v3126_v62, %v3234_v21  ;;  %3456 = vst.msk [vmem:[%s7414_s3 + $0x50] sm:$0xf] %vm3435_vm3, %v3419_v36  ;;  %v2733_v47 = vpop.f32.mrf.mxu2  ;;  %v2826_v18 = vpop.f32.mrf.mxu3 }
 0x396   :  { %v2946_v52 = vmax.f32 %v7721_v32, %v2910_v60  ;;  %v3091_v34 = vmin.f32 %v7722_v41, %v3055_v5  ;;  %v1990_v43 = vpop.f32.mrf.mxu0  ;;  %v2822_v12 = vadd.f32 %v7040_v50, %v2453_v61  ;;  %v7730_v32 = vld [vmem:[#allocation87_spill] sm:$0xff] }
 0x397   :  { %v3310_v38 = vsel %vm6502_vm2, %v3198_v25, %v3270_v40  ;;  %v2359_v39 = vpop.f32.mrf.mxu1  ;;  %v7731_v50 = vmax.f32 %v7729_v22, %v7730_v32 }
 0x398   :  { %v3347_v10 = vmul.f32 %v6506_v14, %v3310_v38  ;;  %v2983_v48 = vadd.f32 %v6472_v30, %v2946_v52  ;;  %v3127_v8 = vadd.f32 %v3091_v34, %v6472_v30  ;;  %v2360_v23 = vadd.f32 %v2359_v39, %v1990_v43  ;;  %v7733_v39 = vld [vmem:[#allocation35_spill] sm:$0xff] }
 0x399   :  { %v2455_v17 = vadd.f32 %v6180_v45, %v7733_v39 }
 0x39a   :  { %v3384_v15 = vadd.f32 %v6514_v24, %v3347_v10  ;;  %v3163_v57 = vmul.f32 0.05, %v2983_v48  ;;  %v3235_v54 = vmul.f32 0.05, %v3127_v8  ;;  %v2729_v1 = vadd.f32 %v2728_v37, %v2360_v23 }
 0x39b   :  { %v7726_v37 = vmin.f32 %v5425_v59, %v7724_v44  ;;  %v7734_v44 = vld [vmem:[#allocation89_spill] sm:$0xff] }
 0x39c   :  { %v3420_v58 = vpack.c.bf16 %v3384_v15, %v3384_v15  ;;  %v3199_v31 = vmax.f32 %v2983_v48, %v3163_v57  ;;  %v3271_v63 = vmax.f32 %v3127_v8, %v3235_v54  ;;  %v2911_v26 = vmax.f32 %v2729_v1, %v2819_v55 }
 0x39d   :  { %v3056_v16 = vmin.f32 %v2729_v1, %v2819_v55  ;;  %v2736_v29 = vpop.f32.mrf.mxu2  ;;  %v2828_v15 = vpop.f32.mrf.mxu3  ;;  %v2824_v55 = vadd.f32 %v2823_v20, %v2455_v17  ;;  %v7735_v20 = vmax.f32 %v5458_v35, %v7734_v44 }
 0x39e   :  { %3457 = vst.msk [vmem:[%s7414_s3 + $0x54] sm:$0xf] %vm3435_vm3, %v3420_v58  ;;  %v3311_v7 = vsel %vm6502_vm2, %v3199_v31, %v3271_v63  ;;  %v2947_v2 = vmax.f32 %v7725_v0, %v2911_v26  ;;  %v1993_v19 = vpop.f32.mrf.mxu0 }
 0x39f   :  { %v3092_v28 = vmin.f32 %v7726_v37, %v3056_v16  ;;  %v3348_v4 = vmul.f32 %v6506_v14, %v3311_v7  ;;  %v2362_v13 = vpop.f32.mrf.mxu1 }
 0x3a0   :  { %v2984_v62 = vadd.f32 %v6472_v30, %v2947_v2  ;;  %v2363_v56 = vadd.f32 %v2362_v13, %v1993_v19  ;;  %v7738_v13 = vld [vmem:[#allocation91_spill] sm:$0xff] }
 0x3a1   :  { %v3128_v11 = vadd.f32 %v3092_v28, %v6472_v30  ;;  %v3385_v6 = vadd.f32 %v6514_v24, %v3348_v4  ;;  %v7737_v4 = vld [vmem:[#allocation37_spill] sm:$0xff] }
 0x3a2   :  { %v3164_v21 = vmul.f32 0.05, %v2984_v62  ;;  %v2732_v51 = vadd.f32 %v2731_v33, %v2363_v56  ;;  %v7732_v33 = vmin.f32 %v7729_v22, %v7730_v32  ;;  %v2458_v27 = vadd.f32 %v7738_v13, %v7737_v4 }
 0x3a3   :  { %v3236_v59 = vmul.f32 0.05, %v3128_v11  ;;  %v3421_v36 = vpack.c.bf16 %v3385_v6, %v3385_v6 }
 0x3a4   :  { %v3200_v25 = vmax.f32 %v2984_v62, %v3164_v21  ;;  %v2912_v60 = vmax.f32 %v2732_v51, %v2822_v12  ;;  %v3057_v5 = vmin.f32 %v2732_v51, %v2822_v12  ;;  %v2827_v56 = vadd.f32 %v2826_v18, %v2458_v27  ;;  %v7740_v18 = vld [vmem:[#allocation90_spill] sm:$0xff] }
 0x3a5   :  { %v3272_v40 = vmax.f32 %v3128_v11, %v3236_v59  ;;  %3458 = vst.msk [vmem:[%s7414_s3 + $0x58] sm:$0xf] %vm3435_vm3, %v3421_v36  ;;  %v2738_v38 = vpop.f32.mrf.mxu2  ;;  %v2831_v59 = vpop.f32.mrf.mxu3 }
 0x3a6   :  { %v2948_v52 = vmax.f32 %v7731_v50, %v2912_v60  ;;  %v3093_v41 = vmin.f32 %v7732_v33, %v3057_v5  ;;  %v1995_v34 = vpop.f32.mrf.mxu0 }
 0x3a7   :  { %v3312_v9 = vsel %vm6502_vm2, %v3200_v25, %v3272_v40  ;;  %v2364_v10 = vpop.f32.mrf.mxu1 }
 0x3a8   :  { %v3349_v43 = vmul.f32 %v6506_v14, %v3312_v9  ;;  %v2985_v53 = vadd.f32 %v6472_v30, %v2948_v52  ;;  %v3129_v48 = vadd.f32 %v3093_v41, %v6472_v30  ;;  %v2365_v8 = vadd.f32 %v2364_v10, %v1995_v34  ;;  %v7739_v9 = vld [vmem:[#allocation36_spill] sm:$0xff]  ;;  %v7743_v34 = vld [vmem:[#allocation38_spill] sm:$0xff] }
 0x3a9   :  { %v7741_v22 = vmax.f32 %v7739_v9, %v7740_v18 }
 0x3aa   :  { %v3386_v23 = vadd.f32 %v6514_v24, %v3349_v43  ;;  %v3165_v57 = vmul.f32 0.05, %v2985_v53  ;;  %v3237_v54 = vmul.f32 0.05, %v3129_v48  ;;  %v2734_v1 = vadd.f32 %v2733_v47, %v2365_v8 }
 0x3ab   :  { %v7736_v47 = vmin.f32 %v5458_v35, %v7734_v44  ;;  %v2460_v43 = vadd.f32 %v6222_v42, %v7743_v34 }
 0x3ac   :  { %v3422_v58 = vpack.c.bf16 %v3386_v23, %v3386_v23  ;;  %v3201_v31 = vmax.f32 %v2985_v53, %v3165_v57  ;;  %v3273_v63 = vmax.f32 %v3129_v48, %v3237_v54  ;;  %v2913_v26 = vmax.f32 %v2734_v1, %v2824_v55 }
 0x3ad   :  { %v3058_v16 = vmin.f32 %v2734_v1, %v2824_v55  ;;  %v2741_v45 = vpop.f32.mrf.mxu2  ;;  %v2829_v48 = vadd.f32 %v2828_v15, %v2460_v43  ;;  %v2833_v42 = vpop.f32.mrf.mxu3  ;;  %v7744_v15 = vld [vmem:[#allocation92_spill] sm:$0xff] }
 0x3ae   :  { %3459 = vst.msk [vmem:[%s7414_s3 + $0x5c] sm:$0xf] %vm3435_vm3, %v3422_v58  ;;  %v3313_v7 = vsel %vm6502_vm2, %v3201_v31, %v3273_v63  ;;  %v2949_v0 = vmax.f32 %v7735_v20, %v2913_v26  ;;  %v1998_v37 = vpop.f32.mrf.mxu0 }
 0x3af   :  { %v3094_v2 = vmin.f32 %v7736_v47, %v3058_v16  ;;  %v3350_v28 = vmul.f32 %v6506_v14, %v3313_v7  ;;  %v2367_v19 = vpop.f32.mrf.mxu1  ;;  %v7745_v16 = vmax.f32 %v5491_v3, %v7744_v15 }
 0x3b0   :  { %v2986_v46 = vadd.f32 %v6472_v30, %v2949_v0  ;;  %v2368_v62 = vadd.f32 %v2367_v19, %v1998_v37  ;;  %v7748_v37 = vld [vmem:[#allocation94_spill] sm:$0xff] }
 0x3b1   :  { %v3130_v61 = vadd.f32 %v3094_v2, %v6472_v30  ;;  %v3387_v11 = vadd.f32 %v6514_v24, %v3350_v28  ;;  %v7747_v2 = vld [vmem:[#allocation40_spill] sm:$0xff] }
 0x3b2   :  { %v3166_v6 = vmul.f32 0.05, %v2986_v46  ;;  %v2737_v21 = vadd.f32 %v2736_v29, %v2368_v62  ;;  %v7742_v29 = vmin.f32 %v7739_v9, %v7740_v18  ;;  %v2463_v28 = vadd.f32 %v7748_v37, %v7747_v2 }
 0x3b3   :  { %v3238_v12 = vmul.f32 0.05, %v3130_v61  ;;  %v3423_v35 = vpack.c.bf16 %v3387_v11, %v3387_v11 }
 0x3b4   :  { %v3202_v51 = vmax.f32 %v2986_v46, %v3166_v6  ;;  %v2914_v25 = vmax.f32 %v2737_v21, %v2827_v56  ;;  %v3059_v40 = vmin.f32 %v2737_v21, %v2827_v56  ;;  %v2832_v46 = vadd.f32 %v2831_v59, %v2463_v28 }
 0x3b5   :  { %v3274_v36 = vmax.f32 %v3130_v61, %v3238_v12  ;;  %3460 = vst.msk [vmem:[%s7414_s3 + $0x60] sm:$0xf] %vm3435_vm3, %v3423_v35  ;;  %v2743_v60 = vpop.f32.mrf.mxu2  ;;  %v2836_v18 = vpop.f32.mrf.mxu3 }
 0x3b6   :  { %v2950_v32 = vmax.f32 %v7741_v22, %v2914_v25  ;;  %v3095_v50 = vmin.f32 %v7742_v29, %v3059_v40  ;;  %v2000_v52 = vpop.f32.mrf.mxu0  ;;  %v7750_v25 = vld [vmem:[#allocation93_spill] sm:$0xff]  ;;  %v7753_v29 = vld [vmem:[#allocation42_spill] sm:$0xff] }
 0x3b7   :  { %v3314_v5 = vsel %vm6502_vm2, %v3202_v51, %v3274_v36  ;;  %v2369_v41 = vpop.f32.mrf.mxu1  ;;  %v7749_v36 = vld [vmem:[#allocation39_spill] sm:$0xff] }
 0x3b8   :  { %v3351_v33 = vmul.f32 %v6506_v14, %v3314_v5  ;;  %v2987_v10 = vadd.f32 %v6472_v30, %v2950_v32  ;;  %v3131_v39 = vadd.f32 %v3095_v50, %v6472_v30  ;;  %v2370_v17 = vadd.f32 %v2369_v41, %v2000_v52  ;;  %v7754_v50 = vld [vmem:[#allocation96_spill] sm:$0xff] }
 0x3b9   :  { %v7751_v59 = vmax.f32 %v7749_v36, %v7750_v25  ;;  %v2465_v52 = vadd.f32 %v7754_v50, %v7753_v29 }
 0x3ba   :  { %v3388_v53 = vadd.f32 %v6514_v24, %v3351_v33  ;;  %v3167_v8 = vmul.f32 0.05, %v2987_v10  ;;  %v3239_v23 = vmul.f32 0.05, %v3131_v39  ;;  %v2739_v55 = vadd.f32 %v2738_v38, %v2370_v17 }
 0x3bb   :  { %v7746_v38 = vmin.f32 %v5491_v3, %v7744_v15 }
 0x3bc   :  { %v3424_v57 = vpack.c.bf16 %v3388_v53, %v3388_v53  ;;  %v3203_v54 = vmax.f32 %v2987_v10, %v3167_v8  ;;  %v3275_v1 = vmax.f32 %v3131_v39, %v3239_v23  ;;  %v2915_v58 = vmax.f32 %v2739_v55, %v2829_v48 }
 0x3bd   :  { %v3060_v31 = vmin.f32 %v2739_v55, %v2829_v48  ;;  %v2746_v63 = vpop.f32.mrf.mxu2  ;;  %v2834_v10 = vadd.f32 %v2833_v42, %v2465_v52  ;;  %v2838_v28 = vpop.f32.mrf.mxu3 }
 0x3be   :  { %3461 = vst.msk [vmem:[%s7414_s3 + $0x64] sm:$0xf] %vm3435_vm3, %v3424_v57  ;;  %v3315_v26 = vsel %vm6502_vm2, %v3203_v54, %v3275_v1  ;;  %v2951_v7 = vmax.f32 %v7745_v16, %v2915_v58  ;;  %v2003_v20 = vpop.f32.mrf.mxu0  ;;  %v7755_v58 = vld [vmem:[#allocation41_spill] sm:$0xff] }
 0x3bf   :  { %v3096_v44 = vmin.f32 %v7746_v38, %v3060_v31  ;;  %v3352_v0 = vmul.f32 %v6506_v14, %v3315_v26  ;;  %v2372_v47 = vpop.f32.mrf.mxu1  ;;  %v7756_v31 = vld [vmem:[#allocation95_spill] sm:$0xff] }
 0x3c0   :  { %v2988_v19 = vadd.f32 %v6472_v30, %v2951_v7  ;;  %v2373_v13 = vadd.f32 %v2372_v47, %v2003_v20  ;;  %v7757_v42 = vmax.f32 %v7755_v58, %v7756_v31  ;;  %v7760_v20 = vld [vmem:[#allocation98_spill] sm:$0xff] }
 0x3c1   :  { %v3132_v4 = vadd.f32 %v3096_v44, %v6472_v30  ;;  %v3389_v27 = vadd.f32 %v6514_v24, %v3352_v0  ;;  %v7759_v44 = vld [vmem:[#allocation44_spill] sm:$0xff] }
 0x3c2   :  { %v3168_v61 = vmul.f32 0.05, %v2988_v19  ;;  %v2742_v11 = vadd.f32 %v2741_v45, %v2373_v13  ;;  %v7752_v45 = vmin.f32 %v7749_v36, %v7750_v25  ;;  %v2468_v0 = vadd.f32 %v7760_v20, %v7759_v44 }
 0x3c3   :  { %v3240_v62 = vmul.f32 0.05, %v3132_v4  ;;  %v3425_v3 = vpack.c.bf16 %v3389_v27, %v3389_v27 }
 0x3c4   :  { %v3204_v56 = vmax.f32 %v2988_v19, %v3168_v61  ;;  %v2916_v12 = vmax.f32 %v2742_v11, %v2832_v46  ;;  %v3061_v21 = vmin.f32 %v2742_v11, %v2832_v46 }
 0x3c5   :  { %v3276_v6 = vmax.f32 %v3132_v4, %v3240_v62  ;;  %3462 = vst.msk [vmem:[%s7414_s3 + $0x68] sm:$0xf] %vm3435_vm3, %v3425_v3  ;;  %v2748_v35 = vpop.f32.mrf.mxu2  ;;  %v2837_v4 = vadd.f32 %v2836_v18, %v2468_v0  ;;  %v7766_v18 = vld [vmem:[#allocation100_spill] sm:$0xff] }
 0x3c6   :  { %v2952_v40 = vmax.f32 %v7751_v59, %v2916_v12  ;;  %v3097_v5 = vmin.f32 %v7752_v45, %v3061_v21  ;;  %v2005_v9 = vpop.f32.mrf.mxu0  ;;  %v7761_v21 = vld [vmem:[#allocation43_spill] sm:$0xff] }
 0x3c7   :  { %v3316_v51 = vsel %vm6502_vm2, %v3204_v56, %v3276_v6  ;;  %v2374_v32 = vpop.f32.mrf.mxu1 }
 0x3c8   :  { %v3353_v22 = vmul.f32 %v6506_v14, %v3316_v51  ;;  %v2989_v33 = vadd.f32 %v6472_v30, %v2952_v40  ;;  %v3133_v41 = vadd.f32 %v3097_v5, %v6472_v30  ;;  %v2375_v34 = vadd.f32 %v2374_v32, %v2005_v9  ;;  %v7762_v51 = vld [vmem:[#allocation97_spill] sm:$0xff]  ;;  %v7765_v9 = vld [vmem:[#allocation46_spill] sm:$0xff] }
 0x3c9   :  { %v7763_v36 = vmax.f32 %v7761_v21, %v7762_v51 }
 0x3ca   :  { %v3390_v43 = vadd.f32 %v6514_v24, %v3353_v22  ;;  %v3169_v39 = vmul.f32 0.05, %v2989_v33  ;;  %v3241_v17 = vmul.f32 0.05, %v3133_v41  ;;  %v2744_v53 = vadd.f32 %v2743_v60, %v2375_v34 }
 0x3cb   :  { %v7758_v60 = vmin.f32 %v7755_v58, %v7756_v31  ;;  %v2470_v22 = vadd.f32 %v7766_v18, %v7765_v9 }
 0x3cc   :  { %v3426_v48 = vpack.c.bf16 %v3390_v43, %v3390_v43  ;;  %v3205_v8 = vmax.f32 %v2989_v33, %v3169_v39  ;;  %v3277_v23 = vmax.f32 %v3133_v41, %v3241_v17  ;;  %v2917_v55 = vmax.f32 %v2744_v53, %v2834_v10 }
 0x3cd   :  { %v3062_v57 = vmin.f32 %v2744_v53, %v2834_v10  ;;  %v2751_v54 = vpop.f32.mrf.mxu2  ;;  %v2839_v33 = vadd.f32 %v2838_v28, %v2470_v22  ;;  %v2841_v10 = vpop.f32.mrf.mxu3 }
 0x3ce   :  { %3463 = vst.msk [vmem:[%s7414_s3 + $0x6c] sm:$0xf] %vm3435_vm3, %v3426_v48  ;;  %v3317_v1 = vsel %vm6502_vm2, %v3205_v8, %v3277_v23  ;;  %v2953_v26 = vmax.f32 %v7757_v42, %v2917_v55  ;;  %v2008_v16 = vpop.f32.mrf.mxu0 }
 0x3cf   :  { %v3098_v15 = vmin.f32 %v7758_v60, %v3062_v57  ;;  %v3354_v7 = vmul.f32 %v6506_v14, %v3317_v1  ;;  %v2377_v38 = vpop.f32.mrf.mxu1  ;;  %v7767_v57 = vld [vmem:[#allocation45_spill] sm:$0xff]  ;;  %v7768_v1 = vld [vmem:[#allocation99_spill] sm:$0xff] }
 0x3d0   :  { %v2990_v47 = vadd.f32 %v6472_v30, %v2953_v26  ;;  %v2378_v37 = vadd.f32 %v2377_v38, %v2008_v16  ;;  %v7769_v58 = vmax.f32 %v7767_v57, %v7768_v1  ;;  %v7770_v31 = vmin.f32 %v7767_v57, %v7768_v1  ;;  %v7771_v16 = vld [vmem:[#allocation48_spill] sm:$0xff]  ;;  %v7781_v57 = vld [vmem:[#allocation49_spill] sm:$0xff]  ;;  %v7782_v1 = vld [vmem:[#allocation103_spill] sm:$0xff] }
 0x3d1   :  { %v3134_v2 = vadd.f32 %v3098_v15, %v6472_v30  ;;  %v3391_v19 = vadd.f32 %v6514_v24, %v3354_v7  ;;  %v7772_v7 = vld [vmem:[#allocation102_spill] sm:$0xff] }
 0x3d2   :  { %v3170_v13 = vmul.f32 0.05, %v2990_v47  ;;  %v2747_v46 = vadd.f32 %v2746_v63, %v2378_v37  ;;  %v7764_v63 = vmin.f32 %v7761_v21, %v7762_v51  ;;  %v2473_v38 = vadd.f32 %v7772_v7, %v7771_v16 }
 0x3d3   :  { %v3242_v27 = vmul.f32 0.05, %v3134_v2  ;;  %v3427_v61 = vpack.c.bf16 %v3391_v19, %v3391_v19 }
 0x3d4   :  { %v3206_v62 = vmax.f32 %v2990_v47, %v3170_v13  ;;  %v2918_v3 = vmax.f32 %v2747_v46, %v2837_v4  ;;  %v3063_v56 = vmin.f32 %v2747_v46, %v2837_v4 }
 0x3d5   :  { %v3278_v11 = vmax.f32 %v3134_v2, %v3242_v27  ;;  %3464 = vst.msk [vmem:[%s7414_s3 + $0x70] sm:$0xf] %vm3435_vm3, %v3427_v61  ;;  %v2753_v6 = vpop.f32.mrf.mxu2  ;;  %v2842_v2 = vadd.f32 %v2841_v10, %v2473_v38 }
 0x3d6   :  { %v2954_v25 = vmax.f32 %v7763_v36, %v2918_v3  ;;  %v3099_v59 = vmin.f32 %v7764_v63, %v3063_v56  ;;  %v2010_v40 = vpop.f32.mrf.mxu0  ;;  %v7773_v56 = vld [vmem:[#allocation47_spill] sm:$0xff] }
 0x3d7   :  { %v3318_v12 = vsel %vm6502_vm2, %v3206_v62, %v3278_v11  ;;  %v2379_v5 = vpop.f32.mrf.mxu1  ;;  %v2843_v62 = vpop.f32.mrf.mxu3 }
 0x3d8   :  { %v3355_v45 = vmul.f32 %v6506_v14, %v3318_v12  ;;  %v2991_v32 = vadd.f32 %v6472_v30, %v2954_v25  ;;  %v3135_v29 = vadd.f32 %v3099_v59, %v6472_v30  ;;  %v2380_v50 = vadd.f32 %v2379_v5, %v2010_v40  ;;  %v7774_v12 = vld [vmem:[#allocation101_spill] sm:$0xff]  ;;  %v7777_v40 = vld [vmem:[#allocation50_spill] sm:$0xff] }
 0x3d9   :  { %v7775_v21 = vmax.f32 %v7773_v56, %v7774_v12  ;;  %v7776_v51 = vmin.f32 %v7773_v56, %v7774_v12  ;;  %v7792_v12 = vld [vmem:[#allocation5_spill] sm:$0xff] }
 0x3da   :  { %v3392_v52 = vadd.f32 %v6514_v24, %v3355_v45  ;;  %v3171_v41 = vmul.f32 0.05, %v2991_v32  ;;  %v3243_v34 = vmul.f32 0.05, %v3135_v29  ;;  %v2749_v43 = vadd.f32 %v2748_v35, %v2380_v50  ;;  %v7778_v45 = vld [vmem:[#allocation104_spill] sm:$0xff] }
 0x3db   :  { %v2475_v5 = vadd.f32 %v7778_v45, %v7777_v40 }
 0x3dc   :  { %v3428_v39 = vpack.c.bf16 %v3392_v52, %v3392_v52  ;;  %v3207_v17 = vmax.f32 %v2991_v32, %v3171_v41  ;;  %v3279_v53 = vmax.f32 %v3135_v29, %v3243_v34  ;;  %v2919_v48 = vmax.f32 %v2749_v43, %v2839_v33  ;;  %v7779_v41 = vld [vmem:[#allocation3_spill] sm:$0xff]  ;;  %v7780_v34 = vld [vmem:[#allocation56_spill] sm:$0xff] }
 0x3dd   :  { %v3064_v8 = vmin.f32 %v2749_v43, %v2839_v33  ;;  %v7229_v23 = vpop.f32.mrf.mxu2  ;;  %v2844_v29 = vadd.f32 %v2843_v62, %v2475_v5  ;;  %v2393_v43 = vadd.f32 %v7780_v34, %v7779_v41  ;;  %v7795_v41 = vld [vmem:[#allocation105_spill] sm:$0xff] }
 0x3de   :  { %3465 = vst.msk [vmem:[%s7414_s3 + $0x74] sm:$0xf] %vm3435_vm3, %v3428_v39  ;;  %v3319_v55 = vsel %vm6502_vm2, %v3207_v17, %v3279_v53  ;;  %v2955_v35 = vmax.f32 %v7769_v58, %v2919_v48  ;;  %v2013_v26 = vpop.f32.mrf.mxu0 }
 0x3df   :  { %v3100_v42 = vmin.f32 %v7770_v31, %v3064_v8  ;;  %v3356_v60 = vmul.f32 %v6506_v14, %v3319_v55  ;;  %v2382_v15 = vpop.f32.mrf.mxu1 }
 0x3e0   :  { %v2992_v44 = vadd.f32 %v6472_v30, %v2955_v35  ;;  %v2383_v0 = vadd.f32 %v2382_v15, %v2013_v26  ;;  %v7784_v35 = vmin.f32 %v7781_v57, %v7782_v1 }
 0x3e1   :  { %v3136_v20 = vadd.f32 %v3100_v42, %v6472_v30  ;;  %v3393_v47 = vadd.f32 %v6514_v24, %v3356_v60  ;;  %v2846_v60 = vpop.f32.mrf.mxu3 }
 0x3e2   :  { %v3172_v37 = vmul.f32 0.05, %v2992_v44  ;;  %v2752_v19 = vadd.f32 %v2751_v54, %v2383_v0 }
 0x3e3   :  { %v3244_v28 = vmul.f32 0.05, %v3136_v20  ;;  %v3429_v4 = vpack.c.bf16 %v3393_v47, %v3393_v47  ;;  %v7786_v47 = vld [vmem:[#allocation52_spill] sm:$0xff] }
 0x3e4   :  { %v3208_v13 = vmax.f32 %v2992_v44, %v3172_v37  ;;  %v2920_v46 = vmax.f32 %v2752_v19, %v2842_v2  ;;  %v3065_v61 = vmin.f32 %v2752_v19, %v2842_v2  ;;  %v7785_v44 = vld [vmem:[#allocation109_spill] sm:$0xff]  ;;  %v7787_v2 = vld [vmem:[#allocation106_spill] sm:$0xff] }
 0x3e5   :  { %v3280_v27 = vmax.f32 %v3136_v20, %v3244_v28  ;;  %3466 = vst.msk [vmem:[%s7414_s3 + $0x78] sm:$0xf] %vm3435_vm3, %v3429_v4  ;;  %v7249_v11 = vpop.f32.mrf.mxu2  ;;  %v2478_v37 = vadd.f32 %v7787_v2, %v7786_v47 }
 0x3e6   :  { %v2956_v54 = vmax.f32 %v7775_v21, %v2920_v46  ;;  %v3101_v36 = vmin.f32 %v7776_v51, %v3065_v61  ;;  %v2015_v25 = vpop.f32.mrf.mxu0  ;;  %v7789_v46 = vld [vmem:[#allocation55_spill] sm:$0xff]  ;;  %v7793_v21 = vld [vmem:[#allocation58_spill] sm:$0xff] }
 0x3e7   :  { %v3320_v3 = vsel %vm6502_vm2, %v3208_v13, %v3280_v27  ;;  %v2384_v59 = vpop.f32.mrf.mxu1  ;;  %v7788_v27 = vld [vmem:[#allocation2_spill] sm:$0xff]  ;;  %v2847_v51 = vadd.f32 %v2846_v60, %v2478_v37 }
 0x3e8   :  { %v3357_v63 = vmul.f32 %v6506_v14, %v3320_v3  ;;  %v2993_v9 = vadd.f32 %v6472_v30, %v2956_v54  ;;  %v3137_v18 = vadd.f32 %v3101_v36, %v6472_v30  ;;  %v2385_v22 = vadd.f32 %v2384_v59, %v2015_v25 }
 0x3e9   :  { %v7790_v61 = vmax.f32 %v7788_v27, %v7789_v46  ;;  %v7791_v3 = vmin.f32 %v7788_v27, %v7789_v46  ;;  %v2395_v54 = vadd.f32 %v7793_v21, %v7792_v12  ;;  %v7805_v46 = vld [vmem:[#allocation7_spill] sm:$0xff] }
 0x3ea   :  { %v3394_v32 = vadd.f32 %v6514_v24, %v3357_v63  ;;  %v3173_v50 = vmul.f32 0.05, %v2993_v9  ;;  %v3245_v52 = vmul.f32 0.05, %v3137_v18  ;;  %v2754_v33 = vadd.f32 %v2753_v6, %v2385_v22 }
 0x3eb   :  { %v7783_v6 = vmax.f32 %v7781_v57, %v7782_v1  ;;  %v2848_v1 = vpop.f32.mrf.mxu3 }
 0x3ec   :  { %v3430_v10 = vpack.c.bf16 %v3394_v32, %v3394_v32  ;;  %v3209_v39 = vmax.f32 %v2993_v9, %v3173_v50  ;;  %v3281_v17 = vmax.f32 %v3137_v18, %v3245_v52  ;;  %v2921_v53 = vmax.f32 %v2754_v33, %v2844_v29 }
 0x3ed   :  { %v3066_v48 = vmin.f32 %v2754_v33, %v2844_v29  ;;  %v2761_v8 = vpop.f32.mrf.mxu2  ;;  %v7794_v33 = vld [vmem:[#allocation51_spill] sm:$0xff] }
 0x3ee   :  { %3467 = vst.msk [vmem:[%s7414_s3 + $0x7c] sm:$0xf] %vm3435_vm3, %v3430_v10  ;;  %v3321_v55 = vsel %vm6502_vm2, %v3209_v39, %v3281_v17  ;;  %v2957_v58 = vmax.f32 %v7783_v6, %v2921_v53  ;;  %v2762_v42 = vadd.f32 %v2761_v8, %v2393_v43  ;;  %v2018_v26 = vpop.f32.mrf.mxu0  ;;  %v7796_v34 = vmax.f32 %v7794_v33, %v7795_v41  ;;  %v7798_v8 = vld [vmem:[#allocation110_spill] sm:$0xff] }
 0x3ef   :  { %v3102_v31 = vmin.f32 %v7784_v35, %v3066_v48  ;;  %v3358_v15 = vmul.f32 %v6506_v14, %v3321_v55  ;;  %v2387_v16 = vpop.f32.mrf.mxu1  ;;  %v7797_v10 = vmin.f32 %v7794_v33, %v7795_v41 }
 0x3f0   :  { %v2994_v7 = vadd.f32 %v6472_v30, %v2957_v58  ;;  %v2888_v20 = vmax.f32 %v7785_v44, %v2762_v42  ;;  %v3033_v0 = vmin.f32 %v7785_v44, %v2762_v42  ;;  %v2388_v19 = vadd.f32 %v2387_v16, %v2018_v26  ;;  %v7799_v42 = vld [vmem:[#allocation54_spill] sm:$0xff]  ;;  %v7800_v26 = vld [vmem:[#allocation108_spill] sm:$0xff] }
 0x3f1   :  { %v3138_v38 = vadd.f32 %v3102_v31, %v6472_v30  ;;  %v3395_v28 = vadd.f32 %v6514_v24, %v3358_v15  ;;  %v2480_v60 = vadd.f32 %v7800_v26, %v7799_v42  ;;  %v7801_v16 = vld [vmem:[#allocation4_spill] sm:$0xff] }
 0x3f2   :  { %v3174_v4 = vmul.f32 0.05, %v2994_v7  ;;  %v2924_v62 = vmax.f32 %v7790_v61, %v2888_v20  ;;  %v3069_v56 = vmin.f32 %v7791_v3, %v3033_v0  ;;  %v2757_v25 = vadd.f32 %v7229_v23, %v2388_v19  ;;  %v7806_v61 = vld [vmem:[#allocation60_spill] sm:$0xff] }
 0x3f3   :  { %v3246_v13 = vmul.f32 0.05, %v3138_v38  ;;  %v3431_v36 = vpack.c.bf16 %v3395_v28, %v3395_v28  ;;  %v2849_v19 = vadd.f32 %v2848_v1, %v2480_v60  ;;  %v7816_v1 = vld [vmem:[#allocation9_spill] sm:$0xff] }
 0x3f4   :  { %v3210_v63 = vmax.f32 %v2994_v7, %v3174_v4  ;;  %v2961_v40 = vadd.f32 %v6472_v30, %v2924_v62  ;;  %v3105_v45 = vadd.f32 %v3069_v56, %v6472_v30  ;;  %v2922_v5 = vmax.f32 %v2757_v25, %v2847_v51  ;;  %v7802_v7 = vld [vmem:[#allocation57_spill] sm:$0xff] }
 0x3f5   :  { %v3282_v59 = vmax.f32 %v3138_v38, %v3246_v13  ;;  %3468 = vst.msk [vmem:[%s7414_s3 + $0x80] sm:$0xf] %vm3435_vm3, %v3431_v36  ;;  %v3067_v9 = vmin.f32 %v2757_v25, %v2847_v51  ;;  %v2763_v18 = vpop.f32.mrf.mxu2  ;;  %v7803_v38 = vmax.f32 %v7801_v16, %v7802_v7  ;;  %v7804_v20 = vmin.f32 %v7801_v16, %v7802_v7 }
 0x3f6   :  { %v3141_v32 = vmul.f32 0.05, %v2961_v40  ;;  %v3213_v29 = vmul.f32 0.05, %v3105_v45  ;;  %v2764_v23 = vadd.f32 %v2763_v18, %v2395_v54  ;;  %v2020_v50 = vpop.f32.mrf.mxu0  ;;  %v2958_v43 = vmax.f32 %v7796_v34, %v2922_v5  ;;  %v7808_v18 = vld [vmem:[#allocation107_spill] sm:$0xff] }
 0x3f7   :  { %v3322_v22 = vsel %vm6502_vm2, %v3210_v63, %v3282_v59  ;;  %v3103_v39 = vmin.f32 %v7797_v10, %v3067_v9  ;;  %v2389_v17 = vpop.f32.mrf.mxu1  ;;  %v2398_v62 = vadd.f32 %v7806_v61, %v7805_v46  ;;  %v7807_v9 = vld [vmem:[#allocation53_spill] sm:$0xff]  ;;  %v7819_v46 = vld [vmem:[#allocation8_spill] sm:$0xff] }
 0x3f8   :  { %v3359_v52 = vmul.f32 %v6506_v14, %v3322_v22  ;;  %v3177_v53 = vmax.f32 %v2961_v40, %v3141_v32  ;;  %v3249_v48 = vmax.f32 %v3105_v45, %v3213_v29  ;;  %v2889_v55 = vmax.f32 %v7798_v8, %v2764_v23  ;;  %v7820_v61 = vld [vmem:[#allocation61_spill] sm:$0xff] }
 0x3f9   :  { %v3034_v57 = vmin.f32 %v7798_v8, %v2764_v23  ;;  %v2995_v58 = vadd.f32 %v6472_v30, %v2958_v43  ;;  %v3139_v35 = vadd.f32 %v3103_v39, %v6472_v30  ;;  %v2390_v31 = vadd.f32 %v2389_v17, %v2020_v50  ;;  %v7811_v50 = vld [vmem:[#allocation111_spill] sm:$0xff]  ;;  %v7812_v17 = vld [vmem:[#allocation6_spill] sm:$0xff] }
 0x3fa   :  { %v3396_v6 = vadd.f32 %v6514_v24, %v3359_v52  ;;  %v3289_v15 = vsel %vm6502_vm2, %v3177_v53, %v3249_v48  ;;  %v2925_v44 = vmax.f32 %v7803_v38, %v2889_v55  ;;  %v7809_v22 = vmax.f32 %v7807_v9, %v7808_v18  ;;  %v7813_v53 = vld [vmem:[#allocation59_spill] sm:$0xff] }
 0x3fb   :  { %v3070_v0 = vmin.f32 %v7804_v20, %v3034_v57  ;;  %v3326_v2 = vmul.f32 %v6506_v14, %v3289_v15  ;;  %v3175_v37 = vmul.f32 0.05, %v2995_v58  ;;  %v3247_v28 = vmul.f32 0.05, %v3139_v35 }
 0x3fc   :  { %v3432_v47 = vpack.c.bf16 %v3396_v6, %v3396_v6  ;;  %v2962_v4 = vadd.f32 %v6472_v30, %v2925_v44  ;;  %v2759_v27 = vadd.f32 %v7249_v11, %v2390_v31  ;;  %v7810_v29 = vmin.f32 %v7807_v9, %v7808_v18  ;;  %v7817_v6 = vld [vmem:[#allocation62_spill] sm:$0xff] }
 0x3fd   :  { %v3106_v13 = vadd.f32 %v3070_v0, %v6472_v30  ;;  %v3363_v3 = vadd.f32 %v6514_v24, %v3326_v2  ;;  %v3211_v56 = vmax.f32 %v2995_v58, %v3175_v37  ;;  %v3283_v12 = vmax.f32 %v3139_v35, %v3247_v28  ;;  %v2766_v21 = vpop.f32.mrf.mxu2  ;;  %v7818_v2 = vld [vmem:[#allocation112_spill] sm:$0xff] }
 0x3fe   :  { %3469 = vst.msk [vmem:[%s7414_s3 + $0x84] sm:$0xf] %vm3435_vm3, %v3432_v47  ;;  %v3142_v54 = vmul.f32 0.05, %v2962_v4  ;;  %v2923_v36 = vmax.f32 %v2759_v27, %v2849_v19  ;;  %v3068_v25 = vmin.f32 %v2759_v27, %v2849_v19  ;;  %v2767_v59 = vadd.f32 %v2766_v21, %v2398_v62 }
 0x3ff   :  { %v3214_v51 = vmul.f32 0.05, %v3106_v13  ;;  %v3399_v63 = vpack.c.bf16 %v3363_v3, %v3363_v3  ;;  %v3323_v11 = vsel %vm6502_vm2, %v3211_v56, %v3283_v12  ;;  %v7814_v48 = vmax.f32 %v7812_v17, %v7813_v53 }
 0x400   :  { %v3360_v40 = vmul.f32 %v6506_v14, %v3323_v11  ;;  %v3178_v45 = vmax.f32 %v2962_v4, %v3142_v54  ;;  %v2959_v32 = vmax.f32 %v7809_v22, %v2923_v36  ;;  %v3104_v23 = vmin.f32 %v7810_v29, %v3068_v25 }
 0x401   :  { %v3250_v5 = vmax.f32 %v3106_v13, %v3214_v51  ;;  %3436 = vst.msk [vmem:[%s7414_s3] sm:$0xf] %vm3435_vm3, %v3399_v63  ;;  %v2890_v52 = vmax.f32 %v7811_v50, %v2767_v59  ;;  %v3035_v33 = vmin.f32 %v7811_v50, %v2767_v59  ;;  %v7815_v55 = vmin.f32 %v7812_v17, %v7813_v53 }
 0x402   :  { %v3397_v41 = vadd.f32 %v6514_v24, %v3360_v40  ;;  %v2996_v43 = vadd.f32 %v6472_v30, %v2959_v32  ;;  %v3140_v39 = vadd.f32 %v3104_v23, %v6472_v30  ;;  %v2400_v58 = vadd.f32 %v7817_v6, %v7816_v1 }
 0x403   :  { %v3290_v34 = vsel %vm6502_vm2, %v3178_v45, %v3250_v5  ;;  %v2926_v8 = vmax.f32 %v7814_v48, %v2890_v52  ;;  %v3071_v57 = vmin.f32 %v7815_v55, %v3035_v33  ;;  %v7821_v62 = vmax.f32 %v7819_v46, %v7820_v61 }
 0x404   :  { %v3327_v10 = vmul.f32 %v6506_v14, %v3290_v34  ;;  %v3433_v35 = vpack.c.bf16 %v3397_v41, %v3397_v41  ;;  %v3176_v31 = vmul.f32 0.05, %v2996_v43  ;;  %v3248_v26 = vmul.f32 0.05, %v3140_v39 }
 0x405   :  { %v2963_v60 = vadd.f32 %v6472_v30, %v2926_v8  ;;  %v3107_v15 = vadd.f32 %v3071_v57, %v6472_v30  ;;  %v2768_v16 = vpop.f32.mrf.mxu2  ;;  %v7822_v56 = vmin.f32 %v7819_v46, %v7820_v61 }
 0x406   :  { %v3364_v42 = vadd.f32 %v6514_v24, %v3327_v10  ;;  %3470 = vst.msk [vmem:[%s7414_s3 + $0x88] sm:$0xf] %vm3435_vm3, %v3433_v35  ;;  %v3212_v7 = vmax.f32 %v2996_v43, %v3176_v31  ;;  %v2769_v38 = vadd.f32 %v2768_v16, %v2400_v58  ;;  %v3284_v20 = vmax.f32 %v3140_v39, %v3248_v26 }
 0x407   :  { %v3143_v0 = vmul.f32 0.05, %v2963_v60  ;;  %v3215_v47 = vmul.f32 0.05, %v3107_v15 }
 0x408   :  { %v3400_v44 = vpack.c.bf16 %v3364_v42, %v3364_v42  ;;  %v2891_v37 = vmax.f32 %v7818_v2, %v2769_v38  ;;  %v3036_v28 = vmin.f32 %v7818_v2, %v2769_v38  ;;  %v3324_v19 = vsel %vm6502_vm2, %v3212_v7, %v3284_v20 }
 0x409   :  { %v3179_v4 = vmax.f32 %v2963_v60, %v3143_v0  ;;  %v3251_v13 = vmax.f32 %v3107_v15, %v3215_v47  ;;  %v3361_v27 = vmul.f32 %v6506_v14, %v3324_v19 }
 0x40a   :  { %3437 = vst.msk [vmem:[%s7414_s3 + $0x4] sm:$0xf] %vm3435_vm3, %v3400_v44  ;;  %v2927_v3 = vmax.f32 %v7821_v62, %v2891_v37  ;;  %v3072_v12 = vmin.f32 %v7822_v56, %v3036_v28 }
 0x40b   :  { %v3291_v21 = vsel %vm6502_vm2, %v3179_v4, %v3251_v13  ;;  %v3398_v54 = vadd.f32 %v6514_v24, %v3361_v27 }
 0x40c   :  { %v3328_v51 = vmul.f32 %v6506_v14, %v3291_v21  ;;  %v2964_v36 = vadd.f32 %v6472_v30, %v2927_v3  ;;  %v3108_v25 = vadd.f32 %v3072_v12, %v6472_v30 }
 0x40d   :  { %v3434_v63 = vpack.c.bf16 %v3398_v54, %v3398_v54 }
 0x40e   :  { %v3365_v11 = vadd.f32 %v6514_v24, %v3328_v51  ;;  %v3144_v59 = vmul.f32 0.05, %v2964_v36  ;;  %v3216_v40 = vmul.f32 0.05, %v3108_v25 }
 0x40f   :  { %3471 = vst.msk [vmem:[%s7414_s3 + $0x8c] sm:$0xf] %vm3435_vm3, %v3434_v63 }
 0x410   :  { %v3401_v45 = vpack.c.bf16 %v3365_v11, %v3365_v11  ;;  %v3180_v5 = vmax.f32 %v2964_v36, %v3144_v59  ;;  %v3252_v9 = vmax.f32 %v3108_v25, %v3216_v40 }
 0x412   :  { %3438 = vst.msk [vmem:[%s7414_s3 + $0x8] sm:$0xf] %vm3435_vm3, %v3401_v45  ;;  %v3292_v30 = vsel %vm6502_vm2, %v3180_v5, %v3252_v9 }
 0x413   :  { %v3329_v18 = vmul.f32 %v6506_v14, %v3292_v30 }
 0x415   :  { %v3366_v22 = vadd.f32 %v6514_v24, %v3329_v18 }
 0x417   :  { %v3402_v32 = vpack.c.bf16 %v3366_v22, %v3366_v22 }
 0x419   :  { %3439 = vst.msk [vmem:[%s7414_s3 + $0xc] sm:$0xf] %vm3435_vm3, %v3402_v32 }

// kernel: net_forward.7
= control target key start
LH: loop header
LB: loop body
LE: loop exit
PB: predicated region body
PF: predicated region fallthrough
CT: control target
= control target key end

     0   :  { %vm861_vm0 = vcmask 523264   ;;  %s3335_s1 = inlined_call_operand.vmem [shape: bf16[576,128], index: 1, kind: input, shape index: {}]   ;;  %s3336_s0 = inlined_call_operand.vmem [shape: bf16[4,72,576], index: 0, kind: input, shape index: {}]   ;;  %s3337_s2 = inlined_call_operand.vmem [shape: f32[3,128], index: 2, kind: input, shape index: {}]   ;;  %s3338_s3 = inlined_call_operand.vmem [shape: bf16[72,128], index: 3, kind: output, shape index: {}]  }
   0x1   :  { %v2195_v0 = vld [vmem:[%s3335_s1 + $0x38] sm:$0xff]  ;;  %v2194_v1 = vld [vmem:[%s3335_s1 + $0x30] sm:$0xff]  ;;  %v2193_v2 = vld [vmem:[%s3335_s1 + $0x28] sm:$0xff] }
   0x2   :  { %2247 = vmatpush.bf16.msra.mxu1 %v2195_v0  ;;  %2248 = vmatpush.bf16.msra.mxu2 %v2195_v0  ;;  %v2192_v3 = vld [vmem:[%s3335_s1 + $0x20] sm:$0xff]  ;;  %v2191_v4 = vld [vmem:[%s3335_s1 + $0x18] sm:$0xff]  ;;  %v2190_v5 = vld [vmem:[%s3335_s1 + $0x10] sm:$0xff] }
   0x3   :  { %916 = vmatpush.bf16.msra.mxu0 %v2195_v0  ;;  %2249 = vmatpush.bf16.msra.mxu3 %v2195_v0  ;;  %v2189_v6 = vld [vmem:[%s3335_s1 + $0x8] sm:$0xff]  ;;  %v2188_v7 = vld [vmem:[%s3335_s1] sm:$0xff]  ;;  %v2125_v9 = vld [vmem:[%s3336_s0 + $0xd8] sm:$0xf0] }
   0x4   :  { %v1678_v8 = vld [vmem:[%s3336_s0 + $0xc8] sm:$0xf]  ;;  %v1778_v10 = vld [vmem:[%s3336_s0 + $0x190] sm:$0xf]  ;;  %v2150_v11 = vld [vmem:[%s3336_s0 + $0x1a0] sm:$0xf0] }
   0x5   :  { %v2211_v12 = vld [vmem:[%s3335_s1 + $0xb8] sm:$0xff]  ;;  %v1578_v13 = vld [vmem:[%s3336_s0] sm:$0xf]  ;;  %v2100_v14 = vld [vmem:[%s3336_s0 + $0x10] sm:$0xf0]  ;;  %v1679_v17 = vor.u32 %v2125_v9, %v1678_v8  ;;  %v1779_v18 = vor.u32 %v2150_v11, %v1778_v10 }
   0x6   :  { %2250 = vmatpush.bf16.msra.mxu1 %v2194_v1  ;;  %2251 = vmatpush.bf16.msra.mxu2 %v2194_v1  ;;  %v2203_v15 = vld [vmem:[%s3335_s1 + $0x78] sm:$0xff]  ;;  %v1579_v19 = vor.u32 %v2100_v14, %v1578_v13  ;;  %v2175_v21 = vld [vmem:[%s3336_s0 + $0x268] sm:$0xf0]  ;;  %v2210_v22 = vld [vmem:[%s3335_s1 + $0xb0] sm:$0xff] }
   0x7   :  { %917 = vmatpush.bf16.msra.mxu0 %v2194_v1  ;;  %2252 = vmatpush.bf16.msra.mxu3 %v2194_v1  ;;  %v2223_v16 = vld [vmem:[%s3335_s1 + $0x118] sm:$0xff]  ;;  %v2202_v23 = vld [vmem:[%s3335_s1 + $0x70] sm:$0xff]  ;;  %v2209_v27 = vld [vmem:[%s3335_s1 + $0xa8] sm:$0xff] }
   0x8   :  { %v1878_v20 = vld [vmem:[%s3336_s0 + $0x258] sm:$0xf]  ;;  %v2222_v24 = vld [vmem:[%s3335_s1 + $0x110] sm:$0xff]  ;;  %v2201_v28 = vld [vmem:[%s3335_s1 + $0x68] sm:$0xff] }
   0x9   :  { %v1879_v25 = vor.u32 %v2175_v21, %v1878_v20  ;;  %v2219_v26 = vld [vmem:[%s3335_s1 + $0xf8] sm:$0xff]  ;;  %v2218_v29 = vld [vmem:[%s3335_s1 + $0xf0] sm:$0xff]  ;;  %v2208_v30 = vld [vmem:[%s3335_s1 + $0xa0] sm:$0xff] }
   0xa   :  { %2253 = vmatpush.bf16.msra.mxu1 %v2193_v2  ;;  %2254 = vmatpush.bf16.msra.mxu2 %v2193_v2  ;;  %v2200_v31 = vld [vmem:[%s3335_s1 + $0x60] sm:$0xff]  ;;  %v1698_v32 = vld [vmem:[%s3336_s0 + $0xf0] sm:$0xf]  ;;  %v1798_v34 = vld [vmem:[%s3336_s0 + $0x1b8] sm:$0xf] }
   0xb   :  { %918 = vmatpush.bf16.msra.mxu0 %v2193_v2  ;;  %2255 = vmatpush.bf16.msra.mxu3 %v2193_v2  ;;  %v2130_v33 = vld [vmem:[%s3336_s0 + $0x100] sm:$0xf0]  ;;  %v2155_v35 = vld [vmem:[%s3336_s0 + $0x1c8] sm:$0xf0]  ;;  %v1598_v37 = vld [vmem:[%s3336_s0 + $0x28] sm:$0xf] }
   0xc   :  { %v2217_v36 = vld [vmem:[%s3335_s1 + $0xe8] sm:$0xff]  ;;  %v2105_v38 = vld [vmem:[%s3336_s0 + $0x38] sm:$0xf0]  ;;  %v1699_v41 = vor.u32 %v2130_v33, %v1698_v32  ;;  %v1799_v42 = vor.u32 %v2155_v35, %v1798_v34  ;;  %v1898_v44 = vld [vmem:[%s3336_s0 + $0x280] sm:$0xf] }
   0xd   :  { %v2207_v39 = vld [vmem:[%s3335_s1 + $0x98] sm:$0xff]  ;;  %v1599_v43 = vor.u32 %v2105_v38, %v1598_v37  ;;  %v2180_v45 = vld [vmem:[%s3336_s0 + $0x290] sm:$0xf0]  ;;  %v2221_v48 = vld [vmem:[%s3335_s1 + $0x108] sm:$0xff] }
   0xe   :  { %2256 = vmatpush.bf16.msra.mxu1 %v2192_v3  ;;  %2257 = vmatpush.bf16.msra.mxu2 %v2192_v3  ;;  %v2199_v40 = vld [vmem:[%s3335_s1 + $0x58] sm:$0xff]  ;;  %v1899_v46 = vor.u32 %v2180_v45, %v1898_v44  ;;  %v2206_v47 = vld [vmem:[%s3335_s1 + $0x90] sm:$0xff]  ;;  %v2216_v49 = vld [vmem:[%s3335_s1 + $0xe0] sm:$0xff] }
   0xf   :  { %919 = vmatpush.bf16.msra.mxu0 %v2192_v3  ;;  %2258 = vmatpush.bf16.msra.mxu3 %v2192_v3  ;;  %v2198_v50 = vld [vmem:[%s3335_s1 + $0x50] sm:$0xff]  ;;  %v2205_v51 = vld [vmem:[%s3335_s1 + $0x88] sm:$0xff]  ;;  %v2215_v52 = vld [vmem:[%s3335_s1 + $0xd8] sm:$0xff] }
  0x10   :  { %v1718_v53 = vld [vmem:[%s3336_s0 + $0x118] sm:$0xf]  ;;  %v2135_v54 = vld [vmem:[%s3336_s0 + $0x128] sm:$0xf0]  ;;  %v1818_v55 = vld [vmem:[%s3336_s0 + $0x1e0] sm:$0xf] }
  0x11   :  { %v2160_v56 = vld [vmem:[%s3336_s0 + $0x1f0] sm:$0xf0]  ;;  %v1618_v58 = vld [vmem:[%s3336_s0 + $0x50] sm:$0xf]  ;;  %v2110_v59 = vld [vmem:[%s3336_s0 + $0x60] sm:$0xf0]  ;;  %v1719_v60 = vor.u32 %v2135_v54, %v1718_v53 }
  0x12   :  { %2259 = vmatpush.bf16.msra.mxu1 %v2191_v4  ;;  %2260 = vmatpush.bf16.msra.mxu2 %v2191_v4  ;;  %v2214_v57 = vld [vmem:[%s3335_s1 + $0xd0] sm:$0xff]  ;;  %v1819_v61 = vor.u32 %v2160_v56, %v1818_v55  ;;  %v1619_v62 = vor.u32 %v2110_v59, %v1618_v58  ;;  %v1918_v63 = vld [vmem:[%s3336_s0 + $0x2a8] sm:$0xf]  ;;  %v2185_v0 = vld [vmem:[%s3336_s0 + $0x2b8] sm:$0xf0] }
  0x13   :  { %920 = vmatpush.bf16.msra.mxu0 %v2191_v4  ;;  %2261 = vmatpush.bf16.msra.mxu3 %v2191_v4  ;;  %v1919_v1 = vor.u32 %v2185_v0, %v1918_v63  ;;  %v2197_v2 = vld [vmem:[%s3335_s1 + $0x48] sm:$0xff]  ;;  %v2204_v4 = vld [vmem:[%s3335_s1 + $0x80] sm:$0xff]  ;;  %v2140_v9 = vld [vmem:[%s3336_s0 + $0x150] sm:$0xf0] }
  0x14   :  { %v2213_v3 = vld [vmem:[%s3335_s1 + $0xc8] sm:$0xff]  ;;  %v1738_v8 = vld [vmem:[%s3336_s0 + $0x140] sm:$0xf]  ;;  %v2165_v11 = vld [vmem:[%s3336_s0 + $0x218] sm:$0xf0] }
  0x15   :  { %v1838_v10 = vld [vmem:[%s3336_s0 + $0x208] sm:$0xf]  ;;  %v2115_v13 = vld [vmem:[%s3336_s0 + $0x88] sm:$0xf0]  ;;  %v1739_v14 = vor.u32 %v2140_v9, %v1738_v8  ;;  %v2145_v21 = vld [vmem:[%s3336_s0 + $0x178] sm:$0xf0] }
  0x16   :  { %2262 = vmatpush.bf16.msra.mxu1 %v2190_v5  ;;  %2263 = vmatpush.bf16.msra.mxu2 %v2190_v5  ;;  %v1758_v20 = vld [vmem:[%s3336_s0 + $0x168] sm:$0xf]  ;;  %v2098_v32 = vld [vmem:[%s3336_s0 + $0x4] sm:$0xf]  ;;  %v1580_v33 = vld [vmem:[%s3336_s0 + $0x14] sm:$0xf0] }
  0x17   :  { %921 = vmatpush.bf16.msra.mxu0 %v2190_v5  ;;  %2264 = vmatpush.bf16.msra.mxu3 %v2190_v5  ;;  %v2220_v5 = vld [vmem:[%s3335_s1 + $0x100] sm:$0xff]  ;;  %v1586_v34 = vld [vmem:[%s3336_s0 + $0x8] sm:$0xf]  ;;  %v2101_v35 = vld [vmem:[%s3336_s0 + $0x18] sm:$0xf0]  ;;  %v1583_v38 = vor.u32 %v2098_v32, %v1580_v33 }
  0x18   :  { %v2102_v37 = vld [vmem:[%s3336_s0 + $0x20] sm:$0xf0]  ;;  %v2103_v44 = vld [vmem:[%s3336_s0 + $0x2c] sm:$0xf]  ;;  %v1600_v45 = vld [vmem:[%s3336_s0 + $0x3c] sm:$0xf0] }
  0x19   :  { %v2114_v53 = vld [vmem:[%s3336_s0 + $0x84] sm:$0xf]  ;;  %v1648_v54 = vld [vmem:[%s3336_s0 + $0x94] sm:$0xf0]  ;;  %v2108_v56 = vld [vmem:[%s3336_s0 + $0x54] sm:$0xf] }
  0x1a   :  { %2265 = vmatpush.bf16.msra.mxu1 %v2189_v6  ;;  %2266 = vmatpush.bf16.msra.mxu2 %v2189_v6  ;;  %v1651_v55 = vor.u32 %v2114_v53, %v1648_v54  ;;  %v1626_v58 = vld [vmem:[%s3336_s0 + $0x58] sm:$0xf]  ;;  %v2111_v59 = vld [vmem:[%s3336_s0 + $0x68] sm:$0xf0]  ;;  %v1654_v8 = vld [vmem:[%s3336_s0 + $0x88] sm:$0xf] }
  0x1b   :  { %922 = vmatpush.bf16.msra.mxu0 %v2189_v6  ;;  %2267 = vmatpush.bf16.msra.mxu3 %v2189_v6  ;;  %v2196_v6 = vld [vmem:[%s3335_s1 + $0x40] sm:$0xff]  ;;  %v1627_v63 = vor.u32 %v2111_v59, %v1626_v58  ;;  %v2117_v9 = vld [vmem:[%s3336_s0 + $0x98] sm:$0xf0]  ;;  %v1728_v54 = vld [vmem:[%s3336_s0 + $0x134] sm:$0xf0] }
  0x1c   :  { %v2129_v33 = vld [vmem:[%s3336_s0 + $0xfc] sm:$0xf]  ;;  %v2134_v53 = vld [vmem:[%s3336_s0 + $0x124] sm:$0xf] }
  0x1e   :  { %2268 = vmatpush.bf16.msra.mxu1 %v2188_v7  ;;  %2269 = vmatpush.bf16.msra.mxu2 %v2188_v7 }
  0x1f   :  { %923 = vmatpush.bf16.msra.mxu0 %v2188_v7  ;;  %2270 = vmatpush.bf16.msra.mxu3 %v2188_v7  ;;  %v2212_v7 = vld [vmem:[%s3335_s1 + $0xc0] sm:$0xff] }
  0x21   :  { %949 = vmatmul.bf16.vlgmr.msra.gmra.mxu1 %v1679_v17  ;;  %974 = vmatmul.bf16.vlgmr.msra.gmra.mxu2 %v1779_v18  ;;  %v2099_v17 = vld [vmem:[%s3336_s0 + $0xc] sm:$0xf]  ;;  %v1588_v18 = vld [vmem:[%s3336_s0 + $0x1c] sm:$0xf0] }
  0x22   :  { %1114 = vmatpush.bf16.msrb.mxu2 %v2211_v12  ;;  %1015 = vmatpush.bf16.msrb.mxu1 %v2203_v15  ;;  %v1638_v12 = vld [vmem:[%s3336_s0 + $0x78] sm:$0xf]  ;;  %v1839_v15 = vor.u32 %v2165_v11, %v1838_v10 }
  0x23   :  { %1316 = vmatpush.bf16.msrb.mxu0 %v2223_v16  ;;  %999 = vmatmul.bf16.vlgmr.msra.gmra.mxu3 %v1879_v25  ;;  %v1639_v16 = vor.u32 %v2115_v13, %v1638_v12  ;;  %v2120_v25 = vld [vmem:[%s3336_s0 + $0xb0] sm:$0xf0]  ;;  %v1655_v13 = vor.u32 %v2117_v9, %v1654_v8  ;;  %v2139_v9 = vld [vmem:[%s3336_s0 + $0x14c] sm:$0xf] }
  0x24   :  { %924 = vmatmul.bf16.vlgmr.msra.gmra.mxu0 %v1579_v19  ;;  %1213 = vmatpush.bf16.msrb.mxu3 %v2219_v26  ;;  %v1591_v19 = vor.u32 %v2099_v17, %v1588_v18  ;;  %v1759_v26 = vor.u32 %v2145_v21, %v1758_v20 }
  0x26   :  { %1115 = vmatpush.bf16.msrb.mxu2 %v2210_v22  ;;  %1016 = vmatpush.bf16.msrb.mxu1 %v2202_v23  ;;  %v1858_v22 = vld [vmem:[%s3336_s0 + $0x230] sm:$0xf]  ;;  %v2170_v23 = vld [vmem:[%s3336_s0 + $0x240] sm:$0xf0] }
  0x27   :  { %1317 = vmatpush.bf16.msrb.mxu0 %v2222_v24  ;;  %v1658_v24 = vld [vmem:[%s3336_s0 + $0xa0] sm:$0xf] }
  0x28   :  { %1214 = vmatpush.bf16.msrb.mxu3 %v2218_v29  ;;  %v2104_v29 = vld [vmem:[%s3336_s0 + $0x34] sm:$0xf] }
  0x2a   :  { %1116 = vmatpush.bf16.msrb.mxu2 %v2209_v27  ;;  %1017 = vmatpush.bf16.msrb.mxu1 %v2201_v28  ;;  %v1859_v27 = vor.u32 %v2170_v23, %v1858_v22  ;;  %v1659_v28 = vor.u32 %v2120_v25, %v1658_v24  ;;  %v2118_v22 = vld [vmem:[%s3336_s0 + $0xa4] sm:$0xf]  ;;  %v1660_v23 = vld [vmem:[%s3336_s0 + $0xb4] sm:$0xf0]  ;;  %v1666_v24 = vld [vmem:[%s3336_s0 + $0xa8] sm:$0xf] }
  0x2b   :  { %1318 = vmatpush.bf16.msrb.mxu0 %v2221_v48  ;;  %v1614_v48 = vld [vmem:[%s3336_s0 + $0x38] sm:$0xf]  ;;  %v2121_v25 = vld [vmem:[%s3336_s0 + $0xb8] sm:$0xf0] }
  0x2c   :  { %1215 = vmatpush.bf16.msrb.mxu3 %v2217_v36  ;;  %v1594_v36 = vld [vmem:[%s3336_s0 + $0x10] sm:$0xf] }
  0x2e   :  { %1117 = vmatpush.bf16.msrb.mxu2 %v2208_v30  ;;  %1018 = vmatpush.bf16.msrb.mxu1 %v2200_v31  ;;  %v1608_v30 = vld [vmem:[%s3336_s0 + $0x44] sm:$0xf0] }
  0x2f   :  { %1319 = vmatpush.bf16.msrb.mxu0 %v2220_v5  ;;  %v1611_v31 = vor.u32 %v2104_v29, %v1608_v30  ;;  %v1640_v5 = vld [vmem:[%s3336_s0 + $0x8c] sm:$0xf0]  ;;  %v1663_v29 = vor.u32 %v2118_v22, %v1660_v23  ;;  %v1667_v30 = vor.u32 %v2121_v25, %v1666_v24  ;;  %v2133_v24 = vld [vmem:[%s3336_s0 + $0x11c] sm:$0xf] }
  0x30   :  { %1216 = vmatpush.bf16.msrb.mxu3 %v2216_v49  ;;  %v2107_v49 = vld [vmem:[%s3336_s0 + $0x48] sm:$0xf0]  ;;  %v1720_v25 = vld [vmem:[%s3336_s0 + $0x12c] sm:$0xf0] }
  0x31   :  { %954 = vmatmul.bf16.gmra.mxu1 %v1699_v41  ;;  %979 = vmatmul.bf16.gmra.mxu2 %v1799_v42  ;;  %v2109_v41 = vld [vmem:[%s3336_s0 + $0x5c] sm:$0xf]  ;;  %v1628_v42 = vld [vmem:[%s3336_s0 + $0x6c] sm:$0xf0] }
  0x32   :  { %1118 = vmatpush.bf16.msrb.mxu2 %v2207_v39  ;;  %1019 = vmatpush.bf16.msrb.mxu1 %v2199_v40  ;;  %v1587_v39 = vor.u32 %v2101_v35, %v1586_v34  ;;  %v1595_v40 = vor.u32 %v2102_v37, %v1594_v36  ;;  %v1708_v34 = vld [vmem:[%s3336_s0 + $0x10c] sm:$0xf0] }
  0x33   :  { %1004 = vmatmul.bf16.gmra.mxu3 %v1899_v46  ;;  %v1606_v46 = vld [vmem:[%s3336_s0 + $0x30] sm:$0xf]  ;;  %v1711_v37 = vor.u32 %v2129_v33, %v1708_v34  ;;  %v1723_v33 = vor.u32 %v2133_v24, %v1720_v25 }
  0x34   :  { %929 = vmatmul.bf16.gmra.mxu0 %v1599_v43  ;;  %1217 = vmatpush.bf16.msrb.mxu3 %v2215_v52  ;;  %v1631_v43 = vor.u32 %v2109_v41, %v1628_v42  ;;  %v1615_v52 = vor.u32 %v2107_v49, %v1614_v48  ;;  %v2123_v42 = vld [vmem:[%s3336_s0 + $0xcc] sm:$0xf] }
  0x36   :  { %1119 = vmatpush.bf16.msrb.mxu2 %v2206_v47  ;;  %1020 = vmatpush.bf16.msrb.mxu1 %v2198_v50  ;;  %v2106_v47 = vld [vmem:[%s3336_s0 + $0x40] sm:$0xf0]  ;;  %v1603_v50 = vor.u32 %v2103_v44, %v1600_v45  ;;  %v1686_v44 = vld [vmem:[%s3336_s0 + $0xd0] sm:$0xf] }
  0x37   :  { %v2126_v45 = vld [vmem:[%s3336_s0 + $0xe0] sm:$0xf0] }
  0x38   :  { %1218 = vmatpush.bf16.msrb.mxu3 %v2214_v57  ;;  %v1620_v57 = vld [vmem:[%s3336_s0 + $0x64] sm:$0xf0] }
  0x3a   :  { %1120 = vmatpush.bf16.msrb.mxu2 %v2205_v51  ;;  %1021 = vmatpush.bf16.msrb.mxu1 %v2197_v2  ;;  %v1607_v51 = vor.u32 %v2106_v47, %v1606_v46  ;;  %v1668_v2 = vld [vmem:[%s3336_s0 + $0xbc] sm:$0xf0]  ;;  %v1694_v46 = vld [vmem:[%s3336_s0 + $0xd8] sm:$0xf]  ;;  %v2127_v47 = vld [vmem:[%s3336_s0 + $0xe8] sm:$0xf0] }
  0x3c   :  { %1219 = vmatpush.bf16.msrb.mxu3 %v2213_v3 }
  0x3e   :  { %1121 = vmatpush.bf16.msrb.mxu2 %v2204_v4  ;;  %1022 = vmatpush.bf16.msrb.mxu1 %v2196_v6  ;;  %v2113_v4 = vld [vmem:[%s3336_s0 + $0x7c] sm:$0xf]  ;;  %v1646_v6 = vld [vmem:[%s3336_s0 + $0x80] sm:$0xf] }
  0x3f   :  { %v1643_v10 = vor.u32 %v2113_v4, %v1640_v5 }
  0x40   :  { %1220 = vmatpush.bf16.msrb.mxu3 %v2212_v7  ;;  %v2116_v7 = vld [vmem:[%s3336_s0 + $0x90] sm:$0xf0] }
  0x41   :  { %959 = vmatmul.bf16.gmra.mxu1 %v1719_v60  ;;  %984 = vmatmul.bf16.gmra.mxu2 %v1819_v61  ;;  %v1634_v60 = vld [vmem:[%s3336_s0 + $0x60] sm:$0xf]  ;;  %v2112_v61 = vld [vmem:[%s3336_s0 + $0x70] sm:$0xf0]  ;;  %v1647_v11 = vor.u32 %v2116_v7, %v1646_v6 }
  0x42   :  { %v1635_v0 = vor.u32 %v2112_v61, %v1634_v60 }
  0x43   :  { %1009 = vmatmul.bf16.gmra.mxu3 %v1919_v1  ;;  %v2119_v1 = vld [vmem:[%s3336_s0 + $0xac] sm:$0xf] }
  0x44   :  { %934 = vmatmul.bf16.gmra.mxu0 %v1619_v62  ;;  %v1623_v62 = vor.u32 %v2108_v56, %v1620_v57  ;;  %v1671_v3 = vor.u32 %v2119_v1, %v1668_v2  ;;  %v1731_v57 = vor.u32 %v2134_v53, %v1728_v54  ;;  %v2131_v1 = vld [vmem:[%s3336_s0 + $0x108] sm:$0xf0]  ;;  %v1714_v2 = vld [vmem:[%s3336_s0 + $0x100] sm:$0xf]  ;;  %v2138_v54 = vld [vmem:[%s3336_s0 + $0x144] sm:$0xf] }
  0x51   :  { %964 = vmatmul.bf16.gmra.mxu1 %v1739_v14  ;;  %989 = vmatmul.bf16.gmra.mxu2 %v1839_v15  ;;  %v2124_v14 = vld [vmem:[%s3336_s0 + $0xd4] sm:$0xf]  ;;  %v1688_v15 = vld [vmem:[%s3336_s0 + $0xe4] sm:$0xf0] }
  0x52   :  { %v1691_v17 = vor.u32 %v2124_v14, %v1688_v15 }
  0x53   :  { %1221 = vmatmul.bf16.vlgmr.msrb.gmra.mxu3 %v1591_v19 }
  0x54   :  { %939 = vmatmul.bf16.gmra.mxu0 %v1639_v16 }
  0x61   :  { %969 = vmatmul.bf16.gmra.mxu1 %v1759_v26  ;;  %994 = vmatmul.bf16.gmra.mxu2 %v1859_v27  ;;  %v1674_v26 = vld [vmem:[%s3336_s0 + $0xb0] sm:$0xf]  ;;  %v2122_v27 = vld [vmem:[%s3336_s0 + $0xc0] sm:$0xf0] }
  0x62   :  { %v1675_v32 = vor.u32 %v2122_v27, %v1674_v26  ;;  %v1726_v26 = vld [vmem:[%s3336_s0 + $0x120] sm:$0xf]  ;;  %v2136_v27 = vld [vmem:[%s3336_s0 + $0x130] sm:$0xf0] }
  0x63   :  { %1226 = vmatmul.bf16.gmra.mxu3 %v1611_v31  ;;  %v1727_v34 = vor.u32 %v2136_v27, %v1726_v26 }
  0x64   :  { %944 = vmatmul.bf16.gmra.mxu0 %v1659_v28 }
  0x71   :  { %1023 = vmatmul.bf16.vlgmr.msrb.gmra.mxu1 %v1583_v38  ;;  %1122 = vmatmul.bf16.vlgmr.msrb.gmra.mxu2 %v1587_v39 }
  0x73   :  { %1231 = vmatmul.bf16.gmra.mxu3 %v1631_v43  ;;  %v1680_v43 = vld [vmem:[%s3336_s0 + $0xdc] sm:$0xf0] }
  0x74   :  { %2080 = vmatmul.msk.bf16.vlgmr.msrb.gmra.mxu0 %vm861_vm0, %v1595_v40  ;;  %v1683_v49 = vor.u32 %v2123_v42, %v1680_v43  ;;  %v2144_v43 = vld [vmem:[%s3336_s0 + $0x174] sm:$0xf] }
  0x81   :  { %1028 = vmatmul.bf16.gmra.mxu1 %v1603_v50  ;;  %1127 = vmatmul.bf16.gmra.mxu2 %v1607_v51  ;;  %v1687_v50 = vor.u32 %v2126_v45, %v1686_v44  ;;  %v1768_v44 = vld [vmem:[%s3336_s0 + $0x184] sm:$0xf0] }
  0x83   :  { %1236 = vmatmul.bf16.gmra.mxu3 %v1651_v55 }
  0x84   :  { %2081 = vmatmul.msk.bf16.gmra.mxu0 %vm861_vm0, %v1615_v52  ;;  %v1695_v52 = vor.u32 %v2127_v47, %v1694_v46  ;;  %v1771_v47 = vor.u32 %v2144_v43, %v1768_v44  ;;  %v2143_v44 = vld [vmem:[%s3336_s0 + $0x16c] sm:$0xf] }
  0x91   :  { %1033 = vmatmul.bf16.gmra.mxu1 %v1623_v62  ;;  %1132 = vmatmul.bf16.gmra.mxu2 %v1627_v63  ;;  %v2128_v62 = vld [vmem:[%s3336_s0 + $0xf4] sm:$0xf]  ;;  %v1700_v63 = vld [vmem:[%s3336_s0 + $0x104] sm:$0xf0] }
  0x92   :  { %v1703_v5 = vor.u32 %v2128_v62, %v1700_v63  ;;  %v1746_v62 = vld [vmem:[%s3336_s0 + $0x148] sm:$0xf]  ;;  %v2141_v63 = vld [vmem:[%s3336_s0 + $0x158] sm:$0xf0] }
  0x93   :  { %1241 = vmatmul.bf16.gmra.mxu3 %v1671_v3  ;;  %v2132_v3 = vld [vmem:[%s3336_s0 + $0x110] sm:$0xf0] }
  0x94   :  { %2082 = vmatmul.msk.bf16.gmra.mxu0 %vm861_vm0, %v1635_v0  ;;  %v1706_v0 = vld [vmem:[%s3336_s0 + $0xf8] sm:$0xf]  ;;  %v1715_v8 = vor.u32 %v2132_v3, %v1714_v2 }
  0x95   :  { %v1707_v6 = vor.u32 %v2131_v1, %v1706_v0  ;;  %v1754_v0 = vld [vmem:[%s3336_s0 + $0x150] sm:$0xf]  ;;  %v2142_v1 = vld [vmem:[%s3336_s0 + $0x160] sm:$0xf0] }
  0x9e   :  { %v2614_v12 = vpop.f32.mrf.mxu1 }
  0xa1   :  { %v2622_v16 = vpop.f32.mrf.mxu0  ;;  %1038 = vmatmul.bf16.gmra.mxu1 %v1643_v10  ;;  %1137 = vmatmul.bf16.gmra.mxu2 %v1647_v11  ;;  %v1748_v10 = vld [vmem:[%s3336_s0 + $0x15c] sm:$0xf0] }
  0xa2   :  { %v1751_v14 = vor.u32 %v2139_v9, %v1748_v10  ;;  %v2149_v9 = vld [vmem:[%s3336_s0 + $0x19c] sm:$0xf]  ;;  %v1788_v10 = vld [vmem:[%s3336_s0 + $0x1ac] sm:$0xf0] }
  0xa3   :  { %1246 = vmatmul.bf16.gmra.mxu3 %v1691_v17  ;;  %v1791_v25 = vor.u32 %v2149_v9, %v1788_v10 }
  0xa4   :  { %2083 = vmatmul.msk.bf16.gmra.mxu0 %vm861_vm0, %v1655_v13  ;;  %v2625_v18 = vpop.f32.mrf.mxu2 }
  0xa6   :  { %v2627_v19 = vpop.f32.mrf.mxu1  ;;  %v2631_v21 = vpop.f32.mrf.mxu3 }
  0xa9   :  { %v2629_v20 = vpop.f32.mrf.mxu0 }
  0xac   :  { %v2651_v28 = vpop.f32.mrf.mxu2 }
  0xae   :  { %v2653_v31 = vpop.f32.mrf.mxu1  ;;  %v2663_v36 = vpop.f32.mrf.mxu3 }
  0xb1   :  { %v2661_v35 = vpop.f32.mrf.mxu0  ;;  %1043 = vmatmul.bf16.gmra.mxu1 %v1663_v29  ;;  %1142 = vmatmul.bf16.gmra.mxu2 %v1667_v30  ;;  %v1734_v29 = vld [vmem:[%s3336_s0 + $0x128] sm:$0xf]  ;;  %v2137_v30 = vld [vmem:[%s3336_s0 + $0x138] sm:$0xf0] }
  0xb2   :  { %v1735_v42 = vor.u32 %v2137_v30, %v1734_v29 }
  0xb3   :  { %1251 = vmatmul.bf16.gmra.mxu3 %v1711_v37 }
  0xb4   :  { %2084 = vmatmul.msk.bf16.gmra.mxu0 %vm861_vm0, %v1675_v32  ;;  %v2666_v38 = vpop.f32.mrf.mxu2 }
  0xb6   :  { %v2668_v39 = vpop.f32.mrf.mxu1  ;;  %v2672_v41 = vpop.f32.mrf.mxu3 }
  0xb9   :  { %v2670_v40 = vpop.f32.mrf.mxu0 }
  0xbc   :  { %v2692_v48 = vpop.f32.mrf.mxu2 }
  0xbe   :  { %v2694_v51 = vpop.f32.mrf.mxu1  ;;  %v2704_v56 = vpop.f32.mrf.mxu3 }
  0xc1   :  { %v2702_v55 = vpop.f32.mrf.mxu0  ;;  %1048 = vmatmul.bf16.gmra.mxu1 %v1683_v49  ;;  %1147 = vmatmul.bf16.gmra.mxu2 %v1687_v50 }
  0xc3   :  { %1256 = vmatmul.bf16.gmra.mxu3 %v1731_v57  ;;  %v1740_v57 = vld [vmem:[%s3336_s0 + $0x154] sm:$0xf0] }
  0xc4   :  { %2085 = vmatmul.msk.bf16.gmra.mxu0 %vm861_vm0, %v1695_v52  ;;  %v2707_v58 = vpop.f32.mrf.mxu2  ;;  %v1743_v3 = vor.u32 %v2138_v54, %v1740_v57  ;;  %v1774_v57 = vld [vmem:[%s3336_s0 + $0x178] sm:$0xf] }
  0xc6   :  { %v2709_v59 = vpop.f32.mrf.mxu1  ;;  %v2713_v61 = vpop.f32.mrf.mxu3 }
  0xc9   :  { %v2711_v60 = vpop.f32.mrf.mxu0 }
  0xcc   :  { %v2733_v4 = vpop.f32.mrf.mxu2 }
  0xce   :  { %v2735_v7 = vpop.f32.mrf.mxu1  ;;  %v2745_v13 = vpop.f32.mrf.mxu3 }
  0xd1   :  { %v2743_v11 = vpop.f32.mrf.mxu0  ;;  %1053 = vmatmul.bf16.gmra.mxu1 %v1703_v5  ;;  %1152 = vmatmul.bf16.gmra.mxu2 %v1707_v6  ;;  %v1747_v5 = vor.u32 %v2141_v63, %v1746_v62  ;;  %v2147_v62 = vld [vmem:[%s3336_s0 + $0x188] sm:$0xf0] }
  0xd3   :  { %1261 = vmatmul.bf16.gmra.mxu3 %v1751_v14 }
  0xd4   :  { %2086 = vmatmul.msk.bf16.gmra.mxu0 %vm861_vm0, %v1715_v8  ;;  %v2748_v15 = vpop.f32.mrf.mxu2  ;;  %v1755_v8 = vor.u32 %v2142_v1, %v1754_v0 }
  0xd6   :  { %v2750_v17 = vpop.f32.mrf.mxu1  ;;  %v1222_v23 = vpop.f32.mrf.mxu3 }
  0xd9   :  { %v2752_v22 = vpop.f32.mrf.mxu0 }
  0xdc   :  { %v2772_v32 = vpop.f32.mrf.mxu2 }
  0xde   :  { %v2774_v37 = vpop.f32.mrf.mxu1  ;;  %v1224_v46 = vpop.f32.mrf.mxu3 }
  0xe1   :  { %v2782_v45 = vpop.f32.mrf.mxu0  ;;  %1058 = vmatmul.bf16.gmra.mxu1 %v1723_v33  ;;  %1157 = vmatmul.bf16.gmra.mxu2 %v1727_v34 }
  0xe3   :  { %1266 = vmatmul.bf16.gmra.mxu3 %v1771_v47  ;;  %v1760_v47 = vld [vmem:[%s3336_s0 + $0x17c] sm:$0xf0] }
  0xe4   :  { %2087 = vmatmul.msk.bf16.gmra.mxu0 %vm861_vm0, %v1735_v42  ;;  %v2785_v49 = vpop.f32.mrf.mxu2  ;;  %v1763_v1 = vor.u32 %v2143_v44, %v1760_v47 }
  0xe6   :  { %v2787_v50 = vpop.f32.mrf.mxu1  ;;  %v1227_v53 = vpop.f32.mrf.mxu3 }
  0xe9   :  { %v2789_v52 = vpop.f32.mrf.mxu0 }
  0xec   :  { %v2809_v2 = vpop.f32.mrf.mxu2 }
  0xee   :  { %v1024_v6 = vpop.f32.mrf.mxu1  ;;  %v1229_v24 = vpop.f32.mrf.mxu3 }
  0xef   :  { %v1025_v26 = vadd.f32 %v1024_v6, %v2622_v16  ;;  %v1766_v16 = vld [vmem:[%s3336_s0 + $0x170] sm:$0xf]  ;;  %v1775_v6 = vor.u32 %v2147_v62, %v1774_v57  ;;  %v1794_v57 = vld [vmem:[%s3336_s0 + $0x1a0] sm:$0xf]  ;;  %v2152_v62 = vld [vmem:[%s3336_s0 + $0x1b0] sm:$0xf0] }
  0xf1   :  { %v1321_v14 = vpop.f32.mrf.mxu0  ;;  %1063 = vmatmul.bf16.gmra.mxu1 %v1743_v3  ;;  %1162 = vmatmul.bf16.gmra.mxu2 %v1747_v5 }
  0xf3   :  { %1271 = vmatmul.bf16.gmra.mxu3 %v1791_v25 }
  0xf4   :  { %2088 = vmatmul.msk.bf16.gmra.mxu0 %vm861_vm0, %v1755_v8  ;;  %v1123_v27 = vpop.f32.mrf.mxu2  ;;  %v2154_v8 = vld [vmem:[%s3336_s0 + $0x1c4] sm:$0xf] }
  0xf5   :  { %v1124_v29 = vadd.f32 %v1123_v27, %v1025_v26 }
  0xf6   :  { %v1026_v30 = vpop.f32.mrf.mxu1  ;;  %v1232_v42 = vpop.f32.mrf.mxu3 }
  0xf7   :  { %v1223_v33 = vadd.f32 %v1222_v23, %v1124_v29  ;;  %v2146_v23 = vld [vmem:[%s3336_s0 + $0x180] sm:$0xf0]  ;;  %v1027_v54 = vadd.f32 %v1026_v30, %v2629_v20  ;;  %v1808_v20 = vld [vmem:[%s3336_s0 + $0x1d4] sm:$0xf0] }
  0xf8   :  { %v1767_v3 = vor.u32 %v2146_v23, %v1766_v16  ;;  %v1811_v26 = vor.u32 %v2154_v8, %v1808_v20  ;;  %v2159_v8 = vld [vmem:[%s3336_s0 + $0x1ec] sm:$0xf] }
  0xf9   :  { %v1323_v34 = vpop.f32.mrf.mxu0  ;;  %v2819_v43 = vadd.f32 %v1321_v14, %v1223_v33 }
  0xfc   :  { %v1125_v63 = vpop.f32.mrf.mxu2 }
  0xfd   :  { %v1126_v0 = vadd.f32 %v1125_v63, %v1027_v54 }
  0xfe   :  { %v1029_v5 = vpop.f32.mrf.mxu1  ;;  %v1234_v14 = vpop.f32.mrf.mxu3 }
  0xff   :  { %v1225_v9 = vadd.f32 %v1224_v46, %v1126_v0  ;;  %v1030_v27 = vadd.f32 %v1029_v5, %v2661_v35  ;;  %v2148_v46 = vld [vmem:[%s3336_s0 + $0x194] sm:$0xf]  ;;  %v1786_v35 = vld [vmem:[%s3336_s0 + $0x198] sm:$0xf] }
 0x101   :  { %v1326_v10 = vpop.f32.mrf.mxu0  ;;  %v2846_v25 = vadd.f32 %v1323_v34, %v1225_v9  ;;  %1068 = vmatmul.bf16.gmra.mxu1 %v1763_v1  ;;  %1167 = vmatmul.bf16.gmra.mxu2 %v1767_v3  ;;  %v1780_v34 = vld [vmem:[%s3336_s0 + $0x1a4] sm:$0xf0] }
 0x102   :  { %v1783_v1 = vor.u32 %v2148_v46, %v1780_v34 }
 0x103   :  { %1276 = vmatmul.bf16.gmra.mxu3 %v1811_v26 }
 0x104   :  { %2089 = vmatmul.msk.bf16.gmra.mxu0 %vm861_vm0, %v1775_v6  ;;  %v1128_v29 = vpop.f32.mrf.mxu2  ;;  %v1795_v6 = vor.u32 %v2152_v62, %v1794_v57  ;;  %v1814_v57 = vld [vmem:[%s3336_s0 + $0x1c8] sm:$0xf]  ;;  %v2157_v62 = vld [vmem:[%s3336_s0 + $0x1d8] sm:$0xf0] }
 0x105   :  { %v1129_v30 = vadd.f32 %v1128_v29, %v1030_v27 }
 0x106   :  { %v1031_v33 = vpop.f32.mrf.mxu1  ;;  %v1237_v16 = vpop.f32.mrf.mxu3 }
 0x107   :  { %v1228_v44 = vadd.f32 %v1227_v53, %v1129_v30  ;;  %v2151_v53 = vld [vmem:[%s3336_s0 + $0x1a8] sm:$0xf0]  ;;  %v1032_v54 = vadd.f32 %v1031_v33, %v2670_v40  ;;  %v1828_v40 = vld [vmem:[%s3336_s0 + $0x1fc] sm:$0xf0] }
 0x108   :  { %v1787_v3 = vor.u32 %v2151_v53, %v1786_v35  ;;  %v1831_v27 = vor.u32 %v2159_v8, %v1828_v40  ;;  %v2164_v8 = vld [vmem:[%s3336_s0 + $0x214] sm:$0xf] }
 0x109   :  { %v1328_v47 = vpop.f32.mrf.mxu0  ;;  %v2850_v23 = vadd.f32 %v1326_v10, %v1228_v44 }
 0x10c   :  { %v1130_v63 = vpop.f32.mrf.mxu2 }
 0x10d   :  { %v1131_v0 = vadd.f32 %v1130_v63, %v1032_v54 }
 0x10e   :  { %v1034_v5 = vpop.f32.mrf.mxu1  ;;  %v1239_v10 = vpop.f32.mrf.mxu3 }
 0x10f   :  { %v1230_v20 = vadd.f32 %v1229_v24, %v1131_v0  ;;  %v1035_v29 = vadd.f32 %v1034_v5, %v2702_v55  ;;  %v2153_v24 = vld [vmem:[%s3336_s0 + $0x1bc] sm:$0xf]  ;;  %v1806_v55 = vld [vmem:[%s3336_s0 + $0x1c0] sm:$0xf] }
 0x111   :  { %v1331_v9 = vpop.f32.mrf.mxu0  ;;  %v2877_v26 = vadd.f32 %v1328_v47, %v1230_v20  ;;  %1073 = vmatmul.bf16.gmra.mxu1 %v1783_v1  ;;  %1172 = vmatmul.bf16.gmra.mxu2 %v1787_v3  ;;  %v1800_v47 = vld [vmem:[%s3336_s0 + $0x1cc] sm:$0xf0] }
 0x112   :  { %v1803_v1 = vor.u32 %v2153_v24, %v1800_v47 }
 0x113   :  { %1281 = vmatmul.bf16.gmra.mxu3 %v1831_v27 }
 0x114   :  { %2090 = vmatmul.msk.bf16.gmra.mxu0 %vm861_vm0, %v1795_v6  ;;  %v1133_v30 = vpop.f32.mrf.mxu2  ;;  %v1815_v6 = vor.u32 %v2157_v62, %v1814_v57  ;;  %v1834_v57 = vld [vmem:[%s3336_s0 + $0x1f0] sm:$0xf]  ;;  %v2162_v62 = vld [vmem:[%s3336_s0 + $0x200] sm:$0xf0] }
 0x115   :  { %v1134_v33 = vadd.f32 %v1133_v30, %v1035_v29 }
 0x116   :  { %v1036_v44 = vpop.f32.mrf.mxu1  ;;  %v1242_v35 = vpop.f32.mrf.mxu3 }
 0x117   :  { %v1233_v46 = vadd.f32 %v1232_v42, %v1134_v33  ;;  %v2156_v42 = vld [vmem:[%s3336_s0 + $0x1d0] sm:$0xf0]  ;;  %v1037_v54 = vadd.f32 %v1036_v44, %v2711_v60  ;;  %v1848_v60 = vld [vmem:[%s3336_s0 + $0x224] sm:$0xf0] }
 0x118   :  { %v1807_v3 = vor.u32 %v2156_v42, %v1806_v55  ;;  %v1851_v29 = vor.u32 %v2164_v8, %v1848_v60  ;;  %v1820_v42 = vld [vmem:[%s3336_s0 + $0x1f4] sm:$0xf0]  ;;  %v2169_v8 = vld [vmem:[%s3336_s0 + $0x23c] sm:$0xf] }
 0x119   :  { %v1333_v34 = vpop.f32.mrf.mxu0  ;;  %v2881_v53 = vadd.f32 %v1331_v9, %v1233_v46 }
 0x11c   :  { %v1135_v63 = vpop.f32.mrf.mxu2 }
 0x11d   :  { %v1136_v0 = vadd.f32 %v1135_v63, %v1037_v54 }
 0x11e   :  { %v1039_v5 = vpop.f32.mrf.mxu1  ;;  %v1244_v9 = vpop.f32.mrf.mxu3 }
 0x11f   :  { %v1235_v40 = vadd.f32 %v1234_v14, %v1136_v0  ;;  %v1040_v30 = vadd.f32 %v1039_v5, %v2743_v11  ;;  %v1826_v11 = vld [vmem:[%s3336_s0 + $0x1e8] sm:$0xf] }
 0x121   :  { %v1336_v20 = vpop.f32.mrf.mxu0  ;;  %v2908_v27 = vadd.f32 %v1333_v34, %v1235_v40  ;;  %1078 = vmatmul.bf16.gmra.mxu1 %v1803_v1  ;;  %1177 = vmatmul.bf16.gmra.mxu2 %v1807_v3  ;;  %v2158_v34 = vld [vmem:[%s3336_s0 + $0x1e4] sm:$0xf] }
 0x122   :  { %v1823_v1 = vor.u32 %v2158_v34, %v1820_v42 }
 0x123   :  { %1286 = vmatmul.bf16.gmra.mxu3 %v1851_v29 }
 0x124   :  { %2091 = vmatmul.msk.bf16.gmra.mxu0 %vm861_vm0, %v1815_v6  ;;  %v1138_v33 = vpop.f32.mrf.mxu2  ;;  %v1835_v6 = vor.u32 %v2162_v62, %v1834_v57  ;;  %v1854_v57 = vld [vmem:[%s3336_s0 + $0x218] sm:$0xf]  ;;  %v2167_v62 = vld [vmem:[%s3336_s0 + $0x228] sm:$0xf0] }
 0x125   :  { %v1139_v44 = vadd.f32 %v1138_v33, %v1040_v30 }
 0x126   :  { %v1041_v46 = vpop.f32.mrf.mxu1  ;;  %v2912_v55 = vpop.f32.mrf.mxu3 }
 0x127   :  { %v1238_v24 = vadd.f32 %v1237_v16, %v1139_v44  ;;  %v2161_v16 = vld [vmem:[%s3336_s0 + $0x1f8] sm:$0xf0]  ;;  %v1042_v54 = vadd.f32 %v1041_v46, %v2752_v22  ;;  %v1868_v22 = vld [vmem:[%s3336_s0 + $0x24c] sm:$0xf0] }
 0x128   :  { %v1827_v3 = vor.u32 %v2161_v16, %v1826_v11  ;;  %v1871_v30 = vor.u32 %v2169_v8, %v1868_v22  ;;  %v1840_v16 = vld [vmem:[%s3336_s0 + $0x21c] sm:$0xf0]  ;;  %v2174_v8 = vld [vmem:[%s3336_s0 + $0x264] sm:$0xf] }
 0x129   :  { %v1338_v47 = vpop.f32.mrf.mxu0  ;;  %v2914_v14 = vadd.f32 %v1336_v20, %v1238_v24 }
 0x12c   :  { %v1140_v63 = vpop.f32.mrf.mxu2 }
 0x12d   :  { %v1141_v0 = vadd.f32 %v1140_v63, %v1042_v54 }
 0x12e   :  { %v1044_v5 = vpop.f32.mrf.mxu1  ;;  %v2941_v20 = vpop.f32.mrf.mxu3 }
 0x12f   :  { %v1240_v60 = vadd.f32 %v1239_v10, %v1141_v0  ;;  %v1045_v33 = vadd.f32 %v1044_v5, %v2782_v45  ;;  %v1846_v45 = vld [vmem:[%s3336_s0 + $0x210] sm:$0xf] }
 0x131   :  { %v1341_v40 = vpop.f32.mrf.mxu0  ;;  %v2943_v29 = vadd.f32 %v1338_v47, %v1240_v60  ;;  %1083 = vmatmul.bf16.gmra.mxu1 %v1823_v1  ;;  %1182 = vmatmul.bf16.gmra.mxu2 %v1827_v3  ;;  %v2163_v47 = vld [vmem:[%s3336_s0 + $0x20c] sm:$0xf] }
 0x132   :  { %v1843_v1 = vor.u32 %v2163_v47, %v1840_v16 }
 0x133   :  { %1291 = vmatmul.bf16.gmra.mxu3 %v1871_v30 }
 0x134   :  { %2092 = vmatmul.msk.bf16.gmra.mxu0 %vm861_vm0, %v1835_v6  ;;  %v1143_v44 = vpop.f32.mrf.mxu2  ;;  %v1855_v6 = vor.u32 %v2167_v62, %v1854_v57  ;;  %v1860_v57 = vld [vmem:[%s3336_s0 + $0x244] sm:$0xf0] }
 0x135   :  { %v1144_v46 = vadd.f32 %v1143_v44, %v1045_v33 }
 0x136   :  { %v1046_v24 = vpop.f32.mrf.mxu1  ;;  %v2947_v11 = vpop.f32.mrf.mxu3 }
 0x137   :  { %v1243_v34 = vadd.f32 %v1242_v35, %v1144_v46  ;;  %v2166_v35 = vld [vmem:[%s3336_s0 + $0x220] sm:$0xf0]  ;;  %v1047_v54 = vadd.f32 %v1046_v24, %v2789_v52  ;;  %v1888_v52 = vld [vmem:[%s3336_s0 + $0x274] sm:$0xf0] }
 0x138   :  { %v1847_v3 = vor.u32 %v2166_v35, %v1846_v45  ;;  %v1891_v33 = vor.u32 %v2174_v8, %v1888_v52 }
 0x139   :  { %v1343_v42 = vpop.f32.mrf.mxu0  ;;  %v2949_v10 = vadd.f32 %v1341_v40, %v1243_v34 }
 0x13c   :  { %v1145_v63 = vpop.f32.mrf.mxu2 }
 0x13d   :  { %v1146_v0 = vadd.f32 %v1145_v63, %v1047_v54  ;;  %v2168_v54 = vld [vmem:[%s3336_s0 + $0x234] sm:$0xf] }
 0x13e   :  { %v1049_v5 = vpop.f32.mrf.mxu1  ;;  %v2976_v40 = vpop.f32.mrf.mxu3  ;;  %v1863_v8 = vor.u32 %v2168_v54, %v1860_v57 }
 0x13f   :  { %v1245_v22 = vadd.f32 %v1244_v9, %v1146_v0  ;;  %v1050_v24 = vadd.f32 %v1049_v5, %v2614_v12  ;;  %v1866_v12 = vld [vmem:[%s3336_s0 + $0x238] sm:$0xf] }
 0x141   :  { %v1346_v60 = vpop.f32.mrf.mxu0  ;;  %v2978_v30 = vadd.f32 %v1343_v42, %v1245_v22  ;;  %1088 = vmatmul.bf16.gmra.mxu1 %v1843_v1  ;;  %1187 = vmatmul.bf16.gmra.mxu2 %v1847_v3  ;;  %v1874_v1 = vld [vmem:[%s3336_s0 + $0x240] sm:$0xf]  ;;  %v2172_v3 = vld [vmem:[%s3336_s0 + $0x250] sm:$0xf0] }
 0x143   :  { %v1412_v44 = vmax.f32 %v2819_v43, %v2978_v30  ;;  %v1449_v46 = vmin.f32 %v2819_v43, %v2978_v30  ;;  %1296 = vmatmul.bf16.gmra.mxu3 %v1891_v33  ;;  %v2179_v33 = vld [vmem:[%s3336_s0 + $0x28c] sm:$0xf] }
 0x144   :  { %2093 = vmatmul.msk.bf16.gmra.mxu0 %vm861_vm0, %v1855_v6  ;;  %v1148_v34 = vpop.f32.mrf.mxu2 }
 0x145   :  { %v1149_v9 = vadd.f32 %v1148_v34, %v1050_v24 }
 0x146   :  { %v1051_v47 = vpop.f32.mrf.mxu1  ;;  %v2987_v45 = vpop.f32.mrf.mxu3 }
 0x147   :  { %v1248_v42 = vadd.f32 %v2912_v55, %v1149_v9  ;;  %v2171_v55 = vld [vmem:[%s3336_s0 + $0x248] sm:$0xf0]  ;;  %v1052_v0 = vadd.f32 %v1051_v47, %v2627_v19  ;;  %v1908_v19 = vld [vmem:[%s3336_s0 + $0x29c] sm:$0xf0] }
 0x148   :  { %v1867_v52 = vor.u32 %v2171_v55, %v1866_v12 }
 0x149   :  { %v1348_v16 = vpop.f32.mrf.mxu0  ;;  %v2989_v35 = vadd.f32 %v1346_v60, %v1248_v42  ;;  %v1875_v60 = vor.u32 %v2172_v3, %v1874_v1  ;;  %v1911_v42 = vor.u32 %v2179_v33, %v1908_v19  ;;  %v1894_v33 = vld [vmem:[%s3336_s0 + $0x268] sm:$0xf]  ;;  %v2177_v19 = vld [vmem:[%s3336_s0 + $0x278] sm:$0xf0] }
 0x14b   :  { %v1413_v62 = vmax.f32 %v2846_v25, %v2989_v35  ;;  %v1450_v63 = vmin.f32 %v2846_v25, %v2989_v35 }
 0x14c   :  { %v1150_v5 = vpop.f32.mrf.mxu2 }
 0x14d   :  { %v1151_v6 = vadd.f32 %v1150_v5, %v1052_v0 }
 0x14e   :  { %v1054_v22 = vpop.f32.mrf.mxu1  ;;  %v3021_v9 = vpop.f32.mrf.mxu3 }
 0x14f   :  { %v1250_v24 = vadd.f32 %v2941_v20, %v1151_v6  ;;  %v1055_v12 = vadd.f32 %v1054_v22, %v2653_v31  ;;  %v2173_v6 = vld [vmem:[%s3336_s0 + $0x25c] sm:$0xf]  ;;  %v1886_v31 = vld [vmem:[%s3336_s0 + $0x260] sm:$0xf] }
 0x151   :  { %v1351_v34 = vpop.f32.mrf.mxu0  ;;  %v3023_v47 = vadd.f32 %v1348_v16, %v1250_v24  ;;  %1093 = vmatmul.bf16.gmra.mxu1 %v1863_v8  ;;  %1192 = vmatmul.bf16.gmra.mxu2 %v1867_v52  ;;  %v1880_v8 = vld [vmem:[%s3336_s0 + $0x26c] sm:$0xf0] }
 0x153   :  { %v1414_v54 = vmax.f32 %v2850_v23, %v3023_v47  ;;  %1301 = vmatmul.bf16.gmra.mxu3 %v1911_v42  ;;  %v1883_v42 = vor.u32 %v2173_v6, %v1880_v8 }
 0x154   :  { %2094 = vmatmul.msk.bf16.gmra.mxu0 %vm861_vm0, %v1875_v60  ;;  %v1153_v55 = vpop.f32.mrf.mxu2 }
 0x155   :  { %v1154_v20 = vadd.f32 %v1153_v55, %v1055_v12 }
 0x156   :  { %v1056_v0 = vpop.f32.mrf.mxu1  ;;  %v3032_v3 = vpop.f32.mrf.mxu3 }
 0x157   :  { %v1253_v16 = vadd.f32 %v2947_v11, %v1154_v20  ;;  %v2176_v11 = vld [vmem:[%s3336_s0 + $0x270] sm:$0xf0]  ;;  %v1057_v60 = vadd.f32 %v1056_v0, %v2668_v39  ;;  %v1895_v20 = vor.u32 %v2177_v19, %v1894_v33  ;;  %v1928_v39 = vld [vmem:[%s3336_s0 + $0x2c4] sm:$0xf0] }
 0x158   :  { %v1887_v12 = vor.u32 %v2176_v11, %v1886_v31 }
 0x159   :  { %v1353_v1 = vpop.f32.mrf.mxu0  ;;  %v3034_v5 = vadd.f32 %v1351_v34, %v1253_v16  ;;  %v2184_v16 = vld [vmem:[%s3336_s0 + $0x2b4] sm:$0xf] }
 0x15a   :  { %v1931_v6 = vor.u32 %v2184_v16, %v1928_v39  ;;  %v1914_v16 = vld [vmem:[%s3336_s0 + $0x290] sm:$0xf]  ;;  %v2182_v39 = vld [vmem:[%s3336_s0 + $0x2a0] sm:$0xf0] }
 0x15c   :  { %v1155_v24 = vpop.f32.mrf.mxu2 }
 0x15d   :  { %v1156_v34 = vadd.f32 %v1155_v24, %v1057_v60 }
 0x15e   :  { %v1059_v55 = vpop.f32.mrf.mxu1  ;;  %v3066_v52 = vpop.f32.mrf.mxu3 }
 0x15f   :  { %v1255_v0 = vadd.f32 %v2976_v40, %v1156_v34  ;;  %v1060_v11 = vadd.f32 %v1059_v55, %v2694_v51  ;;  %v1906_v51 = vld [vmem:[%s3336_s0 + $0x288] sm:$0xf] }
 0x161   :  { %v1356_v22 = vpop.f32.mrf.mxu0  ;;  %v3068_v57 = vadd.f32 %v1353_v1, %v1255_v0  ;;  %1098 = vmatmul.bf16.gmra.mxu1 %v1883_v42  ;;  %1197 = vmatmul.bf16.gmra.mxu2 %v1887_v12  ;;  %v2178_v42 = vld [vmem:[%s3336_s0 + $0x284] sm:$0xf]  ;;  %v1900_v12 = vld [vmem:[%s3336_s0 + $0x294] sm:$0xf0] }
 0x163   :  { %1306 = vmatmul.bf16.gmra.mxu3 %v1931_v6 }
 0x164   :  { %2095 = vmatmul.msk.bf16.gmra.mxu0 %vm861_vm0, %v1895_v20  ;;  %v1158_v60 = vpop.f32.mrf.mxu2 }
 0x165   :  { %v1159_v40 = vadd.f32 %v1158_v60, %v1060_v11  ;;  %v1903_v11 = vor.u32 %v2178_v42, %v1900_v12 }
 0x166   :  { %v1061_v33 = vpop.f32.mrf.mxu1  ;;  %v1267_v24 = vpop.f32.mrf.mxu3 }
 0x167   :  { %v1258_v1 = vadd.f32 %v2987_v45, %v1159_v40  ;;  %v2181_v45 = vld [vmem:[%s3336_s0 + $0x298] sm:$0xf0]  ;;  %v1062_v20 = vadd.f32 %v1061_v33, %v2709_v59 }
 0x168   :  { %v1907_v60 = vor.u32 %v2181_v45, %v1906_v51 }
 0x169   :  { %v1358_v19 = vpop.f32.mrf.mxu0  ;;  %v3077_v34 = vadd.f32 %v1356_v22, %v1258_v1  ;;  %v1915_v1 = vor.u32 %v2182_v39, %v1914_v16  ;;  %v2183_v16 = vld [vmem:[%s3336_s0 + $0x2ac] sm:$0xf]  ;;  %v1920_v39 = vld [vmem:[%s3336_s0 + $0x2bc] sm:$0xf0] }
 0x16c   :  { %v1160_v0 = vpop.f32.mrf.mxu2 }
 0x16d   :  { %v1161_v6 = vadd.f32 %v1160_v0, %v1062_v20 }
 0x16e   :  { %v1064_v40 = vpop.f32.mrf.mxu1  ;;  %v1269_v55 = vpop.f32.mrf.mxu3 }
 0x16f   :  { %v1260_v22 = vadd.f32 %v3021_v9, %v1161_v6  ;;  %v1065_v42 = vadd.f32 %v1064_v40, %v2735_v7  ;;  %v1926_v7 = vld [vmem:[%s3336_s0 + $0x2b0] sm:$0xf] }
 0x171   :  { %v1361_v31 = vpop.f32.mrf.mxu0  ;;  %v3103_v8 = vadd.f32 %v1358_v19, %v1260_v22  ;;  %1103 = vmatmul.bf16.gmra.mxu1 %v1903_v11  ;;  %1202 = vmatmul.bf16.gmra.mxu2 %v1907_v60  ;;  %v1934_v11 = vld [vmem:[%s3336_s0 + $0x2b8] sm:$0xf]  ;;  %v2187_v60 = vld [vmem:[%s3336_s0 + $0x2c8] sm:$0xf0] }
 0x173   :  { %v1418_v59 = vmax.f32 %v2914_v14, %v3103_v8 }
 0x174   :  { %2096 = vmatmul.msk.bf16.gmra.mxu0 %vm861_vm0, %v1915_v1  ;;  %v1163_v12 = vpop.f32.mrf.mxu2 }
 0x175   :  { %v1164_v51 = vadd.f32 %v1163_v12, %v1065_v42  ;;  %v1923_v42 = vor.u32 %v2183_v16, %v1920_v39 }
 0x176   :  { %v1066_v45 = vpop.f32.mrf.mxu1  ;;  %v1272_v19 = vpop.f32.mrf.mxu3 }
 0x177   :  { %v1263_v9 = vadd.f32 %v3032_v3, %v1164_v51  ;;  %v2186_v3 = vld [vmem:[%s3336_s0 + $0x2c0] sm:$0xf0]  ;;  %v1067_v6 = vadd.f32 %v1066_v45, %v2750_v17 }
 0x178   :  { %v1927_v12 = vor.u32 %v2186_v3, %v1926_v7 }
 0x179   :  { %v1363_v20 = vpop.f32.mrf.mxu0  ;;  %v3112_v22 = vadd.f32 %v1361_v31, %v1263_v9  ;;  %v1935_v9 = vor.u32 %v2187_v60, %v1934_v11 }
 0x17c   :  { %v1165_v40 = vpop.f32.mrf.mxu2 }
 0x17d   :  { %v1166_v1 = vadd.f32 %v1165_v40, %v1067_v6 }
 0x17e   :  { %v1069_v51 = vpop.f32.mrf.mxu1  ;;  %v1274_v17 = vpop.f32.mrf.mxu3 }
 0x17f   :  { %v1265_v31 = vadd.f32 %v3066_v52, %v1166_v1  ;;  %v1070_v16 = vadd.f32 %v1069_v51, %v2774_v37 }
 0x181   :  { %v1366_v33 = vpop.f32.mrf.mxu0  ;;  %v3138_v0 = vadd.f32 %v1363_v20, %v1265_v31  ;;  %1108 = vmatmul.bf16.gmra.mxu1 %v1923_v42  ;;  %1207 = vmatmul.bf16.gmra.mxu2 %v1927_v12 }
 0x184   :  { %2097 = vmatmul.msk.bf16.gmra.mxu0 %vm861_vm0, %v1935_v9  ;;  %v1168_v39 = vpop.f32.mrf.mxu2 }
 0x185   :  { %v1169_v7 = vadd.f32 %v1168_v39, %v1070_v16 }
 0x186   :  { %v1071_v3 = vpop.f32.mrf.mxu1  ;;  %v1277_v40 = vpop.f32.mrf.mxu3 }
 0x187   :  { %v1268_v52 = vadd.f32 %v1267_v24, %v1169_v7  ;;  %v1072_v31 = vadd.f32 %v1071_v3, %v2787_v50 }
 0x189   :  { %v1368_v11 = vpop.f32.mrf.mxu0  ;;  %v3146_v20 = vadd.f32 %v1366_v33, %v1268_v52 }
 0x18c   :  { %v1170_v60 = vpop.f32.mrf.mxu2 }
 0x18d   :  { %v1171_v1 = vadd.f32 %v1170_v60, %v1072_v31 }
 0x18e   :  { %v1074_v42 = vpop.f32.mrf.mxu1  ;;  %v1279_v39 = vpop.f32.mrf.mxu3 }
 0x18f   :  { %v1270_v12 = vadd.f32 %v1269_v55, %v1171_v1  ;;  %v1075_v6 = vadd.f32 %v1074_v42, %v2625_v18 }
 0x191   :  { %v1371_v9 = vpop.f32.mrf.mxu0  ;;  %v3149_v45 = vadd.f32 %v1368_v11, %v1270_v12 }
 0x194   :  { %v1173_v37 = vpop.f32.mrf.mxu2 }
 0x195   :  { %v1174_v51 = vadd.f32 %v1173_v37, %v1075_v6 }
 0x196   :  { %v1076_v16 = vpop.f32.mrf.mxu1  ;;  %v1282_v1 = vpop.f32.mrf.mxu3 }
 0x197   :  { %v1273_v24 = vadd.f32 %v1272_v19, %v1174_v51  ;;  %v1077_v50 = vadd.f32 %v1076_v16, %v2651_v28 }
 0x199   :  { %v1373_v7 = vpop.f32.mrf.mxu0  ;;  %v3152_v33 = vadd.f32 %v1371_v9, %v1273_v24 }
 0x19c   :  { %v1175_v3 = vpop.f32.mrf.mxu2 }
 0x19d   :  { %v1176_v52 = vadd.f32 %v1175_v3, %v1077_v50 }
 0x19e   :  { %v1079_v31 = vpop.f32.mrf.mxu1  ;;  %v1284_v9 = vpop.f32.mrf.mxu3 }
 0x19f   :  { %v1275_v60 = vadd.f32 %v1274_v17, %v1176_v52  ;;  %v1080_v18 = vadd.f32 %v1079_v31, %v2666_v38 }
 0x1a1   :  { %v1376_v55 = vpop.f32.mrf.mxu0  ;;  %v3155_v11 = vadd.f32 %v1373_v7, %v1275_v60 }
 0x1a4   :  { %v1178_v42 = vpop.f32.mrf.mxu2 }
 0x1a5   :  { %v1179_v6 = vadd.f32 %v1178_v42, %v1080_v18 }
 0x1a6   :  { %v1081_v12 = vpop.f32.mrf.mxu1  ;;  %v1287_v31 = vpop.f32.mrf.mxu3 }
 0x1a7   :  { %v1278_v37 = vadd.f32 %v1277_v40, %v1179_v6  ;;  %v1082_v28 = vadd.f32 %v1081_v12, %v2692_v48 }
 0x1a9   :  { %v1378_v19 = vpop.f32.mrf.mxu0  ;;  %v3158_v51 = vadd.f32 %v1376_v55, %v1278_v37 }
 0x1ac   :  { %v1180_v16 = vpop.f32.mrf.mxu2 }
 0x1ad   :  { %v1181_v24 = vadd.f32 %v1180_v16, %v1082_v28 }
 0x1ae   :  { %v1084_v50 = vpop.f32.mrf.mxu1  ;;  %v1289_v28 = vpop.f32.mrf.mxu3 }
 0x1af   :  { %v1280_v17 = vadd.f32 %v1279_v39, %v1181_v24  ;;  %v1085_v7 = vadd.f32 %v1084_v50, %v2707_v58 }
 0x1b1   :  { %v1381_v3 = vpop.f32.mrf.mxu0  ;;  %v3161_v52 = vadd.f32 %v1378_v19, %v1280_v17 }
 0x1b4   :  { %v1183_v38 = vpop.f32.mrf.mxu2 }
 0x1b5   :  { %v1184_v60 = vadd.f32 %v1183_v38, %v1085_v7 }
 0x1b6   :  { %v1086_v18 = vpop.f32.mrf.mxu1  ;;  %v1292_v38 = vpop.f32.mrf.mxu3 }
 0x1b7   :  { %v1283_v40 = vadd.f32 %v1282_v1, %v1184_v60  ;;  %v1087_v6 = vadd.f32 %v1086_v18, %v2733_v4 }
 0x1b9   :  { %v1383_v42 = vpop.f32.mrf.mxu0  ;;  %v3164_v55 = vadd.f32 %v1381_v3, %v1283_v40 }
 0x1bc   :  { %v1185_v48 = vpop.f32.mrf.mxu2 }
 0x1bd   :  { %v1186_v12 = vadd.f32 %v1185_v48, %v1087_v6 }
 0x1be   :  { %v1089_v37 = vpop.f32.mrf.mxu1 }
 0x1bf   :  { %v1285_v39 = vadd.f32 %v1284_v9, %v1186_v12  ;;  %v1090_v58 = vadd.f32 %v1089_v37, %v2748_v15  ;;  %v1411_v9 = vld [vmem:[%s3337_s2] sm:$0x7] }
 0x1c0   :  { %vm1521_vm1 = vcmp.ge.f32.partialorder %v1411_v9, 0.0  ;;  %v3176_v48 = vperm.slane %v1411_v9, 0 }
 0x1c1   :  { %v1386_v16 = vpop.f32.mrf.mxu0  ;;  %v3167_v19 = vadd.f32 %v1383_v42, %v1285_v39  ;;  %v2272_v39 = vmov 0  }
 0x1c4   :  { %v1188_v24 = vpop.f32.mrf.mxu2 }
 0x1c5   :  { %v1189_v50 = vadd.f32 %v1188_v24, %v1090_v58 }
 0x1c6   :  { %v1091_v17 = vpop.f32.mrf.mxu1 }
 0x1c7   :  { %v1288_v7 = vadd.f32 %v1287_v31, %v1189_v50  ;;  %v1092_v4 = vadd.f32 %v1091_v17, %v2772_v32  ;;  %v1294_v31 = vpop.f32.mrf.mxu3  ;;  %v1522_v32 = vsel %vm1521_vm1, 1, %v2272_v39 }
 0x1c8   :  { %v1523_v17 = vperm.slane %v1522_v32, 1 }
 0x1c9   :  { %v1388_v1 = vpop.f32.mrf.mxu0  ;;  %v3170_v3 = vadd.f32 %v1386_v16, %v1288_v7 }
 0x1ca   :  { %vm3189_vm2 = vcmp.eq.s32.totalorder %v1523_v17, 1 }
 0x1cc   :  { %v1190_v60 = vpop.f32.mrf.mxu2 }
 0x1cd   :  { %v1191_v18 = vadd.f32 %v1190_v60, %v1092_v4 }
 0x1ce   :  { %v1094_v40 = vpop.f32.mrf.mxu1 }
 0x1cf   :  { %v1290_v6 = vadd.f32 %v1289_v28, %v1191_v18  ;;  %v1095_v16 = vadd.f32 %v1094_v40, %v2785_v49 }
 0x1d1   :  { %v1391_v42 = vpop.f32.mrf.mxu0  ;;  %v1389_v15 = vadd.f32 %v1388_v1, %v1290_v6 }
 0x1d3   :  { %v1421_v12 = vmax.f32 %v3146_v20, %v1389_v15  ;;  %v1458_v37 = vmin.f32 %v3146_v20, %v1389_v15 }
 0x1d4   :  { %v1193_v58 = vpop.f32.mrf.mxu2 }
 0x1d5   :  { %v1430_v28 = vmax.f32 %v1412_v44, %v1421_v12  ;;  %v1467_v24 = vmin.f32 %v1449_v46, %v1458_v37  ;;  %v1194_v50 = vadd.f32 %v1193_v58, %v1095_v16  ;;  %v1297_v37 = vpop.f32.mrf.mxu3 }
 0x1d6   :  { %v1096_v7 = vpop.f32.mrf.mxu1 }
 0x1d7   :  { %v1440_v1 = vadd.f32 %v3176_v48, %v1430_v28  ;;  %v1476_v20 = vadd.f32 %v1467_v24, %v3176_v48  ;;  %v1293_v4 = vadd.f32 %v1292_v38, %v1194_v50  ;;  %v1097_v44 = vadd.f32 %v1096_v7, %v2809_v2 }
 0x1d8   :  { %v3206_v24 = vperm.slane %v1411_v9, 1 }
 0x1d9   :  { %v1393_v60 = vpop.f32.mrf.mxu0  ;;  %v1485_v18 = vmul.f32 0.05, %v1440_v1  ;;  %v1503_v49 = vmul.f32 0.05, %v1476_v20  ;;  %v1392_v40 = vadd.f32 %v1391_v42, %v1293_v4  ;;  %v3212_v4 = vperm.slane %v1411_v9, 2 }
 0x1db   :  { %v1494_v43 = vmax.f32 %v1440_v1, %v1485_v18  ;;  %v1512_v30 = vmax.f32 %v1476_v20, %v1503_v49  ;;  %v1422_v46 = vmax.f32 %v3149_v45, %v1392_v40  ;;  %v1459_v15 = vmin.f32 %v3149_v45, %v1392_v40 }
 0x1dc   :  { %v1195_v12 = vpop.f32.mrf.mxu2 }
 0x1dd   :  { %v1525_v38 = vsel %vm3189_vm2, %v1494_v43, %v1512_v30  ;;  %v1431_v42 = vmax.f32 %v1413_v62, %v1422_v46  ;;  %v1468_v39 = vmin.f32 %v1450_v63, %v1459_v15  ;;  %v1196_v2 = vadd.f32 %v1195_v12, %v1097_v44  ;;  %v1299_v43 = vpop.f32.mrf.mxu3 }
 0x1de   :  { %v1099_v32 = vpop.f32.mrf.mxu1  ;;  %v1535_v63 = vmul.f32 %v3206_v24, %v1525_v38 }
 0x1df   :  { %v1441_v16 = vadd.f32 %v3176_v48, %v1431_v42  ;;  %v1477_v58 = vadd.f32 %v1468_v39, %v3176_v48  ;;  %v1295_v45 = vadd.f32 %v1294_v31, %v1196_v2  ;;  %v1100_v1 = vadd.f32 %v1099_v32, %v2631_v21 }
 0x1e0   :  { %v3341_v21 = vmin.f32 %v2850_v23, %v3023_v47  ;;  %v1545_v15 = vadd.f32 %v3212_v4, %v1535_v63 }
 0x1e1   :  { %v1396_v28 = vpop.f32.mrf.mxu0  ;;  %v1486_v50 = vmul.f32 0.05, %v1441_v16  ;;  %v1504_v17 = vmul.f32 0.05, %v1477_v58  ;;  %v1394_v7 = vadd.f32 %v1393_v60, %v1295_v45 }
 0x1e3   :  { %v1495_v62 = vmax.f32 %v1441_v16, %v1486_v50  ;;  %v1513_v20 = vmax.f32 %v1477_v58, %v1504_v17  ;;  %v1423_v25 = vmax.f32 %v3152_v33, %v1394_v7  ;;  %v1460_v35 = vmin.f32 %v3152_v33, %v1394_v7 }
 0x1e4   :  { %v1198_v18 = vpop.f32.mrf.mxu2 }
 0x1e5   :  { %v1526_v31 = vsel %vm3189_vm2, %v1495_v62, %v1513_v20  ;;  %v1432_v60 = vmax.f32 %v1414_v54, %v1423_v25  ;;  %v1469_v49 = vmin.f32 %v3341_v21, %v1460_v35  ;;  %v1199_v40 = vadd.f32 %v1198_v18, %v1100_v1  ;;  %v1302_v25 = vpop.f32.mrf.mxu3 }
 0x1e6   :  { %v1536_v44 = vmul.f32 %v3206_v24, %v1526_v31  ;;  %v1101_v33 = vpop.f32.mrf.mxu1 }
 0x1e7   :  { %v1442_v9 = vadd.f32 %v3176_v48, %v1432_v60  ;;  %v1478_v30 = vadd.f32 %v1469_v49, %v3176_v48  ;;  %v1298_v46 = vadd.f32 %v1297_v37, %v1199_v40  ;;  %v1102_v47 = vadd.f32 %v1101_v33, %v2663_v36 }
 0x1e8   :  { %v1546_v12 = vadd.f32 %v3212_v4, %v1536_v44  ;;  %v3343_v36 = vmin.f32 %v2877_v26, %v3034_v5 }
 0x1e9   :  { %v1398_v38 = vpop.f32.mrf.mxu0  ;;  %v1487_v54 = vmul.f32 0.05, %v1442_v9  ;;  %v1505_v42 = vmul.f32 0.05, %v1478_v30  ;;  %v1397_v39 = vadd.f32 %v1396_v28, %v1298_v46  ;;  %v3342_v28 = vmax.f32 %v2877_v26, %v3034_v5 }
 0x1ea   :  { %v2227_v23 = vpack.c.bf16 %v1546_v12, %v1545_v15 }
 0x1eb   :  { %v1496_v2 = vmax.f32 %v1442_v9, %v1487_v54  ;;  %v1514_v32 = vmax.f32 %v1478_v30, %v1505_v42  ;;  %v1424_v16 = vmax.f32 %v3155_v11, %v1397_v39  ;;  %v1461_v58 = vmin.f32 %v3155_v11, %v1397_v39 }
 0x1ec   :  { %2228 = vst [vmem:[%s3338_s3] sm:$0xff] %v2227_v23   ;;  %v1200_v37 = vpop.f32.mrf.mxu2 }
 0x1ed   :  { %v1527_v45 = vsel %vm3189_vm2, %v1496_v2, %v1514_v32  ;;  %v1433_v50 = vmax.f32 %v3342_v28, %v1424_v16  ;;  %v1470_v17 = vmin.f32 %v3343_v36, %v1461_v58  ;;  %v1201_v7 = vadd.f32 %v1200_v37, %v1102_v47 }
 0x1ee   :  { %v1104_v1 = vpop.f32.mrf.mxu1  ;;  %v1537_v5 = vmul.f32 %v3206_v24, %v1527_v45 }
 0x1ef   :  { %v1443_v11 = vadd.f32 %v3176_v48, %v1433_v50  ;;  %v1479_v62 = vadd.f32 %v1470_v17, %v3176_v48  ;;  %v1300_v20 = vadd.f32 %v1299_v43, %v1201_v7  ;;  %v1105_v31 = vadd.f32 %v1104_v1, %v2672_v41 }
 0x1f0   :  { %v3344_v43 = vmax.f32 %v2881_v53, %v3068_v57  ;;  %v3345_v41 = vmin.f32 %v2881_v53, %v3068_v57  ;;  %v1547_v42 = vadd.f32 %v3212_v4, %v1537_v5  ;;  %v1304_v57 = vpop.f32.mrf.mxu3  ;;  %v3346_v17 = vmax.f32 %v2908_v27, %v3077_v34 }
 0x1f1   :  { %v1488_v35 = vmul.f32 0.05, %v1443_v11  ;;  %v1506_v63 = vmul.f32 0.05, %v1479_v62  ;;  %v1399_v18 = vadd.f32 %v1398_v38, %v1300_v20  ;;  %v1401_v60 = vpop.f32.mrf.mxu0  ;;  %v3347_v7 = vmin.f32 %v2908_v27, %v3077_v34 }
 0x1f3   :  { %v1497_v21 = vmax.f32 %v1443_v11, %v1488_v35  ;;  %v1515_v49 = vmax.f32 %v1479_v62, %v1506_v63  ;;  %v1425_v40 = vmax.f32 %v3158_v51, %v1399_v18  ;;  %v1462_v26 = vmin.f32 %v3158_v51, %v1399_v18 }
 0x1f4   :  { %v1203_v44 = vpop.f32.mrf.mxu2 }
 0x1f5   :  { %v1528_v33 = vsel %vm3189_vm2, %v1497_v21, %v1515_v49  ;;  %v1434_v9 = vmax.f32 %v3344_v43, %v1425_v40  ;;  %v1471_v30 = vmin.f32 %v3345_v41, %v1462_v26  ;;  %v1204_v46 = vadd.f32 %v1203_v44, %v1105_v31 }
 0x1f6   :  { %v1538_v15 = vmul.f32 %v3206_v24, %v1528_v33  ;;  %v1106_v12 = vpop.f32.mrf.mxu1 }
 0x1f7   :  { %v1444_v51 = vadd.f32 %v3176_v48, %v1434_v9  ;;  %v1480_v38 = vadd.f32 %v1471_v30, %v3176_v48  ;;  %v1303_v54 = vadd.f32 %v1302_v25, %v1204_v46  ;;  %v1107_v53 = vadd.f32 %v1106_v12, %v2704_v56 }
 0x1f8   :  { %v1548_v39 = vadd.f32 %v3212_v4, %v1538_v15  ;;  %v1307_v34 = vpop.f32.mrf.mxu3 }
 0x1f9   :  { %v1489_v23 = vmul.f32 0.05, %v1444_v51  ;;  %v1507_v47 = vmul.f32 0.05, %v1480_v38  ;;  %v1402_v2 = vadd.f32 %v1401_v60, %v1303_v54  ;;  %v1403_v28 = vpop.f32.mrf.mxu0 }
 0x1fa   :  { %v2232_v32 = vpack.c.bf16 %v1548_v39, %v1547_v42 }
 0x1fb   :  { %v1498_v16 = vmax.f32 %v1444_v51, %v1489_v23  ;;  %v1516_v58 = vmax.f32 %v1480_v38, %v1507_v47  ;;  %v1426_v37 = vmax.f32 %v3161_v52, %v1402_v2  ;;  %v1463_v45 = vmin.f32 %v3161_v52, %v1402_v2 }
 0x1fc   :  { %2244 = vst [vmem:[%s3338_s3 + $0x8] sm:$0xff] %v2232_v32   ;;  %v1205_v50 = vpop.f32.mrf.mxu2 }
 0x1fd   :  { %v1529_v36 = vsel %vm3189_vm2, %v1498_v16, %v1516_v58  ;;  %v1435_v56 = vmax.f32 %v3346_v17, %v1426_v37  ;;  %v1472_v1 = vmin.f32 %v3347_v7, %v1463_v45  ;;  %v1206_v11 = vadd.f32 %v1205_v50, %v1107_v53 }
 0x1fe   :  { %v1109_v62 = vpop.f32.mrf.mxu1  ;;  %v1539_v27 = vmul.f32 %v3206_v24, %v1529_v36  ;;  %v3349_v53 = vmax.f32 %v2943_v29, %v3112_v22 }
 0x1ff   :  { %v1445_v52 = vadd.f32 %v3176_v48, %v1435_v56  ;;  %v1481_v20 = vadd.f32 %v1472_v1, %v3176_v48  ;;  %v1305_v25 = vadd.f32 %v1304_v57, %v1206_v11  ;;  %v1110_v31 = vadd.f32 %v1109_v62, %v2713_v61 }
 0x200   :  { %v3348_v61 = vmin.f32 %v2914_v14, %v3103_v8  ;;  %v1549_v12 = vadd.f32 %v3212_v4, %v1539_v27  ;;  %v1309_v37 = vpop.f32.mrf.mxu3 }
 0x201   :  { %v1490_v35 = vmul.f32 0.05, %v1445_v52  ;;  %v1508_v63 = vmul.f32 0.05, %v1481_v20  ;;  %v1404_v18 = vadd.f32 %v1403_v28, %v1305_v25  ;;  %v1406_v41 = vpop.f32.mrf.mxu0  ;;  %v3352_v25 = vmin.f32 %v2949_v10, %v3138_v0 }
 0x203   :  { %v1499_v60 = vmax.f32 %v1445_v52, %v1490_v35  ;;  %v1517_v21 = vmax.f32 %v1481_v20, %v1508_v63  ;;  %v1427_v49 = vmax.f32 %v3164_v55, %v1404_v18  ;;  %v1464_v40 = vmin.f32 %v3164_v55, %v1404_v18 }
 0x204   :  { %v1208_v26 = vpop.f32.mrf.mxu2  ;;  %v3351_v52 = vmax.f32 %v2949_v10, %v3138_v0 }
 0x205   :  { %v1530_v5 = vsel %vm3189_vm2, %v1499_v60, %v1517_v21  ;;  %v1436_v44 = vmax.f32 %v1418_v59, %v1427_v49  ;;  %v1473_v33 = vmin.f32 %v3348_v61, %v1464_v40  ;;  %v1209_v43 = vadd.f32 %v1208_v26, %v1110_v31 }
 0x206   :  { %v1540_v9 = vmul.f32 %v3206_v24, %v1530_v5  ;;  %v1111_v15 = vpop.f32.mrf.mxu1 }
 0x207   :  { %v1446_v55 = vadd.f32 %v3176_v48, %v1436_v44  ;;  %v1482_v30 = vadd.f32 %v1473_v33, %v3176_v48  ;;  %v1308_v46 = vadd.f32 %v1307_v34, %v1209_v43  ;;  %v1112_v14 = vadd.f32 %v1111_v15, %v2745_v13 }
 0x208   :  { %v1550_v51 = vadd.f32 %v3212_v4, %v1540_v9  ;;  %v3350_v13 = vmin.f32 %v2943_v29, %v3112_v22 }
 0x209   :  { %v1491_v38 = vmul.f32 0.05, %v1446_v55  ;;  %v1509_v59 = vmul.f32 0.05, %v1482_v30  ;;  %v1407_v54 = vadd.f32 %v1406_v41, %v1308_v46  ;;  %v1408_v50 = vpop.f32.mrf.mxu0 }
 0x20a   :  { %v2237_v42 = vpack.c.bf16 %v1550_v51, %v1549_v12 }
 0x20b   :  { %v1500_v8 = vmax.f32 %v1446_v55, %v1491_v38  ;;  %v1518_v39 = vmax.f32 %v1482_v30, %v1509_v59  ;;  %v1428_v23 = vmax.f32 %v3167_v19, %v1407_v54  ;;  %v1465_v47 = vmin.f32 %v3167_v19, %v1407_v54 }
 0x20c   :  { %2245 = vst [vmem:[%s3338_s3 + $0x10] sm:$0xff] %v2237_v42   ;;  %v1210_v2 = vpop.f32.mrf.mxu2 }
 0x20d   :  { %v1531_v32 = vsel %vm3189_vm2, %v1500_v8, %v1518_v39  ;;  %v1437_v57 = vmax.f32 %v3349_v53, %v1428_v23  ;;  %v1474_v16 = vmin.f32 %v3350_v13, %v1465_v47  ;;  %v1211_v58 = vadd.f32 %v1210_v2, %v1112_v14 }
 0x20e   :  { %v1541_v29 = vmul.f32 %v3206_v24, %v1531_v32 }
 0x20f   :  { %v1447_v19 = vadd.f32 %v3176_v48, %v1437_v57  ;;  %v1483_v45 = vadd.f32 %v1474_v16, %v3176_v48  ;;  %v1310_v28 = vadd.f32 %v1309_v37, %v1211_v58 }
 0x211   :  { %v1492_v36 = vmul.f32 0.05, %v1447_v19  ;;  %v1510_v17 = vmul.f32 0.05, %v1483_v45  ;;  %v1409_v56 = vadd.f32 %v1408_v50, %v1310_v28 }
 0x213   :  { %v1501_v7 = vmax.f32 %v1447_v19, %v1492_v36  ;;  %v1519_v1 = vmax.f32 %v1483_v45, %v1510_v17  ;;  %v1429_v11 = vmax.f32 %v3170_v3, %v1409_v56  ;;  %v1466_v62 = vmin.f32 %v3170_v3, %v1409_v56 }
 0x214   :  { %v1551_v3 = vadd.f32 %v3212_v4, %v1541_v29 }
 0x215   :  { %v1532_v22 = vsel %vm3189_vm2, %v1501_v7, %v1519_v1  ;;  %v1438_v20 = vmax.f32 %v3351_v52, %v1429_v11  ;;  %v1475_v35 = vmin.f32 %v3352_v25, %v1466_v62 }
 0x216   :  { %v1542_v63 = vmul.f32 %v3206_v24, %v1532_v22 }
 0x217   :  { %v1448_v18 = vadd.f32 %v3176_v48, %v1438_v20  ;;  %v1484_v31 = vadd.f32 %v1475_v35, %v3176_v48 }
 0x218   :  { %v1552_v60 = vadd.f32 %v3212_v4, %v1542_v63 }
 0x219   :  { %v1493_v21 = vmul.f32 0.05, %v1448_v18  ;;  %v1511_v49 = vmul.f32 0.05, %v1484_v31 }
 0x21a   :  { %v2242_v40 = vpack.c.bf16 %v1552_v60, %v1551_v3 }
 0x21b   :  { %v1502_v27 = vmax.f32 %v1448_v18, %v1493_v21  ;;  %v1520_v34 = vmax.f32 %v1484_v31, %v1511_v49 }
 0x21c   :  { %2246 = vst [vmem:[%s3338_s3 + $0x18] sm:$0xff] %v2242_v40  }
 0x21d   :  { %v1533_v10 = vsel %vm3189_vm2, %v1502_v27, %v1520_v34 }
 0x21e   :  { %v1543_v0 = vmul.f32 %v3206_v24, %v1533_v10 }
 0x220   :  { %v1553_v48 = vadd.f32 %v3212_v4, %v1543_v0 }
 0x222   :  { %v1562_v26 = vpack.c.bf16 %v1553_v48, %v1553_v48 }
 0x224   :  { %1571 = vst [vmem:[%s3338_s3 + $0x20] sm:$0xf] %v1562_v26 }

// kernel: net_forward.9
= control target key start
LH: loop header
LB: loop body
LE: loop exit
PB: predicated region body
PF: predicated region fallthrough
CT: control target
= control target key end

     0   :  { %vm1323_vm0 = vcmask 56320   ;;  %s3132_s1 = inlined_call_operand.vmem [shape: bf16[1152,256], index: 1, kind: input, shape index: {}]   ;;  %s3133_s0 = inlined_call_operand.vmem [shape: bf16[8,1152], index: 0, kind: input, shape index: {}]   ;;  %s3134_s3 = inlined_call_operand.vmem [shape: bf16[256,7], index: 3, kind: input, shape index: {}]   ;;  %s3135_s4 = inlined_call_operand.vmem [shape: f32[1,7], index: 4, kind: input, shape index: {}]   ;;  %s3136_s2 = inlined_call_operand.vmem [shape: f32[1,256], index: 2, kind: input, shape index: {}]   ;;  %s3137_s5 = inlined_call_operand.vmem [shape: f32[8,7], index: 5, kind: output, shape index: {}]  }
   0x1   :  { %v1387_v0 = vld [vmem:[%s3132_s1 + $0x70] sm:$0xf]  ;;  %v1984_v1 = vld [vmem:[%s3132_s1 + $0x74] sm:$0xf0]  ;;  %v1379_v9 = vld [vmem:[%s3132_s1 + $0x60] sm:$0xf] }
   0x2   :  { %v1451_v2 = vld [vmem:[%s3132_s1 + $0xf0] sm:$0xf]  ;;  %v1388_v3 = vor.u32 %v1984_v1, %v1387_v0  ;;  %v2000_v4 = vld [vmem:[%s3132_s1 + $0xf4] sm:$0xf0]  ;;  %v1982_v10 = vld [vmem:[%s3132_s1 + $0x64] sm:$0xf0] }
   0x3   :  { %v1515_v5 = vld [vmem:[%s3132_s1 + $0x170] sm:$0xf]  ;;  %v2016_v6 = vld [vmem:[%s3132_s1 + $0x174] sm:$0xf0]  ;;  %v1452_v7 = vor.u32 %v2000_v4, %v1451_v2  ;;  %v1443_v11 = vld [vmem:[%s3132_s1 + $0xe0] sm:$0xf]  ;;  %v1380_v12 = vor.u32 %v1982_v10, %v1379_v9 }
   0x4   :  { %v1516_v8 = vor.u32 %v2016_v6, %v1515_v5  ;;  %927 = vmatpush.bf16.msra.mxu0 %v1388_v3  ;;  %v1998_v13 = vld [vmem:[%s3132_s1 + $0xe4] sm:$0xf0]  ;;  %v1579_v14 = vld [vmem:[%s3132_s1 + $0x1f0] sm:$0xf]  ;;  %v2032_v15 = vld [vmem:[%s3132_s1 + $0x1f4] sm:$0xf0] }
   0x5   :  { %940 = vmatpush.bf16.msra.mxu1 %v1452_v7  ;;  %v1444_v16 = vor.u32 %v1998_v13, %v1443_v11  ;;  %v1580_v17 = vor.u32 %v2032_v15, %v1579_v14  ;;  %v1507_v18 = vld [vmem:[%s3132_s1 + $0x160] sm:$0xf]  ;;  %v2014_v19 = vld [vmem:[%s3132_s1 + $0x164] sm:$0xf0]  ;;  %v1371_v20 = vld [vmem:[%s3132_s1 + $0x50] sm:$0xf] }
   0x6   :  { %953 = vmatpush.bf16.msra.mxu2 %v1516_v8  ;;  %v1508_v21 = vor.u32 %v2014_v19, %v1507_v18  ;;  %v1980_v22 = vld [vmem:[%s3132_s1 + $0x54] sm:$0xf0]  ;;  %v1435_v23 = vld [vmem:[%s3132_s1 + $0xd0] sm:$0xf]  ;;  %v1571_v25 = vld [vmem:[%s3132_s1 + $0x1e0] sm:$0xf] }
   0x7   :  { %v1996_v24 = vld [vmem:[%s3132_s1 + $0xd4] sm:$0xf0]  ;;  %966 = vmatpush.bf16.msra.mxu3 %v1580_v17  ;;  %v2030_v26 = vld [vmem:[%s3132_s1 + $0x1e4] sm:$0xf0]  ;;  %v1499_v27 = vld [vmem:[%s3132_s1 + $0x150] sm:$0xf]  ;;  %v1372_v28 = vor.u32 %v1980_v22, %v1371_v20 }
   0x8   :  { %928 = vmatpush.bf16.msra.mxu0 %v1380_v12  ;;  %v1572_v29 = vor.u32 %v2030_v26, %v1571_v25  ;;  %v2012_v30 = vld [vmem:[%s3132_s1 + $0x154] sm:$0xf0]  ;;  %v1363_v31 = vld [vmem:[%s3132_s1 + $0x40] sm:$0xf]  ;;  %v1978_v32 = vld [vmem:[%s3132_s1 + $0x44] sm:$0xf0]  ;;  %v1436_v33 = vor.u32 %v1996_v24, %v1435_v23 }
   0x9   :  { %941 = vmatpush.bf16.msra.mxu1 %v1444_v16  ;;  %v1500_v34 = vor.u32 %v2012_v30, %v1499_v27  ;;  %v1427_v35 = vld [vmem:[%s3132_s1 + $0xc0] sm:$0xf]  ;;  %v1994_v36 = vld [vmem:[%s3132_s1 + $0xc4] sm:$0xf0]  ;;  %v1563_v37 = vld [vmem:[%s3132_s1 + $0x1d0] sm:$0xf]  ;;  %v1364_v42 = vor.u32 %v1978_v32, %v1363_v31 }
   0xa   :  { %954 = vmatpush.bf16.msra.mxu2 %v1508_v21  ;;  %v2028_v38 = vld [vmem:[%s3132_s1 + $0x1d4] sm:$0xf0]  ;;  %v1491_v39 = vld [vmem:[%s3132_s1 + $0x140] sm:$0xf]  ;;  %v2010_v40 = vld [vmem:[%s3132_s1 + $0x144] sm:$0xf0]  ;;  %v1428_v45 = vor.u32 %v1994_v36, %v1427_v35 }
   0xb   :  { %967 = vmatpush.bf16.msra.mxu3 %v1572_v29  ;;  %v1564_v41 = vor.u32 %v2028_v38, %v1563_v37  ;;  %v1555_v43 = vld [vmem:[%s3132_s1 + $0x1c0] sm:$0xf]  ;;  %v2026_v44 = vld [vmem:[%s3132_s1 + $0x1c4] sm:$0xf0]  ;;  %v1492_v46 = vor.u32 %v2010_v40, %v1491_v39  ;;  %v1355_v47 = vld [vmem:[%s3132_s1 + $0x30] sm:$0xf] }
   0xc   :  { %929 = vmatpush.bf16.msra.mxu0 %v1372_v28  ;;  %v1976_v48 = vld [vmem:[%s3132_s1 + $0x34] sm:$0xf0]  ;;  %v1419_v49 = vld [vmem:[%s3132_s1 + $0xb0] sm:$0xf]  ;;  %v1556_v53 = vor.u32 %v2026_v44, %v1555_v43  ;;  %v1347_v59 = vld [vmem:[%s3132_s1 + $0x20] sm:$0xf] }
   0xd   :  { %942 = vmatpush.bf16.msra.mxu1 %v1436_v33  ;;  %v1992_v50 = vld [vmem:[%s3132_s1 + $0xb4] sm:$0xf0]  ;;  %v1483_v51 = vld [vmem:[%s3132_s1 + $0x130] sm:$0xf]  ;;  %v1356_v54 = vor.u32 %v1976_v48, %v1355_v47  ;;  %v1974_v60 = vld [vmem:[%s3132_s1 + $0x24] sm:$0xf0] }
   0xe   :  { %955 = vmatpush.bf16.msra.mxu2 %v1500_v34  ;;  %v2008_v52 = vld [vmem:[%s3132_s1 + $0x134] sm:$0xf0]  ;;  %v1547_v55 = vld [vmem:[%s3132_s1 + $0x1b0] sm:$0xf]  ;;  %v1420_v57 = vor.u32 %v1992_v50, %v1419_v49  ;;  %v1411_v61 = vld [vmem:[%s3132_s1 + $0xa0] sm:$0xf]  ;;  %v1348_v2 = vor.u32 %v1974_v60, %v1347_v59 }
   0xf   :  { %968 = vmatpush.bf16.msra.mxu3 %v1564_v41  ;;  %v2024_v56 = vld [vmem:[%s3132_s1 + $0x1b4] sm:$0xf0]  ;;  %v1484_v58 = vor.u32 %v2008_v52, %v1483_v51  ;;  %v1990_v62 = vld [vmem:[%s3132_s1 + $0xa4] sm:$0xf0]  ;;  %v1475_v63 = vld [vmem:[%s3132_s1 + $0x120] sm:$0xf] }
  0x10   :  { %930 = vmatpush.bf16.msra.mxu0 %v1364_v42  ;;  %v2006_v0 = vld [vmem:[%s3132_s1 + $0x124] sm:$0xf0]  ;;  %v1548_v1 = vor.u32 %v2024_v56, %v1547_v55  ;;  %v1539_v3 = vld [vmem:[%s3132_s1 + $0x1a0] sm:$0xf]  ;;  %v1412_v5 = vor.u32 %v1990_v62, %v1411_v61  ;;  %v1339_v7 = vld [vmem:[%s3132_s1 + $0x10] sm:$0xf] }
  0x11   :  { %943 = vmatpush.bf16.msra.mxu1 %v1428_v45  ;;  %v2022_v4 = vld [vmem:[%s3132_s1 + $0x1a4] sm:$0xf0]  ;;  %v1476_v6 = vor.u32 %v2006_v0, %v1475_v63  ;;  %v1972_v8 = vld [vmem:[%s3132_s1 + $0x14] sm:$0xf0]  ;;  %v1403_v9 = vld [vmem:[%s3132_s1 + $0x90] sm:$0xf] }
  0x12   :  { %956 = vmatpush.bf16.msra.mxu2 %v1492_v46  ;;  %v1988_v10 = vld [vmem:[%s3132_s1 + $0x94] sm:$0xf0]  ;;  %v1467_v11 = vld [vmem:[%s3132_s1 + $0x110] sm:$0xf]  ;;  %v1540_v13 = vor.u32 %v2022_v4, %v1539_v3  ;;  %v1331_v14 = vld [vmem:[%s3132_s1] sm:$0xf]  ;;  %v1340_v15 = vor.u32 %v1972_v8, %v1339_v7 }
  0x13   :  { %969 = vmatpush.bf16.msra.mxu3 %v1556_v53  ;;  %v2004_v12 = vld [vmem:[%s3132_s1 + $0x114] sm:$0xf0]  ;;  %v1970_v16 = vld [vmem:[%s3132_s1 + $0x4] sm:$0xf0]  ;;  %v1531_v17 = vld [vmem:[%s3132_s1 + $0x190] sm:$0xf]  ;;  %v1404_v19 = vor.u32 %v1988_v10, %v1403_v9 }
  0x14   :  { %931 = vmatpush.bf16.msra.mxu0 %v1356_v54  ;;  %v2020_v18 = vld [vmem:[%s3132_s1 + $0x194] sm:$0xf0]  ;;  %v1468_v20 = vor.u32 %v2004_v12, %v1467_v11  ;;  %v1395_v21 = vld [vmem:[%s3132_s1 + $0x80] sm:$0xf]  ;;  %v1986_v22 = vld [vmem:[%s3132_s1 + $0x84] sm:$0xf0]  ;;  %v1332_v31 = vor.u32 %v1970_v16, %v1331_v14 }
  0x15   :  { %944 = vmatpush.bf16.msra.mxu1 %v1420_v57  ;;  %v1643_v23 = vld [vmem:[%s3132_s1 + $0x270] sm:$0xf]  ;;  %v2048_v24 = vld [vmem:[%s3132_s1 + $0x274] sm:$0xf0]  ;;  %v1532_v27 = vor.u32 %v2020_v18, %v1531_v17  ;;  %v1459_v28 = vld [vmem:[%s3132_s1 + $0x100] sm:$0xf]  ;;  %v1396_v35 = vor.u32 %v1986_v22, %v1395_v21 }
  0x16   :  { %957 = vmatpush.bf16.msra.mxu2 %v1484_v58  ;;  %v1707_v25 = vld [vmem:[%s3132_s1 + $0x2f0] sm:$0xf]  ;;  %v2064_v26 = vld [vmem:[%s3132_s1 + $0x2f4] sm:$0xf0]  ;;  %v2002_v29 = vld [vmem:[%s3132_s1 + $0x104] sm:$0xf0]  ;;  %v1644_v36 = vor.u32 %v2048_v24, %v1643_v23 }
  0x17   :  { %970 = vmatpush.bf16.msra.mxu3 %v1548_v1  ;;  %v1771_v30 = vld [vmem:[%s3132_s1 + $0x370] sm:$0xf]  ;;  %v2080_v32 = vld [vmem:[%s3132_s1 + $0x374] sm:$0xf0]  ;;  %v1523_v33 = vld [vmem:[%s3132_s1 + $0x180] sm:$0xf]  ;;  %v1708_v39 = vor.u32 %v2064_v26, %v1707_v25  ;;  %v1460_v40 = vor.u32 %v2002_v29, %v1459_v28 }
  0x18   :  { %932 = vmatpush.bf16.msra.mxu0 %v1348_v2  ;;  %v2018_v34 = vld [vmem:[%s3132_s1 + $0x184] sm:$0xf0]  ;;  %v1835_v37 = vld [vmem:[%s3132_s1 + $0x3f0] sm:$0xf]  ;;  %v2096_v38 = vld [vmem:[%s3132_s1 + $0x3f4] sm:$0xf0]  ;;  %v1772_v43 = vor.u32 %v2080_v32, %v1771_v30 }
  0x19   :  { %945 = vmatpush.bf16.msra.mxu1 %v1412_v5  ;;  %v1635_v41 = vld [vmem:[%s3132_s1 + $0x260] sm:$0xf]  ;;  %v2046_v42 = vld [vmem:[%s3132_s1 + $0x264] sm:$0xf0]  ;;  %v1524_v44 = vor.u32 %v2018_v34, %v1523_v33  ;;  %v1836_v47 = vor.u32 %v2096_v38, %v1835_v37  ;;  %v1627_v54 = vld [vmem:[%s3132_s1 + $0x250] sm:$0xf] }
  0x1a   :  { %958 = vmatpush.bf16.msra.mxu2 %v1476_v6  ;;  %v1699_v45 = vld [vmem:[%s3132_s1 + $0x2e0] sm:$0xf]  ;;  %v2062_v46 = vld [vmem:[%s3132_s1 + $0x2e4] sm:$0xf0]  ;;  %v1636_v50 = vor.u32 %v2046_v42, %v1635_v41  ;;  %v2044_v55 = vld [vmem:[%s3132_s1 + $0x254] sm:$0xf0] }
  0x1b   :  { %971 = vmatpush.bf16.msra.mxu3 %v1540_v13  ;;  %v1763_v48 = vld [vmem:[%s3132_s1 + $0x360] sm:$0xf]  ;;  %v2078_v49 = vld [vmem:[%s3132_s1 + $0x364] sm:$0xf0]  ;;  %v1700_v53 = vor.u32 %v2062_v46, %v1699_v45  ;;  %v1691_v58 = vld [vmem:[%s3132_s1 + $0x2d0] sm:$0xf]  ;;  %v1628_v2 = vor.u32 %v2044_v55, %v1627_v54 }
  0x1c   :  { %933 = vmatpush.bf16.msra.mxu0 %v1340_v15  ;;  %v1827_v51 = vld [vmem:[%s3132_s1 + $0x3e0] sm:$0xf]  ;;  %v2094_v52 = vld [vmem:[%s3132_s1 + $0x3e4] sm:$0xf0]  ;;  %v1764_v57 = vor.u32 %v2078_v49, %v1763_v48  ;;  %v2060_v59 = vld [vmem:[%s3132_s1 + $0x2d4] sm:$0xf0] }
  0x1d   :  { %946 = vmatpush.bf16.msra.mxu1 %v1404_v19  ;;  %v21_v56 = vld [vmem:[%s3133_s0 + $0x8] sm:$0xff]  ;;  %v1828_v62 = vor.u32 %v2094_v52, %v1827_v51  ;;  %v1755_v63 = vld [vmem:[%s3132_s1 + $0x350] sm:$0xf]  ;;  %v2076_v0 = vld [vmem:[%s3132_s1 + $0x354] sm:$0xf0]  ;;  %v1692_v8 = vor.u32 %v2060_v59, %v1691_v58 }
  0x1e   :  { %959 = vmatpush.bf16.msra.mxu2 %v1468_v20  ;;  %v182_v60 = vunpack.c.l.b16 %v21_v56  ;;  %v183_v61 = vunpack.c.h.b16 %v21_v56  ;;  %v20_v1 = vld [vmem:[%s3133_s0] sm:$0xff]  ;;  %v1819_v3 = vld [vmem:[%s3132_s1 + $0x3d0] sm:$0xf]  ;;  %v2092_v4 = vld [vmem:[%s3132_s1 + $0x3d4] sm:$0xf0]  ;;  %v1756_v12 = vor.u32 %v2076_v0, %v1755_v63 }
  0x1f   :  { %972 = vmatpush.bf16.msra.mxu3 %v1532_v27  ;;  %v180_v6 = vunpack.c.l.b16 %v20_v1  ;;  %v1619_v9 = vld [vmem:[%s3132_s1 + $0x240] sm:$0xf]  ;;  %v2042_v10 = vld [vmem:[%s3132_s1 + $0x244] sm:$0xf0]  ;;  %v181_v11 = vunpack.c.h.b16 %v20_v1  ;;  %v1820_v16 = vor.u32 %v2092_v4, %v1819_v3  ;;  %v1611_v24 = vld [vmem:[%s3132_s1 + $0x230] sm:$0xf] }
  0x20   :  { %934 = vmatpush.bf16.msra.mxu0 %v1332_v31  ;;  %v2430_v5 = vpack.c.b16 %v182_v60, %v182_v60  ;;  %v2432_v7 = vpack.c.b16 %v183_v61, %v183_v61  ;;  %v1683_v13 = vld [vmem:[%s3132_s1 + $0x2c0] sm:$0xf]  ;;  %v2058_v14 = vld [vmem:[%s3132_s1 + $0x2c4] sm:$0xf0]  ;;  %v1620_v20 = vor.u32 %v2042_v10, %v1619_v9  ;;  %v2040_v25 = vld [vmem:[%s3132_s1 + $0x234] sm:$0xf0] }
  0x21   :  { %947 = vmatpush.bf16.msra.mxu1 %v1396_v35  ;;  %v2446_v15 = vpack.c.b16 %v180_v6, %v180_v6  ;;  %v1747_v17 = vld [vmem:[%s3132_s1 + $0x340] sm:$0xf]  ;;  %v2074_v18 = vld [vmem:[%s3132_s1 + $0x344] sm:$0xf0]  ;;  %v2456_v19 = vpack.c.b16 %v181_v11, %v181_v11  ;;  %v1684_v23 = vor.u32 %v2058_v14, %v1683_v13  ;;  %v1675_v27 = vld [vmem:[%s3132_s1 + $0x2b0] sm:$0xf]  ;;  %v1612_v32 = vor.u32 %v2040_v25, %v1611_v24 }
  0x22   :  { %960 = vmatpush.bf16.msra.mxu2 %v1460_v40  ;;  %v1811_v21 = vld [vmem:[%s3132_s1 + $0x3c0] sm:$0xf]  ;;  %v2090_v22 = vld [vmem:[%s3132_s1 + $0x3c4] sm:$0xf0]  ;;  %v1748_v26 = vor.u32 %v2074_v18, %v1747_v17  ;;  %v2056_v28 = vld [vmem:[%s3132_s1 + $0x2b4] sm:$0xf0] }
  0x23   :  { %973 = vmatpush.bf16.msra.mxu3 %v1524_v44  ;;  %935 = vmatmul.bf16.vlgmr.msra.gmra.mxu0 %v2446_v15  ;;  %v1812_v29 = vor.u32 %v2090_v22, %v1811_v21  ;;  %v1739_v30 = vld [vmem:[%s3132_s1 + $0x330] sm:$0xf]  ;;  %v2072_v31 = vld [vmem:[%s3132_s1 + $0x334] sm:$0xf0]  ;;  %v1676_v35 = vor.u32 %v2056_v28, %v1675_v27  ;;  %v2038_v37 = vld [vmem:[%s3132_s1 + $0x224] sm:$0xf0] }
  0x24   :  { %979 = vmatpush.bf16.msrb.mxu0 %v1644_v36  ;;  %948 = vmatmul.bf16.vlgmr.msra.gmra.mxu1 %v2456_v19  ;;  %v1803_v33 = vld [vmem:[%s3132_s1 + $0x3b0] sm:$0xf]  ;;  %v2088_v34 = vld [vmem:[%s3132_s1 + $0x3b4] sm:$0xf0]  ;;  %v1603_v36 = vld [vmem:[%s3132_s1 + $0x220] sm:$0xf]  ;;  %v1740_v38 = vor.u32 %v2072_v31, %v1739_v30 }
  0x25   :  { %992 = vmatpush.bf16.msrb.mxu1 %v1708_v39  ;;  %961 = vmatmul.bf16.vlgmr.msra.gmra.mxu2 %v2430_v5  ;;  %v1667_v39 = vld [vmem:[%s3132_s1 + $0x2a0] sm:$0xf]  ;;  %v2054_v40 = vld [vmem:[%s3132_s1 + $0x2a4] sm:$0xf0]  ;;  %v1804_v41 = vor.u32 %v2088_v34, %v1803_v33  ;;  %v1604_v44 = vor.u32 %v2038_v37, %v1603_v36  ;;  %v1595_v48 = vld [vmem:[%s3132_s1 + $0x210] sm:$0xf] }
  0x26   :  { %1005 = vmatpush.bf16.msrb.mxu2 %v1772_v43  ;;  %974 = vmatmul.bf16.vlgmr.msra.gmra.mxu3 %v2432_v7  ;;  %v1731_v42 = vld [vmem:[%s3132_s1 + $0x320] sm:$0xf]  ;;  %v2070_v43 = vld [vmem:[%s3132_s1 + $0x324] sm:$0xf0]  ;;  %v2036_v49 = vld [vmem:[%s3132_s1 + $0x214] sm:$0xf0] }
  0x27   :  { %1018 = vmatpush.bf16.msrb.mxu3 %v1836_v47  ;;  %v1795_v45 = vld [vmem:[%s3132_s1 + $0x3a0] sm:$0xf]  ;;  %v2086_v46 = vld [vmem:[%s3132_s1 + $0x3a4] sm:$0xf0]  ;;  %v1668_v47 = vor.u32 %v2054_v40, %v1667_v39  ;;  %v1659_v51 = vld [vmem:[%s3132_s1 + $0x290] sm:$0xf]  ;;  %v1596_v58 = vor.u32 %v2036_v49, %v1595_v48 }
  0x28   :  { %980 = vmatpush.bf16.msrb.mxu0 %v1636_v50  ;;  %v1732_v50 = vor.u32 %v2070_v43, %v1731_v42  ;;  %v2052_v52 = vld [vmem:[%s3132_s1 + $0x294] sm:$0xf0]  ;;  %v1796_v54 = vor.u32 %v2086_v46, %v1795_v45  ;;  %v1587_v56 = vld [vmem:[%s3132_s1 + $0x200] sm:$0xf]  ;;  %v2050_v60 = vld [vmem:[%s3132_s1 + $0x284] sm:$0xf0] }
  0x29   :  { %993 = vmatpush.bf16.msrb.mxu1 %v1700_v53  ;;  %v1723_v53 = vld [vmem:[%s3132_s1 + $0x310] sm:$0xf]  ;;  %v2068_v55 = vld [vmem:[%s3132_s1 + $0x314] sm:$0xf0]  ;;  %v1651_v59 = vld [vmem:[%s3132_s1 + $0x280] sm:$0xf]  ;;  %v1660_v63 = vor.u32 %v2052_v52, %v1659_v51 }
  0x2a   :  { %1006 = vmatpush.bf16.msrb.mxu2 %v1764_v57  ;;  %v2034_v57 = vld [vmem:[%s3132_s1 + $0x204] sm:$0xf0]  ;;  %v1787_v61 = vld [vmem:[%s3132_s1 + $0x390] sm:$0xf]  ;;  %v2112_v1 = vld [vmem:[%s3132_s1 + $0x474] sm:$0xf0]  ;;  %v1724_v3 = vor.u32 %v2068_v55, %v1723_v53 }
  0x2b   :  { %1019 = vmatpush.bf16.msrb.mxu3 %v1828_v62  ;;  %v2084_v62 = vld [vmem:[%s3132_s1 + $0x394] sm:$0xf0]  ;;  %v1899_v0 = vld [vmem:[%s3132_s1 + $0x470] sm:$0xf]  ;;  %v1983_v4 = vld [vmem:[%s3132_s1 + $0x74] sm:$0xf]  ;;  %v1588_v13 = vor.u32 %v2034_v57, %v1587_v56 }
  0x2c   :  { %981 = vmatpush.bf16.msrb.mxu0 %v1628_v2  ;;  %v22_v2 = vld [vmem:[%s3133_s0 + $0x10] sm:$0xff]  ;;  %v1389_v6 = vld [vmem:[%s3132_s1 + $0x78] sm:$0xf0]  ;;  %v1788_v9 = vor.u32 %v2084_v62, %v1787_v61  ;;  %v1715_v10 = vld [vmem:[%s3132_s1 + $0x300] sm:$0xf]  ;;  %v1900_v21 = vor.u32 %v2112_v1, %v1899_v0 }
  0x2d   :  { %994 = vmatpush.bf16.msrb.mxu1 %v1692_v8  ;;  %v23_v8 = vld [vmem:[%s3133_s0 + $0x18] sm:$0xff]  ;;  %v2066_v11 = vld [vmem:[%s3132_s1 + $0x304] sm:$0xf0]  ;;  %v184_v18 = vunpack.c.l.b16 %v22_v2  ;;  %v2015_v22 = vld [vmem:[%s3132_s1 + $0x174] sm:$0xf]  ;;  %v1392_v25 = vor.u32 %v1983_v4, %v1389_v6  ;;  %v185_v34 = vunpack.c.h.b16 %v22_v2 }
  0x2e   :  { %1007 = vmatpush.bf16.msrb.mxu2 %v1756_v12  ;;  %v1999_v12 = vld [vmem:[%s3132_s1 + $0xf4] sm:$0xf]  ;;  %v1453_v14 = vld [vmem:[%s3132_s1 + $0xf8] sm:$0xf0]  ;;  %v2082_v17 = vld [vmem:[%s3132_s1 + $0x384] sm:$0xf0]  ;;  %v186_v24 = vunpack.c.l.b16 %v23_v8 }
  0x2f   :  { %1020 = vmatpush.bf16.msrb.mxu3 %v1820_v16  ;;  %v1779_v16 = vld [vmem:[%s3132_s1 + $0x380] sm:$0xf]  ;;  %v2110_v28 = vld [vmem:[%s3132_s1 + $0x464] sm:$0xf0]  ;;  %v1456_v30 = vor.u32 %v1999_v12, %v1453_v14  ;;  %v1381_v33 = vld [vmem:[%s3132_s1 + $0x68] sm:$0xf0] }
  0x30   :  { %982 = vmatpush.bf16.msrb.mxu0 %v1620_v20  ;;  %v1652_v20 = vor.u32 %v2050_v60, %v1651_v59  ;;  %v1891_v27 = vld [vmem:[%s3132_s1 + $0x460] sm:$0xf]  ;;  %v1780_v31 = vor.u32 %v2082_v17, %v1779_v16  ;;  %v1997_v36 = vld [vmem:[%s3132_s1 + $0xe4] sm:$0xf]  ;;  %v1445_v37 = vld [vmem:[%s3132_s1 + $0xe8] sm:$0xf0]  ;;  %v2612_v40 = vpack.c.b16 %v186_v24, %v186_v24 }
  0x31   :  { %995 = vmatpush.bf16.msrb.mxu1 %v1684_v23  ;;  %v1517_v23 = vld [vmem:[%s3132_s1 + $0x178] sm:$0xf0]  ;;  %v1892_v39 = vor.u32 %v2110_v28, %v1891_v27  ;;  %v1509_v42 = vld [vmem:[%s3132_s1 + $0x168] sm:$0xf0]  ;;  %v1883_v45 = vld [vmem:[%s3132_s1 + $0x450] sm:$0xf] }
  0x32   :  { %1008 = vmatpush.bf16.msrb.mxu2 %v1748_v26  ;;  %v1716_v26 = vor.u32 %v2066_v11, %v1715_v10  ;;  %v2108_v46 = vld [vmem:[%s3132_s1 + $0x454] sm:$0xf0]  ;;  %v1979_v48 = vld [vmem:[%s3132_s1 + $0x54] sm:$0xf]  ;;  %v1373_v49 = vld [vmem:[%s3132_s1 + $0x58] sm:$0xf0] }
  0x33   :  { %1021 = vmatpush.bf16.msrb.mxu3 %v1812_v29  ;;  %v187_v29 = vunpack.c.h.b16 %v23_v8  ;;  %v1995_v52 = vld [vmem:[%s3132_s1 + $0xd4] sm:$0xf]  ;;  %v1437_v53 = vld [vmem:[%s3132_s1 + $0xd8] sm:$0xf0]  ;;  %v1376_v57 = vor.u32 %v1979_v48, %v1373_v49  ;;  %v2106_v59 = vld [vmem:[%s3132_s1 + $0x444] sm:$0xf0] }
  0x34   :  { %983 = vmatpush.bf16.msrb.mxu0 %v1612_v32  ;;  %v1981_v32 = vld [vmem:[%s3132_s1 + $0x64] sm:$0xf]  ;;  %v2011_v55 = vld [vmem:[%s3132_s1 + $0x154] sm:$0xf]  ;;  %v1501_v56 = vld [vmem:[%s3132_s1 + $0x158] sm:$0xf0]  ;;  %v1440_v60 = vor.u32 %v1995_v52, %v1437_v53 }
  0x35   :  { %996 = vmatpush.bf16.msrb.mxu1 %v1676_v35  ;;  %v1520_v35 = vor.u32 %v2015_v22, %v1517_v23  ;;  %v1384_v43 = vor.u32 %v1981_v32, %v1381_v33  ;;  %v1977_v61 = vld [vmem:[%s3132_s1 + $0x44] sm:$0xf]  ;;  %v1365_v62 = vld [vmem:[%s3132_s1 + $0x48] sm:$0xf0]  ;;  %v1867_v8 = vld [vmem:[%s3132_s1 + $0x430] sm:$0xf] }
  0x36   :  { %1009 = vmatpush.bf16.msrb.mxu2 %v1740_v38  ;;  %v2610_v38 = vpack.c.b16 %v184_v18, %v184_v18  ;;  %v1993_v0 = vld [vmem:[%s3132_s1 + $0xc4] sm:$0xf]  ;;  %v1429_v1 = vld [vmem:[%s3132_s1 + $0xc8] sm:$0xf0]  ;;  %v1368_v6 = vor.u32 %v1977_v61, %v1365_v62  ;;  %v1975_v11 = vld [vmem:[%s3132_s1 + $0x34] sm:$0xf] }
  0x37   :  { %1022 = vmatpush.bf16.msrb.mxu3 %v1804_v41  ;;  %v2013_v41 = vld [vmem:[%s3132_s1 + $0x164] sm:$0xf]  ;;  %v1493_v4 = vld [vmem:[%s3132_s1 + $0x148] sm:$0xf0]  ;;  %v1432_v10 = vor.u32 %v1993_v0, %v1429_v1  ;;  %v1357_v12 = vld [vmem:[%s3132_s1 + $0x38] sm:$0xf0] }
  0x38   :  { %984 = vmatpush.bf16.msrb.mxu0 %v1604_v44  ;;  %v2620_v44 = vpack.c.b16 %v187_v29, %v187_v29  ;;  %v1512_v51 = vor.u32 %v2013_v41, %v1509_v42  ;;  %v1991_v14 = vld [vmem:[%s3132_s1 + $0xb4] sm:$0xf]  ;;  %v1421_v16 = vld [vmem:[%s3132_s1 + $0xb8] sm:$0xf0]  ;;  %v1859_v22 = vld [vmem:[%s3132_s1 + $0x420] sm:$0xf] }
  0x39   :  { %997 = vmatpush.bf16.msrb.mxu1 %v1668_v47  ;;  %v1448_v47 = vor.u32 %v1997_v36, %v1445_v37  ;;  %v2007_v18 = vld [vmem:[%s3132_s1 + $0x134] sm:$0xf]  ;;  %v2102_v23 = vld [vmem:[%s3132_s1 + $0x424] sm:$0xf0]  ;;  %v1424_v24 = vor.u32 %v1991_v14, %v1421_v16  ;;  %v1989_v28 = vld [vmem:[%s3132_s1 + $0xa4] sm:$0xf] }
  0x3a   :  { %1010 = vmatpush.bf16.msrb.mxu2 %v1732_v50  ;;  %v2634_v50 = vpack.c.b16 %v185_v34, %v185_v34  ;;  %v1413_v29 = vld [vmem:[%s3132_s1 + $0xa8] sm:$0xf0]  ;;  %v1851_v34 = vld [vmem:[%s3132_s1 + $0x410] sm:$0xf]  ;;  %v1971_v37 = vld [vmem:[%s3132_s1 + $0x14] sm:$0xf] }
  0x3b   :  { %1023 = vmatpush.bf16.msrb.mxu3 %v1796_v54  ;;  %v1884_v54 = vor.u32 %v2108_v46, %v1883_v45  ;;  %v1477_v32 = vld [vmem:[%s3132_s1 + $0x128] sm:$0xf0]  ;;  %v1416_v36 = vor.u32 %v1989_v28, %v1413_v29  ;;  %v1987_v42 = vld [vmem:[%s3132_s1 + $0x94] sm:$0xf]  ;;  %v1843_v45 = vld [vmem:[%s3132_s1 + $0x400] sm:$0xf] }
  0x3c   :  { %985 = vmatpush.bf16.msrb.mxu0 %v1596_v58  ;;  %v1875_v58 = vld [vmem:[%s3132_s1 + $0x440] sm:$0xf]  ;;  %v1469_v48 = vld [vmem:[%s3132_s1 + $0x118] sm:$0xf0]  ;;  %v2098_v52 = vld [vmem:[%s3132_s1 + $0x404] sm:$0xf0] }
  0x3d   :  { %998 = vmatpush.bf16.msrb.mxu1 %v1660_v63  ;;  %v1504_v63 = vor.u32 %v2011_v55, %v1501_v56  ;;  %v1876_v2 = vor.u32 %v2106_v59, %v1875_v58  ;;  %v24_v49 = vld [vmem:[%s3133_s0 + $0x20] sm:$0xf]  ;;  %v1969_v53 = vld [vmem:[%s3132_s1 + $0x4] sm:$0xf]  ;;  %v2031_v56 = vld [vmem:[%s3132_s1 + $0x1f4] sm:$0xf]  ;;  %v1844_v0 = vor.u32 %v2098_v52, %v1843_v45 }
  0x3e   :  { %1011 = vmatpush.bf16.msrb.mxu2 %v1724_v3  ;;  %v2009_v3 = vld [vmem:[%s3132_s1 + $0x144] sm:$0xf]  ;;  %v2047_v58 = vld [vmem:[%s3132_s1 + $0x274] sm:$0xf]  ;;  %v188_v61 = vunpack.c.l.b16 %v24_v49  ;;  %v1773_v14 = vld [vmem:[%s3132_s1 + $0x378] sm:$0xf0] }
  0x3f   :  { %1024 = vmatpush.bf16.msrb.mxu3 %v1788_v9  ;;  %v2104_v9 = vld [vmem:[%s3132_s1 + $0x434] sm:$0xf0]  ;;  %v1985_v62 = vld [vmem:[%s3132_s1 + $0x84] sm:$0xf]  ;;  %v2063_v1 = vld [vmem:[%s3132_s1 + $0x2f4] sm:$0xf] }
  0x40   :  { %986 = vmatpush.bf16.msrb.mxu0 %v1588_v13  ;;  %v1496_v13 = vor.u32 %v2009_v3, %v1493_v4  ;;  %v1868_v17 = vor.u32 %v2104_v9, %v1867_v8  ;;  %v1461_v8 = vld [vmem:[%s3132_s1 + $0x108] sm:$0xf0]  ;;  %v2029_v9 = vld [vmem:[%s3132_s1 + $0x1e4] sm:$0xf]  ;;  %v2805_v16 = vpack.c.b16 %v188_v61, %v188_v61  ;;  %v1565_v28 = vld [vmem:[%s3132_s1 + $0x1d8] sm:$0xf0] }
  0x41   :  { %999 = vmatpush.bf16.msrb.mxu1 %v1652_v20  ;;  %v1485_v20 = vld [vmem:[%s3132_s1 + $0x138] sm:$0xf0]  ;;  %v2077_v29 = vld [vmem:[%s3132_s1 + $0x364] sm:$0xf]  ;;  %v2023_v52 = vld [vmem:[%s3132_s1 + $0x1b4] sm:$0xf] }
  0x42   :  { %1012 = vmatpush.bf16.msrb.mxu2 %v1716_v26  ;;  %v1349_v26 = vld [vmem:[%s3132_s1 + $0x28] sm:$0xf0]  ;;  %v1488_v27 = vor.u32 %v2007_v18, %v1485_v20  ;;  %v2045_v18 = vld [vmem:[%s3132_s1 + $0x264] sm:$0xf] }
  0x43   :  { %1025 = vmatpush.bf16.msrb.mxu3 %v1780_v31  ;;  %987 = vmatmul.bf16.vlgmr.msrb.gmra.mxu0 %v2610_v38  ;;  %v2005_v31 = vld [vmem:[%s3132_s1 + $0x124] sm:$0xf]  ;;  %v1637_v20 = vld [vmem:[%s3132_s1 + $0x268] sm:$0xf0] }
  0x44   :  { %1031 = vmatpush.bf16.msra.mxu0 %v1900_v21  ;;  %1000 = vmatmul.bf16.vlgmr.msrb.gmra.mxu1 %v2634_v50  ;;  %v1360_v21 = vor.u32 %v1975_v11, %v1357_v12  ;;  %v1480_v41 = vor.u32 %v2005_v31, %v1477_v32  ;;  %v1573_v12 = vld [vmem:[%s3132_s1 + $0x1e8] sm:$0xf0]  ;;  %v2043_v32 = vld [vmem:[%s3132_s1 + $0x254] sm:$0xf] }
  0x45   :  { %1044 = vmatpush.bf16.msra.mxu1 %v1392_v25  ;;  %1013 = vmatmul.bf16.vlgmr.msrb.gmra.mxu2 %v2612_v40  ;;  %v1973_v25 = vld [vmem:[%s3132_s1 + $0x24] sm:$0xf] }
  0x46   :  { %1057 = vmatpush.bf16.msra.mxu2 %v1456_v30  ;;  %1026 = vmatmul.bf16.vlgmr.msrb.gmra.mxu3 %v2620_v44  ;;  %v1860_v30 = vor.u32 %v2102_v23, %v1859_v22  ;;  %v1352_v33 = vor.u32 %v1973_v25, %v1349_v26  ;;  %v2061_v22 = vld [vmem:[%s3132_s1 + $0x2e4] sm:$0xf]  ;;  %v1701_v23 = vld [vmem:[%s3132_s1 + $0x2e8] sm:$0xf0]  ;;  %v2027_v26 = vld [vmem:[%s3132_s1 + $0x1d4] sm:$0xf] }
  0x47   :  { %1070 = vmatpush.bf16.msra.mxu3 %v1520_v35  ;;  %v2100_v35 = vld [vmem:[%s3132_s1 + $0x414] sm:$0xf0]  ;;  %v1704_v31 = vor.u32 %v2061_v22, %v1701_v23  ;;  %v2035_v22 = vld [vmem:[%s3132_s1 + $0x214] sm:$0xf]  ;;  %v1597_v23 = vld [vmem:[%s3132_s1 + $0x218] sm:$0xf0] }
  0x48   :  { %1032 = vmatpush.bf16.msra.mxu0 %v1892_v39  ;;  %v1341_v39 = vld [vmem:[%s3132_s1 + $0x18] sm:$0xf0]  ;;  %v1852_v46 = vor.u32 %v2100_v35, %v1851_v34  ;;  %v2059_v34 = vld [vmem:[%s3132_s1 + $0x2d4] sm:$0xf] }
  0x49   :  { %1045 = vmatpush.bf16.msra.mxu1 %v1384_v43  ;;  %v1405_v43 = vld [vmem:[%s3132_s1 + $0x98] sm:$0xf0] }
  0x4a   :  { %1058 = vmatpush.bf16.msra.mxu2 %v1448_v47  ;;  %v2003_v47 = vld [vmem:[%s3132_s1 + $0x114] sm:$0xf]  ;;  %v1408_v55 = vor.u32 %v1987_v42, %v1405_v43  ;;  %v1693_v35 = vld [vmem:[%s3132_s1 + $0x2d8] sm:$0xf0]  ;;  %v1557_v42 = vld [vmem:[%s3132_s1 + $0x1c8] sm:$0xf0] }
  0x4b   :  { %1071 = vmatpush.bf16.msra.mxu3 %v1512_v51  ;;  %v1344_v51 = vor.u32 %v1971_v37, %v1341_v39  ;;  %v1472_v59 = vor.u32 %v2003_v47, %v1469_v48  ;;  %v2025_v39 = vld [vmem:[%s3132_s1 + $0x1c4] sm:$0xf]  ;;  %v2075_v43 = vld [vmem:[%s3132_s1 + $0x354] sm:$0xf]  ;;  %v1696_v45 = vor.u32 %v2059_v34, %v1693_v35  ;;  %v1621_v47 = vld [vmem:[%s3132_s1 + $0x248] sm:$0xf0] }
  0x4c   :  { %1033 = vmatpush.bf16.msra.mxu0 %v1884_v54  ;;  %v1333_v54 = vld [vmem:[%s3132_s1 + $0x8] sm:$0xf0]  ;;  %v2057_v48 = vld [vmem:[%s3132_s1 + $0x2c4] sm:$0xf]  ;;  %v1560_v49 = vor.u32 %v2025_v39, %v1557_v42  ;;  %v1725_v34 = vld [vmem:[%s3132_s1 + $0x318] sm:$0xf0] }
  0x4d   :  { %1046 = vmatpush.bf16.msra.mxu1 %v1376_v57  ;;  %v1581_v57 = vld [vmem:[%s3132_s1 + $0x1f8] sm:$0xf0]  ;;  %v1336_v3 = vor.u32 %v1969_v53, %v1333_v54  ;;  %v2073_v54 = vld [vmem:[%s3132_s1 + $0x344] sm:$0xf]  ;;  %v2111_v39 = vld [vmem:[%s3132_s1 + $0x474] sm:$0xf] }
  0x4e   :  { %1059 = vmatpush.bf16.msra.mxu2 %v1440_v60  ;;  %v1645_v60 = vld [vmem:[%s3132_s1 + $0x278] sm:$0xf0]  ;;  %v1584_v4 = vor.u32 %v2031_v56, %v1581_v57  ;;  %v2039_v57 = vld [vmem:[%s3132_s1 + $0x234] sm:$0xf]  ;;  %v2049_v42 = vld [vmem:[%s3132_s1 + $0x284] sm:$0xf] }
  0x4f   :  { %1072 = vmatpush.bf16.msra.mxu3 %v1504_v63  ;;  %v1397_v63 = vld [vmem:[%s3132_s1 + $0x88] sm:$0xf0] }
  0x50   :  { %1034 = vmatpush.bf16.msra.mxu0 %v1876_v2  ;;  %v1709_v2 = vld [vmem:[%s3132_s1 + $0x2f8] sm:$0xf0]  ;;  %v1400_v11 = vor.u32 %v1985_v62, %v1397_v63  ;;  %v2021_v63 = vld [vmem:[%s3132_s1 + $0x1a4] sm:$0xf] }
  0x51   :  { %1047 = vmatpush.bf16.msra.mxu1 %v1368_v6  ;;  %v2001_v6 = vld [vmem:[%s3132_s1 + $0x104] sm:$0xf] }
  0x52   :  { %1060 = vmatpush.bf16.msra.mxu2 %v1432_v10  ;;  %v1648_v10 = vor.u32 %v2047_v58, %v1645_v60  ;;  %v1613_v58 = vld [vmem:[%s3132_s1 + $0x238] sm:$0xf0] }
  0x53   :  { %1073 = vmatpush.bf16.msra.mxu3 %v1496_v13  ;;  %v2079_v13 = vld [vmem:[%s3132_s1 + $0x374] sm:$0xf]  ;;  %v1677_v60 = vld [vmem:[%s3132_s1 + $0x2b8] sm:$0xf0] }
  0x54   :  { %1035 = vmatpush.bf16.msra.mxu0 %v1868_v17  ;;  %v1712_v17 = vor.u32 %v2063_v1, %v1709_v2  ;;  %v1776_v25 = vor.u32 %v2079_v13, %v1773_v14  ;;  %v1541_v1 = vld [vmem:[%s3132_s1 + $0x1a8] sm:$0xf0]  ;;  %v2071_v2 = vld [vmem:[%s3132_s1 + $0x334] sm:$0xf] }
  0x55   :  { %1048 = vmatpush.bf16.msra.mxu1 %v1360_v21  ;;  %v1464_v21 = vor.u32 %v2001_v6, %v1461_v8  ;;  %v2037_v6 = vld [vmem:[%s3132_s1 + $0x224] sm:$0xf]  ;;  %v1605_v8 = vld [vmem:[%s3132_s1 + $0x228] sm:$0xf0]  ;;  %v2019_v13 = vld [vmem:[%s3132_s1 + $0x194] sm:$0xf] }
  0x56   :  { %1061 = vmatpush.bf16.msra.mxu2 %v1424_v24  ;;  %v1576_v24 = vor.u32 %v2029_v9, %v1573_v12  ;;  %v2053_v9 = vld [vmem:[%s3132_s1 + $0x2a4] sm:$0xf]  ;;  %v1608_v14 = vor.u32 %v2037_v6, %v1605_v8  ;;  %v1869_v6 = vld [vmem:[%s3132_s1 + $0x438] sm:$0xf0] }
  0x57   :  { %1074 = vmatpush.bf16.msra.mxu3 %v1488_v27  ;;  %v1640_v27 = vor.u32 %v2045_v18, %v1637_v20  ;;  %v2069_v18 = vld [vmem:[%s3132_s1 + $0x324] sm:$0xf]  ;;  %v1733_v20 = vld [vmem:[%s3132_s1 + $0x328] sm:$0xf0] }
  0x58   :  { %1036 = vmatpush.bf16.msra.mxu0 %v1860_v30  ;;  %v1765_v30 = vld [vmem:[%s3132_s1 + $0x368] sm:$0xf0] }
  0x59   :  { %1049 = vmatpush.bf16.msra.mxu1 %v1352_v33  ;;  %v1629_v33 = vld [vmem:[%s3132_s1 + $0x258] sm:$0xf0]  ;;  %v1768_v37 = vor.u32 %v2077_v29, %v1765_v30  ;;  %v1525_v29 = vld [vmem:[%s3132_s1 + $0x188] sm:$0xf0]  ;;  %v2033_v30 = vld [vmem:[%s3132_s1 + $0x204] sm:$0xf] }
  0x5a   :  { %1062 = vmatpush.bf16.msra.mxu2 %v1416_v36  ;;  %v1568_v36 = vor.u32 %v2027_v26, %v1565_v28  ;;  %v2017_v28 = vld [vmem:[%s3132_s1 + $0x184] sm:$0xf] }
  0x5b   :  { %1075 = vmatpush.bf16.msra.mxu3 %v1480_v41  ;;  %v1632_v41 = vor.u32 %v2043_v32, %v1629_v33  ;;  %v1589_v32 = vld [vmem:[%s3132_s1 + $0x208] sm:$0xf0]  ;;  %v2067_v33 = vld [vmem:[%s3132_s1 + $0x314] sm:$0xf] }
  0x5c   :  { %1037 = vmatpush.bf16.msra.mxu0 %v1852_v46  ;;  %v2041_v46 = vld [vmem:[%s3132_s1 + $0x244] sm:$0xf] }
  0x5d   :  { %1050 = vmatpush.bf16.msra.mxu1 %v1344_v51  ;;  %v1624_v53 = vor.u32 %v2041_v46, %v1621_v47  ;;  %v1592_v46 = vor.u32 %v2033_v30, %v1589_v32  ;;  %v2119_v32 = vld [vmem:[%s3134_s3 + $0x30] sm:$0xff] }
  0x5e   :  { %1063 = vmatpush.bf16.msra.mxu2 %v1408_v55  ;;  %v1749_v55 = vld [vmem:[%s3132_s1 + $0x348] sm:$0xf0] }
  0x5f   :  { %1076 = vmatpush.bf16.msra.mxu3 %v1472_v59  ;;  %v2055_v59 = vld [vmem:[%s3132_s1 + $0x2b4] sm:$0xf]  ;;  %v1752_v62 = vor.u32 %v2073_v54, %v1749_v55  ;;  %v1893_v54 = vld [vmem:[%s3132_s1 + $0x468] sm:$0xf0] }
  0x60   :  { %1038 = vmatpush.bf16.msra.mxu0 %v1844_v0  ;;  %v1616_v0 = vor.u32 %v2039_v57, %v1613_v58  ;;  %v2091_v58 = vld [vmem:[%s3132_s1 + $0x3d4] sm:$0xf] }
  0x61   :  { %1051 = vmatpush.bf16.msra.mxu1 %v1336_v3  ;;  %v1741_v3 = vld [vmem:[%s3132_s1 + $0x338] sm:$0xf0] }
  0x62   :  { %1064 = vmatpush.bf16.msra.mxu2 %v1400_v11  ;;  %v1544_v11 = vor.u32 %v2021_v63, %v1541_v1  ;;  %v1744_v12 = vor.u32 %v2071_v2, %v1741_v3  ;;  %v2087_v3 = vld [vmem:[%s3132_s1 + $0x3b4] sm:$0xf] }
  0x63   :  { %1039 = vmatmul.bf16.vlgmr.msra.gmra.mxu0 %v2805_v16  ;;  %1077 = vmatpush.bf16.msra.mxu3 %v1464_v21 }
  0x64   :  { %1083 = vmatpush.bf16.msrb.mxu0 %v1584_v4  ;;  %1052 = vmatmul.bf16.vlgmr.msra.gmra.mxu1 %v2446_v15  ;;  %v1757_v15 = vld [vmem:[%s3132_s1 + $0x358] sm:$0xf0]  ;;  %v1680_v4 = vor.u32 %v2055_v59, %v1677_v60  ;;  %v2107_v60 = vld [vmem:[%s3132_s1 + $0x454] sm:$0xf] }
  0x65   :  { %1096 = vmatpush.bf16.msrb.mxu1 %v1648_v10  ;;  %1065 = vmatmul.bf16.vlgmr.msra.gmra.mxu2 %v2456_v19  ;;  %v1685_v19 = vld [vmem:[%s3132_s1 + $0x2c8] sm:$0xf0]  ;;  %v1760_v51 = vor.u32 %v2075_v43, %v1757_v15  ;;  %v1528_v15 = vor.u32 %v2017_v28, %v1525_v29  ;;  %v1821_v59 = vld [vmem:[%s3132_s1 + $0x3d8] sm:$0xf0] }
  0x66   :  { %1109 = vmatpush.bf16.msrb.mxu2 %v1712_v17  ;;  %1078 = vmatmul.bf16.vlgmr.msra.gmra.mxu3 %v2430_v5  ;;  %v1549_v5 = vld [vmem:[%s3132_s1 + $0x1b8] sm:$0xf0]  ;;  %v1688_v56 = vor.u32 %v2057_v48, %v1685_v19  ;;  %v1669_v10 = vld [vmem:[%s3132_s1 + $0x2a8] sm:$0xf0]  ;;  %v2065_v48 = vld [vmem:[%s3132_s1 + $0x304] sm:$0xf] }
  0x67   :  { %1122 = vmatpush.bf16.msrb.mxu3 %v1776_v25  ;;  %v1552_v61 = vor.u32 %v2023_v52, %v1549_v5  ;;  %v1533_v17 = vld [vmem:[%s3132_s1 + $0x198] sm:$0xf0]  ;;  %v1672_v21 = vor.u32 %v2053_v9, %v1669_v10  ;;  %v1653_v43 = vld [vmem:[%s3132_s1 + $0x288] sm:$0xf0]  ;;  %v2093_v52 = vld [vmem:[%s3132_s1 + $0x3e4] sm:$0xf] }
  0x68   :  { %1084 = vmatpush.bf16.msrb.mxu0 %v1576_v24  ;;  %v2051_v24 = vld [vmem:[%s3132_s1 + $0x294] sm:$0xf]  ;;  %v1661_v25 = vld [vmem:[%s3132_s1 + $0x298] sm:$0xf0]  ;;  %v1536_v26 = vor.u32 %v2019_v13, %v1533_v17  ;;  %v1717_v19 = vld [vmem:[%s3132_s1 + $0x308] sm:$0xf0] }
  0x69   :  { %1097 = vmatpush.bf16.msrb.mxu1 %v1640_v27  ;;  %v1736_v27 = vor.u32 %v2069_v18, %v1733_v20  ;;  %v1664_v35 = vor.u32 %v2051_v24, %v1661_v25  ;;  %v2109_v5 = vld [vmem:[%s3132_s1 + $0x464] sm:$0xf]  ;;  %v1720_v55 = vor.u32 %v2065_v48, %v1717_v19  ;;  %v1861_v13 = vld [vmem:[%s3132_s1 + $0x428] sm:$0xf0]  ;;  %v2083_v18 = vld [vmem:[%s3132_s1 + $0x394] sm:$0xf] }
  0x6a   :  { %1110 = vmatpush.bf16.msrb.mxu2 %v1704_v31  ;;  %v1600_v31 = vor.u32 %v2035_v22, %v1597_v23  ;;  %v1896_v57 = vor.u32 %v2109_v5, %v1893_v54  ;;  %v2085_v10 = vld [vmem:[%s3132_s1 + $0x3a4] sm:$0xf]  ;;  %v1789_v20 = vld [vmem:[%s3132_s1 + $0x398] sm:$0xf0]  ;;  %v1845_v28 = vld [vmem:[%s3132_s1 + $0x408] sm:$0xf0] }
  0x6b   :  { %1123 = vmatpush.bf16.msrb.mxu3 %v1768_v37  ;;  %v1837_v37 = vld [vmem:[%s3132_s1 + $0x3f8] sm:$0xf0]  ;;  %v1792_v23 = vor.u32 %v2083_v18, %v1789_v20  ;;  %v2081_v25 = vld [vmem:[%s3132_s1 + $0x384] sm:$0xf] }
  0x6c   :  { %1085 = vmatpush.bf16.msrb.mxu0 %v1568_v36  ;;  %v2095_v36 = vld [vmem:[%s3132_s1 + $0x3f4] sm:$0xf]  ;;  %v1853_v22 = vld [vmem:[%s3132_s1 + $0x418] sm:$0xf0]  ;;  %v2113_v19 = vld [vmem:[%s3134_s3] sm:$0xff] }
  0x6d   :  { %1098 = vmatpush.bf16.msrb.mxu1 %v1632_v41  ;;  %v1901_v41 = vld [vmem:[%s3132_s1 + $0x478] sm:$0xf0]  ;;  %v1840_v47 = vor.u32 %v2095_v36, %v1837_v37  ;;  %v2117_v37 = vld [vmem:[%s3134_s3 + $0x20] sm:$0xff] }
  0x6e   :  { %1111 = vmatpush.bf16.msrb.mxu2 %v1696_v45  ;;  %v1728_v45 = vor.u32 %v2067_v33, %v1725_v34 }
  0x6f   :  { %1124 = vmatpush.bf16.msrb.mxu3 %v1760_v51  ;;  %v1656_v51 = vor.u32 %v2049_v42, %v1653_v43  ;;  %v2115_v43 = vld [vmem:[%s3134_s3 + $0x10] sm:$0xff] }
  0x70   :  { %1086 = vmatpush.bf16.msrb.mxu0 %v1560_v49  ;;  %v1904_v49 = vor.u32 %v2111_v39, %v1901_v41 }
  0x71   :  { %1099 = vmatpush.bf16.msrb.mxu1 %v1624_v53  ;;  %v1829_v53 = vld [vmem:[%s3132_s1 + $0x3e8] sm:$0xf0] }
  0x72   :  { %1112 = vmatpush.bf16.msrb.mxu2 %v1688_v56  ;;  %v1832_v56 = vor.u32 %v2093_v52, %v1829_v53 }
  0x73   :  { %1125 = vmatpush.bf16.msrb.mxu3 %v1752_v62  ;;  %v1824_v62 = vor.u32 %v2091_v58, %v1821_v59 }
  0x74   :  { %1087 = vmatpush.bf16.msrb.mxu0 %v1552_v61  ;;  %v1885_v61 = vld [vmem:[%s3132_s1 + $0x458] sm:$0xf0] }
  0x75   :  { %1100 = vmatpush.bf16.msrb.mxu1 %v1616_v0  ;;  %v1888_v63 = vor.u32 %v2107_v60, %v1885_v61  ;;  %v1813_v0 = vld [vmem:[%s3132_s1 + $0x3c8] sm:$0xf0] }
  0x76   :  { %1113 = vmatpush.bf16.msrb.mxu2 %v1680_v4  ;;  %v2103_v4 = vld [vmem:[%s3132_s1 + $0x434] sm:$0xf] }
  0x77   :  { %1126 = vmatpush.bf16.msrb.mxu3 %v1744_v12  ;;  %v1872_v9 = vor.u32 %v2103_v4, %v1869_v6  ;;  %v2101_v12 = vld [vmem:[%s3132_s1 + $0x424] sm:$0xf] }
  0x78   :  { %1088 = vmatpush.bf16.msrb.mxu0 %v1544_v11  ;;  %v1797_v11 = vld [vmem:[%s3132_s1 + $0x3a8] sm:$0xf0]  ;;  %v1864_v17 = vor.u32 %v2101_v12, %v1861_v13  ;;  %v2124_v12 = vld [vmem:[%s3134_s3 + $0x58] sm:$0xff] }
  0x79   :  { %1101 = vmatpush.bf16.msrb.mxu1 %v1608_v14  ;;  %v1800_v14 = vor.u32 %v2085_v10, %v1797_v11  ;;  %v2125_v10 = vld [vmem:[%s3134_s3 + $0x60] sm:$0xff] }
  0x7a   :  { %1114 = vmatpush.bf16.msrb.mxu2 %v1672_v21  ;;  %v2099_v21 = vld [vmem:[%s3132_s1 + $0x414] sm:$0xf] }
  0x7b   :  { %1127 = vmatpush.bf16.msrb.mxu3 %v1736_v27  ;;  %v1856_v24 = vor.u32 %v2099_v21, %v1853_v22  ;;  %v2097_v27 = vld [vmem:[%s3132_s1 + $0x404] sm:$0xf] }
  0x7c   :  { %1089 = vmatpush.bf16.msrb.mxu0 %v1536_v26  ;;  %v1781_v26 = vld [vmem:[%s3132_s1 + $0x388] sm:$0xf0]  ;;  %v1848_v30 = vor.u32 %v2097_v27, %v1845_v28  ;;  %v2121_v22 = vld [vmem:[%s3134_s3 + $0x40] sm:$0xff] }
  0x7d   :  { %1102 = vmatpush.bf16.msrb.mxu1 %v1600_v31  ;;  %v1784_v29 = vor.u32 %v2081_v25, %v1781_v26  ;;  %v2120_v31 = vld [vmem:[%s3134_s3 + $0x38] sm:$0xff] }
  0x7e   :  { %1115 = vmatpush.bf16.msrb.mxu2 %v1664_v35  ;;  %v2118_v35 = vld [vmem:[%s3134_s3 + $0x28] sm:$0xff] }
  0x7f   :  { %1128 = vmatpush.bf16.msrb.mxu3 %v1728_v45  ;;  %v169_v45 = vld [vmem:[%s3136_s2] sm:$0x3] }
  0x80   :  { %1090 = vmatpush.bf16.msrb.mxu0 %v1528_v15  ;;  %v172_v18 = vperm.slane %v169_v45, 1 }
  0x81   :  { %1103 = vmatpush.bf16.msrb.mxu1 %v1592_v46  ;;  %v171_v46 = vperm.slane %v169_v45, 0 }
  0x82   :  { %1116 = vmatpush.bf16.msrb.mxu2 %v1656_v51 }
  0x83   :  { %1091 = vmatmul.bf16.vlgmr.msrb.gmra.mxu0 %v2432_v7  ;;  %1129 = vmatpush.bf16.msrb.mxu3 %v1720_v55  ;;  %v2089_v7 = vld [vmem:[%s3132_s1 + $0x3c4] sm:$0xf] }
  0x84   :  { %1135 = vmatpush.bf16.msra.mxu0 %v1840_v47  ;;  %1104 = vmatmul.bf16.vlgmr.msrb.gmra.mxu1 %v2610_v38  ;;  %v2105_v38 = vld [vmem:[%s3132_s1 + $0x444] sm:$0xf]  ;;  %v1816_v1 = vor.u32 %v2089_v7, %v1813_v0  ;;  %v2114_v47 = vld [vmem:[%s3134_s3 + $0x8] sm:$0xff]  ;;  %v2128_v0 = vld [vmem:[%s3134_s3 + $0x78] sm:$0xff] }
  0x85   :  { %1148 = vmatpush.bf16.msra.mxu1 %v1904_v49  ;;  %1117 = vmatmul.bf16.vlgmr.msrb.gmra.mxu2 %v2634_v50  ;;  %v1877_v50 = vld [vmem:[%s3132_s1 + $0x448] sm:$0xf0] }
  0x86   :  { %1130 = vmatmul.bf16.vlgmr.msrb.gmra.mxu3 %v2612_v40  ;;  %v1880_v2 = vor.u32 %v2105_v38, %v1877_v50  ;;  %v1805_v40 = vld [vmem:[%s3132_s1 + $0x3b8] sm:$0xf0]  ;;  %1297 = vmatpush.bf16.msra.mxu2 %v2120_v31 }
  0x87   :  { %v1808_v8 = vor.u32 %v2087_v3, %v1805_v40  ;;  %1310 = vmatpush.bf16.msra.mxu3 %v2128_v0  ;;  %v2127_v3 = vld [vmem:[%s3134_s3 + $0x70] sm:$0xff] }
  0x88   :  { %1136 = vmatpush.bf16.msra.mxu0 %v1832_v56 }
  0x89   :  { %1149 = vmatpush.bf16.msra.mxu1 %v1896_v57 }
  0x8a   :  { %1298 = vmatpush.bf16.msra.mxu2 %v2119_v32 }
  0x8b   :  { %1311 = vmatpush.bf16.msra.mxu3 %v2127_v3 }
  0x8c   :  { %1137 = vmatpush.bf16.msra.mxu0 %v1824_v62 }
  0x8d   :  { %1150 = vmatpush.bf16.msra.mxu1 %v1888_v63 }
  0x8e   :  { %1299 = vmatpush.bf16.msra.mxu2 %v2118_v35 }
  0x90   :  { %1138 = vmatpush.bf16.msra.mxu0 %v1816_v1 }
  0x91   :  { %1151 = vmatpush.bf16.msra.mxu1 %v1880_v2 }
  0x92   :  { %1300 = vmatpush.bf16.msra.mxu2 %v2117_v37 }
  0x94   :  { %1139 = vmatpush.bf16.msra.mxu0 %v1808_v8  ;;  %v2126_v8 = vld [vmem:[%s3134_s3 + $0x68] sm:$0xff] }
  0x95   :  { %1152 = vmatpush.bf16.msra.mxu1 %v1872_v9  ;;  %1312 = vmatpush.bf16.msra.mxu3 %v2126_v8 }
  0x98   :  { %1140 = vmatpush.bf16.msra.mxu0 %v1800_v14  ;;  %v2123_v14 = vld [vmem:[%s3134_s3 + $0x50] sm:$0xff] }
  0x99   :  { %1153 = vmatpush.bf16.msra.mxu1 %v1864_v17  ;;  %1313 = vmatpush.bf16.msra.mxu3 %v2125_v10  ;;  %v2122_v17 = vld [vmem:[%s3134_s3 + $0x48] sm:$0xff] }
  0x9c   :  { %1141 = vmatpush.bf16.msra.mxu0 %v1792_v23 }
  0x9d   :  { %1154 = vmatpush.bf16.msra.mxu1 %v1856_v24  ;;  %1314 = vmatpush.bf16.msra.mxu3 %v2124_v12 }
  0xa0   :  { %1142 = vmatpush.bf16.msra.mxu0 %v1784_v29  ;;  %v936_v33 = vpop.f32.mrf.mxu0 }
  0xa1   :  { %1155 = vmatpush.bf16.msra.mxu1 %v1848_v30  ;;  %v949_v34 = vpop.f32.mrf.mxu1  ;;  %v937_v48 = vadd.f32 %v936_v33, %v171_v46  ;;  %1315 = vmatpush.bf16.msra.mxu3 %v2123_v14  ;;  %v2129_v46 = vld [vmem:[%s3135_s4] ss:$0 sm:$0xff] }
  0xa3   :  { %1143 = vmatmul.bf16.vlgmr.msra.gmra.mxu0 %v2620_v44  ;;  %v950_v51 = vadd.f32 %v949_v34, %v937_v48 }
  0xa4   :  { %1156 = vmatmul.bf16.vlgmr.msra.gmra.mxu1 %v2805_v16  ;;  %v2116_v16 = vld [vmem:[%s3134_s3 + $0x18] sm:$0xff] }
  0xa5   :  { %1301 = vmatpush.bf16.msra.mxu2 %v2116_v16  ;;  %1316 = vmatpush.bf16.msra.mxu3 %v2122_v17 }
  0xa8   :  { %v962_v44 = vpop.f32.mrf.mxu2  ;;  %v938_v39 = vpop.f32.mrf.mxu0 }
  0xa9   :  { %v975_v36 = vpop.f32.mrf.mxu3  ;;  %v951_v41 = vpop.f32.mrf.mxu1  ;;  %1302 = vmatpush.bf16.msra.mxu2 %v2115_v43  ;;  %v963_v53 = vadd.f32 %v962_v44, %v950_v51  ;;  %1317 = vmatpush.bf16.msra.mxu3 %v2121_v22 }
  0xab   :  { %v976_v56 = vadd.f32 %v975_v36, %v963_v53 }
  0xad   :  { %1303 = vmatpush.bf16.msra.mxu2 %v2114_v47 }
  0xb0   :  { %v964_v15 = vpop.f32.mrf.mxu2 }
  0xb1   :  { %v977_v42 = vpop.f32.mrf.mxu3  ;;  %1304 = vmatpush.bf16.msra.mxu2 %v2113_v19 }
  0xc0   :  { %v988_v49 = vpop.f32.mrf.mxu0 }
  0xc1   :  { %v1001_v52 = vpop.f32.mrf.mxu1  ;;  %v989_v58 = vadd.f32 %v988_v49, %v976_v56 }
  0xc3   :  { %v1002_v61 = vadd.f32 %v1001_v52, %v989_v58 }
  0xc8   :  { %v1014_v5 = vpop.f32.mrf.mxu2  ;;  %v990_v55 = vpop.f32.mrf.mxu0 }
  0xc9   :  { %v1027_v54 = vpop.f32.mrf.mxu3  ;;  %v1003_v57 = vpop.f32.mrf.mxu1  ;;  %v1015_v62 = vadd.f32 %v1014_v5, %v1002_v61 }
  0xcb   :  { %v1028_v63 = vadd.f32 %v1027_v54, %v1015_v62 }
  0xd0   :  { %v1016_v59 = vpop.f32.mrf.mxu2 }
  0xd1   :  { %v1029_v60 = vpop.f32.mrf.mxu3 }
  0xe0   :  { %v1040_v7 = vpop.f32.mrf.mxu0 }
  0xe1   :  { %v1041_v38 = vadd.f32 %v1040_v7, %v1028_v63  ;;  %v1053_v50 = vpop.f32.mrf.mxu1 }
  0xe2   :  { %v1054_v23 = vadd.f32 %v1053_v50, %v172_v18 }
  0xe3   :  { %v1161_v1 = vmax.f32 %v1041_v38, 0.0 }
  0xe5   :  { %v1163_v2 = vpack.c.bf16 %v1161_v1, %v1161_v1 }
  0xe7   :  { %1305 = vmatmul.bf16.vlgmr.msra.gmra.mxu2 %v1163_v2 }
  0xe8   :  { %v1042_v40 = vpop.f32.mrf.mxu0  ;;  %v1066_v4 = vpop.f32.mrf.mxu2 }
  0xe9   :  { %v1055_v6 = vpop.f32.mrf.mxu1  ;;  %v1079_v9 = vpop.f32.mrf.mxu3  ;;  %v1067_v24 = vadd.f32 %v1066_v4, %v1054_v23 }
  0xeb   :  { %v1080_v29 = vadd.f32 %v1079_v9, %v1067_v24 }
  0xf0   :  { %v1068_v11 = vpop.f32.mrf.mxu2 }
  0xf1   :  { %v1081_v13 = vpop.f32.mrf.mxu3 }
 0x100   :  { %v1092_v20 = vpop.f32.mrf.mxu0 }
 0x101   :  { %v1105_v21 = vpop.f32.mrf.mxu1  ;;  %v1093_v30 = vadd.f32 %v1092_v20, %v1080_v29 }
 0x103   :  { %v1106_v33 = vadd.f32 %v1105_v21, %v1093_v30 }
 0x108   :  { %v1118_v25 = vpop.f32.mrf.mxu2  ;;  %v1094_v26 = vpop.f32.mrf.mxu0 }
 0x109   :  { %v1107_v27 = vpop.f32.mrf.mxu1  ;;  %v1131_v28 = vpop.f32.mrf.mxu3  ;;  %v1119_v34 = vadd.f32 %v1118_v25, %v1106_v33 }
 0x10b   :  { %v1132_v35 = vadd.f32 %v1131_v28, %v1119_v34 }
 0x110   :  { %v1120_v31 = vpop.f32.mrf.mxu2 }
 0x111   :  { %v1133_v32 = vpop.f32.mrf.mxu3 }
 0x120   :  { %v1144_v36 = vpop.f32.mrf.mxu0 }
 0x121   :  { %v1145_v37 = vadd.f32 %v1144_v36, %v1132_v35  ;;  %v1157_v44 = vpop.f32.mrf.mxu1 }
 0x123   :  { %v1158_v16 = vadd.f32 %v1157_v44, %v1145_v37 }
 0x125   :  { %v1162_v39 = vmax.f32 %v1158_v16, 0.0 }
 0x127   :  { %v1164_v41 = vpack.c.bf16 %v1162_v39, %v1162_v39 }
 0x128   :  { %v1146_v42 = vpop.f32.mrf.mxu0 }
 0x129   :  { %v1159_v43 = vpop.f32.mrf.mxu1  ;;  %1318 = vmatmul.bf16.vlgmr.msra.gmra.mxu3 %v1164_v41 }
 0x16a   :  { %v1306_v15 = vpop.f32.mrf.mxu2 }
 0x16b   :  { %v1307_v47 = vadd.f32 %v2129_v46, %v1306_v15 }
 0x172   :  { %v1308_v45 = vpop.f32.mrf.mxu2 }
 0x1ac   :  { %v1319_v48 = vpop.f32.mrf.mxu3 }
 0x1ad   :  { %v1320_v19 = vadd.f32 %v1319_v48, %v1307_v47 }
 0x1af   :  { %1324 = vst.msk [vmem:[%s3137_s5] sm:$0xff] %vm1323_vm0, %v1320_v19 }
 0x1b4   :  { %v1321_v49 = vpop.f32.mrf.mxu3 }

// kernel: net_forward.8
= control target key start
LH: loop header
LB: loop body
LE: loop exit
PB: predicated region body
PF: predicated region fallthrough
CT: control target
= control target key end

     0   :  { %s2664_s1 = inlined_call_operand.vmem [shape: bf16[1152,128], index: 1, kind: input, shape index: {}]   ;;  %s2665_s0 = inlined_call_operand.vmem [shape: bf16[4,24,1152], index: 0, kind: input, shape index: {}]   ;;  %s2666_s2 = inlined_call_operand.vmem [shape: f32[3,128], index: 2, kind: input, shape index: {}]   ;;  %s2667_s3 = inlined_call_operand.vmem [shape: bf16[24,128], index: 3, kind: output, shape index: {}]  }
   0x1   :  { %v1905_v0 = vld [vmem:[%s2664_s1 + $0x38] sm:$0xff]  ;;  %v1904_v1 = vld [vmem:[%s2664_s1 + $0x30] sm:$0xff]  ;;  %v1903_v4 = vld [vmem:[%s2664_s1 + $0x28] sm:$0xff] }
   0x2   :  { %1975 = vmatpush.bf16.msra.mxu1 %v1905_v0  ;;  %1976 = vmatpush.bf16.msra.mxu2 %v1905_v0  ;;  %v1929_v2 = vld [vmem:[%s2664_s1 + $0xf8] sm:$0xff]  ;;  %v1928_v3 = vld [vmem:[%s2664_s1 + $0xf0] sm:$0xff]  ;;  %v1927_v5 = vld [vmem:[%s2664_s1 + $0xe8] sm:$0xff] }
   0x3   :  { %926 = vmatpush.bf16.msra.mxu0 %v1905_v0  ;;  %1043 = vmatpush.bf16.msra.mxu3 %v1929_v2  ;;  %v1902_v6 = vld [vmem:[%s2664_s1 + $0x20] sm:$0xff]  ;;  %v1901_v8 = vld [vmem:[%s2664_s1 + $0x18] sm:$0xff]  ;;  %v1900_v10 = vld [vmem:[%s2664_s1 + $0x10] sm:$0xff] }
   0x4   :  { %v1926_v7 = vld [vmem:[%s2664_s1 + $0xe0] sm:$0xff]  ;;  %v1925_v9 = vld [vmem:[%s2664_s1 + $0xd8] sm:$0xff]  ;;  %v1924_v11 = vld [vmem:[%s2664_s1 + $0xd0] sm:$0xff] }
   0x5   :  { %v1899_v12 = vld [vmem:[%s2664_s1 + $0x8] sm:$0xff]  ;;  %v1898_v14 = vld [vmem:[%s2664_s1] sm:$0xff]  ;;  %v1414_v15 = vld [vmem:[%s2665_s0 + $0x90] sm:$0xf] }
   0x6   :  { %1977 = vmatpush.bf16.msra.mxu1 %v1904_v1  ;;  %1978 = vmatpush.bf16.msra.mxu2 %v1904_v1  ;;  %v1923_v13 = vld [vmem:[%s2664_s1 + $0xc8] sm:$0xff]  ;;  %v1866_v16 = vld [vmem:[%s2665_s0 + $0xb0] sm:$0xf0]  ;;  %v1486_v17 = vld [vmem:[%s2665_s0 + $0x120] sm:$0xf] }
   0x7   :  { %927 = vmatpush.bf16.msra.mxu0 %v1904_v1  ;;  %1044 = vmatpush.bf16.msra.mxu3 %v1928_v3  ;;  %v1884_v18 = vld [vmem:[%s2665_s0 + $0x140] sm:$0xf0]  ;;  %v1921_v19 = vld [vmem:[%s2664_s1 + $0xb8] sm:$0xff]  ;;  %v1342_v20 = vld [vmem:[%s2665_s0] sm:$0xf]  ;;  %v1415_v24 = vor.u32 %v1866_v16, %v1414_v15 }
   0x8   :  { %v1848_v21 = vld [vmem:[%s2665_s0 + $0x20] sm:$0xf0]  ;;  %v1913_v22 = vld [vmem:[%s2664_s1 + $0x78] sm:$0xff]  ;;  %v1487_v25 = vor.u32 %v1884_v18, %v1486_v17  ;;  %v1845_v28 = vld [vmem:[%s2665_s0 + $0xc] sm:$0xf] }
   0x9   :  { %v1937_v23 = vld [vmem:[%s2664_s1 + $0x138] sm:$0xff]  ;;  %v1343_v26 = vor.u32 %v1848_v21, %v1342_v20  ;;  %v1922_v27 = vld [vmem:[%s2664_s1 + $0xc0] sm:$0xff]  ;;  %v1352_v29 = vld [vmem:[%s2665_s0 + $0x2c] sm:$0xf0] }
   0xa   :  { %1979 = vmatpush.bf16.msra.mxu1 %v1903_v4  ;;  %1980 = vmatpush.bf16.msra.mxu2 %v1903_v4  ;;  %v1920_v30 = vld [vmem:[%s2664_s1 + $0xb0] sm:$0xff]  ;;  %v1355_v33 = vor.u32 %v1845_v28, %v1352_v29  ;;  %v1961_v34 = vld [vmem:[%s2664_s1 + $0x1f8] sm:$0xff]  ;;  %v1919_v35 = vld [vmem:[%s2664_s1 + $0xa8] sm:$0xff] }
   0xb   :  { %928 = vmatpush.bf16.msra.mxu0 %v1903_v4  ;;  %1045 = vmatpush.bf16.msra.mxu3 %v1927_v5  ;;  %v1912_v31 = vld [vmem:[%s2664_s1 + $0x70] sm:$0xff]  ;;  %v1911_v36 = vld [vmem:[%s2664_s1 + $0x68] sm:$0xff]  ;;  %v1918_v39 = vld [vmem:[%s2664_s1 + $0xa0] sm:$0xff] }
   0xc   :  { %v1936_v32 = vld [vmem:[%s2664_s1 + $0x130] sm:$0xff]  ;;  %v1935_v37 = vld [vmem:[%s2664_s1 + $0x128] sm:$0xff]  ;;  %v1910_v40 = vld [vmem:[%s2664_s1 + $0x60] sm:$0xff] }
   0xd   :  { %v1960_v38 = vld [vmem:[%s2664_s1 + $0x1f0] sm:$0xff]  ;;  %v1934_v41 = vld [vmem:[%s2664_s1 + $0x120] sm:$0xff]  ;;  %v1450_v42 = vld [vmem:[%s2665_s0 + $0xd8] sm:$0xf] }
   0xe   :  { %1981 = vmatpush.bf16.msra.mxu1 %v1902_v6  ;;  %1982 = vmatpush.bf16.msra.mxu2 %v1902_v6  ;;  %v1875_v43 = vld [vmem:[%s2665_s0 + $0xf8] sm:$0xf0]  ;;  %v1522_v44 = vld [vmem:[%s2665_s0 + $0x168] sm:$0xf]  ;;  %v1893_v45 = vld [vmem:[%s2665_s0 + $0x188] sm:$0xf0] }
   0xf   :  { %929 = vmatpush.bf16.msra.mxu0 %v1902_v6  ;;  %1046 = vmatpush.bf16.msra.mxu3 %v1926_v7  ;;  %v1917_v46 = vld [vmem:[%s2664_s1 + $0x98] sm:$0xff]  ;;  %v1378_v47 = vld [vmem:[%s2665_s0 + $0x48] sm:$0xf]  ;;  %v1857_v48 = vld [vmem:[%s2665_s0 + $0x68] sm:$0xf0]  ;;  %v1451_v51 = vor.u32 %v1875_v43, %v1450_v42  ;;  %v1523_v52 = vor.u32 %v1893_v45, %v1522_v44 }
  0x10   :  { %v1909_v49 = vld [vmem:[%s2664_s1 + $0x58] sm:$0xff]  ;;  %v1379_v53 = vor.u32 %v1857_v48, %v1378_v47  ;;  %v1854_v54 = vld [vmem:[%s2665_s0 + $0x54] sm:$0xf]  ;;  %v1915_v60 = vld [vmem:[%s2664_s1 + $0x88] sm:$0xff] }
  0x11   :  { %v1933_v50 = vld [vmem:[%s2664_s1 + $0x118] sm:$0xff]  ;;  %v1916_v56 = vld [vmem:[%s2664_s1 + $0x90] sm:$0xff]  ;;  %v1959_v61 = vld [vmem:[%s2664_s1 + $0x1e8] sm:$0xff] }
  0x12   :  { %1983 = vmatpush.bf16.msra.mxu1 %v1901_v8  ;;  %1984 = vmatpush.bf16.msra.mxu2 %v1901_v8  ;;  %v1388_v55 = vld [vmem:[%s2665_s0 + $0x74] sm:$0xf0]  ;;  %v1908_v57 = vld [vmem:[%s2664_s1 + $0x50] sm:$0xff]  ;;  %v1907_v62 = vld [vmem:[%s2664_s1 + $0x48] sm:$0xff] }
  0x13   :  { %930 = vmatpush.bf16.msra.mxu0 %v1901_v8  ;;  %1047 = vmatpush.bf16.msra.mxu3 %v1925_v9  ;;  %v1932_v58 = vld [vmem:[%s2664_s1 + $0x110] sm:$0xff]  ;;  %v1391_v59 = vor.u32 %v1854_v54, %v1388_v55  ;;  %v1931_v63 = vld [vmem:[%s2664_s1 + $0x108] sm:$0xff]  ;;  %v1914_v0 = vld [vmem:[%s2664_s1 + $0x80] sm:$0xff] }
  0x14   :  { %v1906_v1 = vld [vmem:[%s2664_s1 + $0x40] sm:$0xff]  ;;  %v1344_v4 = vld [vmem:[%s2665_s0 + $0x24] sm:$0xf0]  ;;  %v1953_v5 = vld [vmem:[%s2664_s1 + $0x1b8] sm:$0xff] }
  0x15   :  { %v1930_v2 = vld [vmem:[%s2664_s1 + $0x100] sm:$0xff]  ;;  %v1945_v6 = vld [vmem:[%s2664_s1 + $0x178] sm:$0xff]  ;;  %v1350_v7 = vld [vmem:[%s2665_s0 + $0x8] sm:$0xf] }
  0x16   :  { %1985 = vmatpush.bf16.msra.mxu1 %v1900_v10  ;;  %1986 = vmatpush.bf16.msra.mxu2 %v1900_v10  ;;  %v1844_v3 = vld [vmem:[%s2665_s0 + $0x4] sm:$0xf]  ;;  %v1849_v8 = vld [vmem:[%s2665_s0 + $0x28] sm:$0xf0]  ;;  %v1969_v9 = vld [vmem:[%s2664_s1 + $0x238] sm:$0xff] }
  0x17   :  { %931 = vmatpush.bf16.msra.mxu0 %v1900_v10  ;;  %1048 = vmatpush.bf16.msra.mxu3 %v1924_v11  ;;  %v1358_v10 = vld [vmem:[%s2665_s0 + $0x10] sm:$0xf]  ;;  %v1850_v11 = vld [vmem:[%s2665_s0 + $0x30] sm:$0xf0]  ;;  %v1863_v16 = vld [vmem:[%s2665_s0 + $0x9c] sm:$0xf] }
  0x18   :  { %v1952_v15 = vld [vmem:[%s2664_s1 + $0x1b0] sm:$0xff]  ;;  %v1424_v17 = vld [vmem:[%s2665_s0 + $0xbc] sm:$0xf0]  ;;  %v1951_v21 = vld [vmem:[%s2664_s1 + $0x1a8] sm:$0xff] }
  0x19   :  { %v1944_v18 = vld [vmem:[%s2664_s1 + $0x170] sm:$0xff]  ;;  %v1427_v20 = vor.u32 %v1863_v16, %v1424_v17  ;;  %v1853_v28 = vld [vmem:[%s2665_s0 + $0x4c] sm:$0xf]  ;;  %v1941_v42 = vld [vmem:[%s2664_s1 + $0x158] sm:$0xff] }
  0x1a   :  { %1987 = vmatpush.bf16.msra.mxu1 %v1899_v12  ;;  %1988 = vmatpush.bf16.msra.mxu2 %v1899_v12  ;;  %v1380_v29 = vld [vmem:[%s2665_s0 + $0x6c] sm:$0xf0]  ;;  %v1965_v43 = vld [vmem:[%s2664_s1 + $0x218] sm:$0xff]  ;;  %v1881_v55 = vld [vmem:[%s2665_s0 + $0x12c] sm:$0xf] }
  0x1b   :  { %932 = vmatpush.bf16.msra.mxu0 %v1899_v12  ;;  %1049 = vmatpush.bf16.msra.mxu3 %v1923_v13  ;;  %v1347_v12 = vor.u32 %v1844_v3, %v1344_v4  ;;  %v1351_v13 = vor.u32 %v1849_v8, %v1350_v7  ;;  %v1948_v44 = vld [vmem:[%s2664_s1 + $0x190] sm:$0xff]  ;;  %v1416_v47 = vld [vmem:[%s2665_s0 + $0xb4] sm:$0xf0]  ;;  %v1466_v3 = vld [vmem:[%s2665_s0 + $0xe8] sm:$0xf] }
  0x1c   :  { %v1956_v45 = vld [vmem:[%s2664_s1 + $0x1d0] sm:$0xff]  ;;  %v1422_v48 = vld [vmem:[%s2665_s0 + $0x98] sm:$0xf]  ;;  %v1877_v4 = vld [vmem:[%s2665_s0 + $0x108] sm:$0xf0] }
  0x1d   :  { %v1467_v7 = vor.u32 %v1877_v4, %v1466_v3  ;;  %v1890_v8 = vld [vmem:[%s2665_s0 + $0x174] sm:$0xf]  ;;  %v1488_v16 = vld [vmem:[%s2665_s0 + $0x144] sm:$0xf0] }
  0x1e   :  { %1989 = vmatpush.bf16.msra.mxu1 %v1898_v14  ;;  %1990 = vmatpush.bf16.msra.mxu2 %v1898_v14  ;;  %v1494_v17 = vld [vmem:[%s2665_s0 + $0x128] sm:$0xf] }
  0x1f   :  { %933 = vmatpush.bf16.msra.mxu0 %v1898_v14  ;;  %1050 = vmatpush.bf16.msra.mxu3 %v1922_v27  ;;  %v1359_v14 = vor.u32 %v1850_v11, %v1358_v10  ;;  %v1966_v27 = vld [vmem:[%s2664_s1 + $0x220] sm:$0xff]  ;;  %v1963_v11 = vld [vmem:[%s2664_s1 + $0x208] sm:$0xff] }
  0x21   :  { %944 = vmatmul.bf16.vlgmr.msra.gmra.mxu1 %v1415_v24  ;;  %954 = vmatmul.bf16.vlgmr.msra.gmra.mxu2 %v1487_v25  ;;  %v1967_v24 = vld [vmem:[%s2664_s1 + $0x228] sm:$0xff]  ;;  %v1950_v25 = vld [vmem:[%s2664_s1 + $0x1a0] sm:$0xff] }
  0x22   :  { %1004 = vmatpush.bf16.msrb.mxu2 %v1921_v19  ;;  %965 = vmatpush.bf16.msrb.mxu1 %v1913_v22  ;;  %v1968_v19 = vld [vmem:[%s2664_s1 + $0x230] sm:$0xff]  ;;  %v1958_v22 = vld [vmem:[%s2664_s1 + $0x1e0] sm:$0xff] }
  0x23   :  { %1082 = vmatpush.bf16.msrb.mxu0 %v1937_v23  ;;  %1051 = vmatmul.bf16.vlgmr.msra.gmra.mxu3 %v1355_v33  ;;  %v1943_v23 = vld [vmem:[%s2664_s1 + $0x168] sm:$0xff]  ;;  %v1859_v33 = vld [vmem:[%s2665_s0 + $0x78] sm:$0xf0] }
  0x24   :  { %934 = vmatmul.bf16.vlgmr.msra.gmra.mxu0 %v1343_v26  ;;  %1199 = vmatpush.bf16.msrb.mxu3 %v1961_v34  ;;  %v1942_v26 = vld [vmem:[%s2664_s1 + $0x160] sm:$0xff]  ;;  %v1383_v34 = vor.u32 %v1853_v28, %v1380_v29  ;;  %v1889_v28 = vld [vmem:[%s2665_s0 + $0x16c] sm:$0xf]  ;;  %v1524_v29 = vld [vmem:[%s2665_s0 + $0x18c] sm:$0xf0] }
  0x26   :  { %1005 = vmatpush.bf16.msrb.mxu2 %v1920_v30  ;;  %966 = vmatpush.bf16.msrb.mxu1 %v1912_v31  ;;  %v1386_v30 = vld [vmem:[%s2665_s0 + $0x50] sm:$0xf]  ;;  %v1858_v31 = vld [vmem:[%s2665_s0 + $0x70] sm:$0xf0] }
  0x27   :  { %1083 = vmatpush.bf16.msrb.mxu0 %v1936_v32  ;;  %v1394_v32 = vld [vmem:[%s2665_s0 + $0x58] sm:$0xf] }
  0x28   :  { %1200 = vmatpush.bf16.msrb.mxu3 %v1960_v38  ;;  %v1460_v38 = vld [vmem:[%s2665_s0 + $0x104] sm:$0xf0] }
  0x2a   :  { %1006 = vmatpush.bf16.msrb.mxu2 %v1919_v35  ;;  %967 = vmatpush.bf16.msrb.mxu1 %v1911_v36  ;;  %v1387_v35 = vor.u32 %v1858_v31, %v1386_v30  ;;  %v1395_v36 = vor.u32 %v1859_v33, %v1394_v32  ;;  %v1530_v30 = vld [vmem:[%s2665_s0 + $0x170] sm:$0xf]  ;;  %v1894_v31 = vld [vmem:[%s2665_s0 + $0x190] sm:$0xf0]  ;;  %v1538_v32 = vld [vmem:[%s2665_s0 + $0x178] sm:$0xf] }
  0x2b   :  { %1084 = vmatpush.bf16.msrb.mxu0 %v1935_v37  ;;  %v1872_v37 = vld [vmem:[%s2665_s0 + $0xe4] sm:$0xf]  ;;  %v1895_v33 = vld [vmem:[%s2665_s0 + $0x198] sm:$0xf0] }
  0x2c   :  { %1201 = vmatpush.bf16.msrb.mxu3 %v1959_v61  ;;  %v1955_v61 = vld [vmem:[%s2664_s1 + $0x1c8] sm:$0xff] }
  0x2e   :  { %1007 = vmatpush.bf16.msrb.mxu2 %v1918_v39  ;;  %968 = vmatpush.bf16.msrb.mxu1 %v1910_v40  ;;  %v1463_v39 = vor.u32 %v1872_v37, %v1460_v38  ;;  %v1949_v40 = vld [vmem:[%s2664_s1 + $0x198] sm:$0xff]  ;;  %v1856_v37 = vld [vmem:[%s2665_s0 + $0x64] sm:$0xf]  ;;  %v1404_v38 = vld [vmem:[%s2665_s0 + $0x84] sm:$0xf0] }
  0x2f   :  { %1085 = vmatpush.bf16.msrb.mxu0 %v1934_v41  ;;  %v1957_v41 = vld [vmem:[%s2664_s1 + $0x1d8] sm:$0xff] }
  0x30   :  { %1202 = vmatpush.bf16.msrb.mxu3 %v1958_v22 }
  0x31   :  { %949 = vmatmul.bf16.gmra.mxu1 %v1451_v51  ;;  %959 = vmatmul.bf16.gmra.mxu2 %v1523_v52  ;;  %v1868_v51 = vld [vmem:[%s2665_s0 + $0xc0] sm:$0xf0] }
  0x32   :  { %1008 = vmatpush.bf16.msrb.mxu2 %v1917_v46  ;;  %969 = vmatpush.bf16.msrb.mxu1 %v1909_v49  ;;  %v1862_v46 = vld [vmem:[%s2665_s0 + $0x94] sm:$0xf]  ;;  %v1867_v49 = vld [vmem:[%s2665_s0 + $0xb8] sm:$0xf0] }
  0x33   :  { %1086 = vmatpush.bf16.msrb.mxu0 %v1933_v50  ;;  %1056 = vmatmul.bf16.gmra.mxu3 %v1391_v59  ;;  %v1430_v50 = vld [vmem:[%s2665_s0 + $0xa0] sm:$0xf]  ;;  %v1419_v52 = vor.u32 %v1862_v46, %v1416_v47  ;;  %v1964_v59 = vld [vmem:[%s2664_s1 + $0x210] sm:$0xff] }
  0x34   :  { %939 = vmatmul.bf16.gmra.mxu0 %v1379_v53  ;;  %1203 = vmatpush.bf16.msrb.mxu3 %v1957_v41  ;;  %v1423_v53 = vor.u32 %v1867_v49, %v1422_v48  ;;  %v1431_v54 = vor.u32 %v1868_v51, %v1430_v50  ;;  %v1360_v41 = vld [vmem:[%s2665_s0 + $0x34] sm:$0xf0]  ;;  %v1865_v50 = vld [vmem:[%s2665_s0 + $0xac] sm:$0xf]  ;;  %v1440_v51 = vld [vmem:[%s2665_s0 + $0xcc] sm:$0xf0] }
  0x36   :  { %1009 = vmatpush.bf16.msrb.mxu2 %v1916_v56  ;;  %970 = vmatpush.bf16.msrb.mxu1 %v1908_v57  ;;  %v1496_v56 = vld [vmem:[%s2665_s0 + $0x14c] sm:$0xf0] }
  0x37   :  { %1087 = vmatpush.bf16.msrb.mxu0 %v1932_v58  ;;  %v1499_v57 = vor.u32 %v1881_v55, %v1496_v56  ;;  %v1940_v58 = vld [vmem:[%s2664_s1 + $0x150] sm:$0xff] }
  0x38   :  { %1204 = vmatpush.bf16.msrb.mxu3 %v1956_v45  ;;  %v1852_v45 = vld [vmem:[%s2665_s0 + $0x40] sm:$0xf0] }
  0x3a   :  { %1010 = vmatpush.bf16.msrb.mxu2 %v1915_v60  ;;  %971 = vmatpush.bf16.msrb.mxu1 %v1907_v62  ;;  %v1947_v60 = vld [vmem:[%s2664_s1 + $0x188] sm:$0xff] }
  0x3b   :  { %1088 = vmatpush.bf16.msrb.mxu0 %v1931_v63  ;;  %v1939_v62 = vld [vmem:[%s2664_s1 + $0x148] sm:$0xff]  ;;  %v1871_v63 = vld [vmem:[%s2665_s0 + $0xdc] sm:$0xf] }
  0x3c   :  { %1205 = vmatpush.bf16.msrb.mxu3 %v1955_v61  ;;  %v1860_v61 = vld [vmem:[%s2665_s0 + $0x80] sm:$0xf0] }
  0x3e   :  { %1011 = vmatpush.bf16.msrb.mxu2 %v1914_v0  ;;  %972 = vmatpush.bf16.msrb.mxu1 %v1906_v1  ;;  %v1452_v0 = vld [vmem:[%s2665_s0 + $0xfc] sm:$0xf0] }
  0x3f   :  { %1089 = vmatpush.bf16.msrb.mxu0 %v1930_v2  ;;  %v1458_v1 = vld [vmem:[%s2665_s0 + $0xe0] sm:$0xf]  ;;  %v1876_v2 = vld [vmem:[%s2665_s0 + $0x100] sm:$0xf0] }
  0x41   :  { %973 = vmatmul.bf16.vlgmr.msrb.gmra.mxu1 %v1347_v12  ;;  %1012 = vmatmul.bf16.vlgmr.msrb.gmra.mxu2 %v1351_v13  ;;  %v1946_v12 = vld [vmem:[%s2664_s1 + $0x180] sm:$0xff] }
  0x42   :  { %1160 = vmatpush.bf16.msra.mxu2 %v1953_v5  ;;  %1121 = vmatpush.bf16.msra.mxu1 %v1945_v6  ;;  %v1455_v5 = vor.u32 %v1871_v63, %v1452_v0  ;;  %v1459_v6 = vor.u32 %v1876_v2, %v1458_v1  ;;  %v1954_v13 = vld [vmem:[%s2664_s1 + $0x1c0] sm:$0xff]  ;;  %v1861_v63 = vld [vmem:[%s2665_s0 + $0x88] sm:$0xf0] }
  0x43   :  { %1238 = vmatpush.bf16.msra.mxu0 %v1969_v9  ;;  %1061 = vmatmul.bf16.gmra.mxu3 %v1427_v20  ;;  %v1532_v9 = vld [vmem:[%s2665_s0 + $0x194] sm:$0xf0]  ;;  %v1886_v20 = vld [vmem:[%s2665_s0 + $0x150] sm:$0xf0] }
  0x44   :  { %1090 = vmatmul.bf16.vlgmr.msrb.gmra.mxu0 %v1359_v14  ;;  %v1535_v10 = vor.u32 %v1890_v8, %v1532_v9  ;;  %v1938_v14 = vld [vmem:[%s2664_s1 + $0x140] sm:$0xff]  ;;  %1206 = vmatpush.bf16.msrb.mxu3 %v1954_v13 }
  0x46   :  { %1161 = vmatpush.bf16.msra.mxu2 %v1952_v15  ;;  %1122 = vmatpush.bf16.msra.mxu1 %v1944_v18  ;;  %v1880_v15 = vld [vmem:[%s2665_s0 + $0x124] sm:$0xf]  ;;  %v1885_v18 = vld [vmem:[%s2665_s0 + $0x148] sm:$0xf0] }
  0x47   :  { %1239 = vmatpush.bf16.msra.mxu0 %v1968_v19  ;;  %v1502_v19 = vld [vmem:[%s2665_s0 + $0x130] sm:$0xf]  ;;  %v1495_v22 = vor.u32 %v1885_v18, %v1494_v17  ;;  %v1869_v17 = vld [vmem:[%s2665_s0 + $0xc8] sm:$0xf0] }
  0x48   :  { %v1446_v18 = vld [vmem:[%s2665_s0 + $0xb0] sm:$0xf] }
  0x4a   :  { %1162 = vmatpush.bf16.msra.mxu2 %v1951_v21  ;;  %1123 = vmatpush.bf16.msra.mxu1 %v1943_v23  ;;  %v1491_v21 = vor.u32 %v1880_v15, %v1488_v16  ;;  %v1503_v23 = vor.u32 %v1886_v20, %v1502_v19  ;;  %v1432_v15 = vld [vmem:[%s2665_s0 + $0xc4] sm:$0xf0]  ;;  %v1870_v19 = vld [vmem:[%s2665_s0 + $0xd0] sm:$0xf0] }
  0x4b   :  { %1240 = vmatpush.bf16.msra.mxu0 %v1967_v24  ;;  %v1847_v24 = vld [vmem:[%s2665_s0 + $0x1c] sm:$0xf]  ;;  %v1438_v16 = vld [vmem:[%s2665_s0 + $0xa8] sm:$0xf] }
  0x4e   :  { %1163 = vmatpush.bf16.msra.mxu2 %v1950_v25  ;;  %1124 = vmatpush.bf16.msra.mxu1 %v1942_v26  ;;  %v1368_v25 = vld [vmem:[%s2665_s0 + $0x3c] sm:$0xf0] }
  0x4f   :  { %1241 = vmatpush.bf16.msra.mxu0 %v1966_v27  ;;  %v1962_v26 = vld [vmem:[%s2664_s1 + $0x200] sm:$0xff]  ;;  %v1371_v27 = vor.u32 %v1847_v24, %v1368_v25  ;;  %v1447_v24 = vor.u32 %v1870_v19, %v1446_v18  ;;  %v1883_v25 = vld [vmem:[%s2665_s0 + $0x13c] sm:$0xf] }
  0x51   :  { %978 = vmatmul.bf16.gmra.mxu1 %v1383_v34  ;;  %1017 = vmatmul.bf16.gmra.mxu2 %v1387_v35  ;;  %v1527_v34 = vor.u32 %v1889_v28, %v1524_v29  ;;  %v1531_v35 = vor.u32 %v1894_v31, %v1530_v30 }
  0x52   :  { %1164 = vmatpush.bf16.msra.mxu2 %v1949_v40  ;;  %1125 = vmatpush.bf16.msra.mxu1 %v1941_v42  ;;  %v1846_v40 = vld [vmem:[%s2665_s0 + $0x14] sm:$0xf]  ;;  %v1366_v42 = vld [vmem:[%s2665_s0 + $0x18] sm:$0xf] }
  0x53   :  { %1066 = vmatmul.bf16.gmra.mxu3 %v1463_v39  ;;  %1242 = vmatpush.bf16.msra.mxu0 %v1965_v43  ;;  %v1407_v39 = vor.u32 %v1856_v37, %v1404_v38  ;;  %v1851_v43 = vld [vmem:[%s2665_s0 + $0x38] sm:$0xf0]  ;;  %v1363_v46 = vor.u32 %v1846_v40, %v1360_v41  ;;  %v1873_v38 = vld [vmem:[%s2665_s0 + $0xec] sm:$0xf]  ;;  %v1468_v40 = vld [vmem:[%s2665_s0 + $0x10c] sm:$0xf0] }
  0x54   :  { %1095 = vmatmul.bf16.gmra.mxu0 %v1395_v36  ;;  %v1539_v36 = vor.u32 %v1895_v33, %v1538_v32  ;;  %v1367_v47 = vor.u32 %v1851_v43, %v1366_v42  ;;  %v1474_v41 = vld [vmem:[%s2665_s0 + $0xf0] sm:$0xf]  ;;  %v1878_v42 = vld [vmem:[%s2665_s0 + $0x110] sm:$0xf0]  ;;  %v1482_v43 = vld [vmem:[%s2665_s0 + $0xf8] sm:$0xf] }
  0x56   :  { %1165 = vmatpush.bf16.msra.mxu2 %v1948_v44  ;;  %1126 = vmatpush.bf16.msra.mxu1 %v1940_v58  ;;  %v1374_v44 = vld [vmem:[%s2665_s0 + $0x20] sm:$0xf]  ;;  %v1855_v58 = vld [vmem:[%s2665_s0 + $0x5c] sm:$0xf] }
  0x57   :  { %1243 = vmatpush.bf16.msra.mxu0 %v1964_v59  ;;  %v1375_v49 = vor.u32 %v1852_v45, %v1374_v44  ;;  %v1396_v59 = vld [vmem:[%s2665_s0 + $0x7c] sm:$0xf0]  ;;  %v1879_v44 = vld [vmem:[%s2665_s0 + $0x118] sm:$0xf0] }
  0x58   :  { %v1399_v1 = vor.u32 %v1855_v58, %v1396_v59 }
  0x5a   :  { %1166 = vmatpush.bf16.msra.mxu2 %v1947_v60  ;;  %1127 = vmatpush.bf16.msra.mxu1 %v1939_v62  ;;  %v1402_v60 = vld [vmem:[%s2665_s0 + $0x60] sm:$0xf]  ;;  %v1410_v62 = vld [vmem:[%s2665_s0 + $0x68] sm:$0xf] }
  0x5b   :  { %1244 = vmatpush.bf16.msra.mxu0 %v1963_v11  ;;  %v1403_v2 = vor.u32 %v1860_v61, %v1402_v60  ;;  %v1411_v4 = vor.u32 %v1861_v63, %v1410_v62 }
  0x5e   :  { %1167 = vmatpush.bf16.msra.mxu2 %v1946_v12  ;;  %1128 = vmatpush.bf16.msra.mxu1 %v1938_v14  ;;  %v1864_v14 = vld [vmem:[%s2665_s0 + $0xa4] sm:$0xf] }
  0x5f   :  { %1245 = vmatpush.bf16.msra.mxu0 %v1962_v26  ;;  %v1512_v26 = vld [vmem:[%s2665_s0 + $0x15c] sm:$0xf0] }
  0x60   :  { %v1515_v30 = vor.u32 %v1883_v25, %v1512_v26 }
  0x61   :  { %983 = vmatmul.bf16.gmra.mxu1 %v1419_v52  ;;  %1022 = vmatmul.bf16.gmra.mxu2 %v1423_v53  ;;  %v1443_v53 = vor.u32 %v1865_v50, %v1440_v51  ;;  %v1483_v51 = vor.u32 %v1879_v44, %v1482_v43 }
  0x63   :  { %1071 = vmatmul.bf16.gmra.mxu3 %v1499_v57 }
  0x64   :  { %1100 = vmatmul.bf16.gmra.mxu0 %v1431_v54 }
  0x71   :  { %988 = vmatmul.bf16.gmra.mxu1 %v1455_v5  ;;  %1027 = vmatmul.bf16.gmra.mxu2 %v1459_v6  ;;  %v1874_v5 = vld [vmem:[%s2665_s0 + $0xf4] sm:$0xf]  ;;  %v1476_v6 = vld [vmem:[%s2665_s0 + $0x114] sm:$0xf0] }
  0x72   :  { %v1479_v9 = vor.u32 %v1874_v5, %v1476_v6 }
  0x73   :  { %1076 = vmatmul.bf16.gmra.mxu3 %v1535_v10 }
  0x74   :  { %1105 = vmatmul.bf16.gmra.mxu0 %v1467_v7 }
  0x81   :  { %993 = vmatmul.bf16.gmra.mxu1 %v1491_v21  ;;  %1032 = vmatmul.bf16.gmra.mxu2 %v1495_v22  ;;  %v1435_v21 = vor.u32 %v1864_v14, %v1432_v15  ;;  %v1439_v22 = vor.u32 %v1869_v17, %v1438_v16  ;;  %v1510_v14 = vld [vmem:[%s2665_s0 + $0x138] sm:$0xf]  ;;  %v1888_v15 = vld [vmem:[%s2665_s0 + $0x160] sm:$0xf0] }
  0x83   :  { %1207 = vmatmul.bf16.vlgmr.msrb.gmra.mxu3 %v1371_v27 }
  0x84   :  { %1110 = vmatmul.bf16.gmra.mxu0 %v1503_v23 }
  0x91   :  { %998 = vmatmul.bf16.gmra.mxu1 %v1527_v34  ;;  %1037 = vmatmul.bf16.gmra.mxu2 %v1531_v35 }
  0x93   :  { %1212 = vmatmul.bf16.gmra.mxu3 %v1407_v39 }
  0x94   :  { %1115 = vmatmul.bf16.gmra.mxu0 %v1539_v36 }
  0x9e   :  { %v2439_v48 = vpop.f32.mrf.mxu1 }
  0xa1   :  { %v935_v52 = vpop.f32.mrf.mxu0  ;;  %1129 = vmatmul.bf16.vlgmr.msra.gmra.mxu1 %v1363_v46  ;;  %1168 = vmatmul.bf16.vlgmr.msra.gmra.mxu2 %v1367_v47  ;;  %v1471_v47 = vor.u32 %v1873_v38, %v1468_v40  ;;  %v1546_v38 = vld [vmem:[%s2665_s0 + $0x180] sm:$0xf]  ;;  %v1897_v40 = vld [vmem:[%s2665_s0 + $0x1a8] sm:$0xf0] }
  0xa3   :  { %1217 = vmatmul.bf16.gmra.mxu3 %v1443_v53  ;;  %v1548_v53 = vld [vmem:[%s2665_s0 + $0x1a4] sm:$0xf0] }
  0xa4   :  { %1246 = vmatmul.bf16.vlgmr.msra.gmra.mxu0 %v1375_v49  ;;  %v2447_v54 = vpop.f32.mrf.mxu2  ;;  %v1475_v49 = vor.u32 %v1878_v42, %v1474_v41 }
  0xa6   :  { %v2449_v55 = vpop.f32.mrf.mxu1  ;;  %v1052_v57 = vpop.f32.mrf.mxu3 }
  0xa9   :  { %v937_v56 = vpop.f32.mrf.mxu0 }
  0xac   :  { %v2469_v0 = vpop.f32.mrf.mxu2 }
  0xae   :  { %v2471_v3 = vpop.f32.mrf.mxu1  ;;  %v1054_v8 = vpop.f32.mrf.mxu3 }
  0xb1   :  { %v940_v7 = vpop.f32.mrf.mxu0  ;;  %1134 = vmatmul.bf16.gmra.mxu1 %v1399_v1  ;;  %1173 = vmatmul.bf16.gmra.mxu2 %v1403_v2 }
  0xb3   :  { %1222 = vmatmul.bf16.gmra.mxu3 %v1479_v9  ;;  %v1504_v9 = vld [vmem:[%s2665_s0 + $0x154] sm:$0xf0] }
  0xb4   :  { %1251 = vmatmul.bf16.gmra.mxu0 %v1411_v4  ;;  %v2479_v10 = vpop.f32.mrf.mxu2 }
  0xb6   :  { %v2481_v11 = vpop.f32.mrf.mxu1  ;;  %v1057_v13 = vpop.f32.mrf.mxu3 }
  0xb9   :  { %v942_v12 = vpop.f32.mrf.mxu0 }
  0xbc   :  { %v2501_v20 = vpop.f32.mrf.mxu2 }
  0xbe   :  { %v974_v23 = vpop.f32.mrf.mxu1  ;;  %v1059_v29 = vpop.f32.mrf.mxu3 }
  0xbf   :  { %v975_v27 = vadd.f32 %v974_v23, %v935_v52  ;;  %v1892_v52 = vld [vmem:[%s2665_s0 + $0x184] sm:$0xf] }
  0xc0   :  { %v1551_v60 = vor.u32 %v1892_v52, %v1548_v53 }
  0xc1   :  { %v1091_v28 = vpop.f32.mrf.mxu0  ;;  %1139 = vmatmul.bf16.gmra.mxu1 %v1435_v21  ;;  %1178 = vmatmul.bf16.gmra.mxu2 %v1439_v22 }
  0xc3   :  { %1227 = vmatmul.bf16.gmra.mxu3 %v1515_v30 }
  0xc4   :  { %1256 = vmatmul.bf16.gmra.mxu0 %v1447_v24  ;;  %v1013_v31 = vpop.f32.mrf.mxu2 }
  0xc5   :  { %v1014_v32 = vadd.f32 %v1013_v31, %v975_v27 }
  0xc6   :  { %v976_v33 = vpop.f32.mrf.mxu1  ;;  %v1062_v37 = vpop.f32.mrf.mxu3 }
  0xc7   :  { %v1053_v34 = vadd.f32 %v1052_v57, %v1014_v32  ;;  %v977_v35 = vadd.f32 %v976_v33, %v937_v56 }
  0xc9   :  { %v1093_v36 = vpop.f32.mrf.mxu0  ;;  %v2512_v39 = vadd.f32 %v1091_v28, %v1053_v34 }
  0xcc   :  { %v1015_v45 = vpop.f32.mrf.mxu2 }
  0xcd   :  { %v1016_v46 = vadd.f32 %v1015_v45, %v977_v35 }
  0xce   :  { %v979_v50 = vpop.f32.mrf.mxu1  ;;  %v1064_v59 = vpop.f32.mrf.mxu3 }
  0xcf   :  { %v1055_v56 = vadd.f32 %v1054_v8, %v1016_v46  ;;  %v980_v57 = vadd.f32 %v979_v50, %v940_v7  ;;  %v1882_v7 = vld [vmem:[%s2665_s0 + $0x134] sm:$0xf] }
  0xd0   :  { %v1507_v18 = vor.u32 %v1882_v7, %v1504_v9 }
  0xd1   :  { %v1096_v58 = vpop.f32.mrf.mxu0  ;;  %1144 = vmatmul.bf16.gmra.mxu1 %v1471_v47  ;;  %1183 = vmatmul.bf16.gmra.mxu2 %v1475_v49  ;;  %v2535_v61 = vadd.f32 %v1093_v36, %v1055_v56  ;;  %v1540_v36 = vld [vmem:[%s2665_s0 + $0x19c] sm:$0xf0] }
  0xd3   :  { %1232 = vmatmul.bf16.gmra.mxu3 %v1551_v60 }
  0xd4   :  { %1261 = vmatmul.bf16.gmra.mxu0 %v1483_v51  ;;  %v1018_v62 = vpop.f32.mrf.mxu2 }
  0xd5   :  { %v1019_v63 = vadd.f32 %v1018_v62, %v980_v57 }
  0xd6   :  { %v981_v1 = vpop.f32.mrf.mxu1  ;;  %v1067_v6 = vpop.f32.mrf.mxu3 }
  0xd7   :  { %v1058_v2 = vadd.f32 %v1057_v13, %v1019_v63  ;;  %v982_v4 = vadd.f32 %v981_v1, %v942_v12  ;;  %v1887_v12 = vld [vmem:[%s2665_s0 + $0x158] sm:$0xf0]  ;;  %v1518_v13 = vld [vmem:[%s2665_s0 + $0x140] sm:$0xf] }
  0xd8   :  { %v1511_v19 = vor.u32 %v1887_v12, %v1510_v14  ;;  %v1519_v22 = vor.u32 %v1888_v15, %v1518_v13 }
  0xd9   :  { %v1098_v5 = vpop.f32.mrf.mxu0  ;;  %v2540_v8 = vadd.f32 %v1096_v58, %v1058_v2 }
  0xdc   :  { %v1020_v16 = vpop.f32.mrf.mxu2 }
  0xdd   :  { %v1021_v17 = vadd.f32 %v1020_v16, %v982_v4 }
  0xde   :  { %v984_v21 = vpop.f32.mrf.mxu1  ;;  %v1069_v26 = vpop.f32.mrf.mxu3 }
  0xdf   :  { %v1060_v23 = vadd.f32 %v1059_v29, %v1021_v17  ;;  %v985_v24 = vadd.f32 %v984_v21, %v2439_v48  ;;  %v1891_v29 = vld [vmem:[%s2665_s0 + $0x17c] sm:$0xf] }
  0xe0   :  { %v1543_v43 = vor.u32 %v1891_v29, %v1540_v36 }
  0xe1   :  { %v1101_v25 = vpop.f32.mrf.mxu0  ;;  %1149 = vmatmul.bf16.gmra.mxu1 %v1507_v18  ;;  %1188 = vmatmul.bf16.gmra.mxu2 %v1511_v19  ;;  %v2558_v27 = vadd.f32 %v1098_v5, %v1060_v23 }
  0xe4   :  { %1266 = vmatmul.bf16.gmra.mxu0 %v1519_v22  ;;  %v1023_v28 = vpop.f32.mrf.mxu2 }
  0xe5   :  { %v1024_v30 = vadd.f32 %v1023_v28, %v985_v24 }
  0xe6   :  { %v986_v31 = vpop.f32.mrf.mxu1  ;;  %v1072_v35 = vpop.f32.mrf.mxu3 }
  0xe7   :  { %v1063_v32 = vadd.f32 %v1062_v37, %v1024_v30  ;;  %v987_v33 = vadd.f32 %v986_v31, %v2449_v55  ;;  %v1896_v55 = vld [vmem:[%s2665_s0 + $0x1a0] sm:$0xf0]  ;;  %v1554_v37 = vld [vmem:[%s2665_s0 + $0x188] sm:$0xf] }
  0xe8   :  { %v1547_v44 = vor.u32 %v1896_v55, %v1546_v38  ;;  %v1555_v46 = vor.u32 %v1897_v40, %v1554_v37 }
  0xe9   :  { %v1103_v34 = vpop.f32.mrf.mxu0  ;;  %v2564_v48 = vadd.f32 %v1101_v25, %v1063_v32 }
  0xec   :  { %v1025_v41 = vpop.f32.mrf.mxu2 }
  0xed   :  { %v1026_v42 = vadd.f32 %v1025_v41, %v987_v33 }
  0xee   :  { %v989_v45 = vpop.f32.mrf.mxu1  ;;  %v1074_v52 = vpop.f32.mrf.mxu3 }
  0xef   :  { %v1065_v47 = vadd.f32 %v1064_v59, %v1026_v42  ;;  %v990_v49 = vadd.f32 %v989_v45, %v2471_v3 }
  0xf1   :  { %v1106_v50 = vpop.f32.mrf.mxu0  ;;  %1154 = vmatmul.bf16.gmra.mxu1 %v1543_v43  ;;  %1193 = vmatmul.bf16.gmra.mxu2 %v1547_v44  ;;  %v2582_v51 = vadd.f32 %v1103_v34, %v1065_v47 }
  0xf4   :  { %1271 = vmatmul.bf16.gmra.mxu0 %v1555_v46  ;;  %v1028_v53 = vpop.f32.mrf.mxu2 }
  0xf5   :  { %v1029_v56 = vadd.f32 %v1028_v53, %v990_v49 }
  0xf6   :  { %v991_v57 = vpop.f32.mrf.mxu1  ;;  %v1077_v59 = vpop.f32.mrf.mxu3 }
  0xf7   :  { %v1068_v58 = vadd.f32 %v1067_v6, %v1029_v56  ;;  %v992_v60 = vadd.f32 %v991_v57, %v2481_v11 }
  0xf9   :  { %v1108_v62 = vpop.f32.mrf.mxu0  ;;  %v2585_v63 = vadd.f32 %v1106_v50, %v1068_v58 }
  0xfc   :  { %v1030_v1 = vpop.f32.mrf.mxu2 }
  0xfd   :  { %v1031_v2 = vadd.f32 %v1030_v1, %v992_v60 }
  0xfe   :  { %v994_v3 = vpop.f32.mrf.mxu1  ;;  %v1079_v15 = vpop.f32.mrf.mxu3 }
  0xff   :  { %v1070_v4 = vadd.f32 %v1069_v26, %v1031_v2  ;;  %v995_v9 = vadd.f32 %v994_v3, %v2447_v54 }
 0x101   :  { %v1111_v5 = vpop.f32.mrf.mxu0  ;;  %v2587_v7 = vadd.f32 %v1108_v62, %v1070_v4 }
 0x104   :  { %v1033_v14 = vpop.f32.mrf.mxu2 }
 0x105   :  { %v1034_v12 = vadd.f32 %v1033_v14, %v995_v9 }
 0x106   :  { %v996_v13 = vpop.f32.mrf.mxu1  ;;  %v1208_v24 = vpop.f32.mrf.mxu3 }
 0x107   :  { %v1073_v6 = vadd.f32 %v1072_v35, %v1034_v12  ;;  %v997_v17 = vadd.f32 %v996_v13, %v2469_v0 }
 0x109   :  { %v1113_v16 = vpop.f32.mrf.mxu0  ;;  %v2590_v11 = vadd.f32 %v1111_v5, %v1073_v6 }
 0x10c   :  { %v1035_v18 = vpop.f32.mrf.mxu2 }
 0x10d   :  { %v1036_v19 = vadd.f32 %v1035_v18, %v997_v17 }
 0x10e   :  { %v999_v21 = vpop.f32.mrf.mxu1  ;;  %v1210_v34 = vpop.f32.mrf.mxu3 }
 0x10f   :  { %v1075_v22 = vadd.f32 %v1074_v52, %v1036_v19  ;;  %v1000_v54 = vadd.f32 %v999_v21, %v2479_v10 }
 0x111   :  { %v1116_v23 = vpop.f32.mrf.mxu0  ;;  %v2593_v25 = vadd.f32 %v1113_v16, %v1075_v22 }
 0x114   :  { %v1038_v26 = vpop.f32.mrf.mxu2 }
 0x115   :  { %v1039_v28 = vadd.f32 %v1038_v26, %v1000_v54 }
 0x116   :  { %v1001_v30 = vpop.f32.mrf.mxu1  ;;  %v1213_v41 = vpop.f32.mrf.mxu3 }
 0x117   :  { %v1078_v31 = vadd.f32 %v1077_v59, %v1039_v28  ;;  %v1002_v0 = vadd.f32 %v1001_v30, %v2501_v20 }
 0x119   :  { %v1118_v32 = vpop.f32.mrf.mxu0  ;;  %v2596_v33 = vadd.f32 %v1116_v23, %v1078_v31 }
 0x11c   :  { %v1040_v35 = vpop.f32.mrf.mxu2 }
 0x11d   :  { %v1041_v29 = vadd.f32 %v1040_v35, %v1002_v0 }
 0x11e   :  { %v1130_v36 = vpop.f32.mrf.mxu1  ;;  %v1215_v52 = vpop.f32.mrf.mxu3 }
 0x11f   :  { %v1080_v38 = vadd.f32 %v1079_v15, %v1041_v29  ;;  %v1131_v55 = vadd.f32 %v1130_v36, %v2512_v39 }
 0x121   :  { %v1247_v37 = vpop.f32.mrf.mxu0  ;;  %v2600_v40 = vadd.f32 %v1118_v32, %v1080_v38 }
 0x124   :  { %v1169_v10 = vpop.f32.mrf.mxu2 }
 0x125   :  { %v1170_v42 = vadd.f32 %v1169_v10, %v1131_v55 }
 0x126   :  { %v1132_v43 = vpop.f32.mrf.mxu1  ;;  %v1218_v2 = vpop.f32.mrf.mxu3 }
 0x127   :  { %v1209_v44 = vadd.f32 %v1208_v24, %v1170_v42  ;;  %v1133_v45 = vadd.f32 %v1132_v43, %v2535_v61 }
 0x129   :  { %v1249_v46 = vpop.f32.mrf.mxu0  ;;  %v2603_v47 = vadd.f32 %v1247_v37, %v1209_v44 }
 0x12c   :  { %v1171_v20 = vpop.f32.mrf.mxu2 }
 0x12d   :  { %v1172_v49 = vadd.f32 %v1171_v20, %v1133_v45 }
 0x12e   :  { %v1135_v50 = vpop.f32.mrf.mxu1 }
 0x12f   :  { %v1211_v53 = vadd.f32 %v1210_v34, %v1172_v49  ;;  %v1136_v39 = vadd.f32 %v1135_v50, %v2540_v8  ;;  %v1220_v8 = vpop.f32.mrf.mxu3 }
 0x131   :  { %v1252_v56 = vpop.f32.mrf.mxu0  ;;  %v2606_v57 = vadd.f32 %v1249_v46, %v1211_v53 }
 0x134   :  { %v1174_v58 = vpop.f32.mrf.mxu2 }
 0x135   :  { %v1175_v60 = vadd.f32 %v1174_v58, %v1136_v39  ;;  %v1277_v58 = vld [vmem:[%s2666_s2] sm:$0x7] }
 0x136   :  { %v1137_v62 = vpop.f32.mrf.mxu1  ;;  %vm1315_vm0 = vcmp.ge.f32.partialorder %v1277_v58, 0.0 }
 0x137   :  { %v1214_v1 = vadd.f32 %v1213_v41, %v1175_v60  ;;  %v1138_v3 = vadd.f32 %v1137_v62, %v2558_v27  ;;  %v1223_v28 = vpop.f32.mrf.mxu3 }
 0x139   :  { %v1254_v59 = vpop.f32.mrf.mxu0  ;;  %v2608_v61 = vadd.f32 %v1252_v56, %v1214_v1  ;;  %v1287_v1 = vperm.slane %v1277_v58, 0 }
 0x13c   :  { %v1176_v4 = vpop.f32.mrf.mxu2 }
 0x13d   :  { %v1177_v5 = vadd.f32 %v1176_v4, %v1138_v3 }
 0x13e   :  { %v1140_v9 = vpop.f32.mrf.mxu1 }
 0x13f   :  { %v1216_v14 = vadd.f32 %v1215_v52, %v1177_v5  ;;  %v1141_v16 = vadd.f32 %v1140_v9, %v2564_v48  ;;  %v1225_v38 = vpop.f32.mrf.mxu3 }
 0x141   :  { %v1257_v12 = vpop.f32.mrf.mxu0  ;;  %v1255_v13 = vadd.f32 %v1254_v59, %v1216_v14 }
 0x143   :  { %v1278_v15 = vmax.f32 %v2603_v47, %v1255_v13  ;;  %v1291_v6 = vmin.f32 %v2603_v47, %v1255_v13 }
 0x144   :  { %v1179_v17 = vpop.f32.mrf.mxu2 }
 0x145   :  { %v1180_v18 = vadd.f32 %v1179_v17, %v1141_v16 }
 0x146   :  { %v1142_v19 = vpop.f32.mrf.mxu1 }
 0x147   :  { %v1219_v21 = vadd.f32 %v1218_v2, %v1180_v18  ;;  %v1143_v54 = vadd.f32 %v1142_v19, %v2582_v51  ;;  %v1228_v10 = vpop.f32.mrf.mxu3 }
 0x149   :  { %v1259_v22 = vpop.f32.mrf.mxu0  ;;  %v2614_v23 = vadd.f32 %v1257_v12, %v1219_v21 }
 0x14b   :  { %v1279_v27 = vmax.f32 %v2606_v57, %v2614_v23  ;;  %v1292_v24 = vmin.f32 %v2606_v57, %v2614_v23 }
 0x14c   :  { %v1181_v26 = vpop.f32.mrf.mxu2 }
 0x14d   :  { %v1182_v30 = vadd.f32 %v1181_v26, %v1143_v54 }
 0x14e   :  { %v1145_v31 = vpop.f32.mrf.mxu1 }
 0x14f   :  { %v1221_v48 = vadd.f32 %v1220_v8, %v1182_v30  ;;  %v1146_v44 = vadd.f32 %v1145_v31, %v2585_v63  ;;  %v1230_v46 = vpop.f32.mrf.mxu3 }
 0x151   :  { %v1262_v32 = vpop.f32.mrf.mxu0  ;;  %v2621_v34 = vadd.f32 %v1259_v22, %v1221_v48 }
 0x153   :  { %v1280_v0 = vmax.f32 %v2608_v61, %v2621_v34  ;;  %v1293_v35 = vmin.f32 %v2608_v61, %v2621_v34 }
 0x154   :  { %v1184_v29 = vpop.f32.mrf.mxu2 }
 0x155   :  { %v1185_v45 = vadd.f32 %v1184_v29, %v1146_v44 }
 0x156   :  { %v1147_v36 = vpop.f32.mrf.mxu1 }
 0x157   :  { %v1224_v50 = vadd.f32 %v1223_v28, %v1185_v45  ;;  %v1148_v39 = vadd.f32 %v1147_v36, %v2587_v7  ;;  %v1233_v5 = vpop.f32.mrf.mxu3  ;;  %v1322_v45 = vperm.slane %v1277_v58, 1 }
 0x159   :  { %v1264_v55 = vpop.f32.mrf.mxu0  ;;  %v1263_v60 = vadd.f32 %v1262_v32, %v1224_v50 }
 0x15c   :  { %v1186_v37 = vpop.f32.mrf.mxu2 }
 0x15d   :  { %v1187_v62 = vadd.f32 %v1186_v37, %v1148_v39 }
 0x15e   :  { %v1150_v51 = vpop.f32.mrf.mxu1 }
 0x15f   :  { %v1226_v14 = vadd.f32 %v1225_v38, %v1187_v62  ;;  %v1151_v8 = vadd.f32 %v1150_v51, %v2590_v11 }
 0x161   :  { %v1267_v41 = vpop.f32.mrf.mxu0  ;;  %v1265_v26 = vadd.f32 %v1264_v55, %v1226_v14 }
 0x164   :  { %v1189_v42 = vpop.f32.mrf.mxu2 }
 0x165   :  { %v1190_v54 = vadd.f32 %v1189_v42, %v1151_v8  ;;  %v1235_v42 = vpop.f32.mrf.mxu3 }
 0x166   :  { %v1152_v43 = vpop.f32.mrf.mxu1 }
 0x167   :  { %v1153_v47 = vadd.f32 %v1152_v43, %v2593_v25  ;;  %v1992_v25 = vmov 0   ;;  %v1229_v29 = vadd.f32 %v1228_v10, %v1190_v54 }
 0x168   :  { %v1316_v3 = vsel %vm1315_vm0, 1, %v1992_v25 }
 0x169   :  { %v1269_v20 = vpop.f32.mrf.mxu0  ;;  %v1317_v16 = vperm.slane %v1316_v3, 1  ;;  %v1268_v10 = vadd.f32 %v1267_v41, %v1229_v29 }
 0x16b   :  { %vm2635_vm1 = vcmp.eq.s32.totalorder %v1317_v16, 1 }
 0x16c   :  { %v1191_v49 = vpop.f32.mrf.mxu2 }
 0x16d   :  { %v1192_v52 = vadd.f32 %v1191_v49, %v1153_v47 }
 0x16e   :  { %v1155_v53 = vpop.f32.mrf.mxu1 }
 0x16f   :  { %v1231_v56 = vadd.f32 %v1230_v46, %v1192_v52  ;;  %v1156_v4 = vadd.f32 %v1155_v53, %v2596_v33 }
 0x171   :  { %v1270_v63 = vadd.f32 %v1269_v20, %v1231_v56  ;;  %v1272_v17 = vpop.f32.mrf.mxu0  ;;  %v1326_v56 = vperm.slane %v1277_v58, 2 }
 0x173   :  { %v1281_v59 = vmax.f32 %v1263_v60, %v1270_v63  ;;  %v1294_v2 = vmin.f32 %v1263_v60, %v1270_v63 }
 0x174   :  { %v1194_v9 = vpop.f32.mrf.mxu2 }
 0x175   :  { %v1284_v7 = vmax.f32 %v1278_v15, %v1281_v59  ;;  %v1297_v12 = vmin.f32 %v1291_v6, %v1294_v2  ;;  %v1195_v13 = vadd.f32 %v1194_v9, %v1156_v4 }
 0x176   :  { %v1157_v22 = vpop.f32.mrf.mxu1 }
 0x177   :  { %v1288_v18 = vadd.f32 %v1287_v1, %v1284_v7  ;;  %v1300_v19 = vadd.f32 %v1297_v12, %v1287_v1  ;;  %v1234_v21 = vadd.f32 %v1233_v5, %v1195_v13  ;;  %v1158_v15 = vadd.f32 %v1157_v22, %v2600_v40 }
 0x179   :  { %v1303_v28 = vmul.f32 0.05, %v1288_v18  ;;  %v1309_v30 = vmul.f32 0.05, %v1300_v19  ;;  %v1273_v31 = vadd.f32 %v1272_v17, %v1234_v21  ;;  %v1274_v46 = vpop.f32.mrf.mxu0 }
 0x17b   :  { %v1306_v6 = vmax.f32 %v1288_v18, %v1303_v28  ;;  %v1312_v48 = vmax.f32 %v1300_v19, %v1309_v30  ;;  %v1282_v11 = vmax.f32 %v1265_v26, %v1273_v31  ;;  %v1295_v32 = vmin.f32 %v1265_v26, %v1273_v31 }
 0x17c   :  { %v1196_v36 = vpop.f32.mrf.mxu2 }
 0x17d   :  { %v1319_v38 = vsel %vm2635_vm1, %v1306_v6, %v1312_v48  ;;  %v1285_v55 = vmax.f32 %v1279_v27, %v1282_v11  ;;  %v1298_v37 = vmin.f32 %v1292_v24, %v1295_v32  ;;  %v1197_v51 = vadd.f32 %v1196_v36, %v1158_v15 }
 0x17e   :  { %v1323_v27 = vmul.f32 %v1322_v45, %v1319_v38 }
 0x17f   :  { %v1289_v40 = vadd.f32 %v1287_v1, %v1285_v55  ;;  %v1301_v43 = vadd.f32 %v1298_v37, %v1287_v1  ;;  %v1236_v44 = vadd.f32 %v1235_v42, %v1197_v51 }
 0x180   :  { %v1327_v63 = vadd.f32 %v1326_v56, %v1323_v27 }
 0x181   :  { %v1304_v47 = vmul.f32 0.05, %v1289_v40  ;;  %v1310_v20 = vmul.f32 0.05, %v1301_v43  ;;  %v1275_v49 = vadd.f32 %v1274_v46, %v1236_v44 }
 0x183   :  { %v1307_v50 = vmax.f32 %v1289_v40, %v1304_v47  ;;  %v1313_v52 = vmax.f32 %v1301_v43, %v1310_v20  ;;  %v1283_v53 = vmax.f32 %v1268_v10, %v1275_v49  ;;  %v1296_v39 = vmin.f32 %v1268_v10, %v1275_v49 }
 0x185   :  { %v1320_v57 = vsel %vm2635_vm1, %v1307_v50, %v1313_v52  ;;  %v1286_v23 = vmax.f32 %v1280_v0, %v1283_v53  ;;  %v1299_v24 = vmin.f32 %v1293_v35, %v1296_v39 }
 0x186   :  { %v1324_v41 = vmul.f32 %v1322_v45, %v1320_v57 }
 0x187   :  { %v1290_v60 = vadd.f32 %v1287_v1, %v1286_v23  ;;  %v1302_v62 = vadd.f32 %v1299_v24, %v1287_v1 }
 0x188   :  { %v1328_v59 = vadd.f32 %v1326_v56, %v1324_v41 }
 0x189   :  { %v1305_v2 = vmul.f32 0.05, %v1290_v60  ;;  %v1311_v25 = vmul.f32 0.05, %v1302_v62 }
 0x18a   :  { %v1973_v3 = vpack.c.bf16 %v1328_v59, %v1327_v63 }
 0x18b   :  { %v1308_v58 = vmax.f32 %v1290_v60, %v1305_v2  ;;  %v1314_v4 = vmax.f32 %v1302_v62, %v1311_v25 }
 0x18c   :  { %1974 = vst [vmem:[%s2667_s3] sm:$0xff] %v1973_v3  }
 0x18d   :  { %v1321_v0 = vsel %vm2635_vm1, %v1308_v58, %v1314_v4 }
 0x18e   :  { %v1325_v5 = vmul.f32 %v1322_v45, %v1321_v0 }
 0x190   :  { %v1329_v61 = vadd.f32 %v1326_v56, %v1325_v5 }
 0x192   :  { %v1332_v34 = vpack.c.bf16 %v1329_v61, %v1329_v61 }
 0x194   :  { %1335 = vst [vmem:[%s2667_s3 + $0x8] sm:$0xf] %v1332_v34 }

</bundles_post_ra>
